<compile_context>
chip_gen: v5e
topology: v5e:2x2
jax: 0.10.0
libtpu: 0.0.40
codegen_flags: <defaults>
</compile_context>

<pallas_src>
import functools

import jax
import jax.numpy as jnp
import numpy as np
from jax.experimental import pallas as pl
from jax.experimental.pallas import tpu as pltpu


# --------------------------- pass 1: att / v / stats --------------------------
def _cot_pass1_kernel(x_halo_ref,
                      wk_ref, sk_ref, bk_ref,
                      wxv_ref, sv_ref, bv_ref,
                      wk12_ref, sa_ref, ba_ref, sb_ref, bb_ref,
                      wa2_ref, wb2_ref, b2_ref,
                      att_ref, v_ref, m_ref, l_ref,
                      col_scr, xf_scr,
                      *, TH, W, C, K, G, pad):
    T = TH * W
    C4 = C // G
    CH1 = C // 2

    # ---- key_embed (grouped 3x3 conv + BN + ReLU), one im2col matmul per group,
    #      fused with the k1-side of both attention first-1x1s.
    h12k = jnp.zeros((T, C // 2 + C // 4), jnp.float32)
    for g in range(G):
        for dy in range(K):
            for dx in range(K):
                tap = dy * K + dx
                col_scr[:, :, tap * C4:(tap + 1) * C4] = \
                    x_halo_ref[g, dy:dy + TH, dx:dx + W, :]
        # interior window of this group -> channels-last flat x (no 2nd input DMA)
        xf_scr[:, :, g * C4:(g + 1) * C4] = \
            x_halo_ref[g, pad:pad + TH, pad:pad + W, :]

        kg = jnp.dot(col_scr[...].reshape(T, K * K * C4), wk_ref[g],
                     preferred_element_type=jnp.float32)
        kg = jnp.maximum(kg * sk_ref[g] + bk_ref[g], 0.0)            # BN + ReLU
        h12k = h12k + jnp.dot(kg.astype(jnp.bfloat16), wk12_ref[g],
                              preferred_element_type=jnp.float32)

    # ---- x-side: [attention_embed first 1x1 (x half) | value_embed] in one matmul
    xf_bf = xf_scr[...].reshape(T, C)
    hxv = jnp.dot(xf_bf, wxv_ref[...], preferred_element_type=jnp.float32)
    h1 = jnp.maximum((hxv[:, :CH1] + h12k[:, :CH1]) * sa_ref[...] + ba_ref[...], 0.0)
    h2 = jnp.maximum(h12k[:, CH1:] * sb_ref[...] + bb_ref[...], 0.0)
    v = hxv[:, CH1:] * sv_ref[...] + bv_ref[...]

    # ---- attention logits (K*K tap-mean pre-folded into wa2/wb2/b2 in the wrapper)
    att = (jnp.dot(h1.astype(jnp.bfloat16), wa2_ref[...],
                   preferred_element_type=jnp.float32)
           + jnp.dot(h2.astype(jnp.bfloat16), wb2_ref[...],
                     preferred_element_type=jnp.float32)
           + b2_ref[...])

    att_ref[...] = att.astype(att_ref.dtype)
    v_ref[...] = v.astype(v_ref.dtype)

    # ---- online softmax stats over the spatial axis, accumulated across the
    #      (sequential) spatial-tile grid axis in the resident (1, C) output blocks.
    @pl.when(pl.program_id(1) == 0)
    def _():
        m_ref[...] = jnp.full_like(m_ref, -jnp.inf)
        l_ref[...] = jnp.zeros_like(l_ref)

    m_old = m_ref[...]
    m_new = jnp.maximum(m_old, jnp.max(att, axis=0, keepdims=True))
    l_ref[...] = (l_ref[...] * jnp.exp(m_old - m_new)
                  + jnp.sum(jnp.exp(att - m_new), axis=0, keepdims=True))
    m_ref[...] = m_new


# --------------------- pass 2: normalize, gate, residual ----------------------
def _cot_pass2_kernel(att_ref, v_ref, x_ref, m_ref, l_ref, out_ref):
    p = jnp.exp(att_ref[...] - m_ref[...]) * (1.0 / l_ref[...])
    out_ref[...] = (p * v_ref[...] + x_ref[...]).astype(out_ref.dtype)


def _choose_tile_h(H, W, target=1024):
    """Largest divisor TH of H with TH*W <= target and TH*W % 8 == 0."""
    for th in range(H, 0, -1):
        if H % th == 0 and th * W <= target and (th * W) % 8 == 0:
            return th
    return H  # single tile: block == full spatial extent is always legal


def init_params(key, dim, kernel_size=3):
    K, C = kernel_size, dim
    G = 4
    C4 = C // G
    ks = iter(jax.random.split(key, 24))

    def nrm(shape, scale=0.1):
        return jax.random.normal(next(ks), shape, jnp.float32) * scale

    def bn_fold(n):
        gamma = 1.0 + 0.1 * jax.random.normal(next(ks), (n,), jnp.float32)
        beta = 0.1 * jax.random.normal(next(ks), (n,), jnp.float32)
        mean = 0.1 * jax.random.normal(next(ks), (n,), jnp.float32)
        var = 1.0 + jnp.abs(0.1 * jax.random.normal(next(ks), (n,), jnp.float32))
        scale = gamma / jnp.sqrt(var + 1e-5)
        bias = beta - mean * scale
        return scale.reshape(1, n), bias.reshape(1, n)

    # key_embed: grouped 3x3 conv, torch weight (C, C//G, K, K), groups=4, no bias; + BN.
    wk_t = nrm((C, C4, K, K))
    # wk_g[tap, g, c_in, c_out] = wk_t[g*C4 + c_out, c_in, ky, kx],  tap = ky*K + kx
    wk_g = jnp.transpose(wk_t.reshape(G, C4, C4, K, K), (3, 4, 0, 2, 1)).reshape(K * K, G, C4, C4)
    sk, bk = bn_fold(C)

    # value_embed: 1x1 conv (C->C), no bias; + BN.
    wv = nrm((C, C, 1, 1))[:, :, 0, 0].T
    sv, bv = bn_fold(C)

    # attention_embed: 1x1 (2C -> 2C//4) no bias + BN + ReLU + 1x1 (2C//4 -> K*K*C) with bias.
    wa1 = nrm((C // 2, 2 * C, 1, 1))[:, :, 0, 0].T          # (2C, C//2)
    sa, ba = bn_fold(C // 2)
    wa2 = nrm((K * K * C, C // 2, 1, 1))[:, :, 0, 0].T      # (C//2, K*K*C)
    ba2 = nrm((K * K * C,)).reshape(1, -1)

    # attention_embed2: 1x1 (C -> C//4) no bias + BN + ReLU + 1x1 (C//4 -> K*K*C) with bias.
    wb1 = nrm((C // 4, C, 1, 1))[:, :, 0, 0].T              # (C, C//4)
    sb, bb = bn_fold(C // 4)
    wb2 = nrm((K * K * C, C // 4, 1, 1))[:, :, 0, 0].T      # (C//4, K*K*C)
    bb2 = nrm((K * K * C,)).reshape(1, -1)

    return dict(wk_g=wk_g, sk=sk, bk=bk, wv=wv, sv=sv, bv=bv,
                wa1=wa1, sa=sa, ba=ba, wa2=wa2, ba2=ba2,
                wb1=wb1, sb=sb, bb=bb, wb2=wb2, bb2=bb2)


def cot_increased(x_nchw, p, kernel_size=3, tile_h=None, vmem_limit_bytes=None):
    K = kernel_size
    B, C, H, W = x_nchw.shape
    G = 4
    assert C % 4 == 0 and C % G == 0
    C4 = C // G
    CH1, CH2 = C // 2, C // 4
    HW = H * W
    pad = K // 2
    Wp = W + 2 * pad

    TH = _choose_tile_h(H, W) if tile_h is None else tile_h
    assert H % TH == 0 and ((TH * W) % 8 == 0 or TH == H), "bad spatial tile"
    n_t = H // TH
    THp = TH + 2 * pad
    T = TH * W

    bf = lambda a: a.astype(jnp.bfloat16)

    # ---- inputs --------------------------------------------------------------
    x_nhwc = jnp.transpose(x_nchw, (0, 2, 3, 1)).astype(jnp.float32)
    x_flat = x_nhwc.reshape(B, HW, C)                                  # f32 residual (pass 2)

    # per-tile halo'd padded input, pre-split by conv group (bf16, pass 1 only)
    x_pad = jnp.pad(x_nhwc, ((0, 0), (pad, pad), (pad, pad), (0, 0)))
    rows = jnp.arange(n_t)[:, None] * TH + jnp.arange(THp)[None, :]    # (n_t, THp)
    x_halo = x_pad[:, rows]                                            # (B, n_t, THp, Wp, C)
    x_halo = bf(x_halo.reshape(B, n_t, THp, Wp, G, C4)
                .transpose(0, 1, 4, 2, 3, 5))                          # (B, n_t, G, THp, Wp, C4)

    # ---- weights -------------------------------------------------------------
    # grouped conv, im2col-packed: wk_packed[g, tap*C4 + c_in, c_out]
    wk_packed = bf(jnp.transpose(p['wk_g'], (1, 0, 2, 3)).reshape(G, K * K * C4, C4))
    sk_g = p['sk'].reshape(G, 1, C4)
    bk_g = p['bk'].reshape(G, 1, C4)

    # x-side of attention_embed's first 1x1 fused with value_embed (one matmul)
    wa1_k = p['wa1'][:C].reshape(G, C4, CH1)                 # k1 rows of the cat([k1, x])
    wa1_x = p['wa1'][C:]                                     # x rows
    wxv = bf(jnp.concatenate([wa1_x, p['wv']], axis=1))      # (C, C//2 + C)

    # k1-side of both attention first-1x1s fused per group
    wb1_g = p['wb1'].reshape(G, C4, CH2)
    wk12 = bf(jnp.concatenate([wa1_k, wb1_g], axis=2))       # (G, C4, C//2 + C//4)

    # K*K tap-mean folded into the final 1x1s (torch out-channel order ch = c*K*K + j)
    wa2_m = bf(p['wa2'].reshape(CH1, C, K * K).mean(axis=-1))
    wb2_m = bf(p['wb2'].reshape(CH2, C, K * K).mean(axis=-1))
    b2 = (p['ba2'].reshape(1, C, K * K).mean(axis=-1)
          + p['bb2'].reshape(1, C, K * K).mean(axis=-1))

    sv, bv = p['sv'], p['bv']
    sa, ba = p['sa'], p['ba']
    sb, bb = p['sb'], p['bb']

    def const_spec(a):
        return pl.BlockSpec(a.shape, lambda b, t, n=a.ndim: (0,) * n)

    tile3 = lambda: pl.BlockSpec((None, T, C), lambda b, t: (b, t, 0))
    stat3 = lambda: pl.BlockSpec((None, 1, C), lambda b, t: (b, 0, 0))

    cp1 = dict(dimension_semantics=("parallel", "arbitrary"))   # stats accumulate over t
    cp2 = dict(dimension_semantics=("parallel", "parallel"))
    if vmem_limit_bytes is not None:
        cp1["vmem_limit_bytes"] = vmem_limit_bytes
        cp2["vmem_limit_bytes"] = vmem_limit_bytes

    # ---- pass 1: per-tile att & v + online softmax stats ---------------------
    kernel1 = functools.partial(_cot_pass1_kernel, TH=TH, W=W, C=C, K=K, G=G, pad=pad)
    att_hbm, v_hbm, m_hbm, l_hbm = pl.pallas_call(
        kernel1,
        out_shape=(jax.ShapeDtypeStruct((B, HW, C), jnp.float32),
                   jax.ShapeDtypeStruct((B, HW, C), jnp.float32),
                   jax.ShapeDtypeStruct((B, 1, C), jnp.float32),
                   jax.ShapeDtypeStruct((B, 1, C), jnp.float32)),
        grid=(B, n_t),
        in_specs=[
            pl.BlockSpec((None, None, G, THp, Wp, C4),
                         lambda b, t: (b, t, 0, 0, 0, 0)),
            const_spec(wk_packed), const_spec(sk_g), const_spec(bk_g),
            const_spec(wxv), const_spec(sv), const_spec(bv),
            const_spec(wk12), const_spec(sa), const_spec(ba),
            const_spec(sb), const_spec(bb),
            const_spec(wa2_m), const_spec(wb2_m), const_spec(b2),
        ],
        out_specs=(tile3(), tile3(), stat3(), stat3()),
        scratch_shapes=[pltpu.VMEM((TH, W, K * K * C4), jnp.bfloat16),   # im2col
                        pltpu.VMEM((TH, W, C), jnp.bfloat16)],           # flat x (bf16)
        compiler_params=pltpu.CompilerParams(**cp1),
    )(x_halo, wk_packed, sk_g, bk_g, wxv, sv, bv,
      wk12, sa, ba, sb, bb, wa2_m, wb2_m, b2)

    # ---- pass 2: normalize softmax, gate with v, add f32 residual ------------
    out_flat = pl.pallas_call(
        _cot_pass2_kernel,
        out_shape=jax.ShapeDtypeStruct((B, HW, C), x_nchw.dtype),
        grid=(B, n_t),
        in_specs=[tile3(), tile3(), tile3(), stat3(), stat3()],
        out_specs=tile3(),
        compiler_params=pltpu.CompilerParams(**cp2),
    )(att_hbm, v_hbm, x_flat, m_hbm, l_hbm)

    return jnp.transpose(out_flat.reshape(B, H, W, C), (0, 3, 1, 2))


def reference(x_nchw, p, kernel_size=3):
    """Pure-JAX reference following the original (un-folded) module math."""
    K = kernel_size
    B, C, H, W = x_nchw.shape
    G = 4
    C4 = C // G
    HW = H * W
    pad = K // 2
    x_nhwc = jnp.transpose(x_nchw, (0, 2, 3, 1)).astype(jnp.float32)
    x_pad = jnp.pad(x_nhwc, ((0, 0), (pad, pad), (pad, pad), (0, 0)))
    xf = x_nhwc.reshape(B, HW, C)

    k1 = jnp.zeros((B, HW, C), jnp.float32)
    for dy in range(K):
        for dx in range(K):
            xs = x_pad[:, dy:dy + H, dx:dx + W, :].reshape(B, HW, G, C4)
            k1 = k1 + jnp.einsum('bngc,gcd->bngd', xs,
                                 p['wk_g'][dy * K + dx]).reshape(B, HW, C)
    k1 = jnp.maximum(k1 * p['sk'] + p['bk'], 0.0)

    v = jnp.einsum('bnc,cd->bnd', xf, p['wv']) * p['sv'] + p['bv']

    y = jnp.concatenate([k1, xf], axis=-1)
    h1 = jnp.maximum(jnp.einsum('bnc,cd->bnd', y, p['wa1']) * p['sa'] + p['ba'], 0.0)
    att = jnp.einsum('bnc,cd->bnd', h1, p['wa2']) + p['ba2']
    h2 = jnp.maximum(jnp.einsum('bnc,cd->bnd', k1, p['wb1']) * p['sb'] + p['bb'], 0.0)
    att = att + jnp.einsum('bnc,cd->bnd', h2, p['wb2']) + p['bb2']

    att = att.reshape(B, HW, C, K * K).mean(axis=-1)   # torch: reshape(bs,c,k*k,h,w).mean(2)
    att = jax.nn.softmax(att, axis=1)                  # softmax over spatial
    out = att * v + xf
    return jnp.transpose(out.reshape(B, H, W, C), (0, 3, 1, 2)).astype(x_nchw.dtype)


if __name__ == "__main__":
    key = jax.random.PRNGKey(0)
    dim, ksz = 16, 3          # dim must be divisible by 4 (groups=4, factor=4)
    B, H, W = 2, 16, 16       # B even keeps both v7x TensorCores busy
    k_x, k_p = jax.random.split(key)
    x = jax.random.normal(k_x, (B, dim, H, W), jnp.float32)
    params = init_params(k_p, dim, ksz)

    # tile_h=4 -> 4 spatial tiles: exercises the two-pass / online-softmax path.
    out = cot_increased(x, params, ksz, tile_h=4)
    out = jax.block_until_ready(out)

    ref = reference(x, params, ksz)
    np.testing.assert_allclose(np.asarray(out), np.asarray(ref), rtol=3e-2, atol=3e-2)
    print("KERNEL_OK")
</pallas_src>

<mosaic_0001>
module attributes {stable_mosaic.version = 11 : i64} {
  func.func @_cot_pass1_kernel(%arg0: i32, %arg1: i32, %arg2: memref<1x1x4x6x18x4xbf16, #tpu.memory_space<vmem>>, %arg3: memref<4x36x4xbf16, #tpu.memory_space<vmem>>, %arg4: memref<4x1x4xf32, #tpu.memory_space<vmem>>, %arg5: memref<4x1x4xf32, #tpu.memory_space<vmem>>, %arg6: memref<16x24xbf16, #tpu.memory_space<vmem>>, %arg7: memref<1x16xf32, #tpu.memory_space<vmem>>, %arg8: memref<1x16xf32, #tpu.memory_space<vmem>>, %arg9: memref<4x4x12xbf16, #tpu.memory_space<vmem>>, %arg10: memref<1x8xf32, #tpu.memory_space<vmem>>, %arg11: memref<1x8xf32, #tpu.memory_space<vmem>>, %arg12: memref<1x4xf32, #tpu.memory_space<vmem>>, %arg13: memref<1x4xf32, #tpu.memory_space<vmem>>, %arg14: memref<8x16xbf16, #tpu.memory_space<vmem>>, %arg15: memref<4x16xbf16, #tpu.memory_space<vmem>>, %arg16: memref<1x16xf32, #tpu.memory_space<vmem>>, %arg17: memref<1x64x16xf32, #tpu.memory_space<vmem>>, %arg18: memref<1x64x16xf32, #tpu.memory_space<vmem>>, %arg19: memref<1x1x16xf32, #tpu.memory_space<vmem>>, %arg20: memref<1x1x16xf32, #tpu.memory_space<vmem>>, %arg21: memref<4x16x36xbf16, #tpu.memory_space<vmem>>, %arg22: memref<4x16x16xbf16, #tpu.memory_space<vmem>>) attributes {dimension_semantics = [#tpu.dimension_semantics<parallel>, #tpu.dimension_semantics<arbitrary>], iteration_bounds = array<i64: 2, 4>, scalar_prefetch = 0 : i64, scratch_operands = 2 : i64, tpu.core_type = #tpu.core_type<tc>, window_params = [{transform_indices = @transform_0, window_bounds = array<i64: 1, 1, 4, 6, 18, 4>}, {pipeline_mode = #tpu.pipeline_mode<synchronous>, transform_indices = @transform_1, window_bounds = array<i64: 4, 36, 4>}, {pipeline_mode = #tpu.pipeline_mode<synchronous>, transform_indices = @transform_2, window_bounds = array<i64: 4, 1, 4>}, {pipeline_mode = #tpu.pipeline_mode<synchronous>, transform_indices = @transform_3, window_bounds = array<i64: 4, 1, 4>}, {pipeline_mode = #tpu.pipeline_mode<synchronous>, transform_indices = @transform_4, window_bounds = array<i64: 16, 24>}, {pipeline_mode = #tpu.pipeline_mode<synchronous>, transform_indices = @transform_5, window_bounds = array<i64: 1, 16>}, {pipeline_mode = #tpu.pipeline_mode<synchronous>, transform_indices = @transform_6, window_bounds = array<i64: 1, 16>}, {pipeline_mode = #tpu.pipeline_mode<synchronous>, transform_indices = @transform_7, window_bounds = array<i64: 4, 4, 12>}, {pipeline_mode = #tpu.pipeline_mode<synchronous>, transform_indices = @transform_8, window_bounds = array<i64: 1, 8>}, {pipeline_mode = #tpu.pipeline_mode<synchronous>, transform_indices = @transform_9, window_bounds = array<i64: 1, 8>}, {pipeline_mode = #tpu.pipeline_mode<synchronous>, transform_indices = @transform_10, window_bounds = array<i64: 1, 4>}, {pipeline_mode = #tpu.pipeline_mode<synchronous>, transform_indices = @transform_11, window_bounds = array<i64: 1, 4>}, {pipeline_mode = #tpu.pipeline_mode<synchronous>, transform_indices = @transform_12, window_bounds = array<i64: 8, 16>}, {pipeline_mode = #tpu.pipeline_mode<synchronous>, transform_indices = @transform_13, window_bounds = array<i64: 4, 16>}, {pipeline_mode = #tpu.pipeline_mode<synchronous>, transform_indices = @transform_14, window_bounds = array<i64: 1, 16>}, {transform_indices = @transform_15, window_bounds = array<i64: 1, 64, 16>}, {transform_indices = @transform_16, window_bounds = array<i64: 1, 64, 16>}, {transform_indices = @transform_17, window_bounds = array<i64: 1, 1, 16>}, {transform_indices = @transform_18, window_bounds = array<i64: 1, 1, 16>}]} {
    %cst = arith.constant 0.000000e+00 : f32
    %0 = vector.broadcast %cst : f32 to vector<64x12xf32>
    %c0 = arith.constant 0 : index
    %c0_0 = arith.constant 0 : index
    %c0_1 = arith.constant 0 : index
    %c0_2 = arith.constant 0 : index
    %c0_3 = arith.constant 0 : index
    %c0_4 = arith.constant 0 : index
    %1 = vector.load %arg2[%c0, %c0_0, %c0_1, %c0_2, %c0_3, %c0_4] : memref<1x1x4x6x18x4xbf16, #tpu.memory_space<vmem>>, vector<1x1x1x4x16x4xbf16>
    %2 = vector.shape_cast %1 : vector<1x1x1x4x16x4xbf16> to vector<4x16x4xbf16>
    %c0_5 = arith.constant 0 : index
    %c0_6 = arith.constant 0 : index
    %c0_7 = arith.constant 0 : index
    %3 = vector.load %arg21[%c0_5, %c0_6, %c0_7] : memref<4x16x36xbf16, #tpu.memory_space<vmem>>, vector<4x16x4xbf16>
    tpu.vector_store %arg21[%c0_5, %c0_6, %c0_7], %2 {strides = array<i32>} : memref<4x16x36xbf16, #tpu.memory_space<vmem>>, vector<4x16x4xbf16>,
    %c0_8 = arith.constant 0 : index
    %c0_9 = arith.constant 0 : index
    %c0_10 = arith.constant 0 : index
    %c0_11 = arith.constant 0 : index
    %c1 = arith.constant 1 : index
    %c0_12 = arith.constant 0 : index
    %4 = vector.load %arg2[%c0_8, %c0_9, %c0_10, %c0_11, %c1, %c0_12] : memref<1x1x4x6x18x4xbf16, #tpu.memory_space<vmem>>, vector<1x1x1x4x16x4xbf16>
    %5 = vector.shape_cast %4 : vector<1x1x1x4x16x4xbf16> to vector<4x16x4xbf16>
    %c0_13 = arith.constant 0 : index
    %c0_14 = arith.constant 0 : index
    %c4 = arith.constant 4 : index
    %6 = vector.load %arg21[%c0_13, %c0_14, %c4] : memref<4x16x36xbf16, #tpu.memory_space<vmem>>, vector<4x16x4xbf16>
    tpu.vector_store %arg21[%c0_13, %c0_14, %c4], %5 {strides = array<i32>} : memref<4x16x36xbf16, #tpu.memory_space<vmem>>, vector<4x16x4xbf16>,
    %c0_15 = arith.constant 0 : index
    %c0_16 = arith.constant 0 : index
    %c0_17 = arith.constant 0 : index
    %c0_18 = arith.constant 0 : index
    %c2 = arith.constant 2 : index
    %c0_19 = arith.constant 0 : index
    %7 = vector.load %arg2[%c0_15, %c0_16, %c0_17, %c0_18, %c2, %c0_19] : memref<1x1x4x6x18x4xbf16, #tpu.memory_space<vmem>>, vector<1x1x1x4x16x4xbf16>
    %8 = vector.shape_cast %7 : vector<1x1x1x4x16x4xbf16> to vector<4x16x4xbf16>
    %c0_20 = arith.constant 0 : index
    %c0_21 = arith.constant 0 : index
    %c8 = arith.constant 8 : index
    %9 = vector.load %arg21[%c0_20, %c0_21, %c8] : memref<4x16x36xbf16, #tpu.memory_space<vmem>>, vector<4x16x4xbf16>
    tpu.vector_store %arg21[%c0_20, %c0_21, %c8], %8 {strides = array<i32>} : memref<4x16x36xbf16, #tpu.memory_space<vmem>>, vector<4x16x4xbf16>,
    %c0_22 = arith.constant 0 : index
    %c0_23 = arith.constant 0 : index
    %c0_24 = arith.constant 0 : index
    %c1_25 = arith.constant 1 : index
    %c0_26 = arith.constant 0 : index
    %c0_27 = arith.constant 0 : index
    %10 = vector.load %arg2[%c0_22, %c0_23, %c0_24, %c1_25, %c0_26, %c0_27] : memref<1x1x4x6x18x4xbf16, #tpu.memory_space<vmem>>, vector<1x1x1x4x16x4xbf16>
    %11 = vector.shape_cast %10 : vector<1x1x1x4x16x4xbf16> to vector<4x16x4xbf16>
    %c0_28 = arith.constant 0 : index
    %c0_29 = arith.constant 0 : index
    %c12 = arith.constant 12 : index
    %12 = vector.load %arg21[%c0_28, %c0_29, %c12] : memref<4x16x36xbf16, #tpu.memory_space<vmem>>, vector<4x16x4xbf16>
    tpu.vector_store %arg21[%c0_28, %c0_29, %c12], %11 {strides = array<i32>} : memref<4x16x36xbf16, #tpu.memory_space<vmem>>, vector<4x16x4xbf16>,
    %c0_30 = arith.constant 0 : index
    %c0_31 = arith.constant 0 : index
    %c0_32 = arith.constant 0 : index
    %c1_33 = arith.constant 1 : index
    %c1_34 = arith.constant 1 : index
    %c0_35 = arith.constant 0 : index
    %13 = vector.load %arg2[%c0_30, %c0_31, %c0_32, %c1_33, %c1_34, %c0_35] : memref<1x1x4x6x18x4xbf16, #tpu.memory_space<vmem>>, vector<1x1x1x4x16x4xbf16>
    %14 = vector.shape_cast %13 : vector<1x1x1x4x16x4xbf16> to vector<4x16x4xbf16>
    %c0_36 = arith.constant 0 : index
    %c0_37 = arith.constant 0 : index
    %c16 = arith.constant 16 : index
    %15 = vector.load %arg21[%c0_36, %c0_37, %c16] : memref<4x16x36xbf16, #tpu.memory_space<vmem>>, vector<4x16x4xbf16>
    tpu.vector_store %arg21[%c0_36, %c0_37, %c16], %14 {strides = array<i32>} : memref<4x16x36xbf16, #tpu.memory_space<vmem>>, vector<4x16x4xbf16>,
    %c0_38 = arith.constant 0 : index
    %c0_39 = arith.constant 0 : index
    %c0_40 = arith.constant 0 : index
    %c1_41 = arith.constant 1 : index
    %c2_42 = arith.constant 2 : index
    %c0_43 = arith.constant 0 : index
    %16 = vector.load %arg2[%c0_38, %c0_39, %c0_40, %c1_41, %c2_42, %c0_43] : memref<1x1x4x6x18x4xbf16, #tpu.memory_space<vmem>>, vector<1x1x1x4x16x4xbf16>
    %17 = vector.shape_cast %16 : vector<1x1x1x4x16x4xbf16> to vector<4x16x4xbf16>
    %c0_44 = arith.constant 0 : index
    %c0_45 = arith.constant 0 : index
    %c20 = arith.constant 20 : index
    %18 = vector.load %arg21[%c0_44, %c0_45, %c20] : memref<4x16x36xbf16, #tpu.memory_space<vmem>>, vector<4x16x4xbf16>
    tpu.vector_store %arg21[%c0_44, %c0_45, %c20], %17 {strides = array<i32>} : memref<4x16x36xbf16, #tpu.memory_space<vmem>>, vector<4x16x4xbf16>,
    %c0_46 = arith.constant 0 : index
    %c0_47 = arith.constant 0 : index
    %c0_48 = arith.constant 0 : index
    %c2_49 = arith.constant 2 : index
    %c0_50 = arith.constant 0 : index
    %c0_51 = arith.constant 0 : index
    %19 = vector.load %arg2[%c0_46, %c0_47, %c0_48, %c2_49, %c0_50, %c0_51] : memref<1x1x4x6x18x4xbf16, #tpu.memory_space<vmem>>, vector<1x1x1x4x16x4xbf16>
    %20 = vector.shape_cast %19 : vector<1x1x1x4x16x4xbf16> to vector<4x16x4xbf16>
    %c0_52 = arith.constant 0 : index
    %c0_53 = arith.constant 0 : index
    %c24 = arith.constant 24 : index
    %21 = vector.load %arg21[%c0_52, %c0_53, %c24] : memref<4x16x36xbf16, #tpu.memory_space<vmem>>, vector<4x16x4xbf16>
    tpu.vector_store %arg21[%c0_52, %c0_53, %c24], %20 {strides = array<i32>} : memref<4x16x36xbf16, #tpu.memory_space<vmem>>, vector<4x16x4xbf16>,
    %c0_54 = arith.constant 0 : index
    %c0_55 = arith.constant 0 : index
    %c0_56 = arith.constant 0 : index
    %c2_57 = arith.constant 2 : index
    %c1_58 = arith.constant 1 : index
    %c0_59 = arith.constant 0 : index
    %22 = vector.load %arg2[%c0_54, %c0_55, %c0_56, %c2_57, %c1_58, %c0_59] : memref<1x1x4x6x18x4xbf16, #tpu.memory_space<vmem>>, vector<1x1x1x4x16x4xbf16>
    %23 = vector.shape_cast %22 : vector<1x1x1x4x16x4xbf16> to vector<4x16x4xbf16>
    %c0_60 = arith.constant 0 : index
    %c0_61 = arith.constant 0 : index
    %c28 = arith.constant 28 : index
    %24 = vector.load %arg21[%c0_60, %c0_61, %c28] : memref<4x16x36xbf16, #tpu.memory_space<vmem>>, vector<4x16x4xbf16>
    tpu.vector_store %arg21[%c0_60, %c0_61, %c28], %23 {strides = array<i32>} : memref<4x16x36xbf16, #tpu.memory_space<vmem>>, vector<4x16x4xbf16>,
    %c0_62 = arith.constant 0 : index
    %c0_63 = arith.constant 0 : index
    %c0_64 = arith.constant 0 : index
    %c2_65 = arith.constant 2 : index
    %c2_66 = arith.constant 2 : index
    %c0_67 = arith.constant 0 : index
    %25 = vector.load %arg2[%c0_62, %c0_63, %c0_64, %c2_65, %c2_66, %c0_67] : memref<1x1x4x6x18x4xbf16, #tpu.memory_space<vmem>>, vector<1x1x1x4x16x4xbf16>
    %26 = vector.shape_cast %25 : vector<1x1x1x4x16x4xbf16> to vector<4x16x4xbf16>
    %c0_68 = arith.constant 0 : index
    %c0_69 = arith.constant 0 : index
    %c32 = arith.constant 32 : index
    %27 = vector.load %arg21[%c0_68, %c0_69, %c32] : memref<4x16x36xbf16, #tpu.memory_space<vmem>>, vector<4x16x4xbf16>
    tpu.vector_store %arg21[%c0_68, %c0_69, %c32], %26 {strides = array<i32>} : memref<4x16x36xbf16, #tpu.memory_space<vmem>>, vector<4x16x4xbf16>,
    %c0_70 = arith.constant 0 : index
    %c0_71 = arith.constant 0 : index
    %c0_72 = arith.constant 0 : index
    %c1_73 = arith.constant 1 : index
    %c1_74 = arith.constant 1 : index
    %c0_75 = arith.constant 0 : index
    %28 = vector.load %arg2[%c0_70, %c0_71, %c0_72, %c1_73, %c1_74, %c0_75] : memref<1x1x4x6x18x4xbf16, #tpu.memory_space<vmem>>, vector<1x1x1x4x16x4xbf16>
    %29 = vector.shape_cast %28 : vector<1x1x1x4x16x4xbf16> to vector<4x16x4xbf16>
    %c0_76 = arith.constant 0 : index
    %c0_77 = arith.constant 0 : index
    %c0_78 = arith.constant 0 : index
    %30 = vector.load %arg22[%c0_76, %c0_77, %c0_78] : memref<4x16x16xbf16, #tpu.memory_space<vmem>>, vector<4x16x4xbf16>
    tpu.vector_store %arg22[%c0_76, %c0_77, %c0_78], %29 {strides = array<i32>} : memref<4x16x16xbf16, #tpu.memory_space<vmem>>, vector<4x16x4xbf16>,
    %c0_79 = arith.constant 0 : index
    %c0_80 = arith.constant 0 : index
    %c0_81 = arith.constant 0 : index
    %31 = vector.load %arg21[%c0_79, %c0_80, %c0_81] : memref<4x16x36xbf16, #tpu.memory_space<vmem>>, vector<4x16x36xbf16>
    %32 = vector.shape_cast %31 : vector<4x16x36xbf16> to vector<64x36xbf16>
    %c0_82 = arith.constant 0 : index
    %c0_83 = arith.constant 0 : index
    %c0_84 = arith.constant 0 : index
    %33 = vector.load %arg3[%c0_82, %c0_83, %c0_84] : memref<4x36x4xbf16, #tpu.memory_space<vmem>>, vector<1x36x4xbf16>
    %34 = vector.shape_cast %33 : vector<1x36x4xbf16> to vector<36x4xbf16>
    %cst_85 = arith.constant dense<0.000000e+00> : vector<64x4xf32>
    %35 = tpu.matmul %32, %34, %cst_85 {dimension_numbers = #tpu.dot_dimension_numbers<[1], [0], [0], [1], [0, 0, 1, 1], [], []>} : vector<64x36xbf16>, vector<36x4xbf16>, vector<64x4xf32> -> vector<64x4xf32>
    %c0_86 = arith.constant 0 : index
    %c0_87 = arith.constant 0 : index
    %c0_88 = arith.constant 0 : index
    %36 = vector.load %arg4[%c0_86, %c0_87, %c0_88] : memref<4x1x4xf32, #tpu.memory_space<vmem>>, vector<1x1x4xf32>
    %37 = vector.shape_cast %36 : vector<1x1x4xf32> to vector<1x4xf32>
    %38 = vector.broadcast %37 : vector<1x4xf32> to vector<64x4xf32>
    %39 = arith.mulf %35, %38 : vector<64x4xf32>
    %c0_89 = arith.constant 0 : index
    %c0_90 = arith.constant 0 : index
    %c0_91 = arith.constant 0 : index
    %40 = vector.load %arg5[%c0_89, %c0_90, %c0_91] : memref<4x1x4xf32, #tpu.memory_space<vmem>>, vector<1x1x4xf32>
    %41 = vector.shape_cast %40 : vector<1x1x4xf32> to vector<1x4xf32>
    %42 = vector.broadcast %41 : vector<1x4xf32> to vector<64x4xf32>
    %43 = arith.addf %39, %42 : vector<64x4xf32>
    %cst_92 = arith.constant 0.000000e+00 : f32
    %44 = vector.broadcast %cst_92 : f32 to vector<64x4xf32>
    %45 = arith.maximumf %43, %44 : vector<64x4xf32>
    %46 = arith.truncf %45 : vector<64x4xf32> to vector<64x4xbf16>
    %c0_93 = arith.constant 0 : index
    %c0_94 = arith.constant 0 : index
    %c0_95 = arith.constant 0 : index
    %47 = vector.load %arg9[%c0_93, %c0_94, %c0_95] : memref<4x4x12xbf16, #tpu.memory_space<vmem>>, vector<1x4x12xbf16>
    %48 = vector.shape_cast %47 : vector<1x4x12xbf16> to vector<4x12xbf16>
    %cst_96 = arith.constant dense<0.000000e+00> : vector<64x12xf32>
    %49 = tpu.matmul %46, %48, %cst_96 {dimension_numbers = #tpu.dot_dimension_numbers<[1], [0], [0], [1], [0, 0, 1, 1], [], []>} : vector<64x4xbf16>, vector<4x12xbf16>, vector<64x12xf32> -> vector<64x12xf32>
    %50 = arith.addf %0, %49 : vector<64x12xf32>
    %c0_97 = arith.constant 0 : index
    %c0_98 = arith.constant 0 : index
    %c1_99 = arith.constant 1 : index
    %c0_100 = arith.constant 0 : index
    %c0_101 = arith.constant 0 : index
    %c0_102 = arith.constant 0 : index
    %51 = vector.load %arg2[%c0_97, %c0_98, %c1_99, %c0_100, %c0_101, %c0_102] : memref<1x1x4x6x18x4xbf16, #tpu.memory_space<vmem>>, vector<1x1x1x4x16x4xbf16>
    %52 = vector.shape_cast %51 : vector<1x1x1x4x16x4xbf16> to vector<4x16x4xbf16>
    %c0_103 = arith.constant 0 : index
    %c0_104 = arith.constant 0 : index
    %c0_105 = arith.constant 0 : index
    %53 = vector.load %arg21[%c0_103, %c0_104, %c0_105] : memref<4x16x36xbf16, #tpu.memory_space<vmem>>, vector<4x16x4xbf16>
    tpu.vector_store %arg21[%c0_103, %c0_104, %c0_105], %52 {strides = array<i32>} : memref<4x16x36xbf16, #tpu.memory_space<vmem>>, vector<4x16x4xbf16>,
    %c0_106 = arith.constant 0 : index
    %c0_107 = arith.constant 0 : index
    %c1_108 = arith.constant 1 : index
    %c0_109 = arith.constant 0 : index
    %c1_110 = arith.constant 1 : index
    %c0_111 = arith.constant 0 : index
    %54 = vector.load %arg2[%c0_106, %c0_107, %c1_108, %c0_109, %c1_110, %c0_111] : memref<1x1x4x6x18x4xbf16, #tpu.memory_space<vmem>>, vector<1x1x1x4x16x4xbf16>
    %55 = vector.shape_cast %54 : vector<1x1x1x4x16x4xbf16> to vector<4x16x4xbf16>
    %c0_112 = arith.constant 0 : index
    %c0_113 = arith.constant 0 : index
    %c4_114 = arith.constant 4 : index
    %56 = vector.load %arg21[%c0_112, %c0_113, %c4_114] : memref<4x16x36xbf16, #tpu.memory_space<vmem>>, vector<4x16x4xbf16>
    tpu.vector_store %arg21[%c0_112, %c0_113, %c4_114], %55 {strides = array<i32>} : memref<4x16x36xbf16, #tpu.memory_space<vmem>>, vector<4x16x4xbf16>,
    %c0_115 = arith.constant 0 : index
    %c0_116 = arith.constant 0 : index
    %c1_117 = arith.constant 1 : index
    %c0_118 = arith.constant 0 : index
    %c2_119 = arith.constant 2 : index
    %c0_120 = arith.constant 0 : index
    %57 = vector.load %arg2[%c0_115, %c0_116, %c1_117, %c0_118, %c2_119, %c0_120] : memref<1x1x4x6x18x4xbf16, #tpu.memory_space<vmem>>, vector<1x1x1x4x16x4xbf16>
    %58 = vector.shape_cast %57 : vector<1x1x1x4x16x4xbf16> to vector<4x16x4xbf16>
    %c0_121 = arith.constant 0 : index
    %c0_122 = arith.constant 0 : index
    %c8_123 = arith.constant 8 : index
    %59 = vector.load %arg21[%c0_121, %c0_122, %c8_123] : memref<4x16x36xbf16, #tpu.memory_space<vmem>>, vector<4x16x4xbf16>
    tpu.vector_store %arg21[%c0_121, %c0_122, %c8_123], %58 {strides = array<i32>} : memref<4x16x36xbf16, #tpu.memory_space<vmem>>, vector<4x16x4xbf16>,
    %c0_124 = arith.constant 0 : index
    %c0_125 = arith.constant 0 : index
    %c1_126 = arith.constant 1 : index
    %c1_127 = arith.constant 1 : index
    %c0_128 = arith.constant 0 : index
    %c0_129 = arith.constant 0 : index
    %60 = vector.load %arg2[%c0_124, %c0_125, %c1_126, %c1_127, %c0_128, %c0_129] : memref<1x1x4x6x18x4xbf16, #tpu.memory_space<vmem>>, vector<1x1x1x4x16x4xbf16>
    %61 = vector.shape_cast %60 : vector<1x1x1x4x16x4xbf16> to vector<4x16x4xbf16>
    %c0_130 = arith.constant 0 : index
    %c0_131 = arith.constant 0 : index
    %c12_132 = arith.constant 12 : index
    %62 = vector.load %arg21[%c0_130, %c0_131, %c12_132] : memref<4x16x36xbf16, #tpu.memory_space<vmem>>, vector<4x16x4xbf16>
    tpu.vector_store %arg21[%c0_130, %c0_131, %c12_132], %61 {strides = array<i32>} : memref<4x16x36xbf16, #tpu.memory_space<vmem>>, vector<4x16x4xbf16>,
    %c0_133 = arith.constant 0 : index
    %c0_134 = arith.constant 0 : index
    %c1_135 = arith.constant 1 : index
    %c1_136 = arith.constant 1 : index
    %c1_137 = arith.constant 1 : index
    %c0_138 = arith.constant 0 : index
    %63 = vector.load %arg2[%c0_133, %c0_134, %c1_135, %c1_136, %c1_137, %c0_138] : memref<1x1x4x6x18x4xbf16, #tpu.memory_space<vmem>>, vector<1x1x1x4x16x4xbf16>
    %64 = vector.shape_cast %63 : vector<1x1x1x4x16x4xbf16> to vector<4x16x4xbf16>
    %c0_139 = arith.constant 0 : index
    %c0_140 = arith.constant 0 : index
    %c16_141 = arith.constant 16 : index
    %65 = vector.load %arg21[%c0_139, %c0_140, %c16_141] : memref<4x16x36xbf16, #tpu.memory_space<vmem>>, vector<4x16x4xbf16>
    tpu.vector_store %arg21[%c0_139, %c0_140, %c16_141], %64 {strides = array<i32>} : memref<4x16x36xbf16, #tpu.memory_space<vmem>>, vector<4x16x4xbf16>,
    %c0_142 = arith.constant 0 : index
    %c0_143 = arith.constant 0 : index
    %c1_144 = arith.constant 1 : index
    %c1_145 = arith.constant 1 : index
    %c2_146 = arith.constant 2 : index
    %c0_147 = arith.constant 0 : index
    %66 = vector.load %arg2[%c0_142, %c0_143, %c1_144, %c1_145, %c2_146, %c0_147] : memref<1x1x4x6x18x4xbf16, #tpu.memory_space<vmem>>, vector<1x1x1x4x16x4xbf16>
    %67 = vector.shape_cast %66 : vector<1x1x1x4x16x4xbf16> to vector<4x16x4xbf16>
    %c0_148 = arith.constant 0 : index
    %c0_149 = arith.constant 0 : index
    %c20_150 = arith.constant 20 : index
    %68 = vector.load %arg21[%c0_148, %c0_149, %c20_150] : memref<4x16x36xbf16, #tpu.memory_space<vmem>>, vector<4x16x4xbf16>
    tpu.vector_store %arg21[%c0_148, %c0_149, %c20_150], %67 {strides = array<i32>} : memref<4x16x36xbf16, #tpu.memory_space<vmem>>, vector<4x16x4xbf16>,
    %c0_151 = arith.constant 0 : index
    %c0_152 = arith.constant 0 : index
    %c1_153 = arith.constant 1 : index
    %c2_154 = arith.constant 2 : index
    %c0_155 = arith.constant 0 : index
    %c0_156 = arith.constant 0 : index
    %69 = vector.load %arg2[%c0_151, %c0_152, %c1_153, %c2_154, %c0_155, %c0_156] : memref<1x1x4x6x18x4xbf16, #tpu.memory_space<vmem>>, vector<1x1x1x4x16x4xbf16>
    %70 = vector.shape_cast %69 : vector<1x1x1x4x16x4xbf16> to vector<4x16x4xbf16>
    %c0_157 = arith.constant 0 : index
    %c0_158 = arith.constant 0 : index
    %c24_159 = arith.constant 24 : index
    %71 = vector.load %arg21[%c0_157, %c0_158, %c24_159] : memref<4x16x36xbf16, #tpu.memory_space<vmem>>, vector<4x16x4xbf16>
    tpu.vector_store %arg21[%c0_157, %c0_158, %c24_159], %70 {strides = array<i32>} : memref<4x16x36xbf16, #tpu.memory_space<vmem>>, vector<4x16x4xbf16>,
    %c0_160 = arith.constant 0 : index
    %c0_161 = arith.constant 0 : index
    %c1_162 = arith.constant 1 : index
    %c2_163 = arith.constant 2 : index
    %c1_164 = arith.constant 1 : index
    %c0_165 = arith.constant 0 : index
    %72 = vector.load %arg2[%c0_160, %c0_161, %c1_162, %c2_163, %c1_164, %c0_165] : memref<1x1x4x6x18x4xbf16, #tpu.memory_space<vmem>>, vector<1x1x1x4x16x4xbf16>
    %73 = vector.shape_cast %72 : vector<1x1x1x4x16x4xbf16> to vector<4x16x4xbf16>
    %c0_166 = arith.constant 0 : index
    %c0_167 = arith.constant 0 : index
    %c28_168 = arith.constant 28 : index
    %74 = vector.load %arg21[%c0_166, %c0_167, %c28_168] : memref<4x16x36xbf16, #tpu.memory_space<vmem>>, vector<4x16x4xbf16>
    tpu.vector_store %arg21[%c0_166, %c0_167, %c28_168], %73 {strides = array<i32>} : memref<4x16x36xbf16, #tpu.memory_space<vmem>>, vector<4x16x4xbf16>,
    %c0_169 = arith.constant 0 : index
    %c0_170 = arith.constant 0 : index
    %c1_171 = arith.constant 1 : index
    %c2_172 = arith.constant 2 : index
    %c2_173 = arith.constant 2 : index
    %c0_174 = arith.constant 0 : index
    %75 = vector.load %arg2[%c0_169, %c0_170, %c1_171, %c2_172, %c2_173, %c0_174] : memref<1x1x4x6x18x4xbf16, #tpu.memory_space<vmem>>, vector<1x1x1x4x16x4xbf16>
    %76 = vector.shape_cast %75 : vector<1x1x1x4x16x4xbf16> to vector<4x16x4xbf16>
    %c0_175 = arith.constant 0 : index
    %c0_176 = arith.constant 0 : index
    %c32_177 = arith.constant 32 : index
    %77 = vector.load %arg21[%c0_175, %c0_176, %c32_177] : memref<4x16x36xbf16, #tpu.memory_space<vmem>>, vector<4x16x4xbf16>
    tpu.vector_store %arg21[%c0_175, %c0_176, %c32_177], %76 {strides = array<i32>} : memref<4x16x36xbf16, #tpu.memory_space<vmem>>, vector<4x16x4xbf16>,
    %c0_178 = arith.constant 0 : index
    %c0_179 = arith.constant 0 : index
    %c1_180 = arith.constant 1 : index
    %c1_181 = arith.constant 1 : index
    %c1_182 = arith.constant 1 : index
    %c0_183 = arith.constant 0 : index
    %78 = vector.load %arg2[%c0_178, %c0_179, %c1_180, %c1_181, %c1_182, %c0_183] : memref<1x1x4x6x18x4xbf16, #tpu.memory_space<vmem>>, vector<1x1x1x4x16x4xbf16>
    %79 = vector.shape_cast %78 : vector<1x1x1x4x16x4xbf16> to vector<4x16x4xbf16>
    %c0_184 = arith.constant 0 : index
    %c0_185 = arith.constant 0 : index
    %c4_186 = arith.constant 4 : index
    %80 = vector.load %arg22[%c0_184, %c0_185, %c4_186] : memref<4x16x16xbf16, #tpu.memory_space<vmem>>, vector<4x16x4xbf16>
    tpu.vector_store %arg22[%c0_184, %c0_185, %c4_186], %79 {strides = array<i32>} : memref<4x16x16xbf16, #tpu.memory_space<vmem>>, vector<4x16x4xbf16>,
    %c0_187 = arith.constant 0 : index
    %c0_188 = arith.constant 0 : index
    %c0_189 = arith.constant 0 : index
    %81 = vector.load %arg21[%c0_187, %c0_188, %c0_189] : memref<4x16x36xbf16, #tpu.memory_space<vmem>>, vector<4x16x36xbf16>
    %82 = vector.shape_cast %81 : vector<4x16x36xbf16> to vector<64x36xbf16>
    %c1_190 = arith.constant 1 : index
    %c0_191 = arith.constant 0 : index
    %c0_192 = arith.constant 0 : index
    %83 = vector.load %arg3[%c1_190, %c0_191, %c0_192] : memref<4x36x4xbf16, #tpu.memory_space<vmem>>, vector<1x36x4xbf16>
    %84 = vector.shape_cast %83 : vector<1x36x4xbf16> to vector<36x4xbf16>
    %cst_193 = arith.constant dense<0.000000e+00> : vector<64x4xf32>
    %85 = tpu.matmul %82, %84, %cst_193 {dimension_numbers = #tpu.dot_dimension_numbers<[1], [0], [0], [1], [0, 0, 1, 1], [], []>} : vector<64x36xbf16>, vector<36x4xbf16>, vector<64x4xf32> -> vector<64x4xf32>
    %c1_194 = arith.constant 1 : index
    %c0_195 = arith.constant 0 : index
    %c0_196 = arith.constant 0 : index
    %86 = vector.load %arg4[%c1_194, %c0_195, %c0_196] : memref<4x1x4xf32, #tpu.memory_space<vmem>>, vector<1x1x4xf32>
    %87 = vector.shape_cast %86 : vector<1x1x4xf32> to vector<1x4xf32>
    %88 = vector.broadcast %87 : vector<1x4xf32> to vector<64x4xf32>
    %89 = arith.mulf %85, %88 : vector<64x4xf32>
    %c1_197 = arith.constant 1 : index
    %c0_198 = arith.constant 0 : index
    %c0_199 = arith.constant 0 : index
    %90 = vector.load %arg5[%c1_197, %c0_198, %c0_199] : memref<4x1x4xf32, #tpu.memory_space<vmem>>, vector<1x1x4xf32>
    %91 = vector.shape_cast %90 : vector<1x1x4xf32> to vector<1x4xf32>
    %92 = vector.broadcast %91 : vector<1x4xf32> to vector<64x4xf32>
    %93 = arith.addf %89, %92 : vector<64x4xf32>
    %cst_200 = arith.constant 0.000000e+00 : f32
    %94 = vector.broadcast %cst_200 : f32 to vector<64x4xf32>
    %95 = arith.maximumf %93, %94 : vector<64x4xf32>
    %96 = arith.truncf %95 : vector<64x4xf32> to vector<64x4xbf16>
    %c1_201 = arith.constant 1 : index
    %c0_202 = arith.constant 0 : index
    %c0_203 = arith.constant 0 : index
    %97 = vector.load %arg9[%c1_201, %c0_202, %c0_203] : memref<4x4x12xbf16, #tpu.memory_space<vmem>>, vector<1x4x12xbf16>
    %98 = vector.shape_cast %97 : vector<1x4x12xbf16> to vector<4x12xbf16>
    %cst_204 = arith.constant dense<0.000000e+00> : vector<64x12xf32>
    %99 = tpu.matmul %96, %98, %cst_204 {dimension_numbers = #tpu.dot_dimension_numbers<[1], [0], [0], [1], [0, 0, 1, 1], [], []>} : vector<64x4xbf16>, vector<4x12xbf16>, vector<64x12xf32> -> vector<64x12xf32>
    %100 = arith.addf %50, %99 : vector<64x12xf32>
    %c0_205 = arith.constant 0 : index
    %c0_206 = arith.constant 0 : index
    %c2_207 = arith.constant 2 : index
    %c0_208 = arith.constant 0 : index
    %c0_209 = arith.constant 0 : index
    %c0_210 = arith.constant 0 : index
    %101 = vector.load %arg2[%c0_205, %c0_206, %c2_207, %c0_208, %c0_209, %c0_210] : memref<1x1x4x6x18x4xbf16, #tpu.memory_space<vmem>>, vector<1x1x1x4x16x4xbf16>
    %102 = vector.shape_cast %101 : vector<1x1x1x4x16x4xbf16> to vector<4x16x4xbf16>
    %c0_211 = arith.constant 0 : index
    %c0_212 = arith.constant 0 : index
    %c0_213 = arith.constant 0 : index
    %103 = vector.load %arg21[%c0_211, %c0_212, %c0_213] : memref<4x16x36xbf16, #tpu.memory_space<vmem>>, vector<4x16x4xbf16>
    tpu.vector_store %arg21[%c0_211, %c0_212, %c0_213], %102 {strides = array<i32>} : memref<4x16x36xbf16, #tpu.memory_space<vmem>>, vector<4x16x4xbf16>,
    %c0_214 = arith.constant 0 : index
    %c0_215 = arith.constant 0 : index
    %c2_216 = arith.constant 2 : index
    %c0_217 = arith.constant 0 : index
    %c1_218 = arith.constant 1 : index
    %c0_219 = arith.constant 0 : index
    %104 = vector.load %arg2[%c0_214, %c0_215, %c2_216, %c0_217, %c1_218, %c0_219] : memref<1x1x4x6x18x4xbf16, #tpu.memory_space<vmem>>, vector<1x1x1x4x16x4xbf16>
    %105 = vector.shape_cast %104 : vector<1x1x1x4x16x4xbf16> to vector<4x16x4xbf16>
    %c0_220 = arith.constant 0 : index
    %c0_221 = arith.constant 0 : index
    %c4_222 = arith.constant 4 : index
    %106 = vector.load %arg21[%c0_220, %c0_221, %c4_222] : memref<4x16x36xbf16, #tpu.memory_space<vmem>>, vector<4x16x4xbf16>
    tpu.vector_store %arg21[%c0_220, %c0_221, %c4_222], %105 {strides = array<i32>} : memref<4x16x36xbf16, #tpu.memory_space<vmem>>, vector<4x16x4xbf16>,
    %c0_223 = arith.constant 0 : index
    %c0_224 = arith.constant 0 : index
    %c2_225 = arith.constant 2 : index
    %c0_226 = arith.constant 0 : index
    %c2_227 = arith.constant 2 : index
    %c0_228 = arith.constant 0 : index
    %107 = vector.load %arg2[%c0_223, %c0_224, %c2_225, %c0_226, %c2_227, %c0_228] : memref<1x1x4x6x18x4xbf16, #tpu.memory_space<vmem>>, vector<1x1x1x4x16x4xbf16>
    %108 = vector.shape_cast %107 : vector<1x1x1x4x16x4xbf16> to vector<4x16x4xbf16>
    %c0_229 = arith.constant 0 : index
    %c0_230 = arith.constant 0 : index
    %c8_231 = arith.constant 8 : index
    %109 = vector.load %arg21[%c0_229, %c0_230, %c8_231] : memref<4x16x36xbf16, #tpu.memory_space<vmem>>, vector<4x16x4xbf16>
    tpu.vector_store %arg21[%c0_229, %c0_230, %c8_231], %108 {strides = array<i32>} : memref<4x16x36xbf16, #tpu.memory_space<vmem>>, vector<4x16x4xbf16>,
    %c0_232 = arith.constant 0 : index
    %c0_233 = arith.constant 0 : index
    %c2_234 = arith.constant 2 : index
    %c1_235 = arith.constant 1 : index
    %c0_236 = arith.constant 0 : index
    %c0_237 = arith.constant 0 : index
    %110 = vector.load %arg2[%c0_232, %c0_233, %c2_234, %c1_235, %c0_236, %c0_237] : memref<1x1x4x6x18x4xbf16, #tpu.memory_space<vmem>>, vector<1x1x1x4x16x4xbf16>
    %111 = vector.shape_cast %110 : vector<1x1x1x4x16x4xbf16> to vector<4x16x4xbf16>
    %c0_238 = arith.constant 0 : index
    %c0_239 = arith.constant 0 : index
    %c12_240 = arith.constant 12 : index
    %112 = vector.load %arg21[%c0_238, %c0_239, %c12_240] : memref<4x16x36xbf16, #tpu.memory_space<vmem>>, vector<4x16x4xbf16>
    tpu.vector_store %arg21[%c0_238, %c0_239, %c12_240], %111 {strides = array<i32>} : memref<4x16x36xbf16, #tpu.memory_space<vmem>>, vector<4x16x4xbf16>,
    %c0_241 = arith.constant 0 : index
    %c0_242 = arith.constant 0 : index
    %c2_243 = arith.constant 2 : index
    %c1_244 = arith.constant 1 : index
    %c1_245 = arith.constant 1 : index
    %c0_246 = arith.constant 0 : index
    %113 = vector.load %arg2[%c0_241, %c0_242, %c2_243, %c1_244, %c1_245, %c0_246] : memref<1x1x4x6x18x4xbf16, #tpu.memory_space<vmem>>, vector<1x1x1x4x16x4xbf16>
    %114 = vector.shape_cast %113 : vector<1x1x1x4x16x4xbf16> to vector<4x16x4xbf16>
    %c0_247 = arith.constant 0 : index
    %c0_248 = arith.constant 0 : index
    %c16_249 = arith.constant 16 : index
    %115 = vector.load %arg21[%c0_247, %c0_248, %c16_249] : memref<4x16x36xbf16, #tpu.memory_space<vmem>>, vector<4x16x4xbf16>
    tpu.vector_store %arg21[%c0_247, %c0_248, %c16_249], %114 {strides = array<i32>} : memref<4x16x36xbf16, #tpu.memory_space<vmem>>, vector<4x16x4xbf16>,
    %c0_250 = arith.constant 0 : index
    %c0_251 = arith.constant 0 : index
    %c2_252 = arith.constant 2 : index
    %c1_253 = arith.constant 1 : index
    %c2_254 = arith.constant 2 : index
    %c0_255 = arith.constant 0 : index
    %116 = vector.load %arg2[%c0_250, %c0_251, %c2_252, %c1_253, %c2_254, %c0_255] : memref<1x1x4x6x18x4xbf16, #tpu.memory_space<vmem>>, vector<1x1x1x4x16x4xbf16>
    %117 = vector.shape_cast %116 : vector<1x1x1x4x16x4xbf16> to vector<4x16x4xbf16>
    %c0_256 = arith.constant 0 : index
    %c0_257 = arith.constant 0 : index
    %c20_258 = arith.constant 20 : index
    %118 = vector.load %arg21[%c0_256, %c0_257, %c20_258] : memref<4x16x36xbf16, #tpu.memory_space<vmem>>, vector<4x16x4xbf16>
    tpu.vector_store %arg21[%c0_256, %c0_257, %c20_258], %117 {strides = array<i32>} : memref<4x16x36xbf16, #tpu.memory_space<vmem>>, vector<4x16x4xbf16>,
    %c0_259 = arith.constant 0 : index
    %c0_260 = arith.constant 0 : index
    %c2_261 = arith.constant 2 : index
    %c2_262 = arith.constant 2 : index
    %c0_263 = arith.constant 0 : index
    %c0_264 = arith.constant 0 : index
    %119 = vector.load %arg2[%c0_259, %c0_260, %c2_261, %c2_262, %c0_263, %c0_264] : memref<1x1x4x6x18x4xbf16, #tpu.memory_space<vmem>>, vector<1x1x1x4x16x4xbf16>
    %120 = vector.shape_cast %119 : vector<1x1x1x4x16x4xbf16> to vector<4x16x4xbf16>
    %c0_265 = arith.constant 0 : index
    %c0_266 = arith.constant 0 : index
    %c24_267 = arith.constant 24 : index
    %121 = vector.load %arg21[%c0_265, %c0_266, %c24_267] : memref<4x16x36xbf16, #tpu.memory_space<vmem>>, vector<4x16x4xbf16>
    tpu.vector_store %arg21[%c0_265, %c0_266, %c24_267], %120 {strides = array<i32>} : memref<4x16x36xbf16, #tpu.memory_space<vmem>>, vector<4x16x4xbf16>,
    %c0_268 = arith.constant 0 : index
    %c0_269 = arith.constant 0 : index
    %c2_270 = arith.constant 2 : index
    %c2_271 = arith.constant 2 : index
    %c1_272 = arith.constant 1 : index
    %c0_273 = arith.constant 0 : index
    %122 = vector.load %arg2[%c0_268, %c0_269, %c2_270, %c2_271, %c1_272, %c0_273] : memref<1x1x4x6x18x4xbf16, #tpu.memory_space<vmem>>, vector<1x1x1x4x16x4xbf16>
    %123 = vector.shape_cast %122 : vector<1x1x1x4x16x4xbf16> to vector<4x16x4xbf16>
    %c0_274 = arith.constant 0 : index
    %c0_275 = arith.constant 0 : index
    %c28_276 = arith.constant 28 : index
    %124 = vector.load %arg21[%c0_274, %c0_275, %c28_276] : memref<4x16x36xbf16, #tpu.memory_space<vmem>>, vector<4x16x4xbf16>
    tpu.vector_store %arg21[%c0_274, %c0_275, %c28_276], %123 {strides = array<i32>} : memref<4x16x36xbf16, #tpu.memory_space<vmem>>, vector<4x16x4xbf16>,
    %c0_277 = arith.constant 0 : index
    %c0_278 = arith.constant 0 : index
    %c2_279 = arith.constant 2 : index
    %c2_280 = arith.constant 2 : index
    %c2_281 = arith.constant 2 : index
    %c0_282 = arith.constant 0 : index
    %125 = vector.load %arg2[%c0_277, %c0_278, %c2_279, %c2_280, %c2_281, %c0_282] : memref<1x1x4x6x18x4xbf16, #tpu.memory_space<vmem>>, vector<1x1x1x4x16x4xbf16>
    %126 = vector.shape_cast %125 : vector<1x1x1x4x16x4xbf16> to vector<4x16x4xbf16>
    %c0_283 = arith.constant 0 : index
    %c0_284 = arith.constant 0 : index
    %c32_285 = arith.constant 32 : index
    %127 = vector.load %arg21[%c0_283, %c0_284, %c32_285] : memref<4x16x36xbf16, #tpu.memory_space<vmem>>, vector<4x16x4xbf16>
    tpu.vector_store %arg21[%c0_283, %c0_284, %c32_285], %126 {strides = array<i32>} : memref<4x16x36xbf16, #tpu.memory_space<vmem>>, vector<4x16x4xbf16>,
    %c0_286 = arith.constant 0 : index
    %c0_287 = arith.constant 0 : index
    %c2_288 = arith.constant 2 : index
    %c1_289 = arith.constant 1 : index
    %c1_290 = arith.constant 1 : index
    %c0_291 = arith.constant 0 : index
    %128 = vector.load %arg2[%c0_286, %c0_287, %c2_288, %c1_289, %c1_290, %c0_291] : memref<1x1x4x6x18x4xbf16, #tpu.memory_space<vmem>>, vector<1x1x1x4x16x4xbf16>
    %129 = vector.shape_cast %128 : vector<1x1x1x4x16x4xbf16> to vector<4x16x4xbf16>
    %c0_292 = arith.constant 0 : index
    %c0_293 = arith.constant 0 : index
    %c8_294 = arith.constant 8 : index
    %130 = vector.load %arg22[%c0_292, %c0_293, %c8_294] : memref<4x16x16xbf16, #tpu.memory_space<vmem>>, vector<4x16x4xbf16>
    tpu.vector_store %arg22[%c0_292, %c0_293, %c8_294], %129 {strides = array<i32>} : memref<4x16x16xbf16, #tpu.memory_space<vmem>>, vector<4x16x4xbf16>,
    %c0_295 = arith.constant 0 : index
    %c0_296 = arith.constant 0 : index
    %c0_297 = arith.constant 0 : index
    %131 = vector.load %arg21[%c0_295, %c0_296, %c0_297] : memref<4x16x36xbf16, #tpu.memory_space<vmem>>, vector<4x16x36xbf16>
    %132 = vector.shape_cast %131 : vector<4x16x36xbf16> to vector<64x36xbf16>
    %c2_298 = arith.constant 2 : index
    %c0_299 = arith.constant 0 : index
    %c0_300 = arith.constant 0 : index
    %133 = vector.load %arg3[%c2_298, %c0_299, %c0_300] : memref<4x36x4xbf16, #tpu.memory_space<vmem>>, vector<1x36x4xbf16>
    %134 = vector.shape_cast %133 : vector<1x36x4xbf16> to vector<36x4xbf16>
    %cst_301 = arith.constant dense<0.000000e+00> : vector<64x4xf32>
    %135 = tpu.matmul %132, %134, %cst_301 {dimension_numbers = #tpu.dot_dimension_numbers<[1], [0], [0], [1], [0, 0, 1, 1], [], []>} : vector<64x36xbf16>, vector<36x4xbf16>, vector<64x4xf32> -> vector<64x4xf32>
    %c2_302 = arith.constant 2 : index
    %c0_303 = arith.constant 0 : index
    %c0_304 = arith.constant 0 : index
    %136 = vector.load %arg4[%c2_302, %c0_303, %c0_304] : memref<4x1x4xf32, #tpu.memory_space<vmem>>, vector<1x1x4xf32>
    %137 = vector.shape_cast %136 : vector<1x1x4xf32> to vector<1x4xf32>
    %138 = vector.broadcast %137 : vector<1x4xf32> to vector<64x4xf32>
    %139 = arith.mulf %135, %138 : vector<64x4xf32>
    %c2_305 = arith.constant 2 : index
    %c0_306 = arith.constant 0 : index
    %c0_307 = arith.constant 0 : index
    %140 = vector.load %arg5[%c2_305, %c0_306, %c0_307] : memref<4x1x4xf32, #tpu.memory_space<vmem>>, vector<1x1x4xf32>
    %141 = vector.shape_cast %140 : vector<1x1x4xf32> to vector<1x4xf32>
    %142 = vector.broadcast %141 : vector<1x4xf32> to vector<64x4xf32>
    %143 = arith.addf %139, %142 : vector<64x4xf32>
    %cst_308 = arith.constant 0.000000e+00 : f32
    %144 = vector.broadcast %cst_308 : f32 to vector<64x4xf32>
    %145 = arith.maximumf %143, %144 : vector<64x4xf32>
    %146 = arith.truncf %145 : vector<64x4xf32> to vector<64x4xbf16>
    %c2_309 = arith.constant 2 : index
    %c0_310 = arith.constant 0 : index
    %c0_311 = arith.constant 0 : index
    %147 = vector.load %arg9[%c2_309, %c0_310, %c0_311] : memref<4x4x12xbf16, #tpu.memory_space<vmem>>, vector<1x4x12xbf16>
    %148 = vector.shape_cast %147 : vector<1x4x12xbf16> to vector<4x12xbf16>
    %cst_312 = arith.constant dense<0.000000e+00> : vector<64x12xf32>
    %149 = tpu.matmul %146, %148, %cst_312 {dimension_numbers = #tpu.dot_dimension_numbers<[1], [0], [0], [1], [0, 0, 1, 1], [], []>} : vector<64x4xbf16>, vector<4x12xbf16>, vector<64x12xf32> -> vector<64x12xf32>
    %150 = arith.addf %100, %149 : vector<64x12xf32>
    %c0_313 = arith.constant 0 : index
    %c0_314 = arith.constant 0 : index
    %c3 = arith.constant 3 : index
    %c0_315 = arith.constant 0 : index
    %c0_316 = arith.constant 0 : index
    %c0_317 = arith.constant 0 : index
    %151 = vector.load %arg2[%c0_313, %c0_314, %c3, %c0_315, %c0_316, %c0_317] : memref<1x1x4x6x18x4xbf16, #tpu.memory_space<vmem>>, vector<1x1x1x4x16x4xbf16>
    %152 = vector.shape_cast %151 : vector<1x1x1x4x16x4xbf16> to vector<4x16x4xbf16>
    %c0_318 = arith.constant 0 : index
    %c0_319 = arith.constant 0 : index
    %c0_320 = arith.constant 0 : index
    %153 = vector.load %arg21[%c0_318, %c0_319, %c0_320] : memref<4x16x36xbf16, #tpu.memory_space<vmem>>, vector<4x16x4xbf16>
    tpu.vector_store %arg21[%c0_318, %c0_319, %c0_320], %152 {strides = array<i32>} : memref<4x16x36xbf16, #tpu.memory_space<vmem>>, vector<4x16x4xbf16>,
    %c0_321 = arith.constant 0 : index
    %c0_322 = arith.constant 0 : index
    %c3_323 = arith.constant 3 : index
    %c0_324 = arith.constant 0 : index
    %c1_325 = arith.constant 1 : index
    %c0_326 = arith.constant 0 : index
    %154 = vector.load %arg2[%c0_321, %c0_322, %c3_323, %c0_324, %c1_325, %c0_326] : memref<1x1x4x6x18x4xbf16, #tpu.memory_space<vmem>>, vector<1x1x1x4x16x4xbf16>
    %155 = vector.shape_cast %154 : vector<1x1x1x4x16x4xbf16> to vector<4x16x4xbf16>
    %c0_327 = arith.constant 0 : index
    %c0_328 = arith.constant 0 : index
    %c4_329 = arith.constant 4 : index
    %156 = vector.load %arg21[%c0_327, %c0_328, %c4_329] : memref<4x16x36xbf16, #tpu.memory_space<vmem>>, vector<4x16x4xbf16>
    tpu.vector_store %arg21[%c0_327, %c0_328, %c4_329], %155 {strides = array<i32>} : memref<4x16x36xbf16, #tpu.memory_space<vmem>>, vector<4x16x4xbf16>,
    %c0_330 = arith.constant 0 : index
    %c0_331 = arith.constant 0 : index
    %c3_332 = arith.constant 3 : index
    %c0_333 = arith.constant 0 : index
    %c2_334 = arith.constant 2 : index
    %c0_335 = arith.constant 0 : index
    %157 = vector.load %arg2[%c0_330, %c0_331, %c3_332, %c0_333, %c2_334, %c0_335] : memref<1x1x4x6x18x4xbf16, #tpu.memory_space<vmem>>, vector<1x1x1x4x16x4xbf16>
    %158 = vector.shape_cast %157 : vector<1x1x1x4x16x4xbf16> to vector<4x16x4xbf16>
    %c0_336 = arith.constant 0 : index
    %c0_337 = arith.constant 0 : index
    %c8_338 = arith.constant 8 : index
    %159 = vector.load %arg21[%c0_336, %c0_337, %c8_338] : memref<4x16x36xbf16, #tpu.memory_space<vmem>>, vector<4x16x4xbf16>
    tpu.vector_store %arg21[%c0_336, %c0_337, %c8_338], %158 {strides = array<i32>} : memref<4x16x36xbf16, #tpu.memory_space<vmem>>, vector<4x16x4xbf16>,
    %c0_339 = arith.constant 0 : index
    %c0_340 = arith.constant 0 : index
    %c3_341 = arith.constant 3 : index
    %c1_342 = arith.constant 1 : index
    %c0_343 = arith.constant 0 : index
    %c0_344 = arith.constant 0 : index
    %160 = vector.load %arg2[%c0_339, %c0_340, %c3_341, %c1_342, %c0_343, %c0_344] : memref<1x1x4x6x18x4xbf16, #tpu.memory_space<vmem>>, vector<1x1x1x4x16x4xbf16>
    %161 = vector.shape_cast %160 : vector<1x1x1x4x16x4xbf16> to vector<4x16x4xbf16>
    %c0_345 = arith.constant 0 : index
    %c0_346 = arith.constant 0 : index
    %c12_347 = arith.constant 12 : index
    %162 = vector.load %arg21[%c0_345, %c0_346, %c12_347] : memref<4x16x36xbf16, #tpu.memory_space<vmem>>, vector<4x16x4xbf16>
    tpu.vector_store %arg21[%c0_345, %c0_346, %c12_347], %161 {strides = array<i32>} : memref<4x16x36xbf16, #tpu.memory_space<vmem>>, vector<4x16x4xbf16>,
    %c0_348 = arith.constant 0 : index
    %c0_349 = arith.constant 0 : index
    %c3_350 = arith.constant 3 : index
    %c1_351 = arith.constant 1 : index
    %c1_352 = arith.constant 1 : index
    %c0_353 = arith.constant 0 : index
    %163 = vector.load %arg2[%c0_348, %c0_349, %c3_350, %c1_351, %c1_352, %c0_353] : memref<1x1x4x6x18x4xbf16, #tpu.memory_space<vmem>>, vector<1x1x1x4x16x4xbf16>
    %164 = vector.shape_cast %163 : vector<1x1x1x4x16x4xbf16> to vector<4x16x4xbf16>
    %c0_354 = arith.constant 0 : index
    %c0_355 = arith.constant 0 : index
    %c16_356 = arith.constant 16 : index
    %165 = vector.load %arg21[%c0_354, %c0_355, %c16_356] : memref<4x16x36xbf16, #tpu.memory_space<vmem>>, vector<4x16x4xbf16>
    tpu.vector_store %arg21[%c0_354, %c0_355, %c16_356], %164 {strides = array<i32>} : memref<4x16x36xbf16, #tpu.memory_space<vmem>>, vector<4x16x4xbf16>,
    %c0_357 = arith.constant 0 : index
    %c0_358 = arith.constant 0 : index
    %c3_359 = arith.constant 3 : index
    %c1_360 = arith.constant 1 : index
    %c2_361 = arith.constant 2 : index
    %c0_362 = arith.constant 0 : index
    %166 = vector.load %arg2[%c0_357, %c0_358, %c3_359, %c1_360, %c2_361, %c0_362] : memref<1x1x4x6x18x4xbf16, #tpu.memory_space<vmem>>, vector<1x1x1x4x16x4xbf16>
    %167 = vector.shape_cast %166 : vector<1x1x1x4x16x4xbf16> to vector<4x16x4xbf16>
    %c0_363 = arith.constant 0 : index
    %c0_364 = arith.constant 0 : index
    %c20_365 = arith.constant 20 : index
    %168 = vector.load %arg21[%c0_363, %c0_364, %c20_365] : memref<4x16x36xbf16, #tpu.memory_space<vmem>>, vector<4x16x4xbf16>
    tpu.vector_store %arg21[%c0_363, %c0_364, %c20_365], %167 {strides = array<i32>} : memref<4x16x36xbf16, #tpu.memory_space<vmem>>, vector<4x16x4xbf16>,
    %c0_366 = arith.constant 0 : index
    %c0_367 = arith.constant 0 : index
    %c3_368 = arith.constant 3 : index
    %c2_369 = arith.constant 2 : index
    %c0_370 = arith.constant 0 : index
    %c0_371 = arith.constant 0 : index
    %169 = vector.load %arg2[%c0_366, %c0_367, %c3_368, %c2_369, %c0_370, %c0_371] : memref<1x1x4x6x18x4xbf16, #tpu.memory_space<vmem>>, vector<1x1x1x4x16x4xbf16>
    %170 = vector.shape_cast %169 : vector<1x1x1x4x16x4xbf16> to vector<4x16x4xbf16>
    %c0_372 = arith.constant 0 : index
    %c0_373 = arith.constant 0 : index
    %c24_374 = arith.constant 24 : index
    %171 = vector.load %arg21[%c0_372, %c0_373, %c24_374] : memref<4x16x36xbf16, #tpu.memory_space<vmem>>, vector<4x16x4xbf16>
    tpu.vector_store %arg21[%c0_372, %c0_373, %c24_374], %170 {strides = array<i32>} : memref<4x16x36xbf16, #tpu.memory_space<vmem>>, vector<4x16x4xbf16>,
    %c0_375 = arith.constant 0 : index
    %c0_376 = arith.constant 0 : index
    %c3_377 = arith.constant 3 : index
    %c2_378 = arith.constant 2 : index
    %c1_379 = arith.constant 1 : index
    %c0_380 = arith.constant 0 : index
    %172 = vector.load %arg2[%c0_375, %c0_376, %c3_377, %c2_378, %c1_379, %c0_380] : memref<1x1x4x6x18x4xbf16, #tpu.memory_space<vmem>>, vector<1x1x1x4x16x4xbf16>
    %173 = vector.shape_cast %172 : vector<1x1x1x4x16x4xbf16> to vector<4x16x4xbf16>
    %c0_381 = arith.constant 0 : index
    %c0_382 = arith.constant 0 : index
    %c28_383 = arith.constant 28 : index
    %174 = vector.load %arg21[%c0_381, %c0_382, %c28_383] : memref<4x16x36xbf16, #tpu.memory_space<vmem>>, vector<4x16x4xbf16>
    tpu.vector_store %arg21[%c0_381, %c0_382, %c28_383], %173 {strides = array<i32>} : memref<4x16x36xbf16, #tpu.memory_space<vmem>>, vector<4x16x4xbf16>,
    %c0_384 = arith.constant 0 : index
    %c0_385 = arith.constant 0 : index
    %c3_386 = arith.constant 3 : index
    %c2_387 = arith.constant 2 : index
    %c2_388 = arith.constant 2 : index
    %c0_389 = arith.constant 0 : index
    %175 = vector.load %arg2[%c0_384, %c0_385, %c3_386, %c2_387, %c2_388, %c0_389] : memref<1x1x4x6x18x4xbf16, #tpu.memory_space<vmem>>, vector<1x1x1x4x16x4xbf16>
    %176 = vector.shape_cast %175 : vector<1x1x1x4x16x4xbf16> to vector<4x16x4xbf16>
    %c0_390 = arith.constant 0 : index
    %c0_391 = arith.constant 0 : index
    %c32_392 = arith.constant 32 : index
    %177 = vector.load %arg21[%c0_390, %c0_391, %c32_392] : memref<4x16x36xbf16, #tpu.memory_space<vmem>>, vector<4x16x4xbf16>
    tpu.vector_store %arg21[%c0_390, %c0_391, %c32_392], %176 {strides = array<i32>} : memref<4x16x36xbf16, #tpu.memory_space<vmem>>, vector<4x16x4xbf16>,
    %c0_393 = arith.constant 0 : index
    %c0_394 = arith.constant 0 : index
    %c3_395 = arith.constant 3 : index
    %c1_396 = arith.constant 1 : index
    %c1_397 = arith.constant 1 : index
    %c0_398 = arith.constant 0 : index
    %178 = vector.load %arg2[%c0_393, %c0_394, %c3_395, %c1_396, %c1_397, %c0_398] : memref<1x1x4x6x18x4xbf16, #tpu.memory_space<vmem>>, vector<1x1x1x4x16x4xbf16>
    %179 = vector.shape_cast %178 : vector<1x1x1x4x16x4xbf16> to vector<4x16x4xbf16>
    %c0_399 = arith.constant 0 : index
    %c0_400 = arith.constant 0 : index
    %c12_401 = arith.constant 12 : index
    %180 = vector.load %arg22[%c0_399, %c0_400, %c12_401] : memref<4x16x16xbf16, #tpu.memory_space<vmem>>, vector<4x16x4xbf16>
    tpu.vector_store %arg22[%c0_399, %c0_400, %c12_401], %179 {strides = array<i32>} : memref<4x16x16xbf16, #tpu.memory_space<vmem>>, vector<4x16x4xbf16>,
    %c0_402 = arith.constant 0 : index
    %c0_403 = arith.constant 0 : index
    %c0_404 = arith.constant 0 : index
    %181 = vector.load %arg21[%c0_402, %c0_403, %c0_404] : memref<4x16x36xbf16, #tpu.memory_space<vmem>>, vector<4x16x36xbf16>
    %182 = vector.shape_cast %181 : vector<4x16x36xbf16> to vector<64x36xbf16>
    %c3_405 = arith.constant 3 : index
    %c0_406 = arith.constant 0 : index
    %c0_407 = arith.constant 0 : index
    %183 = vector.load %arg3[%c3_405, %c0_406, %c0_407] : memref<4x36x4xbf16, #tpu.memory_space<vmem>>, vector<1x36x4xbf16>
    %184 = vector.shape_cast %183 : vector<1x36x4xbf16> to vector<36x4xbf16>
    %cst_408 = arith.constant dense<0.000000e+00> : vector<64x4xf32>
    %185 = tpu.matmul %182, %184, %cst_408 {dimension_numbers = #tpu.dot_dimension_numbers<[1], [0], [0], [1], [0, 0, 1, 1], [], []>} : vector<64x36xbf16>, vector<36x4xbf16>, vector<64x4xf32> -> vector<64x4xf32>
    %c3_409 = arith.constant 3 : index
    %c0_410 = arith.constant 0 : index
    %c0_411 = arith.constant 0 : index
    %186 = vector.load %arg4[%c3_409, %c0_410, %c0_411] : memref<4x1x4xf32, #tpu.memory_space<vmem>>, vector<1x1x4xf32>
    %187 = vector.shape_cast %186 : vector<1x1x4xf32> to vector<1x4xf32>
    %188 = vector.broadcast %187 : vector<1x4xf32> to vector<64x4xf32>
    %189 = arith.mulf %185, %188 : vector<64x4xf32>
    %c3_412 = arith.constant 3 : index
    %c0_413 = arith.constant 0 : index
    %c0_414 = arith.constant 0 : index
    %190 = vector.load %arg5[%c3_412, %c0_413, %c0_414] : memref<4x1x4xf32, #tpu.memory_space<vmem>>, vector<1x1x4xf32>
    %191 = vector.shape_cast %190 : vector<1x1x4xf32> to vector<1x4xf32>
    %192 = vector.broadcast %191 : vector<1x4xf32> to vector<64x4xf32>
    %193 = arith.addf %189, %192 : vector<64x4xf32>
    %cst_415 = arith.constant 0.000000e+00 : f32
    %194 = vector.broadcast %cst_415 : f32 to vector<64x4xf32>
    %195 = arith.maximumf %193, %194 : vector<64x4xf32>
    %196 = arith.truncf %195 : vector<64x4xf32> to vector<64x4xbf16>
    %c3_416 = arith.constant 3 : index
    %c0_417 = arith.constant 0 : index
    %c0_418 = arith.constant 0 : index
    %197 = vector.load %arg9[%c3_416, %c0_417, %c0_418] : memref<4x4x12xbf16, #tpu.memory_space<vmem>>, vector<1x4x12xbf16>
    %198 = vector.shape_cast %197 : vector<1x4x12xbf16> to vector<4x12xbf16>
    %cst_419 = arith.constant dense<0.000000e+00> : vector<64x12xf32>
    %199 = tpu.matmul %196, %198, %cst_419 {dimension_numbers = #tpu.dot_dimension_numbers<[1], [0], [0], [1], [0, 0, 1, 1], [], []>} : vector<64x4xbf16>, vector<4x12xbf16>, vector<64x12xf32> -> vector<64x12xf32>
    %200 = arith.addf %150, %199 : vector<64x12xf32>
    %c0_420 = arith.constant 0 : index
    %c0_421 = arith.constant 0 : index
    %c0_422 = arith.constant 0 : index
    %201 = vector.load %arg22[%c0_420, %c0_421, %c0_422] : memref<4x16x16xbf16, #tpu.memory_space<vmem>>, vector<4x16x16xbf16>
    %202 = vector.shape_cast %201 : vector<4x16x16xbf16> to vector<64x16xbf16>
    %c0_423 = arith.constant 0 : index
    %c0_424 = arith.constant 0 : index
    %203 = vector.load %arg6[%c0_423, %c0_424] : memref<16x24xbf16, #tpu.memory_space<vmem>>, vector<16x24xbf16>
    %cst_425 = arith.constant dense<0.000000e+00> : vector<64x24xf32>
    %204 = tpu.matmul %202, %203, %cst_425 {dimension_numbers = #tpu.dot_dimension_numbers<[1], [0], [0], [1], [0, 0, 1, 1], [], []>} : vector<64x16xbf16>, vector<16x24xbf16>, vector<64x24xf32> -> vector<64x24xf32>
    %205 = vector.extract_strided_slice %204 {offsets = [0, 0], sizes = [64, 8], strides = [1, 1]} : vector<64x24xf32> to vector<64x8xf32>
    %206 = vector.extract_strided_slice %200 {offsets = [0, 0], sizes = [64, 8], strides = [1, 1]} : vector<64x12xf32> to vector<64x8xf32>
    %207 = arith.addf %205, %206 : vector<64x8xf32>
    %c0_426 = arith.constant 0 : index
    %c0_427 = arith.constant 0 : index
    %208 = vector.load %arg10[%c0_426, %c0_427] : memref<1x8xf32, #tpu.memory_space<vmem>>, vector<1x8xf32>
    %209 = vector.broadcast %208 : vector<1x8xf32> to vector<64x8xf32>
    %210 = arith.mulf %207, %209 : vector<64x8xf32>
    %c0_428 = arith.constant 0 : index
    %c0_429 = arith.constant 0 : index
    %211 = vector.load %arg11[%c0_428, %c0_429] : memref<1x8xf32, #tpu.memory_space<vmem>>, vector<1x8xf32>
    %212 = vector.broadcast %211 : vector<1x8xf32> to vector<64x8xf32>
    %213 = arith.addf %210, %212 : vector<64x8xf32>
    %cst_430 = arith.constant 0.000000e+00 : f32
    %214 = vector.broadcast %cst_430 : f32 to vector<64x8xf32>
    %215 = arith.maximumf %213, %214 : vector<64x8xf32>
    %216 = vector.extract_strided_slice %200 {offsets = [0, 8], sizes = [64, 4], strides = [1, 1]} : vector<64x12xf32> to vector<64x4xf32>
    %c0_431 = arith.constant 0 : index
    %c0_432 = arith.constant 0 : index
    %217 = vector.load %arg12[%c0_431, %c0_432] : memref<1x4xf32, #tpu.memory_space<vmem>>, vector<1x4xf32>
    %218 = vector.broadcast %217 : vector<1x4xf32> to vector<64x4xf32>
    %219 = arith.mulf %216, %218 : vector<64x4xf32>
    %c0_433 = arith.constant 0 : index
    %c0_434 = arith.constant 0 : index
    %220 = vector.load %arg13[%c0_433, %c0_434] : memref<1x4xf32, #tpu.memory_space<vmem>>, vector<1x4xf32>
    %221 = vector.broadcast %220 : vector<1x4xf32> to vector<64x4xf32>
    %222 = arith.addf %219, %221 : vector<64x4xf32>
    %cst_435 = arith.constant 0.000000e+00 : f32
    %223 = vector.broadcast %cst_435 : f32 to vector<64x4xf32>
    %224 = arith.maximumf %222, %223 : vector<64x4xf32>
    %225 = vector.extract_strided_slice %204 {offsets = [0, 8], sizes = [64, 16], strides = [1, 1]} : vector<64x24xf32> to vector<64x16xf32>
    %c0_436 = arith.constant 0 : index
    %c0_437 = arith.constant 0 : index
    %226 = vector.load %arg7[%c0_436, %c0_437] : memref<1x16xf32, #tpu.memory_space<vmem>>, vector<1x16xf32>
    %227 = vector.broadcast %226 : vector<1x16xf32> to vector<64x16xf32>
    %228 = arith.mulf %225, %227 : vector<64x16xf32>
    %c0_438 = arith.constant 0 : index
    %c0_439 = arith.constant 0 : index
    %229 = vector.load %arg8[%c0_438, %c0_439] : memref<1x16xf32, #tpu.memory_space<vmem>>, vector<1x16xf32>
    %230 = vector.broadcast %229 : vector<1x16xf32> to vector<64x16xf32>
    %231 = arith.addf %228, %230 : vector<64x16xf32>
    %232 = arith.truncf %215 : vector<64x8xf32> to vector<64x8xbf16>
    %c0_440 = arith.constant 0 : index
    %c0_441 = arith.constant 0 : index
    %233 = vector.load %arg14[%c0_440, %c0_441] : memref<8x16xbf16, #tpu.memory_space<vmem>>, vector<8x16xbf16>
    %cst_442 = arith.constant dense<0.000000e+00> : vector<64x16xf32>
    %234 = tpu.matmul %232, %233, %cst_442 {dimension_numbers = #tpu.dot_dimension_numbers<[1], [0], [0], [1], [0, 0, 1, 1], [], []>} : vector<64x8xbf16>, vector<8x16xbf16>, vector<64x16xf32> -> vector<64x16xf32>
    %235 = arith.truncf %224 : vector<64x4xf32> to vector<64x4xbf16>
    %c0_443 = arith.constant 0 : index
    %c0_444 = arith.constant 0 : index
    %236 = vector.load %arg15[%c0_443, %c0_444] : memref<4x16xbf16, #tpu.memory_space<vmem>>, vector<4x16xbf16>
    %cst_445 = arith.constant dense<0.000000e+00> : vector<64x16xf32>
    %237 = tpu.matmul %235, %236, %cst_445 {dimension_numbers = #tpu.dot_dimension_numbers<[1], [0], [0], [1], [0, 0, 1, 1], [], []>} : vector<64x4xbf16>, vector<4x16xbf16>, vector<64x16xf32> -> vector<64x16xf32>
    %238 = arith.addf %234, %237 : vector<64x16xf32>
    %c0_446 = arith.constant 0 : index
    %c0_447 = arith.constant 0 : index
    %239 = vector.load %arg16[%c0_446, %c0_447] : memref<1x16xf32, #tpu.memory_space<vmem>>, vector<1x16xf32>
    %240 = vector.broadcast %239 : vector<1x16xf32> to vector<64x16xf32>
    %241 = arith.addf %238, %240 : vector<64x16xf32>
    %c0_448 = arith.constant 0 : index
    %c0_449 = arith.constant 0 : index
    %c0_450 = arith.constant 0 : index
    %242 = vector.load %arg17[%c0_448, %c0_449, %c0_450] : memref<1x64x16xf32, #tpu.memory_space<vmem>>, vector<1x64x16xf32>
    %243 = vector.shape_cast %242 : vector<1x64x16xf32> to vector<64x16xf32>
    %244 = vector.shape_cast %241 : vector<64x16xf32> to vector<1x64x16xf32>
    tpu.vector_store %arg17[%c0_448, %c0_449, %c0_450], %244 {strides = array<i32>} : memref<1x64x16xf32, #tpu.memory_space<vmem>>, vector<1x64x16xf32>,
    %c0_451 = arith.constant 0 : index
    %c0_452 = arith.constant 0 : index
    %c0_453 = arith.constant 0 : index
    %245 = vector.load %arg18[%c0_451, %c0_452, %c0_453] : memref<1x64x16xf32, #tpu.memory_space<vmem>>, vector<1x64x16xf32>
    %246 = vector.shape_cast %245 : vector<1x64x16xf32> to vector<64x16xf32>
    %247 = vector.shape_cast %231 : vector<64x16xf32> to vector<1x64x16xf32>
    tpu.vector_store %arg18[%c0_451, %c0_452, %c0_453], %247 {strides = array<i32>} : memref<1x64x16xf32, #tpu.memory_space<vmem>>, vector<1x64x16xf32>,
    %c0_i32 = arith.constant 0 : i32
    %248 = arith.cmpi eq, %arg1, %c0_i32 : i32
    %249 = arith.extui %248 : i1 to i32
    %c0_i32_454 = arith.constant 0 : i32
    %250 = arith.cmpi ne, %249, %c0_i32_454 : i32
    scf.if %250 {
      %cst_469 = arith.constant 0xFF800000 : f32
      %273 = vector.broadcast %cst_469 : f32 to vector<1x16xf32>
      %c0_470 = arith.constant 0 : index
      %c0_471 = arith.constant 0 : index
      %c0_472 = arith.constant 0 : index
      %274 = vector.load %arg19[%c0_470, %c0_471, %c0_472] : memref<1x1x16xf32, #tpu.memory_space<vmem>>, vector<1x1x16xf32>
      %275 = vector.shape_cast %274 : vector<1x1x16xf32> to vector<1x16xf32>
      %276 = vector.shape_cast %273 : vector<1x16xf32> to vector<1x1x16xf32>
      tpu.vector_store %arg19[%c0_470, %c0_471, %c0_472], %276 {strides = array<i32>} : memref<1x1x16xf32, #tpu.memory_space<vmem>>, vector<1x1x16xf32>,
      %cst_473 = arith.constant 0.000000e+00 : f32
      %277 = vector.broadcast %cst_473 : f32 to vector<1x16xf32>
      %c0_474 = arith.constant 0 : index
      %c0_475 = arith.constant 0 : index
      %c0_476 = arith.constant 0 : index
      %278 = vector.load %arg20[%c0_474, %c0_475, %c0_476] : memref<1x1x16xf32, #tpu.memory_space<vmem>>, vector<1x1x16xf32>
      %279 = vector.shape_cast %278 : vector<1x1x16xf32> to vector<1x16xf32>
      %280 = vector.shape_cast %277 : vector<1x16xf32> to vector<1x1x16xf32>
      tpu.vector_store %arg20[%c0_474, %c0_475, %c0_476], %280 {strides = array<i32>} : memref<1x1x16xf32, #tpu.memory_space<vmem>>, vector<1x1x16xf32>,
    } else {
    }
    %c0_455 = arith.constant 0 : index
    %c0_456 = arith.constant 0 : index
    %c0_457 = arith.constant 0 : index
    %251 = vector.load %arg19[%c0_455, %c0_456, %c0_457] : memref<1x1x16xf32, #tpu.memory_space<vmem>>, vector<1x1x16xf32>
    %252 = vector.shape_cast %251 : vector<1x1x16xf32> to vector<1x16xf32>
    %cst_458 = arith.constant dense<0xFF800000> : vector<16xf32>
    %253 = vector.multi_reduction <maximumf>, %241, %cst_458 [0] : vector<64x16xf32> to vector<16xf32>
    %254 = vector.shape_cast %253 : vector<16xf32> to vector<1x16xf32>
    %255 = arith.maximumf %252, %254 : vector<1x16xf32>
    %c0_459 = arith.constant 0 : index
    %c0_460 = arith.constant 0 : index
    %c0_461 = arith.constant 0 : index
    %256 = vector.load %arg20[%c0_459, %c0_460, %c0_461] : memref<1x1x16xf32, #tpu.memory_space<vmem>>, vector<1x1x16xf32>
    %257 = vector.shape_cast %256 : vector<1x1x16xf32> to vector<1x16xf32>
    %258 = arith.subf %252, %255 : vector<1x16xf32>
    %259 = math.exp %258 : vector<1x16xf32>
    %260 = arith.mulf %257, %259 : vector<1x16xf32>
    %261 = vector.broadcast %255 : vector<1x16xf32> to vector<64x16xf32>
    %262 = arith.subf %241, %261 : vector<64x16xf32>
    %263 = math.exp %262 : vector<64x16xf32>
    %cst_462 = arith.constant dense<0.000000e+00> : vector<16xf32>
    %264 = vector.multi_reduction <add>, %263, %cst_462 [0] : vector<64x16xf32> to vector<16xf32>
    %265 = vector.shape_cast %264 : vector<16xf32> to vector<1x16xf32>
    %266 = arith.addf %260, %265 : vector<1x16xf32>
    %c0_463 = arith.constant 0 : index
    %c0_464 = arith.constant 0 : index
    %c0_465 = arith.constant 0 : index
    %267 = vector.load %arg20[%c0_463, %c0_464, %c0_465] : memref<1x1x16xf32, #tpu.memory_space<vmem>>, vector<1x1x16xf32>
    %268 = vector.shape_cast %267 : vector<1x1x16xf32> to vector<1x16xf32>
    %269 = vector.shape_cast %266 : vector<1x16xf32> to vector<1x1x16xf32>
    tpu.vector_store %arg20[%c0_463, %c0_464, %c0_465], %269 {strides = array<i32>} : memref<1x1x16xf32, #tpu.memory_space<vmem>>, vector<1x1x16xf32>,
    %c0_466 = arith.constant 0 : index
    %c0_467 = arith.constant 0 : index
    %c0_468 = arith.constant 0 : index
    %270 = vector.load %arg19[%c0_466, %c0_467, %c0_468] : memref<1x1x16xf32, #tpu.memory_space<vmem>>, vector<1x1x16xf32>
    %271 = vector.shape_cast %270 : vector<1x1x16xf32> to vector<1x16xf32>
    %272 = vector.shape_cast %255 : vector<1x16xf32> to vector<1x1x16xf32>
    tpu.vector_store %arg19[%c0_466, %c0_467, %c0_468], %272 {strides = array<i32>} : memref<1x1x16xf32, #tpu.memory_space<vmem>>, vector<1x1x16xf32>,
    return
  }
  func.func @transform_0(%arg0: i32, %arg1: i32) -> (i32, i32, i32, i32, i32, i32) {
    %c0_i32 = arith.constant 0 : i32
    %c0_i32_0 = arith.constant 0 : i32
    %c0_i32_1 = arith.constant 0 : i32
    %c0_i32_2 = arith.constant 0 : i32
    %c0_i32_3 = arith.constant 0 : i32
    return %arg0, %arg1, %c0_i32, %c0_i32_0, %c0_i32_1, %c0_i32_2 : i32, i32, i32, i32, i32, i32
  }
  func.func @transform_1(%arg0: i32, %arg1: i32) -> (i32, i32, i32) {
    %c0_i32 = arith.constant 0 : i32
    %c0_i32_0 = arith.constant 0 : i32
    %c0_i32_1 = arith.constant 0 : i32
    %c0_i32_2 = arith.constant 0 : i32
    return %c0_i32, %c0_i32_0, %c0_i32_1 : i32, i32, i32
  }
  func.func @transform_2(%arg0: i32, %arg1: i32) -> (i32, i32, i32) {
    %c0_i32 = arith.constant 0 : i32
    %c0_i32_0 = arith.constant 0 : i32
    %c0_i32_1 = arith.constant 0 : i32
    %c0_i32_2 = arith.constant 0 : i32
    return %c0_i32, %c0_i32_0, %c0_i32_1 : i32, i32, i32
  }
  func.func @transform_3(%arg0: i32, %arg1: i32) -> (i32, i32, i32) {
    %c0_i32 = arith.constant 0 : i32
    %c0_i32_0 = arith.constant 0 : i32
    %c0_i32_1 = arith.constant 0 : i32
    %c0_i32_2 = arith.constant 0 : i32
    return %c0_i32, %c0_i32_0, %c0_i32_1 : i32, i32, i32
  }
  func.func @transform_4(%arg0: i32, %arg1: i32) -> (i32, i32) {
    %c0_i32 = arith.constant 0 : i32
    %c0_i32_0 = arith.constant 0 : i32
    %c0_i32_1 = arith.constant 0 : i32
    return %c0_i32, %c0_i32_0 : i32, i32
  }
  func.func @transform_5(%arg0: i32, %arg1: i32) -> (i32, i32) {
    %c0_i32 = arith.constant 0 : i32
    %c0_i32_0 = arith.constant 0 : i32
    %c0_i32_1 = arith.constant 0 : i32
    return %c0_i32, %c0_i32_0 : i32, i32
  }
  func.func @transform_6(%arg0: i32, %arg1: i32) -> (i32, i32) {
    %c0_i32 = arith.constant 0 : i32
    %c0_i32_0 = arith.constant 0 : i32
    %c0_i32_1 = arith.constant 0 : i32
    return %c0_i32, %c0_i32_0 : i32, i32
  }
  func.func @transform_7(%arg0: i32, %arg1: i32) -> (i32, i32, i32) {
    %c0_i32 = arith.constant 0 : i32
    %c0_i32_0 = arith.constant 0 : i32
    %c0_i32_1 = arith.constant 0 : i32
    %c0_i32_2 = arith.constant 0 : i32
    return %c0_i32, %c0_i32_0, %c0_i32_1 : i32, i32, i32
  }
  func.func @transform_8(%arg0: i32, %arg1: i32) -> (i32, i32) {
    %c0_i32 = arith.constant 0 : i32
    %c0_i32_0 = arith.constant 0 : i32
    %c0_i32_1 = arith.constant 0 : i32
    return %c0_i32, %c0_i32_0 : i32, i32
  }
  func.func @transform_9(%arg0: i32, %arg1: i32) -> (i32, i32) {
    %c0_i32 = arith.constant 0 : i32
    %c0_i32_0 = arith.constant 0 : i32
    %c0_i32_1 = arith.constant 0 : i32
    return %c0_i32, %c0_i32_0 : i32, i32
  }
  func.func @transform_10(%arg0: i32, %arg1: i32) -> (i32, i32) {
    %c0_i32 = arith.constant 0 : i32
    %c0_i32_0 = arith.constant 0 : i32
    %c0_i32_1 = arith.constant 0 : i32
    return %c0_i32, %c0_i32_0 : i32, i32
  }
  func.func @transform_11(%arg0: i32, %arg1: i32) -> (i32, i32) {
    %c0_i32 = arith.constant 0 : i32
    %c0_i32_0 = arith.constant 0 : i32
    %c0_i32_1 = arith.constant 0 : i32
    return %c0_i32, %c0_i32_0 : i32, i32
  }
  func.func @transform_12(%arg0: i32, %arg1: i32) -> (i32, i32) {
    %c0_i32 = arith.constant 0 : i32
    %c0_i32_0 = arith.constant 0 : i32
    %c0_i32_1 = arith.constant 0 : i32
    return %c0_i32, %c0_i32_0 : i32, i32
  }
  func.func @transform_13(%arg0: i32, %arg1: i32) -> (i32, i32) {
    %c0_i32 = arith.constant 0 : i32
    %c0_i32_0 = arith.constant 0 : i32
    %c0_i32_1 = arith.constant 0 : i32
    return %c0_i32, %c0_i32_0 : i32, i32
  }
  func.func @transform_14(%arg0: i32, %arg1: i32) -> (i32, i32) {
    %c0_i32 = arith.constant 0 : i32
    %c0_i32_0 = arith.constant 0 : i32
    %c0_i32_1 = arith.constant 0 : i32
    return %c0_i32, %c0_i32_0 : i32, i32
  }
  func.func @transform_15(%arg0: i32, %arg1: i32) -> (i32, i32, i32) {
    %c0_i32 = arith.constant 0 : i32
    %c0_i32_0 = arith.constant 0 : i32
    return %arg0, %arg1, %c0_i32 : i32, i32, i32
  }
  func.func @transform_16(%arg0: i32, %arg1: i32) -> (i32, i32, i32) {
    %c0_i32 = arith.constant 0 : i32
    %c0_i32_0 = arith.constant 0 : i32
    return %arg0, %arg1, %c0_i32 : i32, i32, i32
  }
  func.func @transform_17(%arg0: i32, %arg1: i32) -> (i32, i32, i32) {
    %c0_i32 = arith.constant 0 : i32
    %c0_i32_0 = arith.constant 0 : i32
    %c0_i32_1 = arith.constant 0 : i32
    return %arg0, %c0_i32, %c0_i32_0 : i32, i32, i32
  }
  func.func @transform_18(%arg0: i32, %arg1: i32) -> (i32, i32, i32) {
    %c0_i32 = arith.constant 0 : i32
    %c0_i32_0 = arith.constant 0 : i32
    %c0_i32_1 = arith.constant 0 : i32
    return %arg0, %c0_i32, %c0_i32_0 : i32, i32, i32
  }
}

</mosaic_0001>

<bundles_post_ra>
// kernel: tpu_custom_call.1
= control target key start
LH: loop header
LB: loop body
LE: loop exit
PB: predicated region body
PF: predicated region fallthrough
CT: control target
= control target key end

     0   :  { %s9088_s0 = inlined_call_operand.vmem [shape: bf16[2,4,4,6,18,4], index: 0, kind: input, shape index: {}]   ;;  %s9089_s1 = inlined_call_operand.vmem [shape: bf16[4,36,4], index: 1, kind: input, shape index: {}]   ;;  %s9090_s2 = inlined_call_operand.vmem [shape: f32[4,1,4], index: 2, kind: input, shape index: {}]   ;;  %s9091_s3 = inlined_call_operand.vmem [shape: f32[4,1,4], index: 3, kind: input, shape index: {}]   ;;  %s9092_s4 = inlined_call_operand.vmem [shape: bf16[16,24], index: 4, kind: input, shape index: {}]   ;;  %s9093_s5 = inlined_call_operand.vmem [shape: f32[1,16], index: 5, kind: input, shape index: {}]   ;;  %s9094_s6 = inlined_call_operand.vmem [shape: f32[1,16], index: 6, kind: input, shape index: {}]   ;;  %s9095_s7 = inlined_call_operand.vmem [shape: bf16[4,4,12], index: 7, kind: input, shape index: {}]   ;;  %s9096_s8 = inlined_call_operand.vmem [shape: f32[1,8], index: 8, kind: input, shape index: {}]   ;;  %s9097_s9 = inlined_call_operand.vmem [shape: f32[1,8], index: 9, kind: input, shape index: {}]   ;;  %s9098_s10 = inlined_call_operand.vmem [shape: f32[1,4], index: 10, kind: input, shape index: {}]   ;;  %s9099_s11 = inlined_call_operand.vmem [shape: f32[1,4], index: 11, kind: input, shape index: {}]   ;;  %s9100_s12 = inlined_call_operand.vmem [shape: bf16[8,16], index: 12, kind: input, shape index: {}]   ;;  %s9101_s13 = inlined_call_operand.vmem [shape: bf16[4,16], index: 13, kind: input, shape index: {}]   ;;  %s9102_s14 = inlined_call_operand.vmem [shape: f32[1,16], index: 14, kind: input, shape index: {}]   ;;  %s9103_s15 = inlined_call_operand.vmem [shape: f32[2,256,16], index: 15, kind: output, shape index: {0}]   ;;  %s9104_s16 = inlined_call_operand.vmem [shape: f32[2,256,16], index: 16, kind: output, shape index: {1}]   ;;  %s9105_s17 = inlined_call_operand.hbm [shape: f32[2,1,16], index: 17, kind: output, shape index: {2}]   ;;  %s9106_s18 = inlined_call_operand.hbm [shape: f32[2,1,16], index: 18, kind: output, shape index: {3}]  }
   0x1   :  { %9143 = sst [smem:[#allocation23_spill]] %s9088_s0 }
   0x2   :  { %9144 = sst [smem:[#allocation24_spill]] %s9089_s1 }
   0x3   :  { %9145 = sst [smem:[#allocation25_spill]] %s9090_s2 }
   0x4   :  { %9146 = sst [smem:[#allocation26_spill]] %s9091_s3 }
   0x5   :  { %9147 = sst [smem:[#allocation27_spill]] %s9105_s17 }
   0x6   :  { %9148 = sst [smem:[#allocation28_spill]] %s9106_s18 }
   0x7   :  { %24 = vsyncpa [#allocation5], 0 }
   0x8   :  { %26 = vsyncpa [#allocation5 + $0x1], 0 }
   0x9   :  { %27 = vsyncpa [#allocation7], 0 }
   0xa   :  { %29 = vsyncpa [#allocation7 + $0x1], 0  ;;  %s6794_s27 = smov 0   ;;  %s6796_s28 = smov 0  }
   0xb   :  { %s6798_s29 = smov 0   ;;  %s6800_s30 = smov 0  }
   0xc   :  { %s6802_s0 = smov 0   ;;  %s6804_s19 = smov 0  }
   0xd   :  { %s6806_s1 = smov 0   ;;  %s6808_s20 = smov 0  }
   0xe LB: > { %9149 = sst [smem:[#allocation10_spill]] %s6658_s27  ;;  %s5759_s21 = sadd.s32 4294967295, %s6686_s20   ;;  %s6686_s20 = sphi %s6808_s20, %s35_s20   ;;  %s6682_s1 = sphi %s6806_s1, %s9196_s1   ;;  %s6678_s19 = sphi %s6804_s19, %s9195_s19   ;;  %s6674_s0 = sphi %s6802_s0, %s9194_s0   ;;  %s6670_s30 = sphi %s6800_s30, %s9193_s30   ;;  %s6666_s29 = sphi %s6798_s29, %s9192_s29   ;;  %s6662_s28 = sphi %s6796_s28, %s9191_s28   ;;  %s6658_s27 = sphi %s6794_s27, %s9190_s27  }
   0xf   : > { %9150 = sst [smem:[#allocation11_spill]] %s6662_s28  ;;  %s5760_s22 = sadd.s32 4294967294, %s6686_s20  }
  0x10   : > { %9151 = sst [smem:[#allocation12_spill]] %s6666_s29  ;;  %s44_s2 = sadd.s32 1, %s6678_s19 }
  0x11   : > { %9152 = sst [smem:[#allocation13_spill]] %s6674_s0  ;;  %p45_p0 = scmp.ge.s32.totalorder %s44_s2, 4 }
  0x12   : > { %9153 = sst [smem:[#allocation14_spill]] %s6678_s19  ;;  %s47_s23 = sadd.s32 1, %s6682_s1 }
  0x13   : > { %9154 = sst [smem:[#allocation15_spill]] %s6682_s1  ;;  %p442_p1 = scmp.ne.s32.totalorder %s6666_s29, %s6662_s28 }
  0x14   : > { %9155 = sst [smem:[#allocation16_spill]] %s6686_s20  ;;  %p443_p2 = scmp.eq.s32.totalorder %s5759_s21, 7 }
  0x15   : > { %s9198_s2 = smov (%p45_p0, %s44_s2), 0  ;;  %s9200_s23 = smov (!%p45_p0, %s47_s23), %s6682_s1 }
  0x16   : > { %9156 = sst [smem:[#allocation17_spill]] %s9198_s2  ;;  %p6843_p3 = por %p443_p2, %p442_p1 }
  0x17   : > { %p448_p4 = scmp.ne.s32.totalorder %s6662_s28, %s6658_s27  ;;  %p49_p5 = scmp.ge.s32.totalorder %s9200_s23, 2 }
  0x18   : > { %s9157_s24 = scalar_select %p6843_p3, 1, 0 }
  0x19   : > { %p449_p6 = scmp.eq.s32.totalorder %s5760_s22, 7  ;;  %p5763_p7 = scmp.ge.s32.totalorder %s6686_s20, 1 }
  0x1a   : > { %9158 = sst [smem:[#allocation18_spill]] %s9157_s24  ;;  %p547_p8 = scmp.lt.s32.totalorder %s6686_s20, 9 }
  0x1b   : > { %s9202_s23 = smov (%p49_p5, %s9200_s23), 0  ;;  %p6853_p9 = por %p449_p6, %p448_p4 }
  0x1c   : > { %9159 = sst [smem:[#allocation19_spill]] %s9202_s23  ;;  %p548_p10 = pnand %p5763_p7, %p547_p8 }
  0x1d   : > { %s9160_s25 = scalar_select %p6853_p9, 1, 0 }
  0x1e   : > { %s429_s26 = ssub.s32 %s6682_s1, %s9202_s23  ;;  %s432_s21 = sadd.s32 1, %s6666_s29 }
  0x1f   : > { %9161 = sst [smem:[#allocation20_spill]] %s9160_s25  ;;  %p430_p11 = scmp.eq.s32.totalorder %s429_s26, 0 }
  0x20   : > { %551 = sbr.rel (%p548_p10) target bundleno = 1479 (0x5c7), region = 80 }
  0x21   : > { %s6861_s2 = scalar_select %p430_p11, %s6666_s29, %s432_s21  }
  0x23   : > { %9162 = sst [smem:[#allocation21_spill]] %s6861_s2 }
  0x25   : > { %p626_p12 = scmp.lt.s32.totalorder %s6674_s0, 1  ;;  %p628_p13 = scmp.lt.s32.totalorder %s6670_s30, 3  ;;  %vm685_vm0 = vsmask.f32 3328  ;;  %vm686_vm1 = vsmask.f32 7440 }
  0x26   : > { %s9163_s26 = sld [smem:[#allocation23_spill]]  ;;  %vm841_vm2 = vcmask 1042432   ;;  %vm6884_vm3 = vmor %vm685_vm0, %vm686_vm1  ;;  %vm842_vm4 = vcmask 1046532   ;;  %s9121_s1 = smov 16   ;;  %vm664_vm6 = vcmask 27648   ;;  %vm808_vm7 = vcmask 60448  }
  0x27   : > { %s6866_s22 = scalar_select %p626_p12, %s6674_s0, 1  ;;  %vm6897_vm5 = vmor %vm841_vm2, %vm842_vm4  ;;  %vm896_vm8 = vcmask 93248   ;;  %vm946_vm9 = vcmask 126048   ;;  %vm1642_vm10 = vcmask 1041408   ;;  %vm1087_vm11 = vcmask 158848  }
  0x28   : > { %s629_s19 = scalar_select %p628_p13, %s6670_s30, 3  ;;  %vm1172_vm12 = vcmask 191648   ;;  %vm1222_vm13 = vcmask 224448   ;;  %vm1363_vm14 = vcmask 257248   ;;  %vm1448_vm15 = vcmask 290048  }
  0x29   : > { %s6439_s27 = smul.u32 288, %s6866_s22  ;;  %s9119_s23 = smov 24   ;;  %vm1629_vm0 = vcmask 293888   ;;  %vm2772_vm1 = vcmask 31744   ;;  %vm5121_vm2 = vcmask 130048   ;;  %vm5333_vm4 = vcmask 64512  }
  0x2a   : > { %s6438_s20 = smul.u32 72, %s629_s19  ;;  %s9123_s19 = smov 12  }
  0x2b   : > { %s9176_s2 = smov 32   ;;  %s9178_s29 = smov 28  }
  0x2c   : > { %s632_s25 = sadd.s32 %s6439_s27, %s6438_s20  ;;  %s9127_s27 = smov 8  }
  0x2d   : > { %s5764_s18 = sshll.u32 %s632_s25, 2  ;;  %s9117_s20 = smov 20  }
  0x2e   : > { %s6873_s21 = scalar_lea.vmem %s9163_s26, %s5764_s18  ;;  %s9125_s18 = smov 4  }
  0x2f   : > { %v676_v0 = vld [vmem:[%s6873_s21 + $0xc] sm:$0xf]  ;;  %v677_v1 = vld [vmem:[%s6873_s21 + $0x10] sm:$0xf]  ;;  %v673_v2 = vld [vmem:[%s6873_s21] sm:$0xf] }
  0x30   : > { %v713_v3 = vshrl.u32 %v676_v0, 16  ;;  %v716_v4 = vshll.u32 %v676_v0, 16  ;;  %v722_v5 = vshll.u32 %v677_v1, 16  ;;  %v726_v6 = vshrl.u32 %v677_v1, 16  ;;  %v674_v7 = vld [vmem:[%s6873_s21 + $0x4] sm:$0xf] }
  0x31   : > { %v689_v8 = vshrl.u32 %v673_v2, 16  ;;  %v692_v9 = vshll.u32 %v673_v2, 16  ;;  %v698_v10 = vshll.u32 %v674_v7, 16  ;;  %v702_v11 = vshrl.u32 %v674_v7, 16  ;;  %v678_v15 = vld [vmem:[%s6873_s21 + $0x14] sm:$0x1] }
  0x32   : > { %v715_v12 = vrot.slane %v713_v3, 4  ;;  %v718_v13 = vrot.slane %v716_v4, 5  ;;  %v728_v14 = vrot.slane %v726_v6, 4  ;;  %v724_v16 = vrot.slane %v722_v5, 5  ;;  %v683_v20 = vld [vmem:[%s6873_s21 + $0x28] sm:$0xf] }
  0x33   : > { %v691_v17 = vrot.slane %v689_v8, 4  ;;  %v694_v18 = vrot.slane %v692_v9, 5  ;;  %v704_v19 = vrot.slane %v702_v11, 4  ;;  %v675_v22 = vld [vmem:[%s6873_s21 + $0x8] sm:$0x1]  ;;  %v700_v25 = vrot.slane %v698_v10, 5 }
  0x34   : > { %v719_v21 = vor.u32 %v718_v13, %v715_v12  ;;  %v729_v26 = vor.u32 %v728_v14, %v724_v16  ;;  %v732_v27 = vshll.u32 %v678_v15, 16  ;;  %v682_v28 = vld [vmem:[%s6873_s21 + $0x24] sm:$0xf]  ;;  %v770_v30 = vshll.u32 %v683_v20, 16  ;;  %v817_v35 = vld [vmem:[%s6873_s21] sm:$0xe] }
  0x35   : > { %v695_v24 = vor.u32 %v694_v18, %v691_v17  ;;  %v774_v31 = vshrl.u32 %v683_v20, 16  ;;  %v705_v33 = vor.u32 %v704_v19, %v700_v25  ;;  %v708_v34 = vshll.u32 %v675_v22, 16  ;;  %v818_v36 = vld [vmem:[%s6873_s21 + $0x4] sm:$0xf]  ;;  %v679_v44 = vld [vmem:[%s6873_s21 + $0x18] sm:$0xf] }
  0x36   : > { %v720_v29 = vrot.slane %v719_v21, 4  ;;  %v761_v38 = vshrl.u32 %v682_v28, 16  ;;  %v730_v40 = vrot.slane %v729_v26, 4  ;;  %v734_v41 = vrot.slane %v732_v27, 5  ;;  %v684_v45 = vld [vmem:[%s6873_s21 + $0x2c] sm:$0x1] }
  0x37   : > { %v696_v32 = vrot.slane %v695_v24, 4  ;;  %v764_v42 = vshll.u32 %v682_v28, 16  ;;  %v772_v46 = vrot.slane %v770_v30, 5  ;;  %v776_v47 = vrot.slane %v774_v31, 4  ;;  %v680_v54 = vld [vmem:[%s6873_s21 + $0x1c] sm:$0xf] }
  0x38   : > { %v725_v37 = vsel %vm6884_vm3, %v720_v29, %v724_v16  ;;  %v5771_v48 = vrot.slane %v817_v35, 9  ;;  %v846_v49 = vrot.slane %v818_v36, 5  ;;  %v706_v50 = vrot.slane %v705_v33, 4  ;;  %v681_v3 = vld [vmem:[%s6873_s21 + $0x20] sm:$0x1]  ;;  %s9131_s25 = smov 28  }
  0x39   : > { %788 = vrot.lane.b32.xlu1 %v725_v37, %s9125_s18  ;;  %v701_v39 = vsel %vm6884_vm3, %v696_v32, %v700_v25  ;;  %v710_v51 = vrot.slane %v708_v34, 5  ;;  %v763_v52 = vrot.slane %v761_v38, 4  ;;  %v766_v53 = vrot.slane %v764_v42, 5  ;;  %v820_v16 = vld [vmem:[%s6873_s21 + $0xc] sm:$0xe]  ;;  %s9129_s26 = smov 32  }
  0x3a   : > { %784 = vrot.lane.b32.xlu0 %v701_v39, %s9125_s18  ;;  %v847_v55 = vsel %vm6897_vm5, %v5771_v48, %v846_v49  ;;  %v737_v56 = vshrl.u32 %v679_v44, 16  ;;  %v735_v57 = vsel %vm6884_vm3, %v730_v40, %v734_v41  ;;  %v780_v58 = vshll.u32 %v684_v45, 16  ;;  %v821_v17 = vld [vmem:[%s6873_s21 + $0x10] sm:$0xf]  ;;  %v819_v20 = vld [vmem:[%s6873_s21 + $0x8] sm:$0x1] }
  0x3b   : > { %872 = vrot.lane.b32.xlu2 %v847_v55, %s9127_s27  ;;  %v740_v59 = vshll.u32 %v679_v44, 16  ;;  %v777_v60 = vor.u32 %v776_v47, %v772_v46  ;;  %v746_v62 = vshll.u32 %v680_v54, 16  ;;  %v750_v63 = vshrl.u32 %v680_v54, 16  ;;  %v824_v26 = vld [vmem:[%s6873_s21 + $0x1c] sm:$0xf]  ;;  %s9179_s17 = sld [smem:[#allocation25_spill]] }
  0x3c   : > { %v739_v61 = vrot.slane %v737_v56, 4  ;;  %v711_v0 = vsel %vm6884_vm3, %v706_v50, %v710_v51  ;;  %v767_v1 = vor.u32 %v766_v53, %v763_v52  ;;  %v782_v8 = vrot.slane %v780_v58, 5  ;;  %v822_v28 = vld [vmem:[%s6873_s21 + $0x14] sm:$0x1]  ;;  %v825_v32 = vld [vmem:[%s6873_s21 + $0x20] sm:$0x1] }
  0x3d   : > { %v742_v2 = vrot.slane %v740_v59, 5  ;;  %v752_v4 = vrot.slane %v750_v63, 4  ;;  %v748_v6 = vrot.slane %v746_v62, 5  ;;  %v778_v7 = vrot.slane %v777_v60, 4  ;;  %v823_v35 = vld [vmem:[%s6873_s21 + $0x18] sm:$0xe] }
  0x3e   : > { %v768_v9 = vrot.slane %v767_v1, 4  ;;  %v756_v12 = vshll.u32 %v681_v3, 16  ;;  %v5772_v21 = vrot.slane %v820_v16, 9  ;;  %v853_v22 = vrot.slane %v821_v17, 5  ;;  %v5786_v40 = vld [vmem:[%s6873_s21 + $0x18] sm:$0xf] }
  0x3f   : > { %v743_v5 = vor.u32 %v742_v2, %v739_v61  ;;  %v753_v11 = vor.u32 %v752_v4, %v748_v6  ;;  %v783_v14 = vsel %vm6884_vm3, %v778_v7, %v782_v8  ;;  %v848_v24 = vrot.slane %v846_v49, 4  ;;  %v827_v41 = vld [vmem:[%s6873_s21 + $0x28] sm:$0xf]  ;;  %v826_v42 = vld [vmem:[%s6873_s21 + $0x24] sm:$0xe]  ;;  %s9180_s3 = sld [smem:[#allocation26_spill]] }
  0x40   : > { %v773_v15 = vsel %vm6884_vm3, %v768_v9, %v772_v46  ;;  %v758_v19 = vrot.slane %v756_v12, 5  ;;  %v849_v25 = vrot.slane %v819_v20, 5  ;;  %v854_v29 = vsel %vm6897_vm5, %v5772_v21, %v853_v22  ;;  %v828_v50 = vld [vmem:[%s6873_s21 + $0x2c] sm:$0x1]  ;;  %v5787_v51 = vld [vmem:[%s6873_s21 + $0x1c] sm:$0xf] }
  0x41   : > { %790 = vrot.lane.b32.xlu1 %v735_v57, %s9125_s18  ;;  %v744_v10 = vrot.slane %v743_v5, 4  ;;  %v754_v18 = vrot.slane %v753_v11, 4  ;;  %v860_v30 = vrot.slane %v824_v26, 5  ;;  %v855_v33 = vrot.slane %v853_v22, 4  ;;  %v5775_v59 = vld [vmem:[%s6873_s21 + $0xc] sm:$0xf] }
  0x42   : > { %786 = vrot.lane.b32.xlu0 %v711_v0, %s9125_s18  ;;  %v850_v31 = vsel %vm6897_vm5, %v848_v24, %v849_v25  ;;  %v856_v34 = vrot.slane %v822_v28, 5  ;;  %v863_v37 = vrot.slane %v825_v32, 5  ;;  %v5773_v38 = vrot.slane %v823_v35, 9  ;;  %v5788_v63 = vld [vmem:[%s6873_s21 + $0x20] sm:$0x1]  ;;  %p6403_p1 = scmp.ne.s32.totalorder %s6670_s30, 0 }
  0x43   : > { %v749_v13 = vsel %vm6884_vm3, %v744_v10, %v748_v6  ;;  %v759_v27 = vsel %vm6884_vm3, %v754_v18, %v758_v19  ;;  %v862_v36 = vrot.slane %v860_v30, 4  ;;  %v992_v45 = vshrl.u32 %v5786_v40, 16  ;;  %v5799_v2 = vld [vmem:[%s6873_s21 + $0x1c] sm:$0xf]  ;;  %v5777_v3 = vld [vmem:[%s6873_s21 + $0x18] sm:$0xf] }
  0x44   : > { %792 = vrot.lane.b32.xlu2 %v749_v13, %s9125_s18  ;;  %v857_v39 = vsel %vm6897_vm5, %v855_v33, %v856_v34  ;;  %v995_v46 = vshll.u32 %v5786_v40, 16  ;;  %v861_v47 = vsel %vm6897_vm5, %v5773_v38, %v860_v30  ;;  %v867_v48 = vrot.slane %v827_v41, 5  ;;  %v5822_v4 = vld [vmem:[%s6873_s21 + $0x24] sm:$0xf]  ;;  %v5778_v11 = vld [vmem:[%s6873_s21 + $0x1c] sm:$0xf] }
  0x45   : > { %v864_v44 = vsel %vm6897_vm5, %v862_v36, %v863_v37  ;;  %v5774_v49 = vrot.slane %v826_v42, 9  ;;  %v994_v52 = vrot.slane %v992_v45, 4  ;;  %v870_v55 = vrot.slane %v828_v50, 5  ;;  %v5800_v12 = vld [vmem:[%s6873_s21 + $0x20] sm:$0x1] }
  0x46   : > { %v997_v53 = vrot.slane %v995_v46, 5  ;;  %v869_v54 = vrot.slane %v867_v48, 4  ;;  %v1005_v56 = vshrl.u32 %v5787_v51, 16  ;;  %v1001_v58 = vshll.u32 %v5787_v51, 16  ;;  %v5823_v18 = vld [vmem:[%s6873_s21 + $0x28] sm:$0xf] }
  0x47   : > { %v868_v57 = vsel %vm6897_vm5, %v5774_v49, %v867_v48  ;;  %v1011_v6 = vshll.u32 %v5788_v63, 16  ;;  %v1129_v8 = vrot.slane %v5799_v2, 5  ;;  %v1268_v9 = vshrl.u32 %v5822_v4, 16  ;;  %v5824_v30 = vld [vmem:[%s6873_s21 + $0x2c] sm:$0x1] }
  0x48   : > { %v998_v60 = vor.u32 %v997_v53, %v994_v52  ;;  %v871_v61 = vsel %vm6897_vm5, %v869_v54, %v870_v55  ;;  %v1007_v62 = vrot.slane %v1005_v56, 4  ;;  %v1003_v0 = vrot.slane %v1001_v58, 5  ;;  %v5835_v33 = vld [vmem:[%s6873_s21 + $0x28] sm:$0xf]  ;;  %v5813_v34 = vld [vmem:[%s6873_s21 + $0x24] sm:$0xf] }
  0x49   : > { %798 = vrot.lane.b32.xlu1 %v783_v14, %s9125_s18  ;;  %v1271_v10 = vshll.u32 %v5822_v4, 16  ;;  %v1013_v14 = vrot.slane %v1011_v6, 5  ;;  %v1131_v16 = vrot.slane %v1129_v8, 4  ;;  %v1132_v17 = vrot.slane %v5800_v12, 5  ;;  %v5789_v35 = vld [vmem:[%s6873_s21 + $0x24] sm:$0xf] }
  0x4a   : > { %796 = vrot.lane.b32.xlu0 %v773_v15, %s9125_s18  ;;  %v999_v1 = vrot.slane %v998_v60, 4  ;;  %v1008_v5 = vor.u32 %v1007_v62, %v1003_v0  ;;  %v5798_v15 = vld [vmem:[%s6873_s21 + $0x18] sm:$0xe]  ;;  %v1270_v19 = vrot.slane %v1268_v9, 4  ;;  %v1281_v22 = vshrl.u32 %v5823_v18, 16 }
  0x4b   : > { %v1273_v20 = vrot.slane %v1271_v10, 5  ;;  %v5808_v21 = vrot.slane %v5798_v15, 9  ;;  %v1277_v25 = vshll.u32 %v5823_v18, 16  ;;  %v1133_v26 = vsel %vm6897_vm5, %v1131_v16, %v1132_v17  ;;  %v5814_v42 = vld [vmem:[%s6873_s21 + $0x28] sm:$0xf] }
  0x4c   : > { %794 = vrot.lane.b32.xlu2 %v759_v27, %s9125_s18  ;;  %v1004_v7 = vsel %vm6884_vm3, %v999_v1, %v1003_v0  ;;  %v1009_v13 = vrot.slane %v1008_v5, 4  ;;  %v1287_v37 = vshll.u32 %v5824_v30, 16  ;;  %v1016_v40 = vshrl.u32 %v5789_v35, 16  ;;  %v5790_v50 = vld [vmem:[%s6873_s21 + $0x28] sm:$0xf] }
  0x4d   : > { %v1274_v27 = vor.u32 %v1273_v20, %v1270_v19  ;;  %v1130_v28 = vsel %vm6897_vm5, %v5808_v21, %v1129_v8  ;;  %v1019_v41 = vshll.u32 %v5789_v35, 16  ;;  %v1029_v54 = vshrl.u32 %v5790_v50, 16  ;;  %v5802_v0 = vld [vmem:[%s6873_s21 + $0x28] sm:$0xf]  ;;  %v5779_v1 = vld [vmem:[%s6873_s21 + $0x24] sm:$0xf] }
  0x4e   : > { %v1014_v24 = vsel %vm6884_vm3, %v1009_v13, %v1013_v14  ;;  %v1289_v46 = vrot.slane %v1287_v37, 5  ;;  %v1018_v51 = vrot.slane %v1016_v40, 4  ;;  %v1025_v56 = vshll.u32 %v5790_v50, 16  ;;  %v5825_v2 = vld [vmem:[%s6873_s21 + $0x30] sm:$0xf] }
  0x4f   : > { %v1275_v32 = vrot.slane %v1274_v27, 4  ;;  %v1021_v52 = vrot.slane %v1019_v41, 5  ;;  %v1031_v60 = vrot.slane %v1029_v54, 4  ;;  %v5803_v6 = vld [vmem:[%s6873_s21 + $0x2c] sm:$0x1]  ;;  %v1292_v8 = vshrl.u32 %v5825_v2, 16 }
  0x50   : > { %v1027_v62 = vrot.slane %v1025_v56, 5  ;;  %v1295_v9 = vshll.u32 %v5825_v2, 16  ;;  %v5780_v10 = vld [vmem:[%s6873_s21 + $0x28] sm:$0xf]  ;;  %v5801_v13 = vld [vmem:[%s6873_s21 + $0x24] sm:$0xe] }
  0x51   : > { %876 = vrot.lane.b32.xlu1 %v854_v29, %s9127_s27  ;;  %v1283_v29 = vrot.slane %v1281_v22, 4  ;;  %v1022_v58 = vor.u32 %v1021_v52, %v1018_v51  ;;  %v1139_v14 = vrot.slane %v5803_v6, 5  ;;  %v5826_v16 = vld [vmem:[%s6873_s21 + $0x34] sm:$0xf]  ;;  %v1294_v17 = vrot.slane %v1292_v8, 4 }
  0x52   : > { %874 = vrot.lane.b32.xlu0 %v850_v31, %s9127_s27  ;;  %v1279_v31 = vrot.slane %v1277_v25, 5  ;;  %v1297_v18 = vrot.slane %v1295_v9, 5  ;;  %v5809_v19 = vrot.slane %v5801_v13, 9  ;;  %v1305_v20 = vshrl.u32 %v5826_v16, 16  ;;  %v658_v22 = vld [vmem:[%s6873_s21 + $0xc] sm:$0xf] }
  0x53   : > { %v1023_v63 = vrot.slane %v1022_v58, 4  ;;  %667 = vst.msk [vmem:[#allocation2 + $0x8] sm:$0xf] %vm664_vm6, %v658_v22  ;;  %v1301_v25 = vshll.u32 %v5826_v16, 16  ;;  %v5784_v54 = vld [vmem:[%s6873_s21 + $0x10] sm:$0xf] }
  0x54   : > { %878 = vrot.lane.b32.xlu2 %v857_v39, %s9127_s27  ;;  %v1284_v36 = vor.u32 %v1283_v29, %v1279_v31  ;;  %v1280_v38 = vsel %vm6884_vm3, %v1275_v32, %v1279_v31  ;;  %v1405_v39 = vrot.slane %v5835_v33, 5  ;;  %v1298_v27 = vor.u32 %v1297_v18, %v1294_v17  ;;  %v5827_v29 = vld [vmem:[%s6873_s21 + $0x38] sm:$0x1]  ;;  %v5838_v32 = vld [vmem:[%s6873_s21 + $0x34] sm:$0xf] }
  0x55   : > { %v1028_v5 = vsel %vm6884_vm3, %v1023_v63, %v1027_v62  ;;  %v1307_v30 = vrot.slane %v1305_v20, 4  ;;  %v1303_v31 = vrot.slane %v1301_v25, 5  ;;  %v1311_v35 = vshll.u32 %v5827_v29, 16  ;;  %v5793_v6 = vld [vmem:[%s6873_s21 + $0x34] sm:$0xf] }
  0x56   : > { %v1285_v45 = vrot.slane %v1284_v36, 4  ;;  %v1407_v48 = vrot.slane %v1405_v39, 4  ;;  %v1299_v33 = vrot.slane %v1298_v27, 4  ;;  %v660_v36 = vld [vmem:[%s6873_s21 + $0x18] sm:$0xf]  ;;  %v1412_v40 = vrot.slane %v5838_v32, 5 }
  0x57   : > { %v1308_v37 = vor.u32 %v1307_v30, %v1303_v31  ;;  %669 = vst.msk [vmem:[#allocation2 + $0x10] sm:$0xf] %vm664_vm6, %v660_v36  ;;  %v5776_v13 = vld [vmem:[%s6873_s21 + $0x10] sm:$0xf]  ;;  %v5782_v16 = vld [vmem:[%s6873_s21 + $0x34] sm:$0xf] }
  0x58   : > { %v1290_v55 = vsel %vm6884_vm3, %v1285_v45, %v1289_v46  ;;  %v1304_v41 = vsel %vm6884_vm3, %v1299_v33, %v1303_v31  ;;  %v5816_v45 = vld [vmem:[%s6873_s21 + $0x34] sm:$0xf]  ;;  %v1414_v50 = vrot.slane %v1412_v40, 4  ;;  %v5781_v20 = vld [vmem:[%s6873_s21 + $0x30] sm:$0xf] }
  0x59   : > { %882 = vrot.lane.b32.xlu1 %v864_v44, %s9127_s27  ;;  %v5836_v44 = vld [vmem:[%s6873_s21 + $0x2c] sm:$0x1]  ;;  %v5794_v25 = vld [vmem:[%s6873_s21 + $0x38] sm:$0x1]  ;;  %v5796_v31 = vld [vmem:[%s6873_s21 + $0x10] sm:$0xf] }
  0x5a   : > { %880 = vrot.lane.b32.xlu0 %v861_v47, %s9127_s27  ;;  %v5834_v47 = vld [vmem:[%s6873_s21 + $0x24] sm:$0xe]  ;;  %v1408_v49 = vrot.slane %v5836_v44, 5  ;;  %v5837_v44 = vld [vmem:[%s6873_s21 + $0x30] sm:$0xe] }
  0x5b   : > { %v5844_v53 = vrot.slane %v5834_v47, 9  ;;  %v1309_v47 = vrot.slane %v1308_v37, 4  ;;  %v5845_v52 = vrot.slane %v5837_v44, 9  ;;  %v1122_v37 = vrot.slane %v5796_v31, 5 }
  0x5c   : > { %884 = vrot.lane.b32.xlu2 %v868_v57, %s9127_s27  ;;  %v1409_v57 = vsel %vm6897_vm5, %v1407_v48, %v1408_v49  ;;  %v1313_v48 = vrot.slane %v1311_v35, 5  ;;  %v5783_v49 = vld [vmem:[%s6873_s21 + $0xc] sm:$0xf] }
  0x5d   : > { %v968_v56 = vshrl.u32 %v5783_v49, 16  ;;  %v1413_v2 = vsel %vm6897_vm5, %v5845_v52, %v1412_v40  ;;  %v5804_v52 = vld [vmem:[%s6873_s21 + $0x30] sm:$0xe] }
  0x5e   : > { %v1314_v58 = vsel %vm6884_vm3, %v1309_v47, %v1313_v48 }
  0x61   : > { %922 = vrot.lane.b32.xlu1 %v5775_v59, %s9123_s19  ;;  %v1406_v59 = vsel %vm6897_vm5, %v5844_v53, %v1405_v39  ;;  %v657_v39 = vld [vmem:[%s6873_s21 + $0x4] sm:$0xf]  ;;  %v5792_v53 = vld [vmem:[%s6873_s21 + $0x30] sm:$0xf] }
  0x62   : > { %886 = vrot.lane.b32.xlu0 %v871_v61, %s9127_s27  ;;  %v5791_v61 = vld [vmem:[%s6873_s21 + $0x2c] sm:$0x1]  ;;  %666 = vst.msk [vmem:[#allocation2 + $0x4] sm:$0xf] %vm664_vm6, %v657_v39  ;;  %v1043_v63 = vshll.u32 %v5792_v53, 16 }
  0x63   : > { %v1035_v4 = vshll.u32 %v5791_v61, 16  ;;  %v5797_v39 = vld [vmem:[%s6873_s21 + $0x14] sm:$0x1] }
  0x64   : > { %926 = vrot.lane.b32.xlu2 %v5777_v3, %s9123_s19  ;;  %v1032_v3 = vor.u32 %v1031_v60, %v1027_v62  ;;  %v662_v60 = vld [vmem:[%s6873_s21 + $0x24] sm:$0xf]  ;;  %v1040_v62 = vshrl.u32 %v5792_v53, 16  ;;  %v1045_v8 = vrot.slane %v1043_v63, 5  ;;  %v1125_v47 = vrot.slane %v5797_v39, 5 }
  0x65   : > { %v1037_v12 = vrot.slane %v1035_v4, 5  ;;  %671 = vst.msk [vmem:[#allocation2 + $0x18] sm:$0xf] %vm664_vm6, %v662_v60  ;;  %v5832_v39 = vld [vmem:[%s6873_s21 + $0x1c] sm:$0xf] }
  0x69   : > { %1067 = vrot.lane.b32.xlu1 %v1004_v7, %s9121_s1  ;;  %v1136_v7 = vrot.slane %v5802_v0, 5  ;;  %v977_v0 = vshll.u32 %v5784_v54, 16 }
  0x6a   : > { %928 = vrot.lane.b32.xlu0 %v5778_v11, %s9123_s19  ;;  %v1033_v11 = vrot.slane %v1032_v3, 4  ;;  %v970_v3 = vrot.slane %v968_v56, 4  ;;  %v5806_v56 = vld [vmem:[%s6873_s21 + $0x38] sm:$0x1] }
  0x6b   : > { %v1138_v15 = vrot.slane %v1136_v7, 4  ;;  %v979_v9 = vrot.slane %v977_v0, 5  ;;  %v5828_v0 = vld [vmem:[%s6873_s21 + $0x3c] sm:$0xf] }
  0x6c   : > { %1069 = vrot.lane.b32.xlu2 %v1014_v24, %s9121_s1  ;;  %v1038_v21 = vsel %vm6884_vm3, %v1033_v11, %v1037_v12  ;;  %v656_v24 = vld [vmem:[%s6873_s21] sm:$0xf]  ;;  %v1053_v11 = vshrl.u32 %v5793_v6, 16  ;;  %v5785_v12 = vld [vmem:[%s6873_s21 + $0x14] sm:$0x1] }
  0x6d   : > { %665 = vst.msk [vmem:[#allocation2] sm:$0xf] %vm664_vm6, %v656_v24 }
  0x6e   : > { %v1055_v22 = vrot.slane %v1053_v11, 4 }
  0x71   : > { %1154 = vrot.lane.b32.xlu1 %v1133_v26, %s9117_s20  ;;  %v1140_v26 = vsel %vm6897_vm5, %v1138_v15, %v1139_v14  ;;  %v1049_v15 = vshll.u32 %v5793_v6, 16 }
  0x72   : > { %1152 = vrot.lane.b32.xlu0 %v1130_v28, %s9117_s20  ;;  %v1137_v28 = vsel %vm6897_vm5, %v5809_v19, %v1136_v7  ;;  %v1042_v7 = vrot.slane %v1040_v62, 4  ;;  %v987_v19 = vshll.u32 %v5785_v12, 16 }
  0x74   : > { %1202 = vrot.lane.b32.xlu2 %v5813_v34, %s9119_s23  ;;  %v5815_v34 = vld [vmem:[%s6873_s21 + $0x30] sm:$0xf]  ;;  %v1046_v17 = vor.u32 %v1045_v8, %v1042_v7  ;;  %v989_v29 = vrot.slane %v987_v19, 5  ;;  %v1316_v7 = vshrl.u32 %v5828_v0, 16  ;;  %v1319_v8 = vshll.u32 %v5828_v0, 16 }
  0x76   : > { %v1047_v27 = vrot.slane %v1046_v17, 4 }
  0x79   : > { %1343 = vrot.lane.b32.xlu1 %v1280_v38, %s9131_s25  ;;  %v659_v38 = vld [vmem:[%s6873_s21 + $0x10] sm:$0xf] }
  0x7a   : > { %1204 = vrot.lane.b32.xlu0 %v5814_v42, %s9119_s23  ;;  %668 = vst.msk [vmem:[#allocation2 + $0xc] sm:$0xf] %vm664_vm6, %v659_v38  ;;  %v5839_v42 = vld [vmem:[%s6873_s21 + $0x38] sm:$0x1] }
  0x7b   : > { %v1415_v51 = vrot.slane %v5839_v42, 5  ;;  %v5795_v42 = vld [vmem:[%s6873_s21 + $0xc] sm:$0xe] }
  0x7c   : > { %1345 = vrot.lane.b32.xlu2 %v1290_v55, %s9131_s25  ;;  %v661_v55 = vld [vmem:[%s6873_s21 + $0x1c] sm:$0xf] }
  0x7d   : > { %670 = vst.msk [vmem:[#allocation2 + $0x14] sm:$0xf] %vm664_vm6, %v661_v55  ;;  %v1416_v61 = vsel %vm6897_vm5, %v1414_v50, %v1415_v51 }
  0x81   : > { %1430 = vrot.lane.b32.xlu1 %v1409_v57, %s9129_s26  ;;  %v971_v57 = vshll.u32 %v5783_v49, 16  ;;  %v5807_v49 = vrot.slane %v5795_v42, 9 }
  0x82   : > { %1428 = vrot.lane.b32.xlu0 %v1406_v59, %s9129_s26  ;;  %v663_v59 = vld [vmem:[%s6873_s21 + $0x28] sm:$0xf] }
  0x83   : > { %672 = vst.msk [vmem:[#allocation2 + $0x1c] sm:$0xf] %vm664_vm6, %v663_v59  ;;  %v973_v4 = vrot.slane %v971_v57, 5  ;;  %v1123_v55 = vsel %vm6897_vm5, %v5807_v49, %v1122_v37  ;;  %v5810_v57 = vrot.slane %v5804_v52, 9  ;;  %v5819_v59 = vld [vmem:[%s6873_s21 + $0x18] sm:$0xf] }
  0x84   : > { %930 = vrot.lane.b32.xlu2 %v5779_v1, %s9123_s19  ;;  %v981_v1 = vshrl.u32 %v5784_v54, 16  ;;  %v5833_v49 = vld [vmem:[%s6873_s21 + $0x20] sm:$0x1] }
  0x85   : > { %v974_v14 = vor.u32 %v973_v4, %v970_v3  ;;  %v5820_v4 = vld [vmem:[%s6873_s21 + $0x1c] sm:$0xf] }
  0x89   : > { %1071 = vrot.lane.b32.xlu1 %v1028_v5, %s9121_s1 }
  0x8a   : > { %932 = vrot.lane.b32.xlu0 %v5780_v10, %s9123_s19  ;;  %v983_v10 = vrot.slane %v981_v1, 4  ;;  %v1244_v1 = vshrl.u32 %v5819_v59, 16 }
  0x8c   : > { %1073 = vrot.lane.b32.xlu2 %v1038_v21, %s9121_s1  ;;  %v984_v18 = vor.u32 %v983_v10, %v979_v9  ;;  %v975_v21 = vrot.slane %v974_v14, 4  ;;  %v1257_v10 = vshrl.u32 %v5820_v4, 16  ;;  %v1246_v11 = vrot.slane %v1244_v1, 4  ;;  %v5829_v14 = vld [vmem:[%s6873_s21 + $0x40] sm:$0xf] }
  0x8d   : > { %v1329_v17 = vshrl.u32 %v5829_v14, 16 }
  0x8e   : > { %v980_v32 = vsel %vm6884_vm3, %v975_v21, %v979_v9  ;;  %v1253_v9 = vshll.u32 %v5820_v4, 16  ;;  %v1259_v21 = vrot.slane %v1257_v10, 4 }
  0x91   : > { %1158 = vrot.lane.b32.xlu1 %v1140_v26, %s9117_s20  ;;  %v1051_v26 = vrot.slane %v1049_v15, 5  ;;  %v1318_v15 = vrot.slane %v1316_v7, 4 }
  0x92   : > { %1156 = vrot.lane.b32.xlu0 %v1137_v28, %s9117_s20  ;;  %v985_v28 = vrot.slane %v984_v18, 4  ;;  %v5821_v18 = vld [vmem:[%s6873_s21 + $0x20] sm:$0x1] }
  0x93   : > { %v1056_v33 = vor.u32 %v1055_v22, %v1051_v26  ;;  %v1052_v36 = vsel %vm6884_vm3, %v1047_v27, %v1051_v26  ;;  %v5812_v22 = vld [vmem:[%s6873_s21 + $0x1c] sm:$0xf]  ;;  %v1325_v26 = vshll.u32 %v5829_v14, 16  ;;  %v5818_v27 = vld [vmem:[%s6873_s21 + $0x40] sm:$0xf] }
  0x94   : > { %1206 = vrot.lane.b32.xlu2 %v5815_v34, %s9119_s23  ;;  %v1059_v34 = vshll.u32 %v5794_v25, 16  ;;  %v990_v38 = vsel %vm6884_vm3, %v985_v28, %v989_v29  ;;  %v1263_v29 = vshll.u32 %v5821_v18, 16 }
  0x95   : > { %v7047_v46 = vpop.permute.xlu2 %872  ;;  %v1057_v40 = vrot.slane %v1056_v33, 4  ;;  %v1331_v33 = vrot.slane %v1329_v17, 4 }
  0x99   : > { %1347 = vrot.lane.b32.xlu1 %v1304_v41, %s9131_s25  ;;  %v1061_v41 = vrot.slane %v1059_v34, 5 }
  0x9a   : > { %1208 = vrot.lane.b32.xlu0 %v5816_v45, %s9119_s23  ;;  %v1124_v45 = vrot.slane %v1122_v37, 4 }
  0x9b   : > { %v1062_v50 = vsel %vm6884_vm3, %v1057_v40, %v1061_v41 }
  0x9c   : > { %1349 = vrot.lane.b32.xlu2 %v1314_v58, %s9131_s25  ;;  %v1126_v53 = vsel %vm6897_vm5, %v1124_v45, %v1125_v47 }
  0x9e   : > { %v793_v5 = vpop.permute.xlu2 %792 }
  0x9f   : > { %813 = vst.msk [vmem:[#allocation2 + $0x10] sm:$0xf] %vm808_vm7, %v793_v5  ;;  %v5811_v5 = vld [vmem:[%s6873_s21 + $0x18] sm:$0xf] }
  0xa1   : > { %1434 = vrot.lane.b32.xlu1 %v1416_v61, %s9129_s26  ;;  %v1146_v61 = vrot.slane %v5806_v56, 5 }
  0xa2   : > { %1432 = vrot.lane.b32.xlu0 %v1413_v2, %s9129_s26  ;;  %v1247_v2 = vshll.u32 %v5819_v59, 16 }
  0xa4   : > { %924 = vrot.lane.b32.xlu2 %v5776_v13, %s9123_s19  ;;  %v1249_v12 = vrot.slane %v1247_v2, 5 }
  0xa6   : > { %v795_v24 = vpop.permute.xlu2 %794 }
  0xa7   : > { %814 = vst.msk [vmem:[#allocation2 + $0x14] sm:$0xf] %vm808_vm7, %v795_v24  ;;  %v1250_v24 = vor.u32 %v1249_v12, %v1246_v11 }
  0xa9   : > { %936 = vrot.lane.b32.xlu1 %v5782_v16, %s9123_s19  ;;  %v1321_v16 = vrot.slane %v1319_v8, 5  ;;  %v5841_v8 = vld [vmem:[%s6873_s21 + $0x40] sm:$0xf] }
  0xaa   : > { %934 = vrot.lane.b32.xlu0 %v5781_v20, %s9123_s19  ;;  %v1255_v20 = vrot.slane %v1253_v9, 5  ;;  %s9169_s19 = sld [smem:[#allocation24_spill]]  ;;  %v5840_v9 = vld [vmem:[%s6873_s21 + $0x3c] sm:$0xe] }
  0xab   : > { %v789_v30 = vpop.permute.xlu1 %788  ;;  %v1322_v28 = vor.u32 %v1321_v16, %v1318_v15  ;;  %v5842_v15 = vld [vmem:[%s6873_s21 + $0x44] sm:$0x1]  ;;  %v1419_v16 = vrot.slane %v5841_v8, 5  ;;  %v5846_v17 = vrot.slane %v5840_v9, 9 }
  0xac   : > { %811 = vst.msk [vmem:[#allocation2 + $0x8] sm:$0xf] %vm808_vm7, %v789_v30  ;;  %v785_v35 = vpop.permute.xlu0 %784  ;;  %1063 = vrot.lane.b32.xlu2 %v980_v32, %s9121_s1  ;;  %v5817_v30 = vld [vmem:[%s6873_s21 + $0x3c] sm:$0xf]  ;;  %v1260_v31 = vor.u32 %v1259_v21, %v1255_v20  ;;  %v1251_v32 = vrot.slane %v1250_v24, 4  ;;  %v1422_v24 = vrot.slane %v5842_v15, 5 }
  0xad   : > { %809 = vst.msk [vmem:[#allocation2] sm:$0xf] %vm808_vm7, %v785_v35  ;;  %v5830_v35 = vld [vmem:[%s6873_s21 + $0x44] sm:$0x1]  ;;  %v1323_v37 = vrot.slane %v1322_v28, 4 }
  0xae   : > { %897 = vst.msk [vmem:[#allocation2] sm:$0xf] %vm896_vm8, %v7047_v46  ;;  %v879_v44 = vpop.permute.xlu2 %878  ;;  %v5805_v46 = vld [vmem:[%s6873_s21 + $0x34] sm:$0xf]  ;;  %v1261_v41 = vrot.slane %v1260_v31, 4  ;;  %v1256_v42 = vsel %vm6884_vm3, %v1251_v32, %v1255_v20  ;;  %v1335_v47 = vshll.u32 %v5830_v35, 16 }
  0xaf   : > { %v1143_v54 = vrot.slane %v5805_v46, 5  ;;  %v5897_v20 = vld [vmem:[%s6873_s21 + $0x50] sm:$0x1]  ;;  %v5908_v28 = vld [vmem:[%s6873_s21 + $0x4c] sm:$0xf] }
  0xb0   : > { %s9170_s18 = smov %s9169_s19  ;;  %v1337_v56 = vrot.slane %v1335_v47, 5  ;;  %v1761_v32 = vshll.u32 %v5897_v20, 16  ;;  %v5943_v15 = vld [vmem:[%s6873_s21 + $0x54] sm:$0xe] }
  0xb1   : > { %1075 = vrot.lane.b32.xlu1 %v1052_v36, %s9121_s1  ;;  %v1145_v60 = vrot.slane %v1143_v54, 4  ;;  %v1144_v63 = vsel %vm6897_vm5, %v5810_v57, %v1143_v54  ;;  %v1327_v36 = vrot.slane %v1325_v26, 5 }
  0xb2   : > { %1065 = vrot.lane.b32.xlu0 %v990_v38, %s9121_s1  ;;  %v1265_v38 = vrot.slane %v1263_v29, 5  ;;  %v1420_v29 = vsel %vm6897_vm5, %v5846_v17, %v1419_v16 }
  0xb3   : > { %v791_v48 = vpop.permute.xlu1 %790  ;;  %v1147_v6 = vsel %vm6897_vm5, %v1145_v60, %v1146_v61  ;;  %v1332_v45 = vor.u32 %v1331_v33, %v1327_v36  ;;  %v1328_v46 = vsel %vm6884_vm3, %v1323_v37, %v1327_v36  ;;  %v1401_v60 = vrot.slane %v5833_v49, 5 }
  0xb4   : > { %812 = vst.msk [vmem:[#allocation2 + $0xc] sm:$0xf] %vm808_vm7, %v791_v48  ;;  %v787_v51 = vpop.permute.xlu0 %786  ;;  %1077 = vrot.lane.b32.xlu2 %v1062_v50, %s9121_s1  ;;  %v1398_v50 = vrot.slane %v5832_v39, 5  ;;  %v1266_v54 = vsel %vm6884_vm3, %v1261_v41, %v1265_v38  ;;  %v1895_v36 = vrot.slane %v5908_v28, 5  ;;  %s9171_s1 = smov 4  }
  0xb5   : > { %810 = vst.msk [vmem:[#allocation2 + $0x4] sm:$0xf] %vm808_vm7, %v787_v51 }
  0xb6   : > { %900 = vst.msk [vmem:[#allocation2 + $0xc] sm:$0xf] %vm896_vm8, %v879_v44  ;;  %v885_v58 = vpop.permute.xlu2 %884  ;;  %v5895_v44 = vld [vmem:[%s6873_s21 + $0x48] sm:$0xf] }
  0xb7   : > { %v1742_v51 = vshrl.u32 %v5895_v44, 16  ;;  %v1745_v52 = vshll.u32 %v5895_v44, 16  ;;  %v5907_v44 = vld [vmem:[%s6873_s21 + $0x48] sm:$0xe] }
  0xb9   : > { %1150 = vrot.lane.b32.xlu1 %v1126_v53, %s9117_s20  ;;  %v1593_v53 = vld [vmem:[%s9169_s19 + $0x10] sm:$0x3]  ;;  %v1744_v0 = vrot.slane %v1742_v51, 4  ;;  %v1747_v1 = vrot.slane %v1745_v52, 5  ;;  %v5919_v51 = vrot.slane %v5907_v44, 9  ;;  %s9173_s19 = smov 16  }
  0xba   : > { %1148 = vrot.lane.b32.xlu0 %v1123_v55, %s9117_s20  ;;  %v1333_v55 = vrot.slane %v1332_v45, 4  ;;  %v1623_v57 = vunpack.c.l.b16 %v1593_v53 }
  0xbb   : > { %v799_v62 = vpop.permute.xlu1 %798  ;;  %v1748_v12 = vor.u32 %v1747_v1, %v1744_v0  ;;  %v5967_v1 = vld [vmem:[%s6873_s21 + $0x60] sm:$0xf] }
  0xbc   : > { %816 = vst.msk [vmem:[#allocation2 + $0x1c] sm:$0xf] %vm808_vm7, %v799_v62  ;;  %v797_v3 = vpop.permute.xlu0 %796  ;;  %1160 = vrot.lane.b32.xlu2 %v1144_v63, %s9117_s20  ;;  %v1626_v61 = vpack.c.b16 %v1623_v57, %v1623_v57  ;;  %v1400_v62 = vrot.slane %v1398_v50, 4  ;;  %v5896_v63 = vld [vmem:[%s6873_s21 + $0x4c] sm:$0xf]  ;;  %v2291_v8 = vshll.u32 %v5967_v1, 16 }
  0xbd   : > { %815 = vst.msk [vmem:[#allocation2 + $0x18] sm:$0xf] %vm808_vm7, %v797_v3  ;;  %v1755_v4 = vshrl.u32 %v5896_v63, 16  ;;  %v1751_v10 = vshll.u32 %v5896_v63, 16 }
  0xbe   : > { %903 = vst.msk [vmem:[#allocation2 + $0x18] sm:$0xf] %vm896_vm8, %v885_v58  ;;  %v927_v13 = vpop.permute.xlu2 %926  ;;  %v5831_v58 = vld [vmem:[%s6873_s21 + $0x18] sm:$0xe]  ;;  %v1402_v11 = vsel %vm6897_vm5, %v1400_v62, %v1401_v60  ;;  %v5933_v62 = vld [vmem:[%s6873_s21 + $0x5c] sm:$0x1] }
  0xbf   : > { %v5843_v3 = vrot.slane %v5831_v58, 9  ;;  %v1757_v18 = vrot.slane %v1755_v4, 4  ;;  %v1753_v21 = vrot.slane %v1751_v10, 5  ;;  %v1896_v58 = vsel %vm6897_vm5, %v5919_v51, %v1895_v36  ;;  %v5960_v51 = vld [vmem:[%s6873_s21 + $0x64] sm:$0xf] }
  0xc1   : > { %1198 = vrot.lane.b32.xlu1 %v5811_v5, %s9119_s23  ;;  %v1338_v5 = vsel %vm6884_vm3, %v1333_v55, %v1337_v56  ;;  %v1399_v14 = vsel %vm6897_vm5, %v5843_v3, %v1398_v50  ;;  %v1758_v31 = vor.u32 %v1757_v18, %v1753_v21  ;;  %v5923_v3 = vld [vmem:[%s6873_s21 + $0x54] sm:$0xf]  ;;  %v2293_v18 = vrot.slane %v2291_v8, 5  ;;  %v5900_v8 = vld [vmem:[%s6873_s21 + $0x5c] sm:$0x1] }
  0xc2   : > { %1162 = vrot.lane.b32.xlu0 %v1147_v6, %s9117_s20  ;;  %s7141_s20 = sand.u32 1, %s6662_s28   ;;  %v1644_v6 = vsel %vm1642_vm10, %v1626_v61, 0 }
  0xc3   : > { %v877_v19 = vpop.permute.xlu1 %876  ;;  %9168 = sst [smem:[#allocation22_spill]] %s7141_s20  ;;  %6435 = vmatpush.bf16.msra.mxu1 %v1644_v6  ;;  %1651 = vmatpush.bf16.msra.mxu0 %v1644_v6  ;;  %v1759_v41 = vrot.slane %v1758_v31, 4  ;;  %s5766_s20 = sshll.u32 %s6866_s22, 5 }
  0xc4   : > { %899 = vst.msk [vmem:[#allocation2 + $0x8] sm:$0xf] %vm896_vm8, %v877_v19  ;;  %v875_v25 = vpop.permute.xlu0 %874  ;;  %1200 = vrot.lane.b32.xlu2 %v5812_v22, %s9119_s23  ;;  %v1749_v22 = vrot.slane %v1748_v12, 4  ;;  %v5945_v12 = vld [vmem:[%s6873_s21 + $0x5c] sm:$0x1]  ;;  %s9181_s0 = sld [smem:[#allocation22_spill]] }
  0xc5   : > { %898 = vst.msk [vmem:[#allocation2 + $0x4] sm:$0xf] %vm896_vm8, %v875_v25  ;;  %v6410_v25 = vld [vmem:[%s9170_s18] sm:$0xff]  ;;  %v2171_v20 = vrot.slane %v5945_v12, 5 }
  0xc6   : > { %949 = vst.msk [vmem:[#allocation2 + $0x8] sm:$0xf] %vm946_vm9, %v927_v13  ;;  %v7134_v34 = vpop.permute.xlu2 %1069  ;;  %v6411_v13 = vld [vmem:[%s9170_s18 + $0x8] sm:$0xff]  ;;  %v1754_v35 = vsel %vm6884_vm3, %v1749_v22, %v1753_v21  ;;  %v5968_v21 = vld [vmem:[%s6873_s21 + $0x64] sm:$0xf] }
  0xc7   : > { %6436 = vmatpush.bf16.msra.mxu1 %v6411_v13  ;;  %1652 = vmatpush.bf16.msra.mxu0 %v6411_v13 }
  0xc9   : > { %1212 = vrot.lane.b32.xlu1 %v5818_v27, %s9119_s23  ;;  %v1421_v27 = vrot.slane %v1419_v16, 4 }
  0xca   : > { %1210 = vrot.lane.b32.xlu0 %v5817_v30, %s9119_s23  ;;  %v5931_v30 = vld [vmem:[%s6873_s21 + $0x54] sm:$0xf]  ;;  %s9172_s23 = smov 12  }
  0xcb   : > { %v883_v40 = vpop.permute.xlu1 %882  ;;  %6437 = vmatpush.bf16.msra.mxu1 %v6410_v25  ;;  %1653 = vmatpush.bf16.msra.mxu0 %v6410_v25  ;;  %v2015_v37 = vshrl.u32 %v5931_v30, 16  ;;  %v2018_v38 = vshll.u32 %v5931_v30, 16  ;;  %v1423_v39 = vsel %vm6897_vm5, %v1421_v27, %v1422_v24  ;;  %v5955_v24 = vrot.slane %v5943_v15, 9  ;;  %v5910_v15 = vld [vmem:[%s6873_s21 + $0x54] sm:$0xe] }
  0xcc   : > { %902 = vst.msk [vmem:[#allocation2 + $0x14] sm:$0xf] %vm896_vm8, %v883_v40  ;;  %v881_v48 = vpop.permute.xlu0 %880  ;;  %1339 = vrot.lane.b32.xlu2 %v1256_v42, %s9131_s25  ;;  %v5909_v40 = vld [vmem:[%s6873_s21 + $0x50] sm:$0x1]  ;;  %v1763_v42 = vrot.slane %v1761_v32, 5  ;;  %v2301_v25 = vshrl.u32 %v5968_v21, 16 }
  0xcd   : > { %901 = vst.msk [vmem:[#allocation2 + $0x10] sm:$0xf] %vm896_vm8, %v881_v48  ;;  %v1898_v47 = vrot.slane %v5909_v40, 5  ;;  %v5932_v48 = vld [vmem:[%s6873_s21 + $0x58] sm:$0xf]  ;;  %v2017_v49 = vrot.slane %v2015_v37, 4 }
  0xce   : > { %v7158_v59 = vpop.permute.xlu2 %1202  ;;  %v2028_v52 = vshrl.u32 %v5932_v48, 16  ;;  %v1764_v53 = vsel %vm6884_vm3, %v1759_v41, %v1763_v42  ;;  %v2024_v55 = vshll.u32 %v5932_v48, 16  ;;  %v2303_v32 = vrot.slane %v2301_v25, 4  ;;  %v5889_v37 = vld [vmem:[%s6873_s21 + $0x54] sm:$0xf] }
  0xcf   : > { %v5980_v40 = vld [vmem:[%s6873_s21 + $0x64] sm:$0xf]  ;;  %v5899_v41 = vld [vmem:[%s6873_s21 + $0x58] sm:$0xf]  ;;  %v5898_v42 = vld [vmem:[%s6873_s21 + $0x54] sm:$0xf] }
  0xd0   : > { %v2030_v60 = vrot.slane %v2028_v52, 4  ;;  %v2026_v63 = vrot.slane %v2024_v55, 5  ;;  %v5981_v52 = vld [vmem:[%s6873_s21 + $0x68] sm:$0x1] }
  0xd1   : > { %1351 = vrot.lane.b32.xlu1 %v1328_v46, %s9131_s25  ;;  %v2020_v46 = vrot.slane %v2018_v38, 5 }
  0xd2   : > { %1341 = vrot.lane.b32.xlu0 %v1266_v54, %s9131_s25  ;;  %v2031_v4 = vor.u32 %v2030_v60, %v2026_v63 }
  0xd3   : > { %v923_v2 = vpop.permute.xlu1 %922  ;;  %v2021_v57 = vor.u32 %v2020_v46, %v2017_v49 }
  0xd4   : > { %947 = vst.msk [vmem:[#allocation2] sm:$0xf] %vm946_vm9, %v923_v2  ;;  %v887_v7 = vpop.permute.xlu0 %886  ;;  %1353 = vrot.lane.b32.xlu2 %v1338_v5, %s9131_s25  ;;  %v5944_v2 = vld [vmem:[%s6873_s21 + $0x58] sm:$0xf]  ;;  %v2034_v5 = vshll.u32 %v5933_v62, 16  ;;  %v2032_v13 = vrot.slane %v2031_v4, 4 }
  0xd5   : > { %904 = vst.msk [vmem:[#allocation2 + $0x1c] sm:$0xf] %vm896_vm8, %v887_v7  ;;  %v2022_v0 = vrot.slane %v2021_v57, 4  ;;  %v2288_v7 = vshrl.u32 %v5967_v1, 16  ;;  %v2168_v10 = vrot.slane %v5944_v2, 5  ;;  %v1775_v57 = vshll.u32 %v5899_v41, 16 }
  0xd6   : > { %v7179_v19 = vpop.permute.xlu2 %1345  ;;  %v5979_v1 = vld [vmem:[%s6873_s21 + $0x60] sm:$0xe] }
  0xd7   : > { %v2027_v9 = vsel %vm6884_vm3, %v2022_v0, %v2026_v63  ;;  %v2290_v17 = vrot.slane %v2288_v7, 4  ;;  %v2169_v31 = vsel %vm6897_vm5, %v5955_v24, %v2168_v10  ;;  %v1777_v4 = vrot.slane %v1775_v57, 5  ;;  %v5934_v24 = vld [vmem:[%s6873_s21 + $0x60] sm:$0xf]  ;;  %v5892_v57 = vld [vmem:[%s6873_s21 + $0x64] sm:$0xf] }
  0xd8   : > { %v5991_v7 = vrot.slane %v5979_v1, 9  ;;  %v5970_v1 = vld [vmem:[%s6873_s21 + $0x6c] sm:$0xf] }
  0xd9   : > { %1426 = vrot.lane.b32.xlu1 %v1402_v11, %s9129_s26  ;;  %v5924_v11 = vld [vmem:[%s6873_s21 + $0x58] sm:$0xf]  ;;  %v2294_v28 = vor.u32 %v2293_v18, %v2290_v17 }
  0xda   : > { %1424 = vrot.lane.b32.xlu0 %v1399_v14, %s9129_s26  ;;  %v2036_v14 = vrot.slane %v2034_v5, 5  ;;  %v5911_v17 = vld [vmem:[%s6873_s21 + $0x58] sm:$0xf] }
  0xdb   : > { %v1068_v26 = vpop.permute.xlu1 %1067  ;;  %v2295_v38 = vrot.slane %v2294_v28, 4  ;;  %v2039_v28 = vshrl.u32 %v5934_v24, 16 }
  0xdc   : > { %1090 = vst.msk [vmem:[#allocation2 + $0x8] sm:$0xf] %vm1087_vm11, %v1068_v26  ;;  %v929_v33 = vpop.permute.xlu0 %928  ;;  %1436 = vrot.lane.b32.xlu2 %v1420_v29, %s9129_s26  ;;  %v2037_v26 = vsel %vm6884_vm3, %v2032_v13, %v2036_v14  ;;  %v2297_v29 = vshll.u32 %v5968_v21, 16  ;;  %v1785_v13 = vshll.u32 %v5900_v8, 16 }
  0xdd   : > { %950 = vst.msk [vmem:[#allocation2 + $0xc] sm:$0xf] %vm946_vm9, %v929_v33 }
  0xde   : > { %1091 = vst.msk [vmem:[#allocation2 + $0xc] sm:$0xf] %vm1087_vm11, %v7134_v34  ;;  %v931_v45 = vpop.permute.xlu2 %930  ;;  %v1897_v34 = vrot.slane %v1895_v36, 4  ;;  %v5890_v36 = vld [vmem:[%s6873_s21 + $0x58] sm:$0xf] }
  0xdf   : > { %951 = vst.msk [vmem:[#allocation2 + $0x10] sm:$0xf] %vm946_vm9, %v931_v45 }
  0xe0   : > { %v1899_v56 = vsel %vm6897_vm5, %v1897_v34, %v1898_v47  ;;  %v5959_v34 = vld [vmem:[%s6873_s21 + $0x60] sm:$0xf] }
  0xe1   : > { %1837 = vrot.lane.b32.xlu1 %v1754_v35, %s9171_s1  ;;  %v5969_v35 = vld [vmem:[%s6873_s21 + $0x68] sm:$0x1] }
  0xe2   : > { %1438 = vrot.lane.b32.xlu0 %v1423_v39, %s9129_s26  ;;  %v2299_v39 = vrot.slane %v2297_v29, 5  ;;  %v2307_v48 = vshll.u32 %v5969_v35, 16  ;;  %s9175_s26 = smov 24   ;;  %v2042_v29 = vshll.u32 %v5934_v24, 16 }
  0xe3   : > { %v1155_v50 = vpop.permute.xlu1 %1154 }
  0xe4   : > { %1176 = vst.msk [vmem:[#allocation2 + $0xc] sm:$0xf] %vm1172_vm12, %v1155_v50  ;;  %v1153_v54 = vpop.permute.xlu0 %1152  ;;  %1839 = vrot.lane.b32.xlu2 %v1764_v53, %s9171_s1  ;;  %v2304_v47 = vor.u32 %v2303_v32, %v2299_v39  ;;  %v1766_v53 = vshrl.u32 %v5898_v42, 16  ;;  %v2300_v55 = vsel %vm6884_vm3, %v2295_v38, %v2299_v39  ;;  %v2309_v62 = vrot.slane %v2307_v48, 5 }
  0xe5   : > { %1175 = vst.msk [vmem:[#allocation2 + $0x8] sm:$0xf] %vm1172_vm12, %v1153_v54  ;;  %v1769_v54 = vshll.u32 %v5898_v42, 16 }
  0xe6   : > { %1225 = vst.msk [vmem:[#allocation2 + $0x8] sm:$0xf] %vm1222_vm13, %v7158_v59  ;;  %v7217_v61 = vpop.permute.xlu2 %1073  ;;  %v2305_v60 = vrot.slane %v2304_v47, 4  ;;  %v1768_v63 = vrot.slane %v1766_v53, 4  ;;  %v5946_v53 = vld [vmem:[%s6873_s21 + $0x60] sm:$0xe] }
  0xe7   : > { %v1771_v0 = vrot.slane %v1769_v54, 5  ;;  %v5947_v54 = vld [vmem:[%s6873_s21 + $0x64] sm:$0xf] }
  0xe9   : > { %1923 = vrot.lane.b32.xlu1 %v1899_v56, %s9127_s27  ;;  %v2441_v56 = vrot.slane %v5980_v40, 5  ;;  %v2041_v40 = vrot.slane %v2039_v28, 4  ;;  %v5962_v28 = vld [vmem:[%s6873_s21 + $0x70] sm:$0xf] }
  0xea   : > { %1921 = vrot.lane.b32.xlu0 %v1896_v58, %s9127_s27  ;;  %s9174_s27 = smov 20   ;;  %v1779_v58 = vshrl.u32 %v5899_v41, 16  ;;  %v2044_v41 = vrot.slane %v2042_v29, 5  ;;  %v5901_v29 = vld [vmem:[%s6873_s21 + $0x60] sm:$0xf] }
  0xeb   : > { %v1344_v59 = vpop.permute.xlu1 %1343  ;;  %v2443_v2 = vrot.slane %v2441_v56, 4  ;;  %v2442_v14 = vsel %vm6897_vm5, %v5991_v7, %v2441_v56 }
  0xec   : > { %1366 = vst.msk [vmem:[#allocation2 + $0x8] sm:$0xf] %vm1363_vm14, %v1344_v59  ;;  %v1205_v6 = vpop.permute.xlu0 %1204  ;;  %1970 = vrot.lane.b32.xlu2 %v5923_v3, %s9172_s23  ;;  %v2444_v3 = vrot.slane %v5981_v52, 5  ;;  %v1781_v5 = vrot.slane %v1779_v58, 4  ;;  %v2045_v48 = vor.u32 %v2044_v41, %v2041_v40  ;;  %v5891_v58 = vld [vmem:[%s6873_s21 + $0x60] sm:$0xf] }
  0xed   : > { %1226 = vst.msk [vmem:[#allocation2 + $0xc] sm:$0xf] %vm1222_vm13, %v1205_v6  ;;  %v1793_v40 = vshll.u32 %v5901_v29, 16 }
  0xee   : > { %1367 = vst.msk [vmem:[#allocation2 + $0xc] sm:$0xf] %vm1363_vm14, %v7179_v19  ;;  %v7235_v16 = vpop.permute.xlu2 %1206  ;;  %v2170_v19 = vrot.slane %v2168_v10, 4  ;;  %v1782_v12 = vor.u32 %v1781_v5, %v1777_v4  ;;  %v2312_v5 = vshrl.u32 %v5970_v1, 16 }
  0xf0   : > { %v2172_v30 = vsel %vm6897_vm5, %v2170_v19, %v2171_v20  ;;  %v1902_v20 = vrot.slane %v5911_v17, 5  ;;  %v1783_v21 = vrot.slane %v1782_v12, 4  ;;  %v2314_v17 = vrot.slane %v2312_v5, 4  ;;  %v5938_v5 = vld [vmem:[%s6873_s21 + $0x70] sm:$0xf] }
  0xf1   : > { %2110 = vrot.lane.b32.xlu1 %v2027_v9, %s9173_s19  ;;  %v1772_v9 = vor.u32 %v1771_v0, %v1768_v63 }
  0xf2   : > { %1972 = vrot.lane.b32.xlu0 %v5924_v11, %s9172_s23  ;;  %v2445_v11 = vsel %vm6897_vm5, %v2443_v2, %v2444_v3  ;;  %v1904_v38 = vrot.slane %v1902_v20, 4 }
  0xf3   : > { %v1431_v22 = vpop.permute.xlu1 %1430  ;;  %v1773_v18 = vrot.slane %v1772_v9, 4 }
  0xf4   : > { %1452 = vst.msk [vmem:[#allocation2 + $0xc] sm:$0xf] %vm1448_vm15, %v1431_v22  ;;  %v1429_v27 = vpop.permute.xlu0 %1428  ;;  %2112 = vrot.lane.b32.xlu2 %v2037_v26, %s9173_s19  ;;  %v1787_v22 = vrot.slane %v1785_v13, 5 }
  0xf5   : > { %1451 = vst.msk [vmem:[#allocation2 + $0x8] sm:$0xf] %vm1448_vm15, %v1429_v27  ;;  %v1778_v26 = vsel %vm6884_vm3, %v1773_v18, %v1777_v4  ;;  %v5935_v27 = vld [vmem:[%s6873_s21 + $0x64] sm:$0xf]  ;;  %v5971_v4 = vld [vmem:[%s6873_s21 + $0x70] sm:$0xf] }
  0xf6   : > { %v7249_v33 = vpop.permute.xlu2 %1349  ;;  %v1788_v35 = vsel %vm6884_vm3, %v1783_v21, %v1787_v22  ;;  %v2321_v12 = vshll.u32 %v5971_v4, 16  ;;  %v2325_v13 = vshrl.u32 %v5971_v4, 16  ;;  %v5972_v21 = vld [vmem:[%s6873_s21 + $0x74] sm:$0x1] }
  0xf8   : > { %v2323_v22 = vrot.slane %v2321_v12, 5  ;;  %v2327_v24 = vrot.slane %v2325_v13, 4 }
  0xf9   : > { %2196 = vrot.lane.b32.xlu1 %v2172_v30, %s9174_s27 }
  0xfa   : > { %2194 = vrot.lane.b32.xlu0 %v2169_v31, %s9174_s27  ;;  %v5912_v31 = vld [vmem:[%s6873_s21 + $0x5c] sm:$0x1] }
  0xfb   : > { %v6407_v44 = vld [vmem:[#allocation2 + $0x8] sm:$0xf0]  ;;  %v1072_v45 = vpop.permute.xlu1 %1071  ;;  %v1905_v39 = vrot.slane %v5912_v31, 5 }
  0xfc   : > { %1724 = vst.msk [vmem:[#allocation2 + $0xc] sm:$0xf] %vm664_vm6, %v5890_v36  ;;  %v5865_v49 = vld [vmem:[#allocation2 + $0x8] sm:$0xf]  ;;  %v933_v46 = vpop.permute.xlu0 %932  ;;  %2243 = vrot.lane.b32.xlu2 %v5959_v34, %s9175_s26  ;;  %v2048_v36 = vshll.u32 %v5935_v27, 16 }
  0xfd   : > { %1723 = vst.msk [vmem:[#allocation2 + $0x8] sm:$0xf] %vm664_vm6, %v5889_v37  ;;  %v5866_v50 = vor.u32 %v6407_v44, %v5865_v49  ;;  %v2052_v37 = vshrl.u32 %v5935_v27, 16  ;;  %v5936_v34 = vld [vmem:[%s6873_s21 + $0x68] sm:$0x1]  ;;  %v1906_v47 = vsel %vm6897_vm5, %v1904_v38, %v1905_v39  ;;  %v2328_v38 = vor.u32 %v2327_v24, %v2323_v22 }
  0xfe   : > { %1092 = vst.msk [vmem:[#allocation2 + $0x10] sm:$0xf] %vm1087_vm11, %v1072_v45  ;;  %v925_v59 = vpop.permute.xlu2 %924  ;;  %v2058_v52 = vshll.u32 %v5936_v34, 16  ;;  %v1790_v39 = vshrl.u32 %v5901_v29, 16 }
  0xff   : > { %952 = vst.msk [vmem:[#allocation2 + $0x14] sm:$0xf] %vm946_vm9, %v933_v46  ;;  %5884 = vmatmul.msk.bf16.vlgmr.msra.gmra.mxu1 %vm1629_vm0, %v5866_v50  ;;  %v2054_v44 = vrot.slane %v2052_v37, 4  ;;  %v5926_v46 = vld [vmem:[%s6873_s21 + $0x64] sm:$0xf] }
 0x100   : > { %1093 = vst.msk [vmem:[#allocation2 + $0x14] sm:$0xf] %vm1087_vm11, %v7217_v61  ;;  %v2310_v61 = vsel %vm6884_vm3, %v2305_v60, %v2309_v62  ;;  %v5925_v50 = vld [vmem:[%s6873_s21 + $0x60] sm:$0xf]  ;;  %v5956_v60 = vrot.slane %v5946_v53, 9  ;;  %v2175_v62 = vrot.slane %v5947_v54, 5 }
 0x101   : > { %2383 = vrot.lane.b32.xlu1 %v2300_v55, %s9131_s25  ;;  %948 = vst.msk [vmem:[#allocation2 + $0x4] sm:$0xf] %vm946_vm9, %v925_v59  ;;  %v2046_v55 = vrot.slane %v2045_v48, 4  ;;  %v2060_v0 = vrot.slane %v2058_v52, 5  ;;  %v5983_v37 = vld [vmem:[%s6873_s21 + $0x70] sm:$0xf] }
 0x102   : > { %2245 = vrot.lane.b32.xlu0 %v5960_v51, %s9175_s26  ;;  %v2448_v34 = vrot.slane %v5983_v37, 5  ;;  %v5903_v48 = vld [vmem:[%s6873_s21 + $0x68] sm:$0x1]  ;;  %v5984_v54 = vld [vmem:[%s6873_s21 + $0x74] sm:$0x1] }
 0x103   : > { %v1159_v6 = vpop.permute.xlu1 %1158 }
 0x104   : > { %1178 = vst.msk [vmem:[#allocation2 + $0x14] sm:$0xf] %vm1172_vm12, %v1159_v6  ;;  %v1157_v10 = vpop.permute.xlu0 %1156  ;;  %2385 = vrot.lane.b32.xlu2 %v2310_v61, %s9131_s25  ;;  %s9177_s25 = smov 8   ;;  %v2315_v6 = vshll.u32 %v5970_v1, 16  ;;  %v5948_v61 = vld [vmem:[%s6873_s21 + $0x68] sm:$0x1] }
 0x105   : > { %1177 = vst.msk [vmem:[#allocation2 + $0x10] sm:$0xf] %vm1172_vm12, %v1157_v10  ;;  %v2176_v10 = vsel %vm6897_vm5, %v5956_v60, %v2175_v62 }
 0x106   : > { %1227 = vst.msk [vmem:[#allocation2 + $0x10] sm:$0xf] %vm1222_vm13, %v7235_v16  ;;  %v1064_v19 = vpop.permute.xlu2 %1063  ;;  %v5920_v16 = vrot.slane %v5910_v15, 9  ;;  %v2178_v15 = vrot.slane %v5948_v61, 5  ;;  %v2317_v18 = vrot.slane %v2315_v6, 5 }
 0x107   : > { %1088 = vst.msk [vmem:[#allocation2] sm:$0xf] %vm1087_vm11, %v1064_v19  ;;  %v5937_v6 = vld [vmem:[%s6873_s21 + $0x6c] sm:$0xf]  ;;  %v5913_v61 = vld [vmem:[%s6873_s21 + $0x60] sm:$0xe] }
 0x108   : > { %v1903_v32 = vsel %vm6897_vm5, %v5920_v16, %v1902_v20  ;;  %v5902_v16 = vld [vmem:[%s6873_s21 + $0x64] sm:$0xf]  ;;  %v2063_v12 = vshrl.u32 %v5937_v6, 16  ;;  %v2066_v13 = vshll.u32 %v5937_v6, 16 }
 0x109   : > { %2469 = vrot.lane.b32.xlu1 %v2445_v11, %s9176_s2  ;;  %v1799_v31 = vshll.u32 %v5902_v16, 16 }
 0x10a   : > { %2467 = vrot.lane.b32.xlu0 %v2442_v14, %s9176_s2  ;;  %v2177_v14 = vrot.slane %v2175_v62, 4  ;;  %v2450_v62 = vrot.slane %v2448_v34, 4 }
 0x10b   : > { %v1348_v25 = vpop.permute.xlu1 %1347 }
 0x10c   : > { %1368 = vst.msk [vmem:[#allocation2 + $0x10] sm:$0xf] %vm1363_vm14, %v1348_v25  ;;  %v1209_v30 = vpop.permute.xlu0 %1208  ;;  %1841 = vrot.lane.b32.xlu2 %v1778_v26, %s9171_s1  ;;  %v2179_v25 = vsel %vm6897_vm5, %v2177_v14, %v2178_v15  ;;  %v2318_v26 = vor.u32 %v2317_v18, %v2314_v17  ;;  %v5921_v17 = vrot.slane %v5913_v61, 9  ;;  %v5915_v18 = vld [vmem:[%s6873_s21 + $0x68] sm:$0x1] }
 0x10d   : > { %1228 = vst.msk [vmem:[#allocation2 + $0x14] sm:$0xf] %vm1222_vm13, %v1209_v30  ;;  %v5961_v30 = vld [vmem:[%s6873_s21 + $0x6c] sm:$0xf]  ;;  %v5963_v61 = vld [vmem:[%s6873_s21 + $0x78] sm:$0xf] }
 0x10e   : > { %1369 = vst.msk [vmem:[#allocation2 + $0x14] sm:$0xf] %vm1363_vm14, %v7249_v33  ;;  %v1078_v42 = vpop.permute.xlu2 %1077  ;;  %v2050_v33 = vrot.slane %v2048_v36, 5  ;;  %v2331_v36 = vshll.u32 %v5972_v21, 16  ;;  %v2319_v41 = vrot.slane %v2318_v26, 4  ;;  %v2065_v21 = vrot.slane %v2063_v12, 4 }
 0x10f   : > { %v1912_v26 = vrot.slane %v5915_v18, 5 }
 0x110   : > { %v2055_v51 = vor.u32 %v2054_v44, %v2050_v33  ;;  %v2051_v3 = vsel %vm6884_vm3, %v2046_v55, %v2050_v33  ;;  %v1801_v33 = vrot.slane %v1799_v31, 5  ;;  %v2324_v52 = vsel %vm6884_vm3, %v2319_v41, %v2323_v22 }
 0x111   : > { %1925 = vrot.lane.b32.xlu1 %v1903_v32, %s9177_s25  ;;  %v1803_v32 = vshrl.u32 %v5902_v16, 16  ;;  %v2068_v22 = vrot.slane %v2066_v13, 5 }
 0x112   : > { %1843 = vrot.lane.b32.xlu0 %v1788_v35, %s9171_s1  ;;  %v2056_v63 = vrot.slane %v2055_v51, 4  ;;  %v5982_v35 = vld [vmem:[%s6873_s21 + $0x6c] sm:$0xe]  ;;  %v1795_v51 = vrot.slane %v1793_v40, 5 }
 0x113   : > { %v1435_v45 = vpop.permute.xlu1 %1434  ;;  %v1805_v44 = vrot.slane %v1803_v32, 4 }
 0x114   : > { %1454 = vst.msk [vmem:[#allocation2 + $0x14] sm:$0xf] %vm1448_vm15, %v1435_v45  ;;  %v1433_v49 = vpop.permute.xlu0 %1432  ;;  %1927 = vrot.lane.b32.xlu2 %v1906_v47, %s9177_s25  ;;  %v2061_v11 = vsel %vm6884_vm3, %v2056_v63, %v2060_v0  ;;  %v5992_v45 = vrot.slane %v5982_v35, 9  ;;  %v2333_v47 = vrot.slane %v2331_v36, 5  ;;  %v2451_v63 = vrot.slane %v5984_v54, 5 }
 0x115   : > { %1453 = vst.msk [vmem:[#allocation2 + $0x10] sm:$0xf] %vm1448_vm15, %v1433_v49  ;;  %v1806_v55 = vor.u32 %v1805_v44, %v1801_v33  ;;  %v2069_v35 = vor.u32 %v2068_v22, %v2065_v21  ;;  %v5974_v44 = vld [vmem:[%s6873_s21 + $0x7c] sm:$0xf] }
 0x116   : > { %v1161_v56 = vpop.permute.xlu2 %1160  ;;  %v2452_v4 = vsel %vm6897_vm5, %v2450_v62, %v2451_v63  ;;  %v5904_v63 = vld [vmem:[%s6873_s21 + $0x6c] sm:$0xf]  ;;  %v5986_v21 = vld [vmem:[%s6873_s21 + $0x7c] sm:$0xf] }
 0x117   : > { %v1807_v1 = vrot.slane %v1806_v55, 4  ;;  %v2070_v40 = vrot.slane %v2069_v35, 4  ;;  %v5951_v55 = vld [vmem:[%s6873_s21 + $0x74] sm:$0x1] }
 0x119   : > { %1976 = vrot.lane.b32.xlu1 %v5926_v46, %s9172_s23  ;;  %v2329_v46 = vrot.slane %v2328_v38, 4 }
 0x11a   : > { %1974 = vrot.lane.b32.xlu0 %v5925_v50, %s9172_s23  ;;  %v1792_v50 = vrot.slane %v1790_v39, 4 }
 0x11b   : > { %v6408_v59 = vld [vmem:[#allocation2 + $0x10] sm:$0xf0]  ;;  %v937_v2 = vpop.permute.xlu1 %936 }
 0x11c   : > { %1726 = vst.msk [vmem:[#allocation2 + $0x14] sm:$0xf] %vm664_vm6, %v5892_v57  ;;  %v5869_v7 = vld [vmem:[#allocation2 + $0x10] sm:$0xf]  ;;  %v935_v8 = vpop.permute.xlu0 %934  ;;  %2114 = vrot.lane.b32.xlu2 %v2051_v3, %s9173_s19  ;;  %v2449_v57 = vsel %vm6897_vm5, %v5992_v45, %v2448_v34  ;;  %v1796_v60 = vor.u32 %v1795_v51, %v1792_v50  ;;  %v5973_v34 = vld [vmem:[%s6873_s21 + $0x78] sm:$0xf] }
 0x11d   : > { %1725 = vst.msk [vmem:[#allocation2 + $0x10] sm:$0xf] %vm664_vm6, %v5891_v58  ;;  %v5870_v9 = vor.u32 %v6408_v59, %v5869_v7  ;;  %v2334_v58 = vsel %vm6884_vm3, %v2329_v46, %v2333_v47  ;;  %v5949_v47 = vld [vmem:[%s6873_s21 + $0x6c] sm:$0xe]  ;;  %v2345_v46 = vshll.u32 %v5974_v44, 16  ;;  %v2349_v50 = vshrl.u32 %v5974_v44, 16 }
 0x11e   : > { %954 = vst.msk [vmem:[#allocation2 + $0x1c] sm:$0xf] %vm946_vm9, %v937_v2  ;;  %v1201_v19 = vpop.permute.xlu2 %1200  ;;  %v1797_v3 = vrot.slane %v1796_v60, 4  ;;  %v5957_v54 = vrot.slane %v5949_v47, 9 }
 0x11f   : > { %953 = vst.msk [vmem:[#allocation2 + $0x18] sm:$0xf] %vm946_vm9, %v935_v8  ;;  %5885 = vmatmul.msk.bf16.gmra.mxu1 %vm1629_vm0, %v5870_v9  ;;  %v5914_v8 = vld [vmem:[%s6873_s21 + $0x64] sm:$0xf]  ;;  %v7420_v60 = vrot.slane %v2345_v46, 5  ;;  %v2351_v62 = vrot.slane %v2349_v50, 4 }
 0x120   : > { %1095 = vst.msk [vmem:[#allocation2 + $0x1c] sm:$0xf] %vm1087_vm11, %v1078_v42  ;;  %v1802_v14 = vsel %vm6884_vm3, %v1797_v3, %v1801_v33  ;;  %v1909_v15 = vrot.slane %v5914_v8, 5  ;;  %v5928_v33 = vld [vmem:[%s6873_s21 + $0x70] sm:$0xf]  ;;  %v1817_v8 = vshll.u32 %v5904_v63, 16 }
 0x121   : > { %2198 = vrot.lane.b32.xlu1 %v2176_v10, %s9174_s27  ;;  %v2072_v10 = vshll.u32 %v5938_v5, 16  ;;  %v5917_v50 = vld [vmem:[%s6873_s21 + $0x70] sm:$0xf] }
 0x122   : > { %2116 = vrot.lane.b32.xlu0 %v2061_v11, %s9173_s19  ;;  %v2076_v11 = vshrl.u32 %v5938_v5, 16  ;;  %v1819_v18 = vrot.slane %v1817_v8, 5 }
 0x123   : > { %v1076_v20 = vpop.permute.xlu1 %1075  ;;  %v2074_v16 = vrot.slane %v2072_v10, 5 }
 0x124   : > { %1094 = vst.msk [vmem:[#allocation2 + $0x18] sm:$0xf] %vm1087_vm11, %v1076_v20  ;;  %v1066_v27 = vpop.permute.xlu0 %1065  ;;  %2200 = vrot.lane.b32.xlu2 %v2179_v25, %s9174_s27  ;;  %v2078_v20 = vrot.slane %v2076_v11, 4  ;;  %v1911_v25 = vrot.slane %v1909_v15, 4 }
 0x125   : > { %1089 = vst.msk [vmem:[#allocation2 + $0x4] sm:$0xf] %vm1087_vm11, %v1066_v27  ;;  %v5939_v27 = vld [vmem:[%s6873_s21 + $0x74] sm:$0x1]  ;;  %v2075_v51 = vsel %vm6884_vm3, %v2070_v40, %v2074_v16 }
 0x126   : > { %1179 = vst.msk [vmem:[#allocation2 + $0x18] sm:$0xf] %vm1172_vm12, %v1161_v56  ;;  %v1340_v42 = vpop.permute.xlu2 %1339  ;;  %v1809_v56 = vshll.u32 %v5903_v48, 16  ;;  %v2079_v31 = vor.u32 %v2078_v20, %v2074_v16  ;;  %v2082_v32 = vshll.u32 %v5939_v27, 16  ;;  %v1913_v36 = vsel %vm6897_vm5, %v1911_v25, %v1912_v26  ;;  %v5905_v20 = vld [vmem:[%s6873_s21 + $0x70] sm:$0xf] }
 0x127   : > { %v1827_v26 = vshrl.u32 %v5905_v20, 16  ;;  %v5964_v27 = vld [vmem:[%s6873_s21 + $0x7c] sm:$0xf]  ;;  %v1823_v35 = vshll.u32 %v5905_v20, 16  ;;  %v6416_v20 = vld [vmem:[%s9170_s18 + $0x14] sm:$0xff] }
 0x128   : > { %v1811_v59 = vrot.slane %v1809_v56, 5  ;;  %v2080_v38 = vrot.slane %v2079_v31, 4  ;;  %v2084_v39 = vrot.slane %v2082_v32, 5 }
 0x129   : > { %2249 = vrot.lane.b32.xlu1 %v5962_v28, %s9175_s26  ;;  %v1910_v28 = vsel %vm6897_vm5, %v5921_v17, %v1909_v15  ;;  %v5887_v15 = vld [vmem:[%s6873_s21 + $0x48] sm:$0xf] }
 0x12a   : > { %2247 = vrot.lane.b32.xlu0 %v5961_v30, %s9175_s26  ;;  %v1812_v9 = vsel %vm6884_vm3, %v1807_v1, %v1811_v59  ;;  %v5927_v30 = vld [vmem:[%s6873_s21 + $0x6c] sm:$0xf]  ;;  %v2085_v48 = vsel %vm6884_vm3, %v2080_v38, %v2084_v39  ;;  %v2185_v1 = vrot.slane %v5951_v55, 5  ;;  %v5975_v59 = vld [vmem:[%s6873_s21 + $0x80] sm:$0x1]  ;;  %v2455_v38 = vrot.slane %v5986_v21, 5 }
 0x12b   : > { %v1151_v49 = vpop.permute.xlu1 %1150  ;;  %v2355_v10 = vshll.u32 %v5975_v59, 16 }
 0x12c   : > { %1174 = vst.msk [vmem:[#allocation2 + $0x4] sm:$0xf] %vm1172_vm12, %v1151_v49  ;;  %v1149_v53 = vpop.permute.xlu0 %1148  ;;  %2387 = vrot.lane.b32.xlu2 %v2324_v52, %s9178_s29  ;;  %v2336_v52 = vshrl.u32 %v5973_v34, 16  ;;  %v2457_v47 = vrot.slane %v2455_v38, 4 }
 0x12d   : > { %1173 = vst.msk [vmem:[#allocation2] sm:$0xf] %vm1172_vm12, %v1149_v53  ;;  %v2339_v53 = vshll.u32 %v5973_v34, 16  ;;  %v2357_v16 = vrot.slane %v2355_v10, 5  ;;  %v6011_v34 = vld [vmem:[%s9170_s18 + $0x24] sm:$0x3] }
 0x12e   : > { %1224 = vst.msk [vmem:[#allocation2 + $0x4] sm:$0xf] %vm1222_vm13, %v1201_v19  ;;  %v1354_v0 = vpop.permute.xlu2 %1353 }
 0x12f   : > { %v2341_v3 = vrot.slane %v2339_v53, 5 }
 0x131   : > { %2471 = vrot.lane.b32.xlu1 %v2449_v57, %s9176_s2  ;;  %v5893_v57 = vld [vmem:[%s6873_s21 + $0x6c] sm:$0xf] }
 0x132   : > { %2389 = vrot.lane.b32.xlu0 %v2334_v58, %s9178_s29 }
 0x133   : > { %v1199_v2 = vpop.permute.xlu1 %1198 }
 0x134   : > { %1223 = vst.msk [vmem:[#allocation2] sm:$0xf] %vm1222_vm13, %v1199_v2  ;;  %v1163_v7 = vpop.permute.xlu0 %1162  ;;  %2473 = vrot.lane.b32.xlu2 %v2452_v4, %s9176_s2  ;;  %v2338_v2 = vrot.slane %v2336_v52, 4  ;;  %v5940_v52 = vld [vmem:[%s6873_s21 + $0x78] sm:$0xf] }
 0x135   : > { %1180 = vst.msk [vmem:[#allocation2 + $0x1c] sm:$0xf] %vm1172_vm12, %v1163_v7  ;;  %v1814_v7 = vshrl.u32 %v5904_v63, 16  ;;  %v2087_v63 = vshrl.u32 %v5940_v52, 16 }
 0x136   : > { %1364 = vst.msk [vmem:[#allocation2] sm:$0xf] %vm1363_vm14, %v1340_v42  ;;  %v1437_v19 = vpop.permute.xlu2 %1436  ;;  %v5950_v42 = vld [vmem:[%s6873_s21 + $0x70] sm:$0xf]  ;;  %v2342_v12 = vor.u32 %v2341_v3, %v2338_v2  ;;  %v5918_v3 = vld [vmem:[%s6873_s21 + $0x74] sm:$0x1] }
 0x137   : > { %v2182_v49 = vrot.slane %v5950_v42, 5  ;;  %v1816_v17 = vrot.slane %v1814_v7, 4  ;;  %v5916_v7 = vld [vmem:[%s6873_s21 + $0x6c] sm:$0xe]  ;;  %v1919_v10 = vrot.slane %v5918_v3, 5 }
 0x138   : > { %v2343_v25 = vrot.slane %v2342_v12, 4  ;;  %v2089_v12 = vrot.slane %v2087_v63, 4 }
 0x139   : > { %1847 = vrot.lane.b32.xlu1 %v1812_v9, %s9171_s1  ;;  %v2184_v58 = vrot.slane %v2182_v49, 4  ;;  %v2183_v4 = vsel %vm6897_vm5, %v5957_v54, %v2182_v49  ;;  %v2352_v9 = vor.u32 %v2351_v62, %v7420_v60  ;;  %v1820_v32 = vor.u32 %v1819_v18, %v1816_v17 }
 0x13a   : > { %1845 = vrot.lane.b32.xlu0 %v1802_v14, %s9171_s1  ;;  %v5888_v14 = vld [vmem:[%s6873_s21 + $0x4c] sm:$0xf]  ;;  %v2348_v39 = vsel %vm6884_vm3, %v2343_v25, %v7420_v60  ;;  %v1916_v62 = vrot.slane %v5917_v50, 5 }
 0x13b   : > { %v1213_v24 = vpop.permute.xlu1 %1212  ;;  %v2186_v11 = vsel %vm6897_vm5, %v2184_v58, %v2185_v1  ;;  %v1821_v44 = vrot.slane %v1820_v32, 4  ;;  %v5894_v58 = vld [vmem:[%s6873_s21 + $0x70] sm:$0xf]  ;;  %v5976_v32 = vld [vmem:[%s6873_s21 + $0x84] sm:$0xf] }
 0x13c   : > { %1230 = vst.msk [vmem:[#allocation2 + $0x1c] sm:$0xf] %vm1222_vm13, %v1213_v24  ;;  %v1211_v29 = vpop.permute.xlu0 %1210  ;;  %1929 = vrot.lane.b32.xlu2 %v1910_v28, %s9177_s25 }
 0x13d   : > { %1229 = vst.msk [vmem:[#allocation2 + $0x18] sm:$0xf] %vm1222_vm13, %v1211_v29 }
 0x13e   : > { %1371 = vst.msk [vmem:[#allocation2 + $0x1c] sm:$0xf] %vm1363_vm14, %v1354_v0  ;;  %v7397_v37 = vpop.permute.xlu2 %1839 }
 0x141   : > { %1978 = vrot.lane.b32.xlu1 %v5927_v30, %s9172_s23  ;;  %v5985_v30 = vld [vmem:[%s6873_s21 + $0x78] sm:$0xe] }
 0x142   : > { %1931 = vrot.lane.b32.xlu0 %v1913_v36, %s9177_s25  ;;  %v5993_v40 = vrot.slane %v5985_v30, 9 }
 0x143   : > { %v1352_v41 = vpop.permute.xlu1 %1351 }
 0x144   : > { %1370 = vst.msk [vmem:[#allocation2 + $0x18] sm:$0xf] %vm1363_vm14, %v1352_v41  ;;  %v1342_v45 = vpop.permute.xlu0 %1341  ;;  %1980 = vrot.lane.b32.xlu2 %v5928_v33, %s9172_s23  ;;  %v1829_v41 = vrot.slane %v1827_v26, 4  ;;  %v5906_v33 = vld [vmem:[%s6873_s21 + $0x74] sm:$0x1] }
 0x145   : > { %1365 = vst.msk [vmem:[#allocation2 + $0x4] sm:$0xf] %vm1363_vm14, %v1342_v45  ;;  %v1825_v45 = vrot.slane %v1823_v35, 5  ;;  %v1833_v54 = vshll.u32 %v5906_v33, 16  ;;  %v5930_v33 = vld [vmem:[%s6873_s21 + $0x7c] sm:$0xf] }
 0x146   : > { %1455 = vst.msk [vmem:[#allocation2 + $0x18] sm:$0xf] %vm1448_vm15, %v1437_v19  ;;  %v7415_v56 = vpop.permute.xlu2 %1970  ;;  %v2353_v19 = vrot.slane %v2352_v9, 4  ;;  %v1918_v9 = vrot.slane %v1916_v62, 4 }
 0x147   : > { %v1830_v53 = vor.u32 %v1829_v41, %v1825_v45  ;;  %v1826_v60 = vsel %vm6884_vm3, %v1821_v44, %v1825_v45  ;;  %v2360_v41 = vshrl.u32 %v5976_v32, 16  ;;  %v5954_v44 = vld [vmem:[%s6873_s21 + $0x80] sm:$0x1] }
 0x148   : > { %v2358_v36 = vsel %vm6884_vm3, %v2353_v19, %v2357_v16  ;;  %v1920_v21 = vsel %vm6897_vm5, %v1918_v9, %v1919_v10  ;;  %v6059_v9 = vld [vmem:[%s6873_s21 + $0x90] sm:$0xf] }
 0x149   : > { %2120 = vrot.lane.b32.xlu1 %v2085_v48, %s9173_s19  ;;  %v2682_v48 = vunpack.c.l.b16 %v6011_v34  ;;  %v2362_v50 = vrot.slane %v2360_v41, 4 }
 0x14a   : > { %2118 = vrot.lane.b32.xlu0 %v2075_v51, %s9173_s19  ;;  %v2456_v51 = vsel %vm6897_vm5, %v5993_v40, %v2455_v38 }
 0x14b   : > { %v1427_v0 = vpop.permute.xlu1 %1426 }
 0x14c   : > { %1450 = vst.msk [vmem:[#allocation2 + $0x4] sm:$0xf] %vm1448_vm15, %v1427_v0  ;;  %v1425_v5 = vpop.permute.xlu0 %1424  ;;  %2202 = vrot.lane.b32.xlu2 %v2183_v4, %s9174_s27  ;;  %v2090_v0 = vshll.u32 %v5940_v52, 16  ;;  %v1831_v4 = vrot.slane %v1830_v53, 4 }
 0x14d   : > { %v7427_v6 = vld [vmem:[#allocation2 + $0x18] sm:$0xf]  ;;  %1449 = vst.msk [vmem:[#allocation2] sm:$0xf] %vm1448_vm15, %v1425_v5  ;;  %v1835_v5 = vrot.slane %v1833_v54, 5 }
 0x14e   : > { %1727 = vst.msk [vmem:[#allocation2 + $0x18] sm:$0xf] %vm664_vm6, %v5893_v57  ;;  %v7436_v13 = vpop.permute.xlu2 %2112  ;;  %v2685_v57 = vpack.c.b16 %v2682_v48, %v2682_v48 }
 0x14f   : > { %v1836_v18 = vsel %vm6884_vm3, %v1831_v4, %v1835_v5  ;;  %v5989_v4 = vld [vmem:[%s6873_s21 + $0x88] sm:$0xf]  ;;  %v6060_v5 = vld [vmem:[%s6873_s21 + $0x94] sm:$0xf] }
 0x150   : > { %v2701_v1 = vsel %vm1642_vm10, %v2685_v57, 0 }
 0x151   : > { %2251 = vrot.lane.b32.xlu1 %v5963_v61, %s9175_s26  ;;  %2708 = vmatpush.bf16.msrb.mxu1 %v2701_v1  ;;  %v6417_v61 = vld [vmem:[%s9170_s18 + $0x1c] sm:$0xff] }
 0x152   : > { %2204 = vrot.lane.b32.xlu0 %v2186_v11, %s9174_s27  ;;  %v5941_v11 = vld [vmem:[%s6873_s21 + $0x7c] sm:$0xf] }
 0x153   : > { %v6406_v22 = vld [vmem:[#allocation2] sm:$0xf0]  ;;  %v1838_v24 = vpop.permute.xlu1 %1837  ;;  %v2100_v17 = vshrl.u32 %v5941_v11, 16  ;;  %v2096_v16 = vshll.u32 %v5941_v11, 16  ;;  %v2891_v11 = vshrl.u32 %v6059_v9, 16 }
 0x154   : > { %1722 = vst.msk [vmem:[#allocation2 + $0x4] sm:$0xf] %vm664_vm6, %v5888_v14  ;;  %v5861_v28 = vld [vmem:[#allocation2] sm:$0xf]  ;;  %v1439_v29 = vpop.permute.xlu0 %1438  ;;  %2253 = vrot.lane.b32.xlu2 %v5964_v27, %s9175_s26  ;;  %v2092_v14 = vrot.slane %v2090_v0, 5 }
 0x155   : > { %1721 = vst.msk [vmem:[#allocation2] sm:$0xf] %vm664_vm6, %v5887_v15  ;;  %v5862_v31 = vor.u32 %v6406_v22, %v5861_v28  ;;  %2709 = vmatpush.bf16.msrb.mxu1 %v6417_v61  ;;  %v2102_v25 = vrot.slane %v2100_v17, 4  ;;  %v5942_v27 = vld [vmem:[%s6873_s21 + $0x80] sm:$0x1]  ;;  %v2098_v28 = vrot.slane %v2096_v16, 5 }
 0x156   : > { %1862 = vst.msk [vmem:[#allocation2 + $0x4] sm:$0xf] %vm808_vm7, %v7397_v37  ;;  %v5987_v37 = vld [vmem:[%s6873_s21 + $0x80] sm:$0x1]  ;;  %v7460_v42 = vpop.permute.xlu2 %2243  ;;  %v2093_v22 = vor.u32 %v2092_v14, %v2089_v12  ;;  %v2894_v12 = vshll.u32 %v6059_v9, 16  ;;  %v2900_v17 = vshll.u32 %v6060_v5, 16 }
 0x157   : > { %1861 = vst.msk [vmem:[#allocation2] sm:$0xf] %vm808_vm7, %v1838_v24  ;;  %5883 = vmatmul.msk.bf16.vlgmr.msra.gmra.mxu0 %vm1629_vm0, %v5862_v31  ;;  %v2458_v46 = vrot.slane %v5987_v37, 5  ;;  %v5929_v31 = vld [vmem:[%s6873_s21 + $0x78] sm:$0xf]  ;;  %v2103_v35 = vor.u32 %v2102_v25, %v2098_v28  ;;  %v2363_v37 = vshll.u32 %v5976_v32, 16 }
 0x158   : > { %1456 = vst.msk [vmem:[#allocation2 + $0x1c] sm:$0xf] %vm1448_vm15, %v1439_v29  ;;  %v5953_v29 = vld [vmem:[%s6873_s21 + $0x7c] sm:$0xf] }
 0x159   : > { %2393 = vrot.lane.b32.xlu1 %v2358_v36, %s9178_s29  ;;  %v2459_v2 = vsel %vm6897_vm5, %v2457_v47, %v2458_v46  ;;  %2710 = vmatpush.bf16.msrb.mxu1 %v6416_v20  ;;  %v2106_v36 = vshll.u32 %v5942_v27, 16  ;;  %v2189_v40 = vrot.slane %v5953_v29, 5  ;;  %v2104_v45 = vrot.slane %v2103_v35, 4  ;;  %v5952_v47 = vld [vmem:[%s6873_s21 + $0x78] sm:$0xe] }
 0x15a   : > { %2391 = vrot.lane.b32.xlu0 %v2348_v39, %s9178_s29  ;;  %v5977_v46 = vld [vmem:[%s6873_s21 + $0x88] sm:$0xf]  ;;  %v5958_v53 = vrot.slane %v5952_v47, 9  ;;  %v6051_v27 = vld [vmem:[%s6873_s21 + $0x90] sm:$0xf]  ;;  %v2902_v29 = vrot.slane %v2900_v17, 5 }
 0x15b   : > { %v1924_v49 = vpop.permute.xlu1 %1923  ;;  %v2108_v34 = vrot.slane %v2106_v36, 5  ;;  %v2373_v54 = vshrl.u32 %v5977_v46, 16  ;;  %v6061_v36 = vld [vmem:[%s6873_s21 + $0x98] sm:$0x1] }
 0x15c   : > { %1946 = vst.msk [vmem:[#allocation2 + $0x4] sm:$0xf] %vm896_vm8, %v1924_v49  ;;  %v1922_v55 = vpop.permute.xlu0 %1921  ;;  %2475 = vrot.lane.b32.xlu2 %v2456_v51, %s9176_s2  ;;  %v2192_v49 = vrot.slane %v5954_v44, 5  ;;  %v2365_v51 = vrot.slane %v2363_v37, 5  ;;  %v2190_v63 = vsel %vm6897_vm5, %v5958_v53, %v2189_v40  ;;  %v6071_v44 = vld [vmem:[%s6873_s21 + $0x90] sm:$0xe] }
 0x15d   : > { %1945 = vst.msk [vmem:[#allocation2] sm:$0xf] %vm896_vm8, %v1922_v55  ;;  %v2109_v55 = vsel %vm6884_vm3, %v2104_v45, %v2108_v34  ;;  %v2375_v0 = vrot.slane %v2373_v54, 4  ;;  %v2910_v34 = vshll.u32 %v6061_v36, 16 }
 0x15e   : > { %1994 = vst.msk [vmem:[#allocation2] sm:$0xf] %vm946_vm9, %v7415_v56  ;;  %v7487_v8 = vpop.permute.xlu2 %2385 }
 0x15f   : > { %v6409_v59 = vld [vmem:[#allocation2 + $0x18] sm:$0xf0]  ;;  %v2912_v53 = vrot.slane %v2910_v34, 5 }
 0x160   : > { %1728 = vst.msk [vmem:[#allocation2 + $0x1c] sm:$0xf] %vm664_vm6, %v5894_v58  ;;  %v5874_v56 = vor.u32 %v6409_v59, %v7427_v6  ;;  %v5922_v6 = vrot.slane %v5916_v7, 9  ;;  %v2369_v58 = vshll.u32 %v5977_v46, 16  ;;  %v5978_v59 = vld [vmem:[%s6873_s21 + $0x8c] sm:$0x1] }
 0x161   : > { %1849 = vrot.lane.b32.xlu1 %v1826_v60, %s9171_s1  ;;  %v5965_v7 = vld [vmem:[%s6873_s21 + $0x84] sm:$0xf]  ;;  %v2379_v61 = vshll.u32 %v5978_v59, 16 }
 0x162   : > { %5886 = vmatmul.msk.bf16.gmra.mxu1 %vm1629_vm0, %v5874_v56  ;;  %2477 = vrot.lane.b32.xlu0 %v2459_v2, %s9176_s2  ;;  %v1917_v24 = vsel %vm6897_vm5, %v5922_v6, %v1916_v62  ;;  %v2366_v62 = vor.u32 %v2365_v51, %v2362_v50  ;;  %v2371_v2 = vrot.slane %v2369_v58, 5  ;;  %v2462_v6 = vrot.slane %v5989_v4, 5  ;;  %v6095_v58 = vld [vmem:[%s6873_s21 + $0x9c] sm:$0xf] }
 0x163   : > { %v2111_v15 = vpop.permute.xlu1 %2110  ;;  %v2381_v20 = vrot.slane %v2379_v61, 5  ;;  %v6083_v50 = vrot.slane %v6071_v44, 9 }
 0x164   : > { %2134 = vst.msk [vmem:[#allocation2] sm:$0xf] %vm1087_vm11, %v2111_v15  ;;  %v1973_v19 = vpop.permute.xlu0 %1972  ;;  %1851 = vrot.lane.b32.xlu2 %v1836_v18, %s9171_s1  ;;  %v2367_v3 = vrot.slane %v2366_v62, 4  ;;  %v5966_v15 = vld [vmem:[%s6873_s21 + $0x88] sm:$0xf]  ;;  %v2904_v18 = vshrl.u32 %v6060_v5, 16 }
 0x165   : > { %1995 = vst.msk [vmem:[#allocation2 + $0x4] sm:$0xf] %vm946_vm9, %v1973_v19  ;;  %v5990_v19 = vld [vmem:[%s6873_s21 + $0x8c] sm:$0x1]  ;;  %v3164_v62 = vshrl.u32 %v6095_v58, 16 }
 0x166   : > { %2135 = vst.msk [vmem:[#allocation2 + $0x4] sm:$0xf] %vm1087_vm11, %v7436_v13  ;;  %v1842_v26 = vpop.permute.xlu2 %1841  ;;  %v2094_v13 = vrot.slane %v2093_v22, 4  ;;  %v2372_v14 = vsel %vm6884_vm3, %v2367_v3, %v2371_v2  ;;  %v2896_v22 = vrot.slane %v2894_v12, 5 }
 0x167   : > { %1863 = vst.msk [vmem:[#allocation2 + $0x8] sm:$0xf] %vm808_vm7, %v1842_v26  ;;  %v6052_v26 = vld [vmem:[%s6873_s21 + $0x94] sm:$0xf] }
 0x168   : > { %v2099_v39 = vsel %vm6884_vm3, %v2094_v13, %v2098_v28  ;;  %v2464_v28 = vrot.slane %v2462_v6, 4  ;;  %v2465_v13 = vrot.slane %v5990_v19, 5  ;;  %v6107_v19 = vld [vmem:[%s6873_s21 + $0x9c] sm:$0xe] }
 0x169   : > { %1935 = vrot.lane.b32.xlu1 %v1920_v21, %s9177_s25  ;;  %v2893_v21 = vrot.slane %v2891_v11, 4 }
 0x16a   : > { %1933 = vrot.lane.b32.xlu0 %v1917_v24, %s9177_s25  ;;  %v5988_v24 = vld [vmem:[%s6873_s21 + $0x84] sm:$0xe] }
 0x16b   : > { %v2197_v30 = vpop.permute.xlu1 %2196  ;;  %v5994_v35 = vrot.slane %v5988_v24, 9 }
 0x16c   : > { %2219 = vst.msk [vmem:[#allocation2 + $0x4] sm:$0xf] %vm1172_vm12, %v2197_v30  ;;  %v2195_v38 = vpop.permute.xlu0 %2194  ;;  %1982 = vrot.lane.b32.xlu2 %v5929_v31, %s9172_s23  ;;  %v2906_v30 = vrot.slane %v2904_v18, 4 }
 0x16d   : > { %2218 = vst.msk [vmem:[#allocation2] sm:$0xf] %vm1172_vm12, %v2195_v38  ;;  %v2463_v47 = vsel %vm6897_vm5, %v5994_v35, %v2462_v6  ;;  %v6087_v6 = vld [vmem:[%s6873_s21 + $0x9c] sm:$0xf] }
 0x16e   : > { %2267 = vst.msk [vmem:[#allocation2] sm:$0xf] %vm1222_vm13, %v7460_v42  ;;  %v7527_v48 = vpop.permute.xlu2 %1927  ;;  %v2191_v42 = vrot.slane %v2189_v40, 4  ;;  %v2907_v45 = vor.u32 %v2906_v30, %v2902_v29 }
 0x170   : > { %v2193_v60 = vsel %vm6897_vm5, %v2191_v42, %v2192_v49  ;;  %v6072_v42 = vld [vmem:[%s6873_s21 + $0x94] sm:$0xf] }
 0x171   : > { %2122 = vrot.lane.b32.xlu1 %v2099_v39, %s9173_s19  ;;  %v2897_v39 = vor.u32 %v2896_v22, %v2893_v21  ;;  %v3044_v51 = vrot.slane %v6072_v42, 5  ;;  %v6119_v22 = vrot.slane %v6107_v19, 9  ;;  %v6133_v42 = vld [vmem:[%s6873_s21 + $0xb0] sm:$0x1] }
 0x172   : > { %1984 = vrot.lane.b32.xlu0 %v5930_v33, %s9172_s23  ;;  %v2466_v33 = vsel %vm6897_vm5, %v2464_v28, %v2465_v13  ;;  %v6145_v19 = vld [vmem:[%s6873_s21 + $0xb0] sm:$0x1] }
 0x173   : > { %v2384_v52 = vpop.permute.xlu1 %2383  ;;  %v2898_v49 = vrot.slane %v2897_v39, 4  ;;  %v3046_v4 = vrot.slane %v3044_v51, 4 }
 0x174   : > { %2407 = vst.msk [vmem:[#allocation2] sm:$0xf] %vm1363_vm14, %v2384_v52  ;;  %v2246_v57 = vpop.permute.xlu0 %2245  ;;  %2124 = vrot.lane.b32.xlu2 %v2109_v55, %s9173_s19  ;;  %v2908_v52 = vrot.slane %v2907_v45, 4 }
 0x175   : > { %2268 = vst.msk [vmem:[#allocation2 + $0x4] sm:$0xf] %vm1222_vm13, %v2246_v57  ;;  %v2903_v55 = vsel %vm6884_vm3, %v2898_v49, %v2902_v29  ;;  %v6096_v57 = vld [vmem:[%s6873_s21 + $0xa0] sm:$0xf]  ;;  %v6131_v29 = vld [vmem:[%s6873_s21 + $0xa8] sm:$0xf] }
 0x176   : > { %2408 = vst.msk [vmem:[#allocation2 + $0x4] sm:$0xf] %vm1363_vm14, %v7487_v8  ;;  %v7543_v1 = vpop.permute.xlu2 %2114  ;;  %v2376_v8 = vor.u32 %v2375_v0, %v2371_v2  ;;  %v3045_v0 = vsel %vm6897_vm5, %v6083_v50, %v3044_v51  ;;  %v2913_v59 = vsel %vm6884_vm3, %v2908_v52, %v2912_v53  ;;  %v3173_v2 = vshll.u32 %v6096_v57, 16  ;;  %v6063_v49 = vld [vmem:[%s6873_s21 + $0xa0] sm:$0xf] }
 0x177   : > { %v3177_v3 = vshrl.u32 %v6096_v57, 16  ;;  %v3440_v35 = vshll.u32 %v6131_v29, 16  ;;  %v6062_v51 = vld [vmem:[%s6873_s21 + $0x9c] sm:$0xf] }
 0x178   : > { %v2377_v16 = vrot.slane %v2376_v8, 4 }
 0x179   : > { %2208 = vrot.lane.b32.xlu1 %v2193_v60, %s9174_s27  ;;  %v3179_v61 = vrot.slane %v3177_v3, 4  ;;  %v3442_v44 = vrot.slane %v3440_v35, 5 }
 0x17a   : > { %2206 = vrot.lane.b32.xlu0 %v2190_v63, %s9174_s27  ;;  %v2382_v38 = vsel %vm6884_vm3, %v2377_v16, %v2381_v20  ;;  %v3167_v63 = vshll.u32 %v6095_v58, 16  ;;  %v6108_v16 = vld [vmem:[%s6873_s21 + $0xa0] sm:$0xf]  ;;  %v3456_v58 = vshll.u32 %v6133_v42, 16 }
 0x17b   : > { %v2470_v56 = vpop.permute.xlu1 %2469  ;;  %v3317_v24 = vrot.slane %v6108_v16, 5  ;;  %v6221_v42 = vld [vmem:[%s6873_s21 + $0xe0] sm:$0x1] }
 0x17c   : > { %2492 = vst.msk [vmem:[#allocation2 + $0x4] sm:$0xf] %vm1448_vm15, %v2470_v56  ;;  %v2468_v10 = vpop.permute.xlu0 %2467  ;;  %2255 = vrot.lane.b32.xlu2 %v5965_v7, %s9175_s26  ;;  %v3166_v56 = vrot.slane %v3164_v62, 4  ;;  %v3169_v7 = vrot.slane %v3167_v63, 5  ;;  %v6124_v62 = vld [vmem:[%s6873_s21 + $0xac] sm:$0xf] }
 0x17d   : > { %2491 = vst.msk [vmem:[#allocation2] sm:$0xf] %vm1448_vm15, %v2468_v10  ;;  %v6097_v10 = vld [vmem:[%s6873_s21 + $0xa4] sm:$0x1]  ;;  %v3318_v39 = vsel %vm6897_vm5, %v6119_v22, %v3317_v24  ;;  %v2915_v63 = vshrl.u32 %v6062_v51, 16 }
 0x17e   : > { %v7560_v25 = vpop.permute.xlu2 %2200  ;;  %v3170_v12 = vor.u32 %v3169_v7, %v3166_v56  ;;  %v3183_v18 = vshll.u32 %v6097_v10, 16  ;;  %v6053_v56 = vld [vmem:[%s6873_s21 + $0x9c] sm:$0xf] }
 0x17f   : > { %v2917_v10 = vrot.slane %v2915_v63, 4 }
 0x180   : > { %v3171_v20 = vrot.slane %v3170_v12, 4 }
 0x181   : > { %2395 = vrot.lane.b32.xlu1 %v2372_v14, %s9178_s29 }
 0x182   : > { %2257 = vrot.lane.b32.xlu0 %v5966_v15, %s9175_s26  ;;  %v6088_v15 = vld [vmem:[%s6873_s21 + $0xa0] sm:$0xf] }
 0x183   : > { %v6412_v31 = vld [vmem:[#allocation2] sm:$0xf0]  ;;  %v1926_v32 = vpop.permute.xlu1 %1925 }
 0x184   : > { %2871 = vst.msk [vmem:[#allocation2 + $0x4] sm:$0xf] %vm664_vm6, %v6052_v26  ;;  %v6014_v40 = vld [vmem:[#allocation2] sm:$0xf]  ;;  %v1844_v41 = vpop.permute.xlu0 %1843  ;;  %2397 = vrot.lane.b32.xlu2 %v2382_v38, %s9178_s29 }
 0x185   : > { %2870 = vst.msk [vmem:[#allocation2] sm:$0xf] %vm664_vm6, %v6051_v27  ;;  %v6015_v37 = vor.u32 %v6412_v31, %v6014_v40  ;;  %v6132_v27 = vld [vmem:[%s6873_s21 + $0xac] sm:$0xf]  ;;  %v6109_v31 = vld [vmem:[%s6873_s21 + $0xa4] sm:$0x1] }
 0x186   : > { %1947 = vst.msk [vmem:[#allocation2 + $0x8] sm:$0xf] %vm896_vm8, %v1926_v32  ;;  %v7583_v46 = vpop.permute.xlu2 %2387  ;;  %v3437_v32 = vshrl.u32 %v6131_v29, 16  ;;  %v3446_v36 = vshll.u32 %v6132_v27, 16  ;;  %v3450_v38 = vshrl.u32 %v6132_v27, 16 }
 0x187   : > { %1864 = vst.msk [vmem:[#allocation2 + $0xc] sm:$0xf] %vm808_vm7, %v1844_v41  ;;  %6036 = vmatmul.msk.bf16.vlgmr.msrb.gmra.mxu1 %vm1629_vm0, %v6015_v37  ;;  %v3319_v41 = vrot.slane %v3317_v24, 4  ;;  %v3320_v37 = vrot.slane %v6109_v31, 5 }
 0x188   : > { %1948 = vst.msk [vmem:[#allocation2 + $0xc] sm:$0xf] %vm896_vm8, %v7527_v48  ;;  %v6073_v48 = vld [vmem:[%s6873_s21 + $0x98] sm:$0x1]  ;;  %v3448_v34 = vrot.slane %v3446_v36, 5 }
 0x189   : > { %2481 = vrot.lane.b32.xlu1 %v2466_v33, %s9176_s2  ;;  %v3047_v5 = vrot.slane %v6073_v48, 5  ;;  %v3439_v33 = vrot.slane %v3437_v32, 4  ;;  %v3321_v50 = vsel %vm6897_vm5, %v3319_v41, %v3320_v37  ;;  %v2928_v48 = vshrl.u32 %v6063_v49, 16 }
 0x18a   : > { %2479 = vrot.lane.b32.xlu0 %v2463_v47, %s9176_s2  ;;  %v3452_v47 = vrot.slane %v3450_v38, 4  ;;  %v3593_v32 = vrot.slane %v6145_v19, 5 }
 0x18b   : > { %v1977_v54 = vpop.permute.xlu1 %1976  ;;  %v3048_v11 = vsel %vm6897_vm5, %v3046_v4, %v3047_v5  ;;  %v3443_v52 = vor.u32 %v3442_v44, %v3439_v33 }
 0x18c   : > { %1997 = vst.msk [vmem:[#allocation2 + $0xc] sm:$0xf] %vm946_vm9, %v1977_v54  ;;  %v1975_v60 = vpop.permute.xlu0 %1974  ;;  %2986 = vrot.lane.b32.xlu2 %v2903_v55, %s9171_s1  ;;  %v6143_v54 = vld [vmem:[%s6873_s21 + $0xa8] sm:$0xe]  ;;  %v6144_v55 = vld [vmem:[%s6873_s21 + $0xac] sm:$0xf]  ;;  %v3453_v57 = vor.u32 %v3452_v47, %v3448_v34 }
 0x18d   : > { %1996 = vst.msk [vmem:[#allocation2 + $0x8] sm:$0xf] %vm946_vm9, %v1975_v60  ;;  %v2924_v60 = vshll.u32 %v6063_v49, 16  ;;  %v6155_v3 = vrot.slane %v6143_v54, 9  ;;  %v3590_v4 = vrot.slane %v6144_v55, 5 }
 0x18e   : > { %2136 = vst.msk [vmem:[#allocation2 + $0x8] sm:$0xf] %vm1087_vm11, %v7543_v1  ;;  %v7601_v8 = vpop.permute.xlu2 %2473  ;;  %v3175_v1 = vrot.slane %v3173_v2, 5  ;;  %v3444_v2 = vrot.slane %v3443_v52, 4  ;;  %v3454_v7 = vrot.slane %v3453_v57, 4 }
 0x18f   : > { %v3591_v24 = vsel %vm6897_vm5, %v6155_v3, %v3590_v4  ;;  %v3592_v31 = vrot.slane %v3590_v4, 4  ;;  %v6233_v4 = vld [vmem:[%s6873_s21 + $0xe0] sm:$0x1] }
 0x190   : > { %v3180_v17 = vor.u32 %v3179_v61, %v3175_v1  ;;  %v3176_v13 = vsel %vm6884_vm3, %v3171_v20, %v3175_v1  ;;  %v2926_v1 = vrot.slane %v2924_v60, 5  ;;  %v2930_v61 = vrot.slane %v2928_v48, 4 }
 0x191   : > { %3070 = vrot.lane.b32.xlu1 %v3045_v0, %s9177_s25  ;;  %v2918_v0 = vshll.u32 %v6062_v51, 16  ;;  %v3594_v44 = vsel %vm6897_vm5, %v3592_v31, %v3593_v32  ;;  %v6075_v51 = vld [vmem:[%s6873_s21 + $0xa0] sm:$0xf]  ;;  %v6100_v31 = vld [vmem:[%s6873_s21 + $0xb0] sm:$0x1] }
 0x192   : > { %2988 = vrot.lane.b32.xlu0 %v2913_v59, %s9171_s1  ;;  %v3181_v26 = vrot.slane %v3180_v17, 4  ;;  %v6123_v59 = vld [vmem:[%s6873_s21 + $0xa8] sm:$0xf]  ;;  %v6219_v17 = vld [vmem:[%s6873_s21 + $0xd8] sm:$0xf]  ;;  %v3051_v57 = vrot.slane %v6075_v51, 5 }
 0x193   : > { %v2199_v9 = vpop.permute.xlu1 %2198  ;;  %v4003_v16 = vshrl.u32 %v6219_v17, 16  ;;  %v4006_v20 = vshll.u32 %v6219_v17, 16  ;;  %v6089_v32 = vld [vmem:[%s6873_s21 + $0xa8] sm:$0xf] }
 0x194   : > { %2220 = vst.msk [vmem:[#allocation2 + $0x8] sm:$0xf] %vm1172_vm12, %v2199_v9  ;;  %v2117_v14 = vpop.permute.xlu0 %2116  ;;  %3072 = vrot.lane.b32.xlu2 %v3048_v11, %s9177_s25  ;;  %v6064_v9 = vld [vmem:[%s6873_s21 + $0xa4] sm:$0x1]  ;;  %v2920_v11 = vrot.slane %v2918_v0, 5 }
 0x195   : > { %2137 = vst.msk [vmem:[#allocation2 + $0xc] sm:$0xf] %vm1087_vm11, %v2117_v14  ;;  %v2934_v27 = vshll.u32 %v6064_v9, 16  ;;  %v4005_v35 = vrot.slane %v4003_v16, 4  ;;  %v4008_v36 = vrot.slane %v4006_v20, 5 }
 0x196   : > { %2221 = vst.msk [vmem:[#allocation2 + $0xc] sm:$0xf] %vm1172_vm12, %v7560_v25  ;;  %v7617_v21 = vpop.permute.xlu2 %1929  ;;  %v3185_v25 = vrot.slane %v3183_v18, 5 }
 0x198   : > { %v3186_v40 = vsel %vm6884_vm3, %v3181_v26, %v3185_v25  ;;  %v2931_v25 = vor.u32 %v2930_v61, %v2926_v1 }
 0x199   : > { %3121 = vrot.lane.b32.xlu1 %v6088_v15, %s9172_s23  ;;  %v3449_v15 = vsel %vm6884_vm3, %v3444_v2, %v3448_v34  ;;  %v4009_v34 = vor.u32 %v4008_v36, %v4005_v35  ;;  %v6255_v35 = vld [vmem:[%s6873_s21 + $0xe4] sm:$0xf] }
 0x19a   : > { %3119 = vrot.lane.b32.xlu0 %v6087_v6, %s9172_s23  ;;  %v6220_v6 = vld [vmem:[%s6873_s21 + $0xdc] sm:$0xf] }
 0x19b   : > { %v2250_v28 = vpop.permute.xlu1 %2249  ;;  %v4012_v29 = vshll.u32 %v6220_v6, 16  ;;  %v4010_v54 = vrot.slane %v4009_v34, 4  ;;  %v6090_v34 = vld [vmem:[%s6873_s21 + $0xac] sm:$0xf] }
 0x19c   : > { %2270 = vst.msk [vmem:[#allocation2 + $0xc] sm:$0xf] %vm1222_vm13, %v2250_v28  ;;  %v2248_v30 = vpop.permute.xlu0 %2247  ;;  %3259 = vrot.lane.b32.xlu2 %v3176_v13, %s9173_s19  ;;  %v2921_v13 = vor.u32 %v2920_v11, %v2917_v10  ;;  %v4159_v10 = vrot.slane %v6233_v4, 5 }
 0x19d   : > { %2269 = vst.msk [vmem:[#allocation2 + $0x8] sm:$0xf] %vm1222_vm13, %v2248_v30  ;;  %v4016_v30 = vshrl.u32 %v6220_v6, 16  ;;  %v1711_v6 = vld [vmem:[%s9095_s7] sm:$0x3] }
 0x19e   : > { %2409 = vst.msk [vmem:[#allocation2 + $0x8] sm:$0xf] %vm1363_vm14, %v7583_v46  ;;  %v7635_v45 = vpop.permute.xlu2 %1980  ;;  %v2922_v41 = vrot.slane %v2921_v13, 4 }
 0x19f   : > { %v4018_v33 = vrot.slane %v4016_v30, 4 }
 0x1a1   : > { %3343 = vrot.lane.b32.xlu1 %v3318_v39, %s9174_s27  ;;  %v2932_v39 = vrot.slane %v2931_v25, 4 }
 0x1a2   : > { %3261 = vrot.lane.b32.xlu0 %v3186_v40, %s9173_s19  ;;  %v2936_v40 = vrot.slane %v2934_v27, 5 }
 0x1a3   : > { %v2472_v46 = vpop.permute.xlu1 %2471 }
 0x1a4   : > { %2493 = vst.msk [vmem:[#allocation2 + $0x8] sm:$0xf] %vm1448_vm15, %v2472_v46  ;;  %v2390_v53 = vpop.permute.xlu0 %2389  ;;  %3345 = vrot.lane.b32.xlu2 %v3321_v50, %s9174_s27  ;;  %v2937_v49 = vsel %vm6884_vm3, %v2932_v39, %v2936_v40  ;;  %v2927_v46 = vsel %vm6884_vm3, %v2922_v41, %v2926_v1  ;;  %v6074_v50 = vld [vmem:[%s6873_s21 + $0x9c] sm:$0xe]  ;;  %v4276_v39 = vshrl.u32 %v6255_v35, 16  ;;  %v4279_v40 = vshll.u32 %v6255_v35, 16  ;;  %v7742_v41 = vpop.f32.mrf.mxu1 }
 0x1a5   : > { %2410 = vst.msk [vmem:[#allocation2 + $0xc] sm:$0xf] %vm1363_vm14, %v2390_v53  ;;  %v4022_v53 = vshll.u32 %v6221_v42, 16 }
 0x1a6   : > { %2494 = vst.msk [vmem:[#allocation2 + $0xc] sm:$0xf] %vm1448_vm15, %v7601_v8  ;;  %v7653_v5 = vpop.permute.xlu2 %2202  ;;  %v3458_v8 = vrot.slane %v3456_v58, 5  ;;  %v6232_v58 = vld [vmem:[%s6873_s21 + $0xdc] sm:$0xf] }
 0x1a7   : > { %v4156_v2 = vrot.slane %v6232_v58, 5 }
 0x1a8   : > { %v3459_v26 = vsel %vm6884_vm3, %v3454_v7, %v3458_v8  ;;  %v6231_v7 = vld [vmem:[%s6873_s21 + $0xd8] sm:$0xe]  ;;  %v3053_v8 = vrot.slane %v3051_v57, 4 }
 0x1a9   : > { %3394 = vrot.lane.b32.xlu1 %v6124_v62, %s9175_s26  ;;  %v4024_v62 = vrot.slane %v4022_v53, 5  ;;  %v4158_v9 = vrot.slane %v4156_v2, 4 }
 0x1aa   : > { %3392 = vrot.lane.b32.xlu0 %v6123_v59, %s9175_s26  ;;  %v6076_v59 = vld [vmem:[%s6873_s21 + $0xa4] sm:$0x1] }
 0x1ab   : > { %v6018_v12 = vld [vmem:[#allocation2 + $0x8] sm:$0xf]  ;;  %v1848_v14 = vpop.permute.xlu1 %1847  ;;  %v3054_v1 = vrot.slane %v6076_v59, 5  ;;  %v4160_v19 = vsel %vm6897_vm5, %v4158_v9, %v4159_v10  ;;  %v6056_v10 = vld [vmem:[%s6873_s21 + $0xac] sm:$0xf] }
 0x1ac   : > { %2872 = vst.msk [vmem:[#allocation2 + $0x8] sm:$0xf] %vm664_vm6, %v6053_v56  ;;  %v1846_v18 = vpop.permute.xlu0 %1845  ;;  %3532 = vrot.lane.b32.xlu2 %v3449_v15, %s9178_s29  ;;  %v6098_v15 = vld [vmem:[%s6873_s21 + $0xa8] sm:$0xf] }
 0x1ad   : > { %v6413_v22 = vld [vmem:[#allocation2 + $0x8] sm:$0xf0]  ;;  %1866 = vst.msk [vmem:[#allocation2 + $0x14] sm:$0xf] %vm808_vm7, %v1848_v14 }
 0x1ae   : > { %1865 = vst.msk [vmem:[#allocation2 + $0x10] sm:$0xf] %vm808_vm7, %v1846_v18  ;;  %v6019_v28 = vor.u32 %v6413_v22, %v6018_v12  ;;  %v7675_v38 = vpop.permute.xlu2 %2253  ;;  %v3055_v12 = vsel %vm6897_vm5, %v3053_v8, %v3054_v1  ;;  %v6099_v14 = vld [vmem:[%s6873_s21 + $0xac] sm:$0xf]  ;;  %v2830_v18 = vsel %vm1642_vm10, %v1711_v6, 0  ;;  %v3188_v22 = vshrl.u32 %v6098_v15, 16  ;;  %v1662_v8 = vpop.f32.mrf.mxu1 }
 0x1af   : > { %1949 = vst.msk [vmem:[#allocation2 + $0x10] sm:$0xf] %vm896_vm8, %v7617_v21  ;;  %v4014_v21 = vrot.slane %v4012_v29, 5  ;;  %2839 = vmatpush.bf16.msra.mxu3 %v2830_v18  ;;  %v3197_v16 = vshll.u32 %v6099_v14, 16  ;;  %v3201_v20 = vshrl.u32 %v6099_v14, 16 }
 0x1b0   : > { %6037 = vmatmul.msk.bf16.gmra.mxu1 %vm1629_vm0, %v6019_v28  ;;  %v3190_v13 = vrot.slane %v3188_v22, 4  ;;  %v6112_v22 = vld [vmem:[%s6873_s21 + $0xb0] sm:$0x1] }
 0x1b1   : > { %3616 = vrot.lane.b32.xlu1 %v3591_v24, %s9176_s2  ;;  %v4019_v52 = vor.u32 %v4018_v33, %v4014_v21  ;;  %v4015_v63 = vsel %vm6884_vm3, %v4010_v54, %v4014_v21  ;;  %v3191_v24 = vshll.u32 %v6098_v15, 16  ;;  %v3199_v27 = vrot.slane %v3197_v16, 5 }
 0x1b2   : > { %3534 = vrot.lane.b32.xlu0 %v3459_v26, %s9178_s29  ;;  %v3203_v28 = vrot.slane %v3201_v20, 4  ;;  %v3207_v33 = vshll.u32 %v6100_v31, 16  ;;  %v6269_v31 = vld [vmem:[%s6873_s21 + $0xec] sm:$0x1]  ;;  %v3327_v35 = vrot.slane %v6112_v22, 5 }
 0x1b3   : > { %v1979_v37 = vpop.permute.xlu1 %1978  ;;  %v4020_v48 = vrot.slane %v4019_v52, 4  ;;  %v3193_v29 = vrot.slane %v3191_v24, 5 }
 0x1b4   : > { %1998 = vst.msk [vmem:[#allocation2 + $0x10] sm:$0xf] %vm946_vm9, %v1979_v37  ;;  %v1932_v47 = vpop.permute.xlu0 %1931  ;;  %3618 = vrot.lane.b32.xlu2 %v3594_v44, %s9176_s2  ;;  %v6247_v37 = vld [vmem:[%s6873_s21 + $0xe4] sm:$0xf]  ;;  %v3204_v21 = vor.u32 %v3203_v28, %v3199_v27  ;;  %v3209_v52 = vrot.slane %v3207_v33, 5 }
 0x1b5   : > { %1950 = vst.msk [vmem:[#allocation2 + $0x14] sm:$0xf] %vm896_vm8, %v1932_v47  ;;  %v4025_v56 = vsel %vm6884_vm3, %v4020_v48, %v4024_v62  ;;  %v3194_v44 = vor.u32 %v3193_v29, %v3190_v13  ;;  %v6257_v62 = vld [vmem:[%s6873_s21 + $0xec] sm:$0x1] }
 0x1b6   : > { %1999 = vst.msk [vmem:[#allocation2 + $0x14] sm:$0xf] %vm946_vm9, %v7635_v45  ;;  %v7693_v55 = vpop.permute.xlu2 %2475  ;;  %v6084_v45 = vrot.slane %v6074_v50, 9  ;;  %v3205_v51 = vrot.slane %v3204_v21, 4  ;;  %v4432_v21 = vrot.slane %v6269_v31, 5 }
 0x1b7   : > { %v3195_v54 = vrot.slane %v3194_v44, 4 }
 0x1b8   : > { %v3052_v3 = vsel %vm6897_vm5, %v6084_v45, %v3051_v57  ;;  %v6248_v57 = vld [vmem:[%s6873_s21 + $0xe8] sm:$0xf] }
 0x1b9   : > { %2992 = vrot.lane.b32.xlu1 %v2937_v49, %s9171_s1  ;;  %v4278_v49 = vrot.slane %v4276_v39, 4  ;;  %v3200_v59 = vsel %vm6884_vm3, %v3195_v54, %v3199_v27 }
 0x1ba   : > { %2990 = vrot.lane.b32.xlu0 %v2927_v46, %s9171_s1  ;;  %v4281_v46 = vrot.slane %v4279_v40, 5 }
 0x1bb   : > { %v2121_v60 = vpop.permute.xlu1 %2120 }
 0x1bc   : > { %2139 = vst.msk [vmem:[#allocation2 + $0x14] sm:$0xf] %vm1087_vm11, %v2121_v60  ;;  %v2119_v0 = vpop.permute.xlu0 %2118  ;;  %4098 = vrot.lane.b32.xlu2 %v4015_v63, %s9171_s1  ;;  %v4282_v58 = vor.u32 %v4281_v46, %v4278_v49  ;;  %v7760_v63 = vld [vmem:[%s9179_s17] ss:$0 sm:$0xff]  ;;  %v6134_v46 = vld [vmem:[%s6873_s21 + $0xb4] sm:$0xf] }
 0x1bd   : > { %2138 = vst.msk [vmem:[#allocation2 + $0x10] sm:$0xf] %vm1087_vm11, %v2119_v0  ;;  %v3210_v0 = vsel %vm6884_vm3, %v3205_v51, %v3209_v52  ;;  %v1682_v51 = vmul.f32 %v7760_v63, %v1662_v8 }
 0x1be   : > { %2222 = vst.msk [vmem:[#allocation2 + $0x10] sm:$0xf] %vm1172_vm12, %v7653_v5  ;;  %v1852_v61 = vpop.permute.xlu2 %1851  ;;  %v6243_v5 = vrot.slane %v6231_v7, 9  ;;  %v4283_v7 = vrot.slane %v4282_v58, 4  ;;  %v1681_v58 = vmul.f32 %v7760_v63, %v7742_v41  ;;  %v6125_v41 = vld [vmem:[%s6873_s21 + $0xb4] sm:$0xf] }
 0x1bf   : > { %1868 = vst.msk [vmem:[#allocation2 + $0x1c] sm:$0xf] %vm808_vm7, %v1852_v61 }
 0x1c0   : > { %v4157_v26 = vsel %vm6897_vm5, %v6243_v5, %v4156_v2  ;;  %v6110_v2 = vld [vmem:[%s6873_s21 + $0xa8] sm:$0xe] }
 0x1c1   : > { %3074 = vrot.lane.b32.xlu1 %v3052_v3, %s9177_s25  ;;  %v6111_v3 = vld [vmem:[%s6873_s21 + $0xac] sm:$0xf]  ;;  %v6120_v5 = vrot.slane %v6110_v2, 9  ;;  %v6292_v2 = vld [vmem:[%s6873_s21 + $0xf4] sm:$0xf] }
 0x1c2   : > { %4100 = vrot.lane.b32.xlu0 %v4025_v56, %s9171_s1  ;;  %v4295_v56 = vshll.u32 %v6257_v62, 16  ;;  %v6136_v62 = vld [vmem:[%s6873_s21 + $0xbc] sm:$0x1] }
 0x1c3   : > { %v2252_v11 = vpop.permute.xlu1 %2251 }
 0x1c4   : > { %2271 = vst.msk [vmem:[#allocation2 + $0x10] sm:$0xf] %vm1222_vm13, %v2252_v11  ;;  %v2205_v17 = vpop.permute.xlu0 %2204  ;;  %3076 = vrot.lane.b32.xlu2 %v3055_v12, %s9177_s25  ;;  %v3324_v11 = vrot.slane %v6111_v3, 5  ;;  %v7778_v12 = vld [vmem:[%s9180_s3] ss:$0 sm:$0xff]  ;;  %v4297_v6 = vrot.slane %v4295_v56, 5 }
 0x1c5   : > { %2223 = vst.msk [vmem:[#allocation2 + $0x14] sm:$0xf] %vm1172_vm12, %v2205_v17  ;;  %v6268_v17 = vld [vmem:[%s6873_s21 + $0xe8] sm:$0xf]  ;;  %v1693_v8 = vadd.f32 %v7778_v12, %v1681_v58 }
 0x1c6   : > { %2272 = vst.msk [vmem:[#allocation2 + $0x14] sm:$0xf] %vm1222_vm13, %v7675_v38  ;;  %v7732_v25 = vpop.permute.xlu2 %1982  ;;  %v6256_v38 = vld [vmem:[%s6873_s21 + $0xe8] sm:$0xf]  ;;  %v3325_v28 = vsel %vm6897_vm5, %v6120_v5, %v3324_v11  ;;  %v4429_v13 = vrot.slane %v6268_v17, 5  ;;  %v4558_v5 = vshll.u32 %v6292_v2, 16 }
 0x1c7   : > { %v4285_v47 = vshll.u32 %v6256_v38, 16  ;;  %v4289_v42 = vshrl.u32 %v6256_v38, 16  ;;  %v6267_v38 = vld [vmem:[%s6873_s21 + $0xe4] sm:$0xe]  ;;  %v3480_v17 = vshll.u32 %v6136_v62, 16  ;;  %v1701_v22 = vmax.f32 %v1693_v8, 0.0 }
 0x1c8   : > { %v6222_v62 = vld [vmem:[%s6873_s21 + $0xe4] sm:$0xf] }
 0x1c9   : > { %4184 = vrot.lane.b32.xlu1 %v4160_v19, %s9177_s25  ;;  %v4291_v45 = vrot.slane %v4289_v42, 4  ;;  %v6135_v42 = vld [vmem:[%s6873_s21 + $0xb8] sm:$0xf]  ;;  %v3482_v31 = vrot.slane %v3480_v17, 5 }
 0x1ca   : > { %4182 = vrot.lane.b32.xlu0 %v4157_v26, %s9177_s25  ;;  %v3474_v54 = vshrl.u32 %v6135_v42, 16 }
 0x1cb   : > { %v2394_v30 = vpop.permute.xlu1 %2393 }
 0x1cc   : > { %2412 = vst.msk [vmem:[#allocation2 + $0x14] sm:$0xf] %vm1363_vm14, %v2394_v30  ;;  %v2392_v36 = vpop.permute.xlu0 %2391  ;;  %3123 = vrot.lane.b32.xlu2 %v6089_v32, %s9172_s23  ;;  %v3326_v32 = vrot.slane %v3324_v11, 4  ;;  %v4562_v11 = vshrl.u32 %v6292_v2, 16 }
 0x1cd   : > { %2411 = vst.msk [vmem:[#allocation2 + $0x10] sm:$0xf] %vm1363_vm14, %v2392_v36  ;;  %v7799_v36 = vpop.f32.mrf.mxu1 }
 0x1ce   : > { %2495 = vst.msk [vmem:[#allocation2 + $0x10] sm:$0xf] %vm1448_vm15, %v7693_v55  ;;  %v7749_v50 = vpop.permute.xlu2 %2124  ;;  %v4287_v55 = vrot.slane %v4285_v47, 5  ;;  %v3328_v47 = vsel %vm6897_vm5, %v3326_v32, %v3327_v35  ;;  %v1683_v35 = vmul.f32 %v7760_v63, %v7799_v36 }
 0x1d0   : > { %v4292_v4 = vor.u32 %v4291_v45, %v4287_v55  ;;  %v4288_v18 = vsel %vm6884_vm3, %v4283_v7, %v4287_v55  ;;  %v3461_v45 = vshrl.u32 %v6134_v46, 16  ;;  %v6291_v7 = vld [vmem:[%s6873_s21 + $0xf0] sm:$0xf] }
 0x1d1   : > { %4231 = vrot.lane.b32.xlu1 %v6247_v37, %s9172_s23 }
 0x1d2   : > { %3125 = vrot.lane.b32.xlu0 %v6090_v34, %s9172_s23  ;;  %v4293_v15 = vrot.slane %v4292_v4, 4  ;;  %v6279_v34 = vrot.slane %v6267_v38, 9  ;;  %v3463_v4 = vrot.slane %v3461_v45, 4 }
 0x1d3   : > { %v1850_v53 = vpop.permute.xlu1 %1849 }
 0x1d4   : > { %1867 = vst.msk [vmem:[#allocation2 + $0x18] sm:$0xf] %vm808_vm7, %v1850_v53  ;;  %v2478_v60 = vpop.permute.xlu0 %2477  ;;  %v1655_v48 = vpop.f32.mrf.mxu0  ;;  %4233 = vrot.lane.b32.xlu2 %v6248_v57, %s9172_s23  ;;  %v4298_v30 = vsel %vm6884_vm3, %v4293_v15, %v4297_v6  ;;  %v3470_v53 = vshll.u32 %v6135_v42, 16  ;;  %v4430_v55 = vsel %vm6897_vm5, %v6279_v34, %v4429_v13  ;;  %v3464_v57 = vshll.u32 %v6134_v46, 16  ;;  %v6283_v15 = vld [vmem:[%s6873_s21 + $0xf0] sm:$0xf] }
 0x1d5   : > { %2496 = vst.msk [vmem:[#allocation2 + $0x14] sm:$0xf] %vm1448_vm15, %v2478_v60  ;;  %v1679_v61 = vmul.f32 %v7760_v63, %v1655_v48  ;;  %v6022_v9 = vld [vmem:[#allocation2 + $0x10] sm:$0xf]  ;;  %v1667_v48 = vpop.f32.mrf.mxu1  ;;  %v6146_v34 = vld [vmem:[%s6873_s21 + $0xb4] sm:$0xe] }
 0x1d6   : > { %v7769_v1 = vpop.permute.xlu2 %2255  ;;  %v3466_v56 = vrot.slane %v3464_v57, 5  ;;  %v1684_v38 = vmul.f32 %v7760_v63, %v1667_v48  ;;  %v7877_v57 = vld [vmem:[%s6873_s21 + $0xf4] sm:$0xf] }
 0x1d7   : > { %v1691_v24 = vadd.f32 %v7778_v12, %v1679_v61 }
 0x1d8   : > { %v1696_v46 = vadd.f32 %v7778_v12, %v1684_v38 }
 0x1d9   : > { %3265 = vrot.lane.b32.xlu1 %v3210_v0, %s9173_s19  ;;  %v1699_v40 = vmax.f32 %v1691_v24, 0.0  ;;  %v7828_v0 = vrot.slane %v3470_v53, 5  ;;  %v6156_v53 = vrot.slane %v6146_v34, 9 }
 0x1da   : > { %3263 = vrot.lane.b32.xlu0 %v3200_v59, %s9173_s19  ;;  %v3476_v59 = vrot.slane %v3474_v54, 4 }
 0x1db   : > { %v1936_v14 = vpop.permute.xlu1 %1935 }
 0x1dc   : > { %v6414_v19 = vld [vmem:[#allocation2 + $0x10] sm:$0xf0]  ;;  %1952 = vst.msk [vmem:[#allocation2 + $0x1c] sm:$0xf] %vm896_vm8, %v1936_v14  ;;  %v1934_v16 = vpop.permute.xlu0 %1933  ;;  %v1657_v20 = vpop.f32.mrf.mxu0  ;;  %4371 = vrot.lane.b32.xlu2 %v4288_v18, %s9173_s19  ;;  %v3477_v6 = vor.u32 %v3476_v59, %v7828_v0  ;;  %v6126_v18 = vld [vmem:[%s6873_s21 + $0xb8] sm:$0xf] }
 0x1dd   : > { %2875 = vst.msk [vmem:[#allocation2 + $0x14] sm:$0xf] %vm664_vm6, %v6056_v10  ;;  %v1680_v26 = vmul.f32 %v7760_v63, %v1657_v20  ;;  %v6023_v27 = vor.u32 %v6414_v19, %v6022_v9  ;;  %v4549_v9 = vshrl.u32 %v6291_v7, 16  ;;  %v4552_v10 = vshll.u32 %v6291_v7, 16 }
 0x1de   : > { %1951 = vst.msk [vmem:[#allocation2 + $0x18] sm:$0xf] %vm896_vm8, %v1934_v16  ;;  %v7802_v39 = vpop.permute.xlu2 %2397  ;;  %v3467_v19 = vor.u32 %v3466_v56, %v3463_v4  ;;  %v6148_v4 = vld [vmem:[%s6873_s21 + $0xbc] sm:$0x1]  ;;  %v6065_v56 = vld [vmem:[%s6873_s21 + $0xa8] sm:$0xf] }
 0x1df   : > { %2000 = vst.msk [vmem:[#allocation2 + $0x18] sm:$0xf] %vm946_vm9, %v7732_v25  ;;  %v1692_v29 = vadd.f32 %v7778_v12, %v1680_v26  ;;  %6038 = vmatmul.msk.bf16.gmra.mxu1 %vm1629_vm0, %v6023_v27  ;;  %v4431_v25 = vrot.slane %v4429_v13, 4  ;;  %v4551_v16 = vrot.slane %v4549_v9, 4  ;;  %v4554_v20 = vrot.slane %v4552_v10, 5  ;;  %v7849_v13 = vpop.f32.mrf.mxu1 }
 0x1e0   : > { %v6293_v26 = vld [vmem:[%s6873_s21 + $0xf8] sm:$0x1]  ;;  %v4560_v27 = vrot.slane %v4558_v5, 5  ;;  %v4702_v7 = vrot.slane %v7877_v57, 5  ;;  %v2939_v8 = vshrl.u32 %v6065_v56, 16  ;;  %v4027_v10 = vshrl.u32 %v6222_v62, 16 }
 0x1e1   : > { %v1700_v37 = vmax.f32 %v1692_v29, 0.0  ;;  %3347 = vrot.lane.b32.xlu1 %v3325_v28, %s9174_s27  ;;  %v4433_v52 = vsel %vm6897_vm5, %v4431_v25, %v4432_v21  ;;  %v4564_v28 = vrot.slane %v4562_v11, 4  ;;  %v6284_v25 = vld [vmem:[%s6873_s21 + $0xf4] sm:$0xf]  ;;  %v4555_v21 = vor.u32 %v4554_v20, %v4551_v16  ;;  %v6305_v9 = vld [vmem:[%s6873_s21 + $0xf8] sm:$0x1] }
 0x1e2   : > { %4373 = vrot.lane.b32.xlu0 %v4298_v30, %s9173_s19  ;;  %v3478_v30 = vrot.slane %v3477_v6, 4  ;;  %v4030_v5 = vshll.u32 %v6222_v62, 16  ;;  %v3600_v17 = vrot.slane %v6148_v4, 5  ;;  %v6058_v20 = vld [vmem:[%s6873_s21 + $0xb8] sm:$0xf] }
 0x1e3   : > { %v2123_v33 = vpop.permute.xlu1 %2122  ;;  %v1707_v44 = vpack.c.bf16 %v1700_v37, %v1699_v40  ;;  %v3468_v37 = vrot.slane %v3467_v19, 4  ;;  %v4565_v42 = vor.u32 %v4564_v28, %v4560_v27  ;;  %v4705_v28 = vrot.slane %v6305_v9, 5  ;;  %v7933_v62 = vld [vmem:[%s9180_s3 + $0x1] ss:$0 sm:$0xff] }
 0x1e4   : > { %2140 = vst.msk [vmem:[#allocation2 + $0x18] sm:$0xf] %vm1087_vm11, %v2123_v33  ;;  %v1985_v49 = vpop.permute.xlu0 %1984  ;;  %3349 = vrot.lane.b32.xlu2 %v3328_v47, %s9174_s27  ;;  %v6147_v47 = vld [vmem:[%s6873_s21 + $0xb8] sm:$0xf]  ;;  %v3483_v36 = vsel %vm6884_vm3, %v3478_v30, %v3482_v31  ;;  %v4029_v30 = vrot.slane %v4027_v10, 4  ;;  %v4032_v31 = vrot.slane %v4030_v5, 5 }
 0x1e5   : > { %2001 = vst.msk [vmem:[#allocation2 + $0x1c] sm:$0xf] %vm946_vm9, %v1985_v49  ;;  %6047 = vmatmul.msk.bf16.vlgmr.msra.gmra.mxu3 %vm2772_vm1, %v1707_v44  ;;  %v4568_v44 = vshll.u32 %v6293_v26, 16  ;;  %v1695_v49 = vadd.f32 %v7778_v12, %v1683_v35  ;;  %v3597_v54 = vrot.slane %v6147_v47, 5  ;;  %v6054_v5 = vld [vmem:[%s6873_s21 + $0xa0] sm:$0xf] }
 0x1e6   : > { %2141 = vst.msk [vmem:[#allocation2 + $0x1c] sm:$0xf] %vm1087_vm11, %v7749_v50  ;;  %v2987_v60 = vpop.permute.xlu2 %2986  ;;  %v1694_v50 = vadd.f32 %v7778_v12, %v1682_v51  ;;  %v3473_v51 = vsel %vm6884_vm3, %v3468_v37, %v7828_v0  ;;  %v6066_v0 = vld [vmem:[%s6873_s21 + $0xac] sm:$0xf]  ;;  %v6067_v37 = vld [vmem:[%s6873_s21 + $0xb0] sm:$0x1] }
 0x1e7   : > { %3010 = vst.msk [vmem:[#allocation2] sm:$0xf] %vm808_vm7, %v2987_v60  ;;  %v4570_v45 = vrot.slane %v4568_v44, 5  ;;  %v1703_v58 = vmax.f32 %v1695_v49, 0.0  ;;  %v1704_v60 = vmax.f32 %v1696_v46, 0.0  ;;  %v1672_v59 = vpop.f32.mrf.mxu1  ;;  %v2948_v11 = vshll.u32 %v6066_v0, 16 }
 0x1e8   : > { %v1702_v14 = vmax.f32 %v1694_v50, 0.0  ;;  %v3599_v6 = vrot.slane %v3597_v54, 4  ;;  %v1686_v46 = vmul.f32 %v7760_v63, %v1672_v59  ;;  %2873 = vst.msk [vmem:[#allocation2 + $0xc] sm:$0xf] %vm664_vm6, %v6054_v5 }
 0x1e9   : > { %4457 = vrot.lane.b32.xlu1 %v4433_v52, %s9174_s27  ;;  %v4556_v52 = vrot.slane %v4555_v21, 4  ;;  %v1709_v26 = vpack.c.bf16 %v1704_v60, %v1703_v58  ;;  %v6224_v60 = vld [vmem:[%s6873_s21 + $0xec] sm:$0x1] }
 0x1ea   : > { %4455 = vrot.lane.b32.xlu0 %v4430_v55, %s9174_s27  ;;  %v1708_v29 = vpack.c.bf16 %v1702_v14, %v1701_v22  ;;  %v2952_v14 = vshrl.u32 %v6066_v0, 16  ;;  %v6057_v22 = vld [vmem:[%s6873_s21 + $0xb4] sm:$0xf]  ;;  %v3601_v21 = vsel %vm6897_vm5, %v3599_v6, %v3600_v17  ;;  %v1698_v59 = vadd.f32 %v7778_v12, %v1686_v46  ;;  %v6079_v17 = vld [vmem:[%s6873_s21 + $0xb0] sm:$0x1] }
 0x1eb   : > { %v2209_v3 = vpop.permute.xlu1 %2208  ;;  %v4561_v48 = vsel %vm6884_vm3, %v4556_v52, %v4560_v27  ;;  %v4704_v27 = vrot.slane %v4702_v7, 4  ;;  %v4033_v52 = vor.u32 %v4032_v31, %v4029_v30 }
 0x1ec   : > { %2225 = vst.msk [vmem:[#allocation2 + $0x1c] sm:$0xf] %vm1172_vm12, %v2209_v3  ;;  %v2207_v61 = vpop.permute.xlu0 %2206  ;;  %3396 = vrot.lane.b32.xlu2 %v6125_v41, %s9175_s26  ;;  %v3598_v3 = vsel %vm6897_vm5, %v6156_v53, %v3597_v54  ;;  %v2958_v53 = vshll.u32 %v6067_v37, 16  ;;  %v6234_v37 = vld [vmem:[%s6873_s21 + $0xe4] sm:$0xe] }
 0x1ed   : > { %2224 = vst.msk [vmem:[#allocation2 + $0x18] sm:$0xf] %vm1172_vm12, %v2207_v61  ;;  %v2942_v61 = vshll.u32 %v6065_v56, 16 }
 0x1ee   : > { %2273 = vst.msk [vmem:[#allocation2 + $0x18] sm:$0xf] %vm1222_vm13, %v7769_v1  ;;  %v7842_v24 = vpop.permute.xlu2 %3072  ;;  %v6042_v1 = vld [vmem:[%s9095_s7 + $0x2] sm:$0x3] }
 0x1ef   : > { %v2786_v32 = vsel %vm1642_vm10, %v6042_v1, 0  ;;  %v2944_v19 = vrot.slane %v2942_v61, 5 }
 0x1f0   : > { %2795 = vmatpush.bf16.msra.mxu2 %v2786_v32  ;;  %v2950_v32 = vrot.slane %v2948_v11, 5  ;;  %v1706_v11 = vmax.f32 %v1698_v59, 0.0 }
 0x1f1   : > { %4504 = vrot.lane.b32.xlu1 %v6283_v15, %s9175_s26  ;;  %v6303_v15 = vld [vmem:[%s6873_s21 + $0xf0] sm:$0xe] }
 0x1f2   : > { %3398 = vrot.lane.b32.xlu0 %v6126_v18, %s9175_s26  ;;  %v2941_v18 = vrot.slane %v2939_v8, 4  ;;  %v6315_v1 = vrot.slane %v6303_v15, 9 }
 0x1f3   : > { %v2396_v40 = vpop.permute.xlu1 %2395 }
 0x1f4   : > { %2413 = vst.msk [vmem:[#allocation2 + $0x18] sm:$0xf] %vm1363_vm14, %v2396_v40  ;;  %v2258_v33 = vpop.permute.xlu0 %2257  ;;  %4506 = vrot.lane.b32.xlu2 %v6284_v25, %s9175_s26  ;;  %v2954_v25 = vrot.slane %v2952_v14, 4  ;;  %v4703_v54 = vsel %vm6897_vm5, %v6315_v1, %v4702_v7  ;;  %v3061_v1 = vrot.slane %v6079_v17, 5 }
 0x1f5   : > { %2274 = vst.msk [vmem:[#allocation2 + $0x1c] sm:$0xf] %vm1222_vm13, %v2258_v33  ;;  %6048 = vmatmul.msk.bf16.gmra.mxu3 %vm2772_vm1, %v1708_v29  ;;  %v6223_v29 = vld [vmem:[%s6873_s21 + $0xe8] sm:$0xf]  ;;  %v2945_v33 = vor.u32 %v2944_v19, %v2941_v18 }
 0x1f6   : > { %2414 = vst.msk [vmem:[#allocation2 + $0x1c] sm:$0xf] %vm1363_vm14, %v7802_v39  ;;  %v7872_v55 = vpop.permute.xlu2 %3259  ;;  %v4566_v39 = vrot.slane %v4565_v42, 4  ;;  %v4040_v40 = vshrl.u32 %v6223_v29, 16  ;;  %v7910_v42 = vld [vmem:[%s9179_s17 + $0x1] ss:$0 sm:$0xff] }
 0x1f7   : > { %v4036_v49 = vshll.u32 %v6223_v29, 16 }
 0x1f8   : > { %v4571_v41 = vsel %vm6884_vm3, %v4566_v39, %v4570_v45  ;;  %v2955_v39 = vor.u32 %v2954_v25, %v2950_v32  ;;  %v2946_v45 = vrot.slane %v2945_v33, 4  ;;  %v4042_v57 = vrot.slane %v4040_v40, 4 }
 0x1f9   : > { %3538 = vrot.lane.b32.xlu1 %v3483_v36, %s9178_s29  ;;  %v4038_v0 = vrot.slane %v4036_v49, 5 }
 0x1fa   : > { %3536 = vrot.lane.b32.xlu0 %v3473_v51, %s9178_s29  ;;  %v4706_v51 = vsel %vm6897_vm5, %v4704_v27, %v4705_v28  ;;  %v2956_v4 = vrot.slane %v2955_v39, 4 }
 0x1fb   : > { %v2482_v50 = vpop.permute.xlu1 %2481  ;;  %v4043_v56 = vor.u32 %v4042_v57, %v4038_v0  ;;  %v6091_v57 = vld [vmem:[%s6873_s21 + $0xb4] sm:$0xf] }
 0x1fc   : > { %2498 = vst.msk [vmem:[#allocation2 + $0x1c] sm:$0xf] %vm1448_vm15, %v2482_v50  ;;  %v2480_v2 = vpop.permute.xlu0 %2479  ;;  %4644 = vrot.lane.b32.xlu2 %v4561_v48, %s9178_s29  ;;  %v1685_v50 = vmul.f32 %v7760_v63, %v7849_v13  ;;  %v6078_v63 = vld [vmem:[%s6873_s21 + $0xac] sm:$0xf]  ;;  %v2951_v13 = vsel %vm6884_vm3, %v2946_v45, %v2950_v32 }
 0x1fd   : > { %2497 = vst.msk [vmem:[#allocation2 + $0x18] sm:$0xf] %vm1448_vm15, %v2480_v2  ;;  %v2960_v2 = vrot.slane %v2958_v53, 5  ;;  %v3058_v15 = vrot.slane %v6078_v63, 5  ;;  %v4044_v18 = vrot.slane %v4043_v56, 4 }
 0x1fe   : > { %v7895_v16 = vpop.permute.xlu2 %3345  ;;  %v1697_v61 = vadd.f32 %v7778_v12, %v1685_v50  ;;  %v6102_v53 = vld [vmem:[%s6873_s21 + $0xb8] sm:$0xf] }
 0x1ff   : > { %v2961_v6 = vsel %vm6884_vm3, %v2956_v4, %v2960_v2  ;;  %v3060_v28 = vrot.slane %v3058_v15, 4  ;;  %v3225_v59 = vshrl.u32 %v6102_v53, 16 }
 0x201   : > { %3620 = vrot.lane.b32.xlu1 %v3598_v3, %s9176_s2  ;;  %v3062_v25 = vsel %vm6897_vm5, %v3060_v28, %v3061_v1 }
 0x202   : > { %4646 = vrot.lane.b32.xlu0 %v4571_v41, %s9178_s29  ;;  %v4046_v41 = vshll.u32 %v6224_v60, 16 }
 0x203   : > { %v6415_v35 = vld [vmem:[#allocation2 + $0x18] sm:$0xf0]  ;;  %v3071_v38 = vpop.permute.xlu1 %3070 }
 0x204   : > { %2877 = vst.msk [vmem:[#allocation2 + $0x1c] sm:$0xf] %vm664_vm6, %v6058_v20  ;;  %v6026_v44 = vld [vmem:[#allocation2 + $0x18] sm:$0xf]  ;;  %v2989_v34 = vpop.permute.xlu0 %2988  ;;  %v2712_v47 = vpop.f32.mrf.mxu1  ;;  %3622 = vrot.lane.b32.xlu2 %v3601_v21, %s9176_s2  ;;  %v4048_v19 = vrot.slane %v4046_v41, 5 }
 0x205   : > { %2876 = vst.msk [vmem:[#allocation2 + $0x18] sm:$0xf] %vm664_vm6, %v6057_v22  ;;  %6049 = vmatmul.msk.bf16.gmra.mxu3 %vm2772_vm1, %v1709_v26  ;;  %v6027_v36 = vor.u32 %v6415_v35, %v6026_v44  ;;  %v2737_v48 = vmul.f32 %v7910_v42, %v2712_v47  ;;  %v6077_v20 = vld [vmem:[%s6873_s21 + $0xa8] sm:$0xe]  ;;  %v6236_v44 = vld [vmem:[%s6873_s21 + $0xec] sm:$0x1] }
 0x206   : > { %3094 = vst.msk [vmem:[#allocation2] sm:$0xf] %vm896_vm8, %v3071_v38  ;;  %v7924_v58 = vpop.permute.xlu2 %3532  ;;  %v6085_v32 = vrot.slane %v6077_v20, 9  ;;  %v6235_v35 = vld [vmem:[%s6873_s21 + $0xe8] sm:$0xf]  ;;  %v4049_v38 = vsel %vm6884_vm3, %v4044_v18, %v4048_v19 }
 0x207   : > { %3011 = vst.msk [vmem:[#allocation2 + $0x4] sm:$0xf] %vm808_vm7, %v2989_v34  ;;  %6039 = vmatmul.msk.bf16.gmra.mxu1 %vm1629_vm0, %v6027_v36  ;;  %v2750_v9 = vadd.f32 %v7933_v62, %v2737_v48  ;;  %v4163_v21 = vrot.slane %v6235_v35, 5  ;;  %v6244_v34 = vrot.slane %v6234_v37, 9  ;;  %v4166_v36 = vrot.slane %v6236_v44, 5 }
 0x208   : > { %3095 = vst.msk [vmem:[#allocation2 + $0x4] sm:$0xf] %vm896_vm8, %v7842_v24  ;;  %v4034_v24 = vrot.slane %v4033_v52, 4  ;;  %v3059_v33 = vsel %vm6897_vm5, %v6085_v32, %v3058_v15  ;;  %v6260_v20 = vld [vmem:[%s6873_s21 + $0xf8] sm:$0x1] }
 0x209   : > { %4730 = vrot.lane.b32.xlu1 %v4706_v51, %s9176_s2  ;;  %v2758_v26 = vmax.f32 %v2750_v9, 0.0  ;;  %v4164_v46 = vsel %vm6897_vm5, %v6244_v34, %v4163_v21  ;;  %v6258_v51 = vld [vmem:[%s6873_s21 + $0xf0] sm:$0xf]  ;;  %v4319_v35 = vshll.u32 %v6260_v20, 16  ;;  %v6212_v37 = vld [vmem:[%s6873_s21 + $0xdc] sm:$0xf] }
 0x20a   : > { %4728 = vrot.lane.b32.xlu0 %v4703_v54, %s9176_s2  ;;  %v4039_v14 = vsel %vm6884_vm3, %v4034_v24, %v4038_v0  ;;  %v6101_v54 = vld [vmem:[%s6873_s21 + $0xb4] sm:$0xf]  ;;  %v4300_v50 = vshrl.u32 %v6258_v51, 16  ;;  %v4303_v48 = vshll.u32 %v6258_v51, 16  ;;  %v3221_v0 = vshll.u32 %v6102_v53, 16 }
 0x20b   : > { %v3122_v3 = vpop.permute.xlu1 %3121  ;;  %v3212_v39 = vshrl.u32 %v6101_v54, 16  ;;  %v3215_v45 = vshll.u32 %v6101_v54, 16  ;;  %v6115_v34 = vld [vmem:[%s6873_s21 + $0xbc] sm:$0x1] }
 0x20c   : > { %3144 = vst.msk [vmem:[#allocation2 + $0x4] sm:$0xf] %vm946_vm9, %v3122_v3  ;;  %v3120_v7 = vpop.permute.xlu0 %3119  ;;  %v2714_v8 = vpop.f32.mrf.mxu1  ;;  %2994 = vrot.lane.b32.xlu2 %v2951_v13, %s9171_s1  ;;  %v4302_v4 = vrot.slane %v4300_v50, 4  ;;  %v4305_v63 = vrot.slane %v4303_v48, 5  ;;  %v6103_v13 = vld [vmem:[%s6873_s21 + $0xbc] sm:$0x1] }
 0x20d   : > { %3143 = vst.msk [vmem:[#allocation2] sm:$0xf] %vm946_vm9, %v3120_v7  ;;  %v2738_v10 = vmul.f32 %v7910_v42, %v2714_v8  ;;  %v3214_v24 = vrot.slane %v3212_v39, 4  ;;  %v3217_v2 = vrot.slane %v3215_v45, 5  ;;  %v3223_v7 = vrot.slane %v3221_v0, 5 }
 0x20e   : > { %3283 = vst.msk [vmem:[#allocation2] sm:$0xf] %vm1087_vm11, %v7872_v55  ;;  %v7958_v22 = vpop.permute.xlu2 %3618  ;;  %v1705_v55 = vmax.f32 %v1697_v61, 0.0  ;;  %v3227_v8 = vrot.slane %v3225_v59, 4  ;;  %v6092_v61 = vld [vmem:[%s6873_s21 + $0xb8] sm:$0xf] }
 0x20f   : > { %v2751_v12 = vadd.f32 %v7933_v62, %v2738_v10  ;;  %v3218_v9 = vor.u32 %v3217_v2, %v3214_v24  ;;  %v3231_v15 = vshll.u32 %v6103_v13, 16  ;;  %v6271_v39 = vld [vmem:[%s6873_s21 + $0xf4] sm:$0xf] }
 0x210   : > { %v1710_v31 = vpack.c.bf16 %v1706_v11, %v1705_v55  ;;  %v6250_v11 = vld [vmem:[%s6873_s21 + $0xf4] sm:$0xf]  ;;  %v6211_v55 = vld [vmem:[%s6873_s21 + $0xd8] sm:$0xf]  ;;  %v4436_v24 = vrot.slane %v6271_v39, 5 }
 0x211   : > { %v2759_v27 = vmax.f32 %v2751_v12, 0.0  ;;  %4102 = vrot.lane.b32.xlu1 %v4039_v14, %s9171_s1  ;;  %v4306_v14 = vor.u32 %v4305_v63, %v4302_v4  ;;  %v6249_v12 = vld [vmem:[%s6873_s21 + $0xf0] sm:$0xf]  ;;  %v3219_v17 = vrot.slane %v3218_v9, 4  ;;  %v6294_v9 = vld [vmem:[%s6873_s21 + $0xfc] sm:$0xf] }
 0x212   : > { %2996 = vrot.lane.b32.xlu0 %v2961_v6, %s9171_s1  ;;  %v3228_v6 = vor.u32 %v3227_v8, %v3223_v7 }
 0x213   : > { %v3344_v29 = vpop.permute.xlu1 %3343  ;;  %v2766_v30 = vpack.c.bf16 %v2759_v27, %v2758_v26  ;;  %v3233_v27 = vrot.slane %v3231_v15, 5 }
 0x214   : > { %3367 = vst.msk [vmem:[#allocation2] sm:$0xf] %vm1172_vm12, %v3344_v29  ;;  %v3262_v40 = vpop.permute.xlu0 %3261  ;;  %4104 = vrot.lane.b32.xlu2 %v4049_v38, %s9171_s1  ;;  %v3229_v29 = vrot.slane %v3228_v6, 4  ;;  %v6127_v6 = vld [vmem:[%s6873_s21 + $0xc0] sm:$0xf] }
 0x215   : > { %3284 = vst.msk [vmem:[#allocation2 + $0x4] sm:$0xf] %vm1087_vm11, %v3262_v40  ;;  %6043 = vmatmul.msk.bf16.vlgmr.msra.gmra.mxu2 %vm2772_vm1, %v2766_v30  ;;  %6050 = vmatmul.msk.bf16.gmra.mxu3 %vm2772_vm1, %v1710_v31  ;;  %v6114_v30 = vld [vmem:[%s6873_s21 + $0xb8] sm:$0xf]  ;;  %v3224_v31 = vsel %vm6884_vm3, %v3219_v17, %v3223_v7 }
 0x216   : > { %3368 = vst.msk [vmem:[#allocation2 + $0x4] sm:$0xf] %vm1172_vm12, %v7895_v16  ;;  %v7978_v47 = vpop.permute.xlu2 %4098  ;;  %v4165_v16 = vrot.slane %v4163_v21, 4  ;;  %v3234_v44 = vsel %vm6884_vm3, %v3229_v29, %v3233_v27 }
 0x218   : > { %v4167_v60 = vsel %vm6897_vm5, %v4165_v16, %v4166_v36  ;;  %v4321_v16 = vrot.slane %v4319_v35, 5  ;;  %v6113_v36 = vld [vmem:[%s6873_s21 + $0xb4] sm:$0xe]  ;;  %v6139_v35 = vld [vmem:[%s6873_s21 + $0xc8] sm:$0x1] }
 0x219   : > { %3080 = vrot.lane.b32.xlu1 %v3062_v25, %s9177_s25  ;;  %v6121_v54 = vrot.slane %v6113_v36, 9  ;;  %v6285_v36 = vld [vmem:[%s6873_s21 + $0xfc] sm:$0xf] }
 0x21a   : > { %3078 = vrot.lane.b32.xlu0 %v3059_v33, %s9177_s25  ;;  %v3331_v33 = vrot.slane %v6114_v30, 5 }
 0x21b   : > { %v3395_v49 = vpop.permute.xlu1 %3394 }
 0x21c   : > { %3417 = vst.msk [vmem:[#allocation2 + $0x4] sm:$0xf] %vm1222_vm13, %v3395_v49  ;;  %v3393_v52 = vpop.permute.xlu0 %3392  ;;  %4186 = vrot.lane.b32.xlu2 %v4164_v46, %s9177_s25  ;;  %v3333_v51 = vrot.slane %v3331_v33, 4  ;;  %v3332_v2 = vsel %vm6897_vm5, %v6121_v54, %v3331_v33 }
 0x21d   : > { %3416 = vst.msk [vmem:[#allocation2] sm:$0xf] %vm1222_vm13, %v3393_v52  ;;  %v3334_v52 = vrot.slane %v6115_v34, 5  ;;  %v6286_v34 = vld [vmem:[%s6873_s21 + $0x100] sm:$0xf] }
 0x21e   : > { %3556 = vst.msk [vmem:[#allocation2] sm:$0xf] %vm1363_vm14, %v7924_v58  ;;  %v3077_v3 = vpop.permute.xlu2 %3076  ;;  %v6259_v58 = vld [vmem:[%s6873_s21 + $0xf4] sm:$0xf] }
 0x21f   : > { %v4313_v41 = vshrl.u32 %v6259_v58, 16  ;;  %v4309_v5 = vshll.u32 %v6259_v58, 16  ;;  %v3335_v59 = vsel %vm6897_vm5, %v3333_v51, %v3334_v52 }
 0x221   : > { %3127 = vrot.lane.b32.xlu1 %v6091_v57, %s9172_s23  ;;  %v4315_v18 = vrot.slane %v4313_v41, 4  ;;  %v4311_v26 = vrot.slane %v4309_v5, 5  ;;  %v4438_v41 = vrot.slane %v4436_v24, 4 }
 0x222   : > { %4188 = vrot.lane.b32.xlu0 %v4167_v60, %s9177_s25  ;;  %v6270_v60 = vld [vmem:[%s6873_s21 + $0xf0] sm:$0xe] }
 0x223   : > { %v3617_v56 = vpop.permute.xlu1 %3616  ;;  %v4316_v32 = vor.u32 %v4315_v18, %v4311_v26  ;;  %v6280_v58 = vrot.slane %v6270_v60, 9  ;;  %v4573_v18 = vshrl.u32 %v6294_v9, 16 }
 0x224   : > { %3640 = vst.msk [vmem:[#allocation2] sm:$0xf] %vm1448_vm15, %v3617_v56  ;;  %v3535_v10 = vpop.permute.xlu0 %3534  ;;  %3129 = vrot.lane.b32.xlu2 %v6092_v61, %s9172_s23 }
 0x225   : > { %3557 = vst.msk [vmem:[#allocation2 + $0x4] sm:$0xf] %vm1363_vm14, %v3535_v10  ;;  %v4437_v61 = vsel %vm6897_vm5, %v6280_v58, %v4436_v24  ;;  %v4575_v29 = vrot.slane %v4573_v18, 4 }
 0x226   : > { %3641 = vst.msk [vmem:[#allocation2 + $0x4] sm:$0xf] %vm1448_vm15, %v7958_v22  ;;  %v3124_v19 = vpop.permute.xlu2 %3123  ;;  %v4307_v22 = vrot.slane %v4306_v14, 4  ;;  %v6137_v14 = vld [vmem:[%s6873_s21 + $0xc0] sm:$0xf] }
 0x227   : > { %v3485_v15 = vshrl.u32 %v6137_v14, 16 }
 0x228   : > { %v4312_v25 = vsel %vm6884_vm3, %v4307_v22, %v4311_v26 }
 0x229   : > { %4237 = vrot.lane.b32.xlu1 %v6250_v11, %s9172_s23  ;;  %v6138_v11 = vld [vmem:[%s6873_s21 + $0xc4] sm:$0xf]  ;;  %v3487_v26 = vrot.slane %v3485_v15, 4  ;;  %v6307_v15 = vld [vmem:[%s6873_s21 + $0x100] sm:$0xf] }
 0x22a   : > { %4235 = vrot.lane.b32.xlu0 %v6249_v12, %s9172_s23  ;;  %v3488_v12 = vshll.u32 %v6137_v14, 16  ;;  %v3494_v20 = vshll.u32 %v6138_v11, 16  ;;  %v6069_v14 = vld [vmem:[%s6873_s21 + $0xb8] sm:$0xf] }
 0x22b   : > { %v8011_v28 = vld [vmem:[#allocation2] sm:$0xf]  ;;  %v2993_v1 = vpop.permute.xlu1 %2992 }
 0x22c   : > { %3982 = vst.msk [vmem:[#allocation2] sm:$0xf] %vm664_vm6, %v6211_v55  ;;  %v2991_v38 = vpop.permute.xlu0 %2990  ;;  %3267 = vrot.lane.b32.xlu2 %v3224_v31, %s9173_s19  ;;  %v3498_v55 = vshrl.u32 %v6138_v11, 16  ;;  %v3490_v22 = vrot.slane %v3488_v12, 5 }
 0x22d   : > { %4122 = vst.msk [vmem:[#allocation2] sm:$0xf] %vm808_vm7, %v7978_v47  ;;  %v2717_v40 = vpop.f32.mrf.mxu1  ;;  %v8023_v21 = vld [vmem:[#allocation2] sm:$0xf0]  ;;  %v4317_v47 = vrot.slane %v4316_v32, 4 }
 0x22e   : > { %3013 = vst.msk [vmem:[#allocation2 + $0xc] sm:$0xf] %vm808_vm7, %v2993_v1  ;;  %v4234_v49 = vpop.permute.xlu2 %4233  ;;  %v2739_v46 = vmul.f32 %v7910_v42, %v2717_v40  ;;  %v6295_v1 = vld [vmem:[%s6873_s21 + $0x100] sm:$0xf]  ;;  %v3500_v40 = vrot.slane %v3498_v55, 4 }
 0x22f   : > { %3012 = vst.msk [vmem:[#allocation2 + $0x8] sm:$0xf] %vm808_vm7, %v2991_v38  ;;  %v4322_v45 = vsel %vm6884_vm3, %v4317_v47, %v4321_v16  ;;  %v4586_v31 = vshrl.u32 %v6295_v1, 16  ;;  %v3496_v38 = vrot.slane %v3494_v20, 5  ;;  %v3504_v16 = vshll.u32 %v6139_v35, 16 }
 0x230   : > { %3097 = vst.msk [vmem:[#allocation2 + $0xc] sm:$0xf] %vm896_vm8, %v3077_v3  ;;  %v2752_v48 = vadd.f32 %v7933_v62, %v2739_v46  ;;  %v6272_v3 = vld [vmem:[%s6873_s21 + $0xf8] sm:$0x1]  ;;  %v6225_v20 = vld [vmem:[%s6873_s21 + $0xf0] sm:$0xf] }
 0x231   : > { %4375 = vrot.lane.b32.xlu1 %v4312_v25, %s9173_s19  ;;  %3983 = vst.msk [vmem:[#allocation2 + $0x4] sm:$0xf] %vm664_vm6, %v6212_v37  ;;  %v4439_v7 = vrot.slane %v6272_v3, 5  ;;  %v6128_v37 = vld [vmem:[%s6873_s21 + $0xc4] sm:$0xf]  ;;  %v3491_v25 = vor.u32 %v3490_v22, %v3487_v26  ;;  %v4588_v51 = vrot.slane %v4586_v31, 4 }
 0x232   : > { %3269 = vrot.lane.b32.xlu0 %v3234_v44, %s9173_s19  ;;  %v2760_v13 = vmax.f32 %v2752_v48, 0.0  ;;  %v4582_v44 = vshll.u32 %v6295_v1, 16  ;;  %v6150_v48 = vld [vmem:[%s6873_s21 + $0xc4] sm:$0xf]  ;;  %v6306_v26 = vld [vmem:[%s6873_s21 + $0xfc] sm:$0xe] }
 0x233   : > { %v3075_v53 = vpop.permute.xlu1 %3074  ;;  %v4440_v17 = vsel %vm6897_vm5, %v4438_v41, %v4439_v7  ;;  %v3492_v46 = vrot.slane %v3491_v25, 4  ;;  %v6308_v1 = vld [vmem:[%s6873_s21 + $0x104] sm:$0x1]  ;;  %v4051_v35 = vshrl.u32 %v6225_v20, 16 }
 0x234   : > { %3096 = vst.msk [vmem:[#allocation2 + $0x8] sm:$0xf] %vm896_vm8, %v3075_v53  ;;  %v4101_v57 = vpop.permute.xlu0 %4100  ;;  %4377 = vrot.lane.b32.xlu2 %v4322_v45, %s9173_s19  ;;  %v6296_v53 = vld [vmem:[%s6873_s21 + $0x104] sm:$0x1]  ;;  %v4584_v54 = vrot.slane %v4582_v44, 5  ;;  %v3506_v45 = vrot.slane %v3504_v16, 5 }
 0x235   : > { %4123 = vst.msk [vmem:[#allocation2 + $0x4] sm:$0xf] %vm808_vm7, %v4101_v57  ;;  %v2719_v50 = vpop.f32.mrf.mxu1  ;;  %v6068_v57 = vld [vmem:[%s6873_s21 + $0xb4] sm:$0xf]  ;;  %v4592_v24 = vshll.u32 %v6296_v53, 16 }
 0x236   : > { %v2740_v0 = vmul.f32 %v7910_v42, %v2719_v50  ;;  %3145 = vst.msk [vmem:[#allocation2 + $0x8] sm:$0xf] %vm946_vm9, %v3124_v19  ;;  %v4372_v63 = vpop.permute.xlu2 %4371  ;;  %v4576_v19 = vshll.u32 %v6294_v9, 16  ;;  %v2963_v3 = vshrl.u32 %v6068_v57, 16  ;;  %v2966_v58 = vshll.u32 %v6068_v57, 16 }
 0x237   : > { %v4594_v7 = vrot.slane %v4592_v24, 5  ;;  %v6070_v44 = vld [vmem:[%s6873_s21 + $0xbc] sm:$0x1]  ;;  %v6055_v24 = vld [vmem:[%s6873_s21 + $0xa8] sm:$0xf] }
 0x238   : > { %v2753_v4 = vadd.f32 %v7933_v62, %v2740_v0  ;;  %v4578_v30 = vrot.slane %v4576_v19, 5  ;;  %v3497_v0 = vsel %vm6884_vm3, %v3492_v46, %v3496_v38  ;;  %v2965_v9 = vrot.slane %v2963_v3, 4  ;;  %v6226_v19 = vld [vmem:[%s6873_s21 + $0xf4] sm:$0xf]  ;;  %2874 = vst.msk [vmem:[#allocation2 + $0x10] sm:$0xf] %vm664_vm6, %v6055_v24 }
 0x239   : > { %3353 = vrot.lane.b32.xlu1 %v3335_v59, %s9174_s27  ;;  %v4589_v59 = vor.u32 %v4588_v51, %v4584_v54  ;;  %v4060_v31 = vshll.u32 %v6226_v19, 16 }
 0x23a   : > { %v2761_v56 = vmax.f32 %v2753_v4, 0.0  ;;  %3351 = vrot.lane.b32.xlu0 %v3332_v2, %s9174_s27  ;;  %v4579_v47 = vor.u32 %v4578_v30, %v4575_v29  ;;  %v4709_v29 = vrot.slane %v6307_v15, 5  ;;  %v6428_v15 = vld [vmem:[%s9170_s18 + $0x3c] sm:$0xff] }
 0x23b   : > { %v4185_v8 = vpop.permute.xlu1 %4184  ;;  %v4590_v41 = vrot.slane %v4589_v59, 4  ;;  %v8119_v46 = vrot.slane %v4060_v31, 5  ;;  %v6082_v31 = vld [vmem:[%s6873_s21 + $0xbc] sm:$0x1] }
 0x23c   : > { %4207 = vst.msk [vmem:[#allocation2 + $0x4] sm:$0xf] %vm896_vm8, %v4185_v8  ;;  %v4183_v10 = vpop.permute.xlu0 %4182  ;;  %v2767_v5 = vpack.c.bf16 %v2761_v56, %v2760_v13  ;;  %4459 = vrot.lane.b32.xlu2 %v4437_v61, %s9174_s27  ;;  %v4580_v39 = vrot.slane %v4579_v47, 4  ;;  %v6151_v56 = vld [vmem:[%s6873_s21 + $0xc8] sm:$0x1]  ;;  %v4711_v16 = vrot.slane %v4709_v29, 4 }
 0x23d   : > { %4206 = vst.msk [vmem:[#allocation2] sm:$0xf] %vm896_vm8, %v4183_v10  ;;  %v6149_v8 = vld [vmem:[%s6873_s21 + $0xc0] sm:$0xe]  ;;  %v2968_v10 = vrot.slane %v2966_v58, 5  ;;  %v3607_v11 = vrot.slane %v6151_v56, 5  ;;  %v4595_v18 = vsel %vm6884_vm3, %v4590_v41, %v4594_v7 }
 0x23e   : > { %6044 = vmatmul.msk.bf16.gmra.mxu2 %vm2772_vm1, %v2767_v5  ;;  %4256 = vst.msk [vmem:[#allocation2 + $0x4] sm:$0xf] %vm946_vm9, %v4234_v49  ;;  %v3350_v27 = vpop.permute.xlu2 %3349  ;;  %v3501_v49 = vor.u32 %v3500_v40, %v3496_v38  ;;  %v4585_v4 = vsel %vm6884_vm3, %v4580_v39, %v4584_v54  ;;  %v4054_v40 = vshll.u32 %v6225_v20, 16  ;;  %v6227_v39 = vld [vmem:[%s6873_s21 + $0xf8] sm:$0x1] }
 0x23f   : > { %v2969_v22 = vor.u32 %v2968_v10, %v2965_v9  ;;  %v4070_v58 = vshll.u32 %v6227_v39, 16 }
 0x240   : > { %v3502_v50 = vrot.slane %v3501_v49, 4  ;;  %v6335_v49 = vld [vmem:[%s9170_s18 + $0x4c] sm:$0x3] }
 0x241   : > { %3400 = vrot.lane.b32.xlu1 %v6127_v6, %s9175_s26  ;;  %v6157_v6 = vrot.slane %v6149_v8, 9  ;;  %v4943_v53 = vunpack.c.l.b16 %v6335_v49  ;;  %v6429_v8 = vld [vmem:[%s9170_s18 + $0x44] sm:$0xff]  ;;  %v4072_v10 = vrot.slane %v4070_v58, 5  ;;  %v6239_v49 = vld [vmem:[%s6873_s21 + $0xf8] sm:$0x1] }
 0x242   : > { %4461 = vrot.lane.b32.xlu0 %v4440_v17, %s9174_s27  ;;  %v3507_v13 = vsel %vm6884_vm3, %v3502_v50, %v3506_v45  ;;  %v2976_v17 = vshrl.u32 %v6069_v14, 16  ;;  %v4056_v45 = vrot.slane %v4054_v40, 5  ;;  %v2982_v50 = vshll.u32 %v6070_v44, 16 }
 0x243   : > { %v4232_v32 = vpop.permute.xlu1 %4231  ;;  %v4946_v59 = vpack.c.b16 %v4943_v53, %v4943_v53  ;;  %v4173_v39 = vrot.slane %v6239_v49, 5 }
 0x244   : > { %4255 = vst.msk [vmem:[#allocation2] sm:$0xf] %vm946_vm9, %v4232_v32  ;;  %v3126_v33 = vpop.permute.xlu0 %3125  ;;  %3402 = vrot.lane.b32.xlu2 %v6128_v37, %s9175_s26  ;;  %v4064_v32 = vshrl.u32 %v6226_v19, 16  ;;  %v6316_v37 = vrot.slane %v6306_v26, 9  ;;  %v2978_v25 = vrot.slane %v2976_v17, 4  ;;  %v2984_v41 = vrot.slane %v2982_v50, 5 }
 0x245   : > { %3146 = vst.msk [vmem:[#allocation2 + $0xc] sm:$0xf] %vm946_vm9, %v3126_v33  ;;  %v6081_v17 = vld [vmem:[%s6873_s21 + $0xb8] sm:$0xf] }
 0x246   : > { %4395 = vst.msk [vmem:[#allocation2] sm:$0xf] %vm1087_vm11, %v4372_v63  ;;  %v3397_v52 = vpop.permute.xlu2 %3396  ;;  %v3604_v63 = vrot.slane %v6150_v48, 5  ;;  %v4066_v51 = vrot.slane %v4064_v32, 4  ;;  %v4710_v57 = vsel %vm6897_vm5, %v6316_v37, %v4709_v29  ;;  %v3065_v29 = vrot.slane %v6081_v17, 5 }
 0x248   : > { %v3606_v5 = vrot.slane %v3604_v63, 4  ;;  %v3605_v38 = vsel %vm6897_vm5, %v6157_v6, %v3604_v63  ;;  %v4067_v3 = vor.u32 %v4066_v51, %v8119_v46  ;;  %v3067_v44 = vrot.slane %v3065_v29, 4 }
 0x249   : > { %4510 = vrot.lane.b32.xlu1 %v6286_v34, %s9175_s26  ;;  %v2970_v34 = vrot.slane %v2969_v22, 4 }
 0x24a   : > { %4508 = vrot.lane.b32.xlu0 %v6285_v36, %s9175_s26  ;;  %v3608_v30 = vsel %vm6897_vm5, %v3606_v5, %v3607_v11  ;;  %v4712_v36 = vrot.slane %v6308_v1, 5  ;;  %v4068_v9 = vrot.slane %v4067_v3, 4  ;;  %v6238_v1 = vld [vmem:[%s6873_s21 + $0xf4] sm:$0xf]  ;;  %v6261_v3 = vld [vmem:[%s6873_s21 + $0xfc] sm:$0xf] }
 0x24b   : > { %v3266_v60 = vpop.permute.xlu1 %3265  ;;  %v4170_v37 = vrot.slane %v6238_v1, 5  ;;  %v6251_v1 = vld [vmem:[%s6873_s21 + $0xfc] sm:$0xf] }
 0x24c   : > { %3286 = vst.msk [vmem:[#allocation2 + $0xc] sm:$0xf] %vm1087_vm11, %v3266_v60  ;;  %v3264_v2 = vpop.permute.xlu0 %3263  ;;  %3540 = vrot.lane.b32.xlu2 %v3497_v0, %s9178_s29  ;;  %v4713_v63 = vsel %vm6897_vm5, %v4711_v16, %v4712_v36  ;;  %v6104_v16 = vld [vmem:[%s6873_s21 + $0xc0] sm:$0xf] }
 0x24d   : > { %3285 = vst.msk [vmem:[#allocation2 + $0x8] sm:$0xf] %vm1087_vm11, %v3264_v2  ;;  %v3236_v51 = vshrl.u32 %v6104_v16, 16 }
 0x24e   : > { %3370 = vst.msk [vmem:[#allocation2 + $0xc] sm:$0xf] %vm1172_vm12, %v3350_v27  ;;  %v4507_v61 = vpop.permute.xlu2 %4506  ;;  %v2972_v27 = vshll.u32 %v6069_v14, 16 }
 0x24f   : > { %v3238_v50 = vrot.slane %v3236_v51, 4 }
 0x250   : > { %v2974_v47 = vrot.slane %v2972_v27, 5  ;;  %v6237_v27 = vld [vmem:[%s6873_s21 + $0xf0] sm:$0xe] }
 0x251   : > { %4648 = vrot.lane.b32.xlu1 %v4585_v4, %s9178_s29  ;;  %v4962_v4 = vsel %vm1642_vm10, %v4946_v59, 0  ;;  %v6245_v40 = vrot.slane %v6237_v27, 9 }
 0x252   : > { %3542 = vrot.lane.b32.xlu0 %v3507_v13, %s9178_s29  ;;  %v2979_v60 = vor.u32 %v2978_v25, %v2974_v47  ;;  %v2975_v2 = vsel %vm6884_vm3, %v2970_v34, %v2974_v47  ;;  %4969 = vmatpush.bf16.msrb.mxu0 %v4962_v4  ;;  %v3068_v34 = vrot.slane %v6082_v31, 5  ;;  %v6094_v4 = vld [vmem:[%s6873_s21 + $0xc4] sm:$0xf] }
 0x253   : > { %v3348_v12 = vpop.permute.xlu1 %3347 }
 0x254   : > { %3369 = vst.msk [vmem:[#allocation2 + $0x8] sm:$0xf] %vm1172_vm12, %v3348_v12  ;;  %v4374_v55 = vpop.permute.xlu0 %4373  ;;  %4650 = vrot.lane.b32.xlu2 %v4595_v18, %s9178_s29  ;;  %v2980_v56 = vrot.slane %v2979_v60, 4  ;;  %v6080_v18 = vld [vmem:[%s6873_s21 + $0xb4] sm:$0xe]  ;;  %v3069_v53 = vsel %vm6897_vm5, %v3067_v44, %v3068_v34 }
 0x255   : > { %4396 = vst.msk [vmem:[#allocation2 + $0x4] sm:$0xf] %vm1087_vm11, %v4374_v55  ;;  %v4073_v55 = vsel %vm6884_vm3, %v4068_v9, %v4072_v10  ;;  %v6105_v60 = vld [vmem:[%s6873_s21 + $0xc4] sm:$0xf]  ;;  %v4327_v9 = vshll.u32 %v6261_v3, 16 }
 0x256   : > { %3418 = vst.msk [vmem:[#allocation2 + $0x8] sm:$0xf] %vm1222_vm13, %v3397_v52  ;;  %v4645_v33 = vpop.permute.xlu2 %4644  ;;  %v4053_v52 = vrot.slane %v4051_v35, 4  ;;  %v2985_v14 = vsel %vm6884_vm3, %v2980_v56, %v2984_v41  ;;  %4970 = vmatpush.bf16.msrb.mxu0 %v6429_v8  ;;  %v3249_v59 = vshrl.u32 %v6105_v60, 16  ;;  %v4324_v8 = vshrl.u32 %v6261_v3, 16 }
 0x257   : > { %v4329_v27 = vrot.slane %v4327_v9, 5  ;;  %v6118_v3 = vld [vmem:[%s6873_s21 + $0xc8] sm:$0x1] }
 0x258   : > { %v4057_v13 = vor.u32 %v4056_v45, %v4053_v52  ;;  %v3239_v52 = vshll.u32 %v6104_v16, 16  ;;  %v3251_v10 = vrot.slane %v3249_v59, 4  ;;  %v6274_v59 = vld [vmem:[%s6873_s21 + $0x100] sm:$0xf] }
 0x259   : > { %3626 = vrot.lane.b32.xlu1 %v3608_v30, %s9176_s2  ;;  %v6086_v30 = vrot.slane %v6080_v18, 9  ;;  %v6263_v18 = vld [vmem:[%s6873_s21 + $0x104] sm:$0x1] }
 0x25a   : > { %3624 = vrot.lane.b32.xlu0 %v3605_v38, %s9176_s2  ;;  %v4058_v11 = vrot.slane %v4057_v13, 4  ;;  %4971 = vmatpush.bf16.msrb.mxu0 %v6428_v15  ;;  %v3245_v13 = vshll.u32 %v6105_v60, 16  ;;  %v6213_v15 = vld [vmem:[%s6873_s21 + $0xe4] sm:$0xf] }
 0x25b   : > { %v4458_v54 = vpop.permute.xlu1 %4457  ;;  %v3066_v47 = vsel %vm6897_vm5, %v6086_v30, %v3065_v29 }
 0x25c   : > { %4480 = vst.msk [vmem:[#allocation2 + $0x4] sm:$0xf] %vm1172_vm12, %v4458_v54  ;;  %v4456_v48 = vpop.permute.xlu0 %4455  ;;  %v2722_v0 = vpop.f32.mrf.mxu1  ;;  %4732 = vrot.lane.b32.xlu2 %v4710_v57, %s9176_s2  ;;  %v4063_v22 = vsel %vm6884_vm3, %v4058_v11, %v8119_v46  ;;  %v4171_v46 = vsel %vm6897_vm5, %v6245_v40, %v4170_v37  ;;  %v4172_v54 = vrot.slane %v4170_v37, 4  ;;  %v6214_v57 = vld [vmem:[%s6873_s21 + $0xe8] sm:$0xf]  ;;  %v4343_v37 = vshll.u32 %v6263_v18, 16 }
 0x25d   : > { %4479 = vst.msk [vmem:[#allocation2] sm:$0xf] %vm1172_vm12, %v4456_v48  ;;  %v3241_v48 = vrot.slane %v3239_v52, 5  ;;  %v6175_v11 = vld [vmem:[%s9170_s18 + $0x38] sm:$0x3] }
 0x25e   : > { %4529 = vst.msk [vmem:[#allocation2 + $0x4] sm:$0xf] %vm1222_vm13, %v4507_v61  ;;  %v3623_v7 = vpop.permute.xlu2 %3622  ;;  %v2741_v61 = vmul.f32 %v7910_v42, %v2722_v0  ;;  %v4174_v24 = vsel %vm6897_vm5, %v4172_v54, %v4173_v39  ;;  %v4345_v49 = vrot.slane %v4343_v37, 5 }
 0x25f   : > { %v3242_v56 = vor.u32 %v3241_v48, %v3238_v50 }
 0x260   : > { %v2754_v19 = vadd.f32 %v7933_v62, %v2741_v61  ;;  %v6093_v61 = vld [vmem:[%s6873_s21 + $0xc0] sm:$0xf] }
 0x261   : > { %2998 = vrot.lane.b32.xlu1 %v2975_v2, %s9171_s1  ;;  %v6262_v2 = vld [vmem:[%s6873_s21 + $0x100] sm:$0xf]  ;;  %v3243_v17 = vrot.slane %v3242_v56, 4  ;;  %v4443_v56 = vrot.slane %v6274_v59, 5 }
 0x262   : > { %4734 = vrot.lane.b32.xlu0 %v4713_v63, %s9176_s2  ;;  %v2762_v35 = vmax.f32 %v2754_v19, 0.0  ;;  %v4333_v41 = vshll.u32 %v6262_v2, 16 }
 0x263   : > { %v4505_v5 = vpop.permute.xlu1 %4504 }
 0x264   : > { %4528 = vst.msk [vmem:[#allocation2] sm:$0xf] %vm1222_vm13, %v4505_v5  ;;  %v3399_v12 = vpop.permute.xlu0 %3398  ;;  %v2724_v6 = vpop.f32.mrf.mxu1  ;;  %3000 = vrot.lane.b32.xlu2 %v2985_v14, %s9171_s1  ;;  %v6106_v14 = vld [vmem:[%s6873_s21 + $0xc8] sm:$0x1]  ;;  %v4335_v19 = vrot.slane %v4333_v41, 5 }
 0x265   : > { %3419 = vst.msk [vmem:[#allocation2 + $0xc] sm:$0xf] %vm1222_vm13, %v3399_v12  ;;  %v2742_v20 = vmul.f32 %v7910_v42, %v2724_v6  ;;  %v3247_v12 = vrot.slane %v3245_v13, 5  ;;  %v3831_v6 = vunpack.c.l.b16 %v6175_v11  ;;  %v3255_v31 = vshll.u32 %v6106_v14, 16  ;;  %v6140_v41 = vld [vmem:[%s6873_s21 + $0xcc] sm:$0xf] }
 0x266   : > { %4668 = vst.msk [vmem:[#allocation2] sm:$0xf] %vm1363_vm14, %v4645_v33  ;;  %v2995_v32 = vpop.permute.xlu2 %2994  ;;  %v6275_v11 = vld [vmem:[%s6873_s21 + $0x104] sm:$0x1] }
 0x267   : > { %v2755_v26 = vadd.f32 %v7933_v62, %v2742_v20  ;;  %3014 = vst.msk [vmem:[#allocation2 + $0x10] sm:$0xf] %vm808_vm7, %v2995_v32  ;;  %v3834_v29 = vpack.c.b16 %v3831_v6, %v3831_v6  ;;  %v3252_v30 = vor.u32 %v3251_v10, %v3247_v12  ;;  %v3512_v6 = vshll.u32 %v6140_v41, 16 }
 0x269   : > { %v2763_v38 = vmax.f32 %v2755_v26, 0.0  ;;  %4108 = vrot.lane.b32.xlu1 %v4073_v55, %s9171_s1  ;;  %v4326_v55 = vrot.slane %v4324_v8, 4  ;;  %v3253_v34 = vrot.slane %v3252_v30, 4  ;;  %v6141_v30 = vld [vmem:[%s6873_s21 + $0xd0] sm:$0xf] }
 0x26a   : > { %4106 = vrot.lane.b32.xlu0 %v4063_v22, %s9171_s1 }
 0x26b   : > { %v3539_v25 = vpop.permute.xlu1 %3538  ;;  %v2768_v33 = vpack.c.bf16 %v2763_v38, %v2762_v35  ;;  %v3850_v35 = vsel %vm1642_vm10, %v3834_v29, 0  ;;  %v3248_v38 = vsel %vm6884_vm3, %v3243_v17, %v3247_v12  ;;  %v4330_v44 = vor.u32 %v4329_v27, %v4326_v55 }
 0x26c   : > { %3559 = vst.msk [vmem:[#allocation2 + $0xc] sm:$0xf] %vm1363_vm14, %v3539_v25  ;;  %v3537_v36 = vpop.permute.xlu0 %3536  ;;  %3082 = vrot.lane.b32.xlu2 %v3066_v47, %s9177_s25  ;;  %3857 = vmatpush.bf16.msrb.mxu2 %v3850_v35  ;;  %v6423_v25 = vld [vmem:[%s9170_s18 + $0x30] sm:$0xff]  ;;  %v3257_v47 = vrot.slane %v3255_v31, 5  ;;  %v3509_v12 = vshrl.u32 %v6140_v41, 16  ;;  %v4446_v55 = vrot.slane %v6275_v11, 5 }
 0x26d   : > { %3558 = vst.msk [vmem:[#allocation2 + $0x8] sm:$0xf] %vm1363_vm14, %v3537_v36  ;;  %6045 = vmatmul.msk.bf16.gmra.mxu2 %vm2772_vm1, %v2768_v33  ;;  %v6252_v33 = vld [vmem:[%s6873_s21 + $0x100] sm:$0xf]  ;;  %v4331_v52 = vrot.slane %v4330_v44, 4  ;;  %v3514_v29 = vrot.slane %v3512_v6, 5 }
 0x26e   : > { %3643 = vst.msk [vmem:[#allocation2 + $0xc] sm:$0xf] %vm1448_vm15, %v3623_v7  ;;  %v4105_v45 = vpop.permute.xlu2 %4104  ;;  %v4337_v7 = vshrl.u32 %v6262_v2, 16  ;;  %v3518_v44 = vshll.u32 %v6141_v30, 16  ;;  %v6153_v6 = vld [vmem:[%s6873_s21 + $0xd0] sm:$0xf] }
 0x26f   : > { %v4336_v48 = vsel %vm6884_vm3, %v4331_v52, %v4335_v19 }
 0x270   : > { %v4339_v20 = vrot.slane %v4337_v7, 4  ;;  %3858 = vmatpush.bf16.msrb.mxu2 %v6423_v25  ;;  %v6130_v25 = vld [vmem:[%s6873_s21 + $0xd0] sm:$0xf] }
 0x271   : > { %4190 = vrot.lane.b32.xlu1 %v4171_v46, %s9177_s25  ;;  %v6422_v46 = vld [vmem:[%s9170_s18 + $0x28] sm:$0xff] }
 0x272   : > { %3084 = vrot.lane.b32.xlu0 %v3069_v53, %s9177_s25  ;;  %v4340_v40 = vor.u32 %v4339_v20, %v4335_v19  ;;  %v3258_v53 = vsel %vm6884_vm3, %v3253_v34, %v3257_v47  ;;  %v4445_v20 = vrot.slane %v4443_v56, 4 }
 0x273   : > { %v3621_v0 = vpop.permute.xlu1 %3620 }
 0x274   : > { %3642 = vst.msk [vmem:[#allocation2 + $0x8] sm:$0xf] %vm1448_vm15, %v3621_v0  ;;  %v4647_v58 = vpop.permute.xlu0 %4646  ;;  %4192 = vrot.lane.b32.xlu2 %v4174_v24, %s9177_s25  ;;  %v4341_v36 = vrot.slane %v4340_v40, 4  ;;  %3859 = vmatpush.bf16.msrb.mxu2 %v6422_v46  ;;  %v6273_v0 = vld [vmem:[%s6873_s21 + $0xfc] sm:$0xe]  ;;  %v4447_v35 = vsel %vm6897_vm5, %v4445_v20, %v4446_v55 }
 0x275   : > { %v8190_v63 = vld [vmem:[#allocation2 + $0x8] sm:$0xf0]  ;;  %4669 = vst.msk [vmem:[#allocation2 + $0x4] sm:$0xf] %vm1363_vm14, %v4647_v58  ;;  %v6281_v13 = vrot.slane %v6273_v0, 9 }
 0x276   : > { %3985 = vst.msk [vmem:[#allocation2 + $0xc] sm:$0xf] %vm664_vm6, %v6214_v57  ;;  %v4187_v5 = vpop.permute.xlu2 %4186  ;;  %v6116_v57 = vld [vmem:[%s6873_s21 + $0xc0] sm:$0xe]  ;;  %v4346_v50 = vsel %vm6884_vm3, %v4341_v36, %v4345_v49  ;;  %v6297_v40 = vld [vmem:[%s6873_s21 + $0x108] sm:$0xf] }
 0x277   : > { %4125 = vst.msk [vmem:[#allocation2 + $0xc] sm:$0xf] %vm808_vm7, %v4105_v45  ;;  %v6117_v45 = vld [vmem:[%s6873_s21 + $0xc4] sm:$0xf]  ;;  %v6122_v2 = vrot.slane %v6116_v57, 9  ;;  %v4444_v17 = vsel %vm6897_vm5, %v6281_v13, %v4443_v56  ;;  %v4600_v36 = vshll.u32 %v6297_v40, 16 }
 0x278   : > { %v3338_v24 = vrot.slane %v6117_v45, 5  ;;  %v6129_v49 = vld [vmem:[%s6873_s21 + $0xcc] sm:$0xf]  ;;  %v3520_v45 = vrot.slane %v3518_v44, 5  ;;  %v6309_v55 = vld [vmem:[%s6873_s21 + $0x108] sm:$0xe] }
 0x279   : > { %3133 = vrot.lane.b32.xlu1 %v6094_v4, %s9172_s23  ;;  %v4602_v0 = vrot.slane %v4600_v36, 5  ;;  %v6152_v20 = vld [vmem:[%s6873_s21 + $0xcc] sm:$0xe] }
 0x27a   : > { %3131 = vrot.lane.b32.xlu0 %v6093_v61, %s9172_s23  ;;  %v3340_v8 = vrot.slane %v3338_v24, 4  ;;  %v3341_v61 = vrot.slane %v6118_v3, 5  ;;  %v3339_v9 = vsel %vm6897_vm5, %v6122_v2, %v3338_v24  ;;  %v6299_v24 = vld [vmem:[%s6873_s21 + $0x110] sm:$0x1]  ;;  %v6287_v2 = vld [vmem:[%s6873_s21 + $0x108] sm:$0xf] }
 0x27b   : > { %v8205_v26 = vld [vmem:[#allocation2 + $0x8] sm:$0xf]  ;;  %v4731_v22 = vpop.permute.xlu1 %4730  ;;  %v4616_v41 = vshll.u32 %v6299_v24, 16 }
 0x27c   : > { %3984 = vst.msk [vmem:[#allocation2 + $0x8] sm:$0xf] %vm664_vm6, %v6213_v15  ;;  %v4729_v32 = vpop.permute.xlu0 %4728  ;;  %4239 = vrot.lane.b32.xlu2 %v6251_v1, %s9172_s23  ;;  %v3342_v19 = vsel %vm6897_vm5, %v3340_v8, %v3341_v61  ;;  %v3511_v1 = vrot.slane %v3509_v12, 4  ;;  %v6288_v8 = vld [vmem:[%s6873_s21 + $0x10c] sm:$0xf]  ;;  %v6179_v12 = vor.u32 %v8023_v21, %v8011_v28 }
 0x27d   : > { %4753 = vst.msk [vmem:[#allocation2 + $0x4] sm:$0xf] %vm1448_vm15, %v4731_v22  ;;  %v4618_v11 = vrot.slane %v4616_v41, 5  ;;  %v6310_v21 = vld [vmem:[%s6873_s21 + $0x10c] sm:$0xf] }
 0x27e   : > { %4752 = vst.msk [vmem:[#allocation2] sm:$0xf] %vm1448_vm15, %v4729_v32  ;;  %v3130_v16 = vpop.permute.xlu2 %3129  ;;  %v3522_v32 = vshrl.u32 %v6141_v30, 16  ;;  %v6265_v41 = vld [vmem:[%s6873_s21 + $0x10c] sm:$0xf] }
 0x280   : > { %v3524_v46 = vrot.slane %v3522_v32, 4 }
 0x281   : > { %3271 = vrot.lane.b32.xlu1 %v3248_v38, %s9173_s19  ;;  %v6298_v38 = vld [vmem:[%s6873_s21 + $0x10c] sm:$0xf] }
 0x282   : > { %4241 = vrot.lane.b32.xlu0 %v6252_v33, %s9172_s23  ;;  %v3515_v33 = vor.u32 %v3514_v29, %v3511_v1  ;;  %v4606_v34 = vshll.u32 %v6298_v38, 16  ;;  %v4610_v47 = vshrl.u32 %v6298_v38, 16  ;;  %v3525_v3 = vor.u32 %v3524_v46, %v3520_v45  ;;  %v6154_v1 = vld [vmem:[%s6873_s21 + $0xd4] sm:$0x1] }
 0x283   : > { %v4103_v51 = vpop.permute.xlu1 %4102  ;;  %v3611_v29 = vrot.slane %v6153_v6, 5  ;;  %v6317_v38 = vrot.slane %v6309_v55, 9  ;;  %v6266_v55 = vld [vmem:[%s6873_s21 + $0x110] sm:$0x1] }
 0x284   : > { %4124 = vst.msk [vmem:[#allocation2 + $0x8] sm:$0xf] %vm808_vm7, %v4103_v51  ;;  %v2997_v54 = vpop.permute.xlu0 %2996  ;;  %v2727_v39 = vpop.f32.mrf.mxu1  ;;  %3273 = vrot.lane.b32.xlu2 %v3258_v53, %s9173_s19  ;;  %v6142_v53 = vld [vmem:[%s6873_s21 + $0xd4] sm:$0x1]  ;;  %v3526_v61 = vrot.slane %v3525_v3, 4 }
 0x285   : > { %3015 = vst.msk [vmem:[#allocation2 + $0x14] sm:$0xf] %vm808_vm7, %v2997_v54  ;;  %v6424_v60 = vld [vmem:[#allocation2] sm:$0xff]  ;;  %v2743_v4 = vmul.f32 %v7910_v42, %v2727_v39  ;;  %v2841_v51 = vpop.f32.mrf.mxu3  ;;  %v3516_v39 = vrot.slane %v3515_v33, 4  ;;  %v3613_v44 = vrot.slane %v3611_v29, 4 }
 0x286   : > { %4208 = vst.msk [vmem:[#allocation2 + $0x8] sm:$0xf] %vm896_vm8, %v4187_v5  ;;  %6360 = vmatmul.msk.bf16.vlgmr.msrb.gmra.mxu0 %vm1629_vm0, %v6424_v60  ;;  %v3268_v58 = vpop.permute.xlu2 %3267  ;;  %v4608_v60 = vrot.slane %v4606_v34, 5 }
 0x287   : > { %v2756_v14 = vadd.f32 %v7933_v62, %v2743_v4  ;;  %v3521_v13 = vsel %vm6884_vm3, %v3516_v39, %v3520_v45 }
 0x289   : > { %4381 = vrot.lane.b32.xlu1 %v4346_v50, %s9173_s19  ;;  %v2764_v22 = vmax.f32 %v2756_v14, 0.0  ;;  %v4612_v50 = vrot.slane %v4610_v47, 4 }
 0x28a   : > { %4379 = vrot.lane.b32.xlu0 %v4336_v48, %s9173_s19 }
 0x28b   : > { %v3081_v7 = vpop.permute.xlu1 %3080  ;;  %v4613_v56 = vor.u32 %v4612_v50, %v4608_v60 }
 0x28c   : > { %3099 = vst.msk [vmem:[#allocation2 + $0x14] sm:$0xf] %vm896_vm8, %v3081_v7  ;;  %v3079_v10 = vpop.permute.xlu0 %3078  ;;  %v2729_v5 = vpop.f32.mrf.mxu1  ;;  %3355 = vrot.lane.b32.xlu2 %v3339_v9, %s9174_s27 }
 0x28d   : > { %3098 = vst.msk [vmem:[#allocation2 + $0x10] sm:$0xf] %vm896_vm8, %v3079_v10  ;;  %v2744_v15 = vmul.f32 %v7910_v42, %v2729_v5  ;;  %v4614_v5 = vrot.slane %v4613_v56, 4  ;;  %v6264_v56 = vld [vmem:[%s6873_s21 + $0x108] sm:$0xf] }
 0x28e   : > { %3148 = vst.msk [vmem:[#allocation2 + $0x14] sm:$0xf] %vm946_vm9, %v3130_v16  ;;  %v4378_v42 = vpop.permute.xlu2 %4377  ;;  %v4597_v16 = vshrl.u32 %v6297_v40, 16  ;;  %v4716_v40 = vrot.slane %v6310_v21, 5  ;;  %v6253_v21 = vld [vmem:[%s6873_s21 + $0x108] sm:$0xf] }
 0x28f   : > { %v2757_v18 = vadd.f32 %v7933_v62, %v2744_v15 }
 0x290   : > { %v4599_v48 = vrot.slane %v4597_v16, 4  ;;  %v6230_v16 = vld [vmem:[%s6873_s21 + $0x104] sm:$0x1] }
 0x291   : > { %v2765_v27 = vmax.f32 %v2757_v18, 0.0  ;;  %4463 = vrot.lane.b32.xlu1 %v4444_v17, %s9174_s27  ;;  %v4094_v39 = vshll.u32 %v6230_v16, 16 }
 0x292   : > { %3357 = vrot.lane.b32.xlu0 %v3342_v19, %s9174_s27  ;;  %v4603_v7 = vor.u32 %v4602_v0, %v4599_v48  ;;  %v6228_v19 = vld [vmem:[%s6873_s21 + $0xfc] sm:$0xf] }
 0x293   : > { %v3128_v31 = vpop.permute.xlu1 %3127  ;;  %v2769_v62 = vpack.c.bf16 %v2765_v27, %v2764_v22  ;;  %v4619_v22 = vsel %vm6884_vm3, %v4614_v5, %v4618_v11  ;;  %v4075_v30 = vshrl.u32 %v6228_v19, 16  ;;  %v6242_v5 = vld [vmem:[%s6873_s21 + $0x104] sm:$0x1]  ;;  %v4357_v11 = vshll.u32 %v6265_v41, 16 }
 0x294   : > { %3147 = vst.msk [vmem:[#allocation2 + $0x10] sm:$0xf] %vm946_vm9, %v3128_v31  ;;  %v4189_v37 = vpop.permute.xlu0 %4188  ;;  %4465 = vrot.lane.b32.xlu2 %v4447_v35, %s9174_s27  ;;  %v4604_v14 = vrot.slane %v4603_v7, 4  ;;  %v4078_v31 = vshll.u32 %v6228_v19, 16  ;;  %v4361_v7 = vshrl.u32 %v6265_v41, 16 }
 0x295   : > { %4209 = vst.msk [vmem:[#allocation2 + $0xc] sm:$0xf] %vm896_vm8, %v4189_v37  ;;  %6046 = vmatmul.msk.bf16.gmra.mxu2 %vm2772_vm1, %v2769_v62  ;;  %v6158_v62 = vrot.slane %v6152_v20, 9  ;;  %v3614_v37 = vrot.slane %v6154_v1, 5  ;;  %v4077_v34 = vrot.slane %v4075_v30, 4  ;;  %v4367_v1 = vshll.u32 %v6266_v55, 16 }
 0x296   : > { %3287 = vst.msk [vmem:[#allocation2 + $0x10] sm:$0xf] %vm1087_vm11, %v3268_v58  ;;  %v4460_v57 = vpop.permute.xlu2 %4459  ;;  %v3528_v58 = vshll.u32 %v6142_v53, 16  ;;  %v4609_v28 = vsel %vm6884_vm3, %v4604_v14, %v4608_v60  ;;  %v4080_v47 = vrot.slane %v4078_v31, 5  ;;  %v4718_v60 = vrot.slane %v4716_v40, 4 }
 0x297   : > { %v3612_v36 = vsel %vm6897_vm5, %v6158_v62, %v3611_v29  ;;  %v3615_v45 = vsel %vm6897_vm5, %v3613_v44, %v3614_v37  ;;  %v4363_v6 = vrot.slane %v4361_v7, 4  ;;  %v6300_v62 = vld [vmem:[%s6873_s21 + $0x114] sm:$0xf]  ;;  %v6277_v37 = vld [vmem:[%s6873_s21 + $0x10c] sm:$0xf] }
 0x298   : > { %v2797_v52 = vpop.f32.mrf.mxu2  ;;  %v3530_v9 = vrot.slane %v3528_v58, 5  ;;  %v6241_v58 = vld [vmem:[%s6873_s21 + $0x100] sm:$0xf]  ;;  %v6301_v44 = vld [vmem:[%s6873_s21 + $0x118] sm:$0xf] }
 0x299   : > { %v8273_v54 = vadd.f32 %v2841_v51, %v2797_v52  ;;  %3406 = vrot.lane.b32.xlu1 %v6130_v25, %s9175_s26  ;;  %v6311_v51 = vld [vmem:[%s6873_s21 + $0x110] sm:$0x1]  ;;  %v4717_v52 = vsel %vm6897_vm5, %v6317_v38, %v4716_v40  ;;  %v4634_v16 = vshrl.u32 %v6301_v44, 16  ;;  %v6160_v55 = vld [vmem:[%s6873_s21 + $0xa0] sm:$0xf] }
 0x29a   : > { %3404 = vrot.lane.b32.xlu0 %v6129_v49, %s9175_s26  ;;  %v3531_v17 = vsel %vm6884_vm3, %v3526_v61, %v3530_v9  ;;  %v4719_v50 = vrot.slane %v6311_v51, 5  ;;  %v4348_v61 = vshrl.u32 %v6264_v56, 16  ;;  %v4351_v9 = vshll.u32 %v6264_v56, 16 }
 0x29b   : > { %v4238_v59 = vpop.permute.xlu1 %4237  ;;  %v4450_v51 = vrot.slane %v6277_v37, 5 }
 0x29c   : > { %4258 = vst.msk [vmem:[#allocation2 + $0xc] sm:$0xf] %vm946_vm9, %v4238_v59  ;;  %v4236_v4 = vpop.permute.xlu0 %4235  ;;  %4512 = vrot.lane.b32.xlu2 %v6287_v2, %s9175_s26  ;;  %v4096_v59 = vrot.slane %v4094_v39, 5  ;;  %v6183_v2 = vor.u32 %v8190_v63, %v8205_v26  ;;  %v4177_v26 = vrot.slane %v6241_v58, 5  ;;  %v4350_v19 = vrot.slane %v4348_v61, 4 }
 0x29d   : > { %4257 = vst.msk [vmem:[#allocation2 + $0x8] sm:$0xf] %vm946_vm9, %v4236_v4  ;;  %v4720_v4 = vsel %vm6897_vm5, %v4718_v60, %v4719_v50  ;;  %v4353_v20 = vrot.slane %v4351_v9, 5  ;;  %v6278_v39 = vld [vmem:[%s6873_s21 + $0x110] sm:$0x1]  ;;  %v4636_v50 = vrot.slane %v4634_v16, 4 }
 0x29e   : > { %4398 = vst.msk [vmem:[#allocation2 + $0xc] sm:$0xf] %vm1087_vm11, %v4378_v42  ;;  %v3403_v10 = vpop.permute.xlu2 %3402  ;;  %v6229_v42 = vld [vmem:[%s6873_s21 + $0x100] sm:$0xf]  ;;  %v6216_v61 = vld [vmem:[%s6873_s21 + $0xf4] sm:$0xf] }
 0x29f   : > { %v4088_v27 = vshrl.u32 %v6229_v42, 16  ;;  %v4084_v32 = vshll.u32 %v6229_v42, 16  ;;  %v4354_v30 = vor.u32 %v4353_v20, %v4350_v19  ;;  %v6215_v9 = vld [vmem:[%s6873_s21 + $0xf0] sm:$0xf]  ;;  %v6161_v16 = vld [vmem:[%s6873_s21 + $0xa4] sm:$0x1] }
 0x2a1   : > { %3544 = vrot.lane.b32.xlu1 %v3521_v13, %s9178_s29  ;;  %v4090_v25 = vrot.slane %v4088_v27, 4  ;;  %v4086_v46 = vrot.slane %v4084_v32, 5  ;;  %v4355_v40 = vrot.slane %v4354_v30, 4 }
 0x2a2   : > { %4514 = vrot.lane.b32.xlu0 %v6288_v8, %s9175_s26 }
 0x2a3   : > { %v4376_v15 = vpop.permute.xlu1 %4375  ;;  %v4091_v53 = vor.u32 %v4090_v25, %v4086_v46  ;;  %v6254_v25 = vld [vmem:[%s6873_s21 + $0x10c] sm:$0xf] }
 0x2a4   : > { %4397 = vst.msk [vmem:[#allocation2 + $0x8] sm:$0xf] %vm1087_vm11, %v4376_v15  ;;  %v3270_v18 = vpop.permute.xlu0 %3269  ;;  %3546 = vrot.lane.b32.xlu2 %v3531_v17, %s9178_s29 }
 0x2a5   : > { %3288 = vst.msk [vmem:[#allocation2 + $0x14] sm:$0xf] %vm1087_vm11, %v3270_v18  ;;  %6200 = vmatmul.msk.bf16.vlgmr.msrb.gmra.mxu2 %vm1629_vm0, %v6179_v12  ;;  %v4092_v0 = vrot.slane %v4091_v53, 4  ;;  %v4179_v12 = vrot.slane %v4177_v26, 4  ;;  %v4180_v18 = vrot.slane %v6242_v5, 5 }
 0x2a6   : > { %4481 = vst.msk [vmem:[#allocation2 + $0x8] sm:$0xf] %vm1172_vm12, %v4460_v57  ;;  %v3541_v35 = vpop.permute.xlu2 %3540  ;;  %v4081_v57 = vor.u32 %v4080_v47, %v4077_v34  ;;  %v4621_v34 = vshrl.u32 %v6300_v62, 16  ;;  %v4624_v47 = vshll.u32 %v6300_v62, 16 }
 0x2a7   : > { %v4097_v63 = vsel %vm6884_vm3, %v4092_v0, %v4096_v59  ;;  %v4181_v29 = vsel %vm6897_vm5, %v4179_v12, %v4180_v18  ;;  %v4452_v59 = vrot.slane %v4450_v51, 4  ;;  %v8389_v12 = vld [vmem:[%s6873_s21 + $0x58] sm:$0xf]  ;;  %v6159_v18 = vld [vmem:[%s6873_s21 + $0x9c] sm:$0xf] }
 0x2a8   : > { %v4082_v3 = vrot.slane %v4081_v57, 4  ;;  %v4626_v57 = vrot.slane %v4624_v47, 5  ;;  %v2521_v30 = vshll.u32 %v8389_v12, 16 }
 0x2a9   : > { %4654 = vrot.lane.b32.xlu1 %v4619_v22, %s9178_s29 }
 0x2aa   : > { %4652 = vrot.lane.b32.xlu0 %v4609_v28, %s9178_s29  ;;  %v4087_v8 = vsel %vm6884_vm3, %v4082_v3, %v4086_v46  ;;  %v4359_v28 = vrot.slane %v4357_v11, 5  ;;  %v5995_v3 = vld [vmem:[%s6873_s21 + $0x54] sm:$0xf] }
 0x2ab   : > { %v3354_v33 = vpop.permute.xlu1 %3353  ;;  %v2515_v7 = vshll.u32 %v5995_v3, 16 }
 0x2ac   : > { %3372 = vst.msk [vmem:[#allocation2 + $0x14] sm:$0xf] %vm1172_vm12, %v3354_v33  ;;  %v3352_v49 = vpop.permute.xlu0 %3351  ;;  %3628 = vrot.lane.b32.xlu2 %v3612_v36, %s9176_s2  ;;  %v4364_v27 = vor.u32 %v4363_v6, %v4359_v28  ;;  %v6276_v36 = vld [vmem:[%s6873_s21 + $0x108] sm:$0xe]  ;;  %v4360_v46 = vsel %vm6884_vm3, %v4355_v40, %v4359_v28 }
 0x2ad   : > { %3371 = vst.msk [vmem:[#allocation2 + $0x10] sm:$0xf] %vm1172_vm12, %v3352_v49  ;;  %v6282_v53 = vrot.slane %v6276_v36, 9  ;;  %v6312_v36 = vld [vmem:[%s6873_s21 + $0x114] sm:$0xe] }
 0x2ae   : > { %3421 = vst.msk [vmem:[#allocation2 + $0x14] sm:$0xf] %vm1222_vm13, %v3403_v10  ;;  %v4651_v48 = vpop.permute.xlu2 %4650  ;;  %v6240_v10 = vld [vmem:[%s6873_s21 + $0xfc] sm:$0xe]  ;;  %v4365_v32 = vrot.slane %v4364_v27, 4  ;;  %v3674_v27 = vshrl.u32 %v6160_v55, 16 }
 0x2af   : > { %v6246_v14 = vrot.slane %v6240_v10, 9  ;;  %v4451_v58 = vsel %vm6897_vm5, %v6282_v53, %v4450_v51  ;;  %v6318_v53 = vrot.slane %v6312_v36, 9 }
 0x2b1   : > { %4736 = vrot.lane.b32.xlu1 %v4717_v52, %s9176_s2  ;;  %v4178_v42 = vsel %vm6897_vm5, %v6246_v14, %v4177_v26  ;;  %v4630_v52 = vshll.u32 %v6301_v44, 16  ;;  %v2512_v26 = vshrl.u32 %v5995_v3, 16  ;;  %v6313_v14 = vld [vmem:[%s6873_s21 + $0x118] sm:$0xf]  ;;  %v2523_v44 = vrot.slane %v2521_v30, 5 }
 0x2b2   : > { %3630 = vrot.lane.b32.xlu0 %v3615_v45, %s9176_s2  ;;  %v4623_v45 = vrot.slane %v4621_v34, 4 }
 0x2b3   : > { %v3401_v24 = vpop.permute.xlu1 %3400  ;;  %v2514_v6 = vrot.slane %v2512_v26, 4 }
 0x2b4   : > { %3420 = vst.msk [vmem:[#allocation2 + $0x10] sm:$0xf] %vm1222_vm13, %v3401_v24  ;;  %v4462_v13 = vpop.permute.xlu0 %4461  ;;  %4738 = vrot.lane.b32.xlu2 %v4720_v4, %s9176_s2  ;;  %v4453_v24 = vrot.slane %v6278_v39, 5 }
 0x2b5   : > { %4482 = vst.msk [vmem:[#allocation2 + $0xc] sm:$0xf] %vm1172_vm12, %v4462_v13  ;;  %6201 = vmatmul.msk.bf16.gmra.mxu2 %vm1629_vm0, %v6183_v2  ;;  %v4632_v2 = vrot.slane %v4630_v52, 5  ;;  %v4627_v13 = vor.u32 %v4626_v57, %v4623_v45  ;;  %v5998_v52 = vld [vmem:[%s6873_s21 + $0x60] sm:$0xf]  ;;  %v2525_v45 = vshrl.u32 %v8389_v12, 16 }
 0x2b6   : > { %3560 = vst.msk [vmem:[#allocation2 + $0x10] sm:$0xf] %vm1363_vm14, %v3541_v35  ;;  %v4733_v15 = vpop.permute.xlu2 %4732  ;;  %v4369_v35 = vrot.slane %v4367_v1, 5 }
 0x2b7   : > { %v4637_v56 = vor.u32 %v4636_v50, %v4632_v2  ;;  %v4628_v10 = vrot.slane %v4627_v13, 4  ;;  %v3680_v50 = vshll.u32 %v6161_v16, 16  ;;  %v5997_v13 = vld [vmem:[%s6873_s21 + $0x5c] sm:$0x1] }
 0x2b8   : > { %v4370_v49 = vsel %vm6884_vm3, %v4365_v32, %v4369_v35  ;;  %v3664_v35 = vshll.u32 %v6159_v18, 16  ;;  %v2531_v26 = vshll.u32 %v5997_v13, 16 }
 0x2b9   : > { %4112 = vrot.lane.b32.xlu1 %v4097_v63, %s9171_s1  ;;  %v6289_v63 = vld [vmem:[%s6873_s21 + $0x114] sm:$0xf]  ;;  %v4638_v5 = vrot.slane %v4637_v56, 4  ;;  %v4633_v40 = vsel %vm6884_vm3, %v4628_v10, %v4632_v2  ;;  %v3682_v43 = vrot.slane %v3680_v50, 5 }
 0x2ba   : > { %4110 = vrot.lane.b32.xlu0 %v4087_v8, %s9171_s1  ;;  %v4454_v8 = vsel %vm6897_vm5, %v4452_v59, %v4453_v24  ;;  %v2536_v59 = vshrl.u32 %v5998_v52, 16  ;;  %v2539_v24 = vshll.u32 %v5998_v52, 16  ;;  %v6323_v50 = vld [vmem:[%s6873_s21 + $0xf4] sm:$0xf] }
 0x2bb   : > { %v4511_v17 = vpop.permute.xlu1 %4510  ;;  %v4810_v13 = vshrl.u32 %v6323_v50, 16 }
 0x2bc   : > { %4531 = vst.msk [vmem:[#allocation2 + $0xc] sm:$0xf] %vm1222_vm13, %v4511_v17  ;;  %v4509_v22 = vpop.permute.xlu0 %4508  ;;  %4194 = vrot.lane.b32.xlu2 %v4178_v42, %s9177_s25  ;;  %v2517_v17 = vrot.slane %v2515_v7, 5  ;;  %v6290_v42 = vld [vmem:[%s6873_s21 + $0x118] sm:$0xf] }
 0x2bd   : > { %4530 = vst.msk [vmem:[#allocation2 + $0x8] sm:$0xf] %vm1222_vm13, %v4509_v22 }
 0x2be   : > { %4671 = vst.msk [vmem:[#allocation2 + $0xc] sm:$0xf] %vm1363_vm14, %v4651_v48  ;;  %v3001_v31 = vpop.permute.xlu2 %3000  ;;  %v6302_v48 = vld [vmem:[%s6873_s21 + $0x11c] sm:$0x1]  ;;  %v2518_v32 = vor.u32 %v2517_v17, %v2514_v6  ;;  %v5999_v17 = vld [vmem:[%s6873_s21 + $0x64] sm:$0xf] }
 0x2bf   : > { %3017 = vst.msk [vmem:[#allocation2 + $0x1c] sm:$0xf] %vm808_vm7, %v3001_v31  ;;  %v4640_v41 = vshll.u32 %v6302_v48, 16  ;;  %v3661_v31 = vshrl.u32 %v6159_v18, 16  ;;  %v6320_v48 = vld [vmem:[%s6873_s21 + $0xe8] sm:$0xf] }
 0x2c0   : > { %v4782_v56 = vshll.u32 %v6320_v48, 16 }
 0x2c1   : > { %4243 = vrot.lane.b32.xlu1 %v6253_v21, %s9172_s23  ;;  %v4642_v11 = vrot.slane %v4640_v41, 5  ;;  %v4723_v21 = vrot.slane %v6313_v14, 5  ;;  %v3663_v34 = vrot.slane %v3661_v31, 4  ;;  %v4786_v41 = vshrl.u32 %v6320_v48, 16 }
 0x2c2   : > { %4196 = vrot.lane.b32.xlu0 %v4181_v29, %s9177_s25  ;;  %v6314_v29 = vld [vmem:[%s6873_s21 + $0x11c] sm:$0x1]  ;;  %v4784_v12 = vrot.slane %v4782_v56, 5 }
 0x2c3   : > { %v4649_v38 = vpop.permute.xlu1 %4648  ;;  %v4643_v62 = vsel %vm6884_vm3, %v4638_v5, %v4642_v11  ;;  %v4725_v37 = vrot.slane %v4723_v21, 4  ;;  %v2533_v5 = vrot.slane %v2531_v26, 5  ;;  %v6162_v11 = vld [vmem:[%s6873_s21 + $0xa8] sm:$0xf]  ;;  %v4788_v6 = vrot.slane %v4786_v41, 4 }
 0x2c4   : > { %4670 = vst.msk [vmem:[#allocation2 + $0x8] sm:$0xf] %vm1363_vm14, %v4649_v38  ;;  %v3543_v33 = vpop.permute.xlu0 %3542  ;;  %4245 = vrot.lane.b32.xlu2 %v6254_v25, %s9172_s23  ;;  %v3670_v38 = vshll.u32 %v6160_v55, 16  ;;  %v4726_v25 = vrot.slane %v6314_v29, 5  ;;  %v6321_v55 = vld [vmem:[%s6873_s21 + $0xec] sm:$0x1] }
 0x2c5   : > { %3561 = vst.msk [vmem:[#allocation2 + $0x14] sm:$0xf] %vm1363_vm14, %v3543_v33  ;;  %v3676_v33 = vrot.slane %v3674_v27, 4  ;;  %v3688_v27 = vshll.u32 %v6162_v11, 16  ;;  %v2545_v29 = vshll.u32 %v5999_v17, 16 }
 0x2c6   : > { %4754 = vst.msk [vmem:[#allocation2 + $0x8] sm:$0xf] %vm1448_vm15, %v4733_v15  ;;  %v3083_v60 = vpop.permute.xlu2 %3082  ;;  %v8411_v51 = vrot.slane %v3670_v38, 5  ;;  %v4727_v3 = vsel %vm6897_vm5, %v4725_v37, %v4726_v25  ;;  %v4792_v38 = vshll.u32 %v6321_v55, 16  ;;  %v6000_v41 = vld [vmem:[%s6873_s21 + $0x68] sm:$0x1] }
 0x2c7   : > { %v2547_v16 = vrot.slane %v2545_v29, 5 }
 0x2c8   : > { %v4794_v52 = vrot.slane %v4792_v38, 5 }
 0x2c9   : > { %4385 = vrot.lane.b32.xlu1 %v4370_v49, %s9173_s19  ;;  %v2519_v49 = vrot.slane %v2518_v32, 4 }
 0x2ca   : > { %4383 = vrot.lane.b32.xlu0 %v4360_v46, %s9173_s19  ;;  %v3666_v46 = vrot.slane %v3664_v35, 5  ;;  %v4789_v35 = vor.u32 %v4788_v6, %v4784_v12 }
 0x2cb   : > { %v3627_v0 = vpop.permute.xlu1 %3626 }
 0x2cc   : > { %3645 = vst.msk [vmem:[#allocation2 + $0x14] sm:$0xf] %vm1448_vm15, %v3627_v0  ;;  %v3625_v4 = vpop.permute.xlu0 %3624  ;;  %4467 = vrot.lane.b32.xlu2 %v4451_v58, %s9174_s27  ;;  %v4724_v0 = vsel %vm6897_vm5, %v6318_v53, %v4723_v21  ;;  %v2524_v58 = vsel %vm6884_vm3, %v2519_v49, %v2523_v44  ;;  %v3685_v21 = vshrl.u32 %v6162_v11, 16  ;;  %v2549_v53 = vshrl.u32 %v5999_v17, 16 }
 0x2cd   : > { %3644 = vst.msk [vmem:[#allocation2 + $0x10] sm:$0xf] %vm1448_vm15, %v3625_v4  ;;  %v3667_v4 = vor.u32 %v3666_v46, %v3663_v34  ;;  %v4812_v11 = vrot.slane %v4810_v13, 4  ;;  %v6165_v13 = vld [vmem:[%s6873_s21 + $0xb4] sm:$0xf] }
 0x2ce   : > { %v4193_v15 = vpop.permute.xlu2 %4192  ;;  %v2551_v56 = vrot.slane %v2549_v53, 4 }
 0x2d0   : > { %v2552_v26 = vor.u32 %v2551_v56, %v2547_v16 }
 0x2d1   : > { %4516 = vrot.lane.b32.xlu1 %v6289_v63, %s9175_s26  ;;  %v2527_v63 = vrot.slane %v2525_v45, 4  ;;  %v8450_v45 = vpop.f32.mrf.mxu2 }
 0x2d2   : > { %4469 = vrot.lane.b32.xlu0 %v4454_v8, %s9174_s27 }
 0x2d3   : > { %v6420_v19 = vld [vmem:[#allocation2 + $0x10] sm:$0xf0]  ;;  %v2999_v20 = vpop.permute.xlu1 %2998  ;;  %v2528_v10 = vor.u32 %v2527_v63, %v2523_v44  ;;  %v3690_v44 = vrot.slane %v3688_v27, 5 }
 0x2d4   : > { %3987 = vst.msk [vmem:[#allocation2 + $0x14] sm:$0xf] %vm664_vm6, %v6216_v61  ;;  %v6186_v22 = vld [vmem:[#allocation2 + $0x10] sm:$0xf]  ;;  %v4735_v28 = vpop.permute.xlu0 %4734  ;;  %4518 = vrot.lane.b32.xlu2 %v6290_v42, %s9175_s26  ;;  %v2538_v61 = vrot.slane %v2536_v59, 4 }
 0x2d5   : > { %3986 = vst.msk [vmem:[#allocation2 + $0x10] sm:$0xf] %vm664_vm6, %v6215_v9  ;;  %v6187_v1 = vor.u32 %v6420_v19, %v6186_v22  ;;  %v2541_v9 = vrot.slane %v2539_v24, 5  ;;  %v2529_v18 = vrot.slane %v2528_v10, 4  ;;  %v6319_v42 = vld [vmem:[%s6873_s21 + $0xe4] sm:$0xf] }
 0x2d6   : > { %3016 = vst.msk [vmem:[#allocation2 + $0x18] sm:$0xf] %vm808_vm7, %v2999_v20  ;;  %v4240_v47 = vpop.permute.xlu2 %4239  ;;  %v4773_v31 = vshrl.u32 %v6319_v42, 16 }
 0x2d7   : > { %4755 = vst.msk [vmem:[#allocation2 + $0xc] sm:$0xf] %vm1448_vm15, %v4735_v28  ;;  %6202 = vmatmul.msk.bf16.gmra.mxu2 %vm1629_vm0, %v6187_v1  ;;  %v2542_v22 = vor.u32 %v2541_v9, %v2538_v61  ;;  %v6163_v28 = vld [vmem:[%s6873_s21 + $0xac] sm:$0xf]  ;;  %v2534_v1 = vsel %vm6884_vm3, %v2529_v18, %v2533_v5  ;;  %v6324_v9 = vld [vmem:[%s6873_s21 + $0xf8] sm:$0x1] }
 0x2d8   : > { %3100 = vst.msk [vmem:[#allocation2 + $0x18] sm:$0xf] %vm896_vm8, %v3083_v60  ;;  %v3677_v60 = vor.u32 %v3676_v33, %v8411_v51  ;;  %v3698_v30 = vshrl.u32 %v6163_v28, 16  ;;  %v4775_v37 = vrot.slane %v4773_v31, 4  ;;  %v3687_v33 = vrot.slane %v3685_v21, 4 }
 0x2d9   : > { %4658 = vrot.lane.b32.xlu1 %v4643_v62, %s9178_s29  ;;  %v4776_v62 = vshll.u32 %v6319_v42, 16  ;;  %v8470_v6 = vpop.f32.mrf.mxu2  ;;  %v4816_v27 = vshll.u32 %v6324_v9, 16 }
 0x2da   : > { %4656 = vrot.lane.b32.xlu0 %v4633_v40, %s9178_s29  ;;  %v3678_v7 = vrot.slane %v3677_v60, 4  ;;  %v3694_v40 = vshll.u32 %v6163_v28, 16  ;;  %v3700_v36 = vrot.slane %v3698_v30, 4 }
 0x2db   : > { %v4109_v39 = vpop.permute.xlu1 %4108  ;;  %v4778_v25 = vrot.slane %v4776_v62, 5 }
 0x2dc   : > { %4127 = vst.msk [vmem:[#allocation2 + $0x14] sm:$0xf] %vm808_vm7, %v4109_v39  ;;  %v4107_v57 = vpop.permute.xlu0 %4106  ;;  %4740 = vrot.lane.b32.xlu2 %v4724_v0, %s9176_s2  ;;  %v3683_v20 = vsel %vm6884_vm3, %v3678_v7, %v3682_v43  ;;  %v6164_v39 = vld [vmem:[%s6873_s21 + $0xb0] sm:$0x1]  ;;  %v3696_v60 = vrot.slane %v3694_v40, 5  ;;  %v3691_v0 = vor.u32 %v3690_v44, %v3687_v33  ;;  %v2555_v7 = vshll.u32 %v6000_v41, 16 }
 0x2dd   : > { %4126 = vst.msk [vmem:[#allocation2 + $0x10] sm:$0xf] %vm808_vm7, %v4107_v57  ;;  %v4779_v49 = vor.u32 %v4778_v25, %v4775_v37 }
 0x2de   : > { %v6425_v2 = vld [vmem:[#allocation2 + $0x8] sm:$0xff]  ;;  %4211 = vst.msk [vmem:[#allocation2 + $0x14] sm:$0xf] %vm896_vm8, %v4193_v15  ;;  %v3274_v8 = vpop.permute.xlu2 %3273  ;;  %v3668_v15 = vrot.slane %v3667_v4, 4  ;;  %v3701_v24 = vor.u32 %v3700_v36, %v3696_v60  ;;  %v4806_v4 = vshll.u32 %v6323_v50, 16  ;;  %v3692_v43 = vrot.slane %v3691_v0, 4 }
 0x2df   : > { %6361 = vmatmul.msk.bf16.gmra.mxu0 %vm1629_vm0, %v6425_v2  ;;  %v4780_v48 = vrot.slane %v4779_v49, 4  ;;  %v3704_v2 = vshll.u32 %v6164_v39, 16  ;;  %v8501_v36 = vld [vmem:[%s9179_s17 + $0x3] ss:$0 sm:$0xff] }
 0x2e0   : > { %v3673_v32 = vsel %vm6884_vm3, %v3668_v15, %v8411_v51  ;;  %v4790_v51 = vrot.slane %v4789_v35, 4  ;;  %v4808_v5 = vrot.slane %v4806_v4, 5  ;;  %v2557_v15 = vrot.slane %v2555_v7, 5 }
 0x2e1   : > { %2607 = vrot.lane.b32.xlu1 %v2524_v58, %s9171_s1  ;;  %v3706_v61 = vrot.slane %v3704_v2, 5  ;;  %v4818_v35 = vrot.slane %v4816_v27, 5  ;;  %v8490_v25 = vpop.f32.mrf.mxu2  ;;  %v8517_v2 = vld [vmem:[%s6873_s21 + $0x70] sm:$0xf] }
 0x2e2   : > { %4742 = vrot.lane.b32.xlu0 %v4727_v3, %s9176_s2  ;;  %v4785_v3 = vsel %vm6884_vm3, %v4780_v48, %v4784_v12  ;;  %v4795_v58 = vsel %vm6884_vm3, %v4790_v51, %v4794_v52  ;;  %v6366_v12 = vld [vmem:[%s9095_s7 + $0x6] sm:$0x3]  ;;  %v4813_v21 = vor.u32 %v4812_v11, %v4808_v5  ;;  %v8511_v51 = vld [vmem:[%s9180_s3 + $0x3] ss:$0 sm:$0xff]  ;;  %v6001_v52 = vld [vmem:[%s6873_s21 + $0x6c] sm:$0xf] }
 0x2e3   : > { %v4191_v14 = vpop.permute.xlu1 %4190  ;;  %v5046_v18 = vsel %vm1642_vm10, %v6366_v12, 0  ;;  %v2560_v39 = vshrl.u32 %v6001_v52, 16  ;;  %v2569_v4 = vshll.u32 %v8517_v2, 16 }
 0x2e4   : > { %4210 = vst.msk [vmem:[#allocation2 + $0x10] sm:$0xf] %vm896_vm8, %v4191_v14  ;;  %v3085_v19 = vpop.permute.xlu0 %3084  ;;  %2609 = vrot.lane.b32.xlu2 %v2534_v1, %s9171_s1  ;;  %v2553_v14 = vrot.slane %v2552_v26, 4  ;;  %5055 = vmatpush.bf16.msra.mxu1 %v5046_v18  ;;  %v3709_v26 = vshrl.u32 %v6165_v13, 16 }
 0x2e5   : > { %3101 = vst.msk [vmem:[#allocation2 + $0x1c] sm:$0xf] %vm896_vm8, %v3085_v19  ;;  %v6322_v19 = vld [vmem:[%s6873_s21 + $0xf0] sm:$0xf]  ;;  %v2562_v50 = vrot.slane %v2560_v39, 4 }
 0x2e6   : > { %4259 = vst.msk [vmem:[#allocation2 + $0x10] sm:$0xf] %vm946_vm9, %v4240_v47  ;;  %v3356_v34 = vpop.permute.xlu2 %3355  ;;  %v2543_v47 = vrot.slane %v2542_v22, 4  ;;  %v4797_v55 = vshrl.u32 %v6322_v19, 16  ;;  %v4800_v42 = vshll.u32 %v6322_v19, 16  ;;  %v3697_v22 = vsel %vm6884_vm3, %v3692_v43, %v3696_v60 }
 0x2e7   : > { %v3711_v11 = vrot.slane %v3709_v26, 4 }
 0x2e8   : > { %v2548_v59 = vsel %vm6884_vm3, %v2543_v47, %v2547_v16  ;;  %v4799_v1 = vrot.slane %v4797_v55, 4  ;;  %v4802_v29 = vrot.slane %v4800_v42, 5  ;;  %v6167_v42 = vld [vmem:[%s6873_s21 + $0xbc] sm:$0x1] }
 0x2e9   : > { %3758 = vrot.lane.b32.xlu1 %v3683_v20, %s9177_s25  ;;  %v2558_v20 = vsel %vm6884_vm3, %v2553_v14, %v2557_v15 }
 0x2ea   : > { %3756 = vrot.lane.b32.xlu0 %v3673_v32, %s9177_s25  ;;  %v4803_v31 = vor.u32 %v4802_v29, %v4799_v1  ;;  %v4814_v32 = vrot.slane %v4813_v21, 4  ;;  %v6326_v1 = vld [vmem:[%s6873_s21 + $0x100] sm:$0xf]  ;;  %v6206_v29 = vld [vmem:[%s9095_s7 + $0x4] sm:$0x3] }
 0x2eb   : > { %v3134_v46 = vpop.permute.xlu1 %3133 }
 0x2ec   : > { %3150 = vst.msk [vmem:[#allocation2 + $0x1c] sm:$0xf] %vm946_vm9, %v3134_v46  ;;  %v3132_v57 = vpop.permute.xlu0 %3131  ;;  %4868 = vrot.lane.b32.xlu2 %v4785_v3, %s9172_s23  ;;  %v4804_v38 = vrot.slane %v4803_v31, 4  ;;  %v4819_v33 = vsel %vm6884_vm3, %v4814_v32, %v4818_v35  ;;  %v4830_v31 = vshll.u32 %v6326_v1, 16 }
 0x2ed   : > { %3149 = vst.msk [vmem:[#allocation2 + $0x18] sm:$0xf] %vm946_vm9, %v3132_v57  ;;  %v2563_v57 = vshll.u32 %v6001_v52, 16 }
 0x2ee   : > { %3290 = vst.msk [vmem:[#allocation2 + $0x1c] sm:$0xf] %vm1087_vm11, %v3274_v8  ;;  %v4466_v63 = vpop.permute.xlu2 %4465  ;;  %v3702_v8 = vrot.slane %v3701_v24, 4  ;;  %v4809_v37 = vsel %vm6884_vm3, %v4804_v38, %v4808_v5  ;;  %v3934_v38 = vsel %vm1642_vm10, %v6206_v29, 0 }
 0x2ef   : > { %v2565_v48 = vrot.slane %v2563_v57, 5  ;;  %3943 = vmatpush.bf16.msrb.mxu3 %v3934_v38  ;;  %v6325_v38 = vld [vmem:[%s6873_s21 + $0xfc] sm:$0xf] }
 0x2f0   : > { %v3707_v28 = vsel %vm6884_vm3, %v3702_v8, %v3706_v61  ;;  %v8504_v49 = vpop.f32.mrf.mxu2  ;;  %v6166_v8 = vld [vmem:[%s6873_s21 + $0xb8] sm:$0xf]  ;;  %v3712_v61 = vshll.u32 %v6165_v13, 16 }
 0x2f1   : > { %2611 = vrot.lane.b32.xlu1 %v2548_v59, %s9171_s1  ;;  %v3718_v14 = vshll.u32 %v6166_v8, 16  ;;  %v3722_v12 = vshrl.u32 %v6166_v8, 16  ;;  %v6169_v8 = vld [vmem:[%s6873_s21 + $0xc4] sm:$0xf] }
 0x2f2   : > { %4870 = vrot.lane.b32.xlu0 %v4795_v58, %s9172_s23  ;;  %v2566_v58 = vor.u32 %v2565_v48, %v2562_v50  ;;  %v3714_v15 = vrot.slane %v3712_v61, 5  ;;  %v2573_v61 = vshrl.u32 %v8517_v2, 16 }
 0x2f3   : > { %v3272_v10 = vpop.permute.xlu1 %3271  ;;  %v3720_v19 = vrot.slane %v3718_v14, 5 }
 0x2f4   : > { %3289 = vst.msk [vmem:[#allocation2 + $0x18] sm:$0xf] %vm1087_vm11, %v3272_v10  ;;  %v4242_v17 = vpop.permute.xlu0 %4241  ;;  %2613 = vrot.lane.b32.xlu2 %v2558_v20, %s9171_s1  ;;  %v2567_v41 = vrot.slane %v2566_v58, 4  ;;  %v3715_v55 = vor.u32 %v3714_v15, %v3711_v11  ;;  %v3746_v11 = vshrl.u32 %v6169_v8, 16 }
 0x2f5   : > { %4260 = vst.msk [vmem:[#allocation2 + $0x14] sm:$0xf] %vm946_vm9, %v4242_v17 }
 0x2f6   : > { %3373 = vst.msk [vmem:[#allocation2 + $0x18] sm:$0xf] %vm1172_vm12, %v3356_v34  ;;  %v4513_v30 = vpop.permute.xlu2 %4512  ;;  %v3716_v21 = vrot.slane %v3715_v55, 4  ;;  %v2575_v55 = vrot.slane %v2573_v61, 4 }
 0x2f8   : > { %v8527_v7 = vpop.f32.mrf.mxu2  ;;  %v3721_v35 = vsel %vm6884_vm3, %v3716_v21, %v3720_v19 }
 0x2f9   : > { %3762 = vrot.lane.b32.xlu1 %v3707_v28, %s9177_s25  ;;  %v3728_v28 = vshll.u32 %v6167_v42, 16 }
 0x2fa   : > { %3760 = vrot.lane.b32.xlu0 %v3697_v22, %s9177_s25  ;;  %v3724_v22 = vrot.slane %v3722_v12, 4  ;;  %v3748_v12 = vrot.slane %v3746_v11, 4 }
 0x2fb   : > { %v4382_v62 = vpop.permute.xlu1 %4381 }
 0x2fc   : > { %4400 = vst.msk [vmem:[#allocation2 + $0x14] sm:$0xf] %vm1087_vm11, %v4382_v62  ;;  %v4380_v40 = vpop.permute.xlu0 %4379  ;;  %4872 = vrot.lane.b32.xlu2 %v4809_v37, %s9172_s23  ;;  %v3725_v27 = vor.u32 %v3724_v22, %v3720_v19  ;;  %v4834_v62 = vshrl.u32 %v6326_v1, 16  ;;  %v6004_v37 = vld [vmem:[%s6873_s21 + $0x78] sm:$0xf] }
 0x2fd   : > { %4399 = vst.msk [vmem:[#allocation2 + $0x10] sm:$0xf] %vm1087_vm11, %v4380_v40  ;;  %v2587_v52 = vshll.u32 %v6004_v37, 16  ;;  %v8594_v1 = vld [vmem:[%s9179_s17 + $0x2] ss:$0 sm:$0xff] }
 0x2fe   : > { %4484 = vst.msk [vmem:[#allocation2 + $0x14] sm:$0xf] %vm1172_vm12, %v4466_v63  ;;  %v3547_v44 = vpop.permute.xlu2 %3546  ;;  %v8525_v63 = vrot.slane %v2569_v4, 5  ;;  %v3726_v40 = vrot.slane %v3725_v27, 4 }
 0x300   : > { %v2572_v5 = vsel %vm6884_vm3, %v2567_v41, %v8525_v63  ;;  %v2576_v21 = vor.u32 %v2575_v55, %v8525_v63 }
 0x301   : > { %2615 = vrot.lane.b32.xlu1 %v2572_v5, %s9171_s1  ;;  %v3742_v5 = vshll.u32 %v6169_v8, 16 }
 0x302   : > { %4874 = vrot.lane.b32.xlu0 %v4819_v33, %s9172_s23 }
 0x303   : > { %v4464_v34 = vpop.permute.xlu1 %4463  ;;  %v4973_v16 = vpop.f32.mrf.mxu0  ;;  %v8583_v15 = vrot.slane %v3742_v5, 5 }
 0x304   : > { %4483 = vst.msk [vmem:[#allocation2 + $0x10] sm:$0xf] %vm1172_vm12, %v4464_v34  ;;  %v3358_v47 = vpop.permute.xlu0 %3357  ;;  %v4998_v46 = vmul.f32 %v8501_v36, %v4973_v16  ;;  %v4836_v34 = vrot.slane %v4834_v62, 4  ;;  %v2577_v62 = vrot.slane %v2576_v21, 4  ;;  %v5848_v21 = vld [vmem:[%s6873_s21 + $0x10] sm:$0xf] }
 0x305   : > { %3374 = vst.msk [vmem:[#allocation2 + $0x1c] sm:$0xf] %vm1172_vm12, %v3358_v47  ;;  %v2584_v47 = vshrl.u32 %v6004_v37, 16 }
 0x306   : > { %4532 = vst.msk [vmem:[#allocation2 + $0x10] sm:$0xf] %vm1222_vm13, %v4513_v30  ;;  %v3629_v53 = vpop.permute.xlu2 %3628  ;;  %v5011_v0 = vadd.f32 %v8511_v51, %v4998_v46  ;;  %v3730_v30 = vrot.slane %v3728_v28, 5  ;;  %v6327_v46 = vld [vmem:[%s6873_s21 + $0x104] sm:$0x1] }
 0x307   : > { %v2586_v50 = vrot.slane %v2584_v47, 4  ;;  %v4824_v47 = vshll.u32 %v6325_v38, 16 }
 0x308   : > { %v5019_v43 = vmax.f32 %v5011_v0, 0.0  ;;  %v3731_v16 = vsel %vm6884_vm3, %v3726_v40, %v3730_v30  ;;  %v8562_v0 = vld [vmem:[%s6873_s21 + $0x7c] sm:$0xf] }
 0x309   : > { %3766 = vrot.lane.b32.xlu1 %v3731_v16, %s9177_s25  ;;  %v2593_v13 = vshll.u32 %v8562_v0, 16 }
 0x30a   : > { %3764 = vrot.lane.b32.xlu0 %v3721_v35, %s9177_s25  ;;  %v6218_v35 = vld [vmem:[%s6873_s21 + $0x100] sm:$0xf] }
 0x30b   : > { %v3407_v60 = vpop.permute.xlu1 %3406  ;;  %v4975_v24 = vpop.f32.mrf.mxu0 }
 0x30c   : > { %3423 = vst.msk [vmem:[#allocation2 + $0x1c] sm:$0xf] %vm1222_vm13, %v3407_v60  ;;  %v3405_v59 = vpop.permute.xlu0 %3404  ;;  %v4999_v3 = vmul.f32 %v8501_v36, %v4975_v24  ;;  %v4840_v60 = vshll.u32 %v6327_v46, 16 }
 0x30d   : > { %3422 = vst.msk [vmem:[#allocation2 + $0x18] sm:$0xf] %vm1222_vm13, %v3405_v59  ;;  %v2589_v59 = vrot.slane %v2587_v52, 5  ;;  %v8609_v52 = vld [vmem:[%s9180_s3 + $0x2] ss:$0 sm:$0xff] }
 0x30e   : > { %3563 = vst.msk [vmem:[#allocation2 + $0x1c] sm:$0xf] %vm1363_vm14, %v3547_v44  ;;  %v5012_v56 = vadd.f32 %v8511_v51, %v4999_v3  ;;  %v4739_v10 = vpop.permute.xlu2 %4738  ;;  %v8552_v44 = vrot.slane %v4830_v31, 5  ;;  %v4842_v58 = vrot.slane %v4840_v60, 5  ;;  %v4826_v60 = vrot.slane %v4824_v47, 5 }
 0x30f   : > { %v2590_v4 = vor.u32 %v2589_v59, %v2586_v50  ;;  %v6535_v50 = vld [vmem:[%s9098_s10] ss:$0 sm:$0xff] }
 0x310   : > { %v5020_v9 = vmax.f32 %v5012_v56, 0.0  ;;  %v4837_v57 = vor.u32 %v4836_v34, %v8552_v44  ;;  %v4821_v34 = vshrl.u32 %v6325_v38, 16 }
 0x311   : > { %v2591_v26 = vrot.slane %v2590_v4, 4 }
 0x312   : > { %v5027_v17 = vpack.c.bf16 %v5020_v9, %v5019_v43  ;;  %v4838_v3 = vrot.slane %v4837_v57, 4  ;;  %v8572_v43 = vrot.slane %v2593_v13, 5  ;;  %v4823_v57 = vrot.slane %v4821_v34, 4  ;;  %v5849_v34 = vld [vmem:[%s6873_s21 + $0x14] sm:$0x1] }
 0x313   : > { %v3545_v18 = vpop.permute.xlu1 %3544 }
 0x314   : > { %3562 = vst.msk [vmem:[#allocation2 + $0x18] sm:$0xf] %vm1363_vm14, %v3545_v18  ;;  %v4515_v20 = vpop.permute.xlu0 %4514  ;;  %6367 = vmatmul.msk.bf16.vlgmr.msra.gmra.mxu1 %vm2772_vm1, %v5027_v17  ;;  %v4843_v56 = vsel %vm6884_vm3, %v4838_v3, %v4842_v58  ;;  %v6170_v17 = vld [vmem:[%s6873_s21 + $0xc8] sm:$0x1]  ;;  %v3749_v18 = vor.u32 %v3748_v12, %v8583_v15  ;;  %v2597_v58 = vshrl.u32 %v8562_v0, 16 }
 0x315   : > { %4533 = vst.msk [vmem:[#allocation2 + $0x14] sm:$0xf] %vm1222_vm13, %v4515_v20  ;;  %4878 = vrot.lane.b32.xlu0 %v4843_v56, %s9172_s23  ;;  %v3752_v19 = vshll.u32 %v6170_v17, 16  ;;  %v6003_v20 = vld [vmem:[%s6873_s21 + $0x74] sm:$0x1] }
 0x316   : > { %3646 = vst.msk [vmem:[#allocation2 + $0x18] sm:$0xf] %vm1448_vm15, %v3629_v53  ;;  %v8549_v33 = vpop.permute.xlu2 %4194  ;;  %v6217_v53 = vld [vmem:[%s6873_s21 + $0xfc] sm:$0xf]  ;;  %v2579_v42 = vshll.u32 %v6003_v20, 16  ;;  %v3750_v22 = vrot.slane %v3749_v18, 4 }
 0x317   : > { %v3754_v28 = vrot.slane %v3752_v19, 5  ;;  %v6006_v0 = vld [vmem:[%s6873_s21 + $0x80] sm:$0x1]  ;;  %v2599_v11 = vrot.slane %v2597_v58, 4  ;;  %v6328_v19 = vld [vmem:[%s6873_s21 + $0x108] sm:$0xf] }
 0x318   : > { %v8543_v32 = vpop.f32.mrf.mxu2  ;;  %v2581_v29 = vrot.slane %v2579_v42, 5  ;;  %v4848_v42 = vshll.u32 %v6328_v19, 16 }
 0x319   : > { %v3755_v31 = vsel %vm6884_vm3, %v3750_v22, %v3754_v28  ;;  %v2600_v12 = vor.u32 %v2599_v11, %v8572_v43 }
 0x31a   : > { %v2582_v63 = vsel %vm6884_vm3, %v2577_v62, %v2581_v29  ;;  %v1483_v62 = vshrl.u32 %v5848_v21, 16  ;;  %v4850_v47 = vrot.slane %v4848_v42, 5 }
 0x31b   : > { %v4655_v39 = vpop.permute.xlu1 %4654  ;;  %2617 = vrot.lane.b32.xlu2 %v2582_v63, %s9171_s1  ;;  %v2601_v18 = vrot.slane %v2600_v12, 4 }
 0x31c   : > { %4673 = vst.msk [vmem:[#allocation2 + $0x14] sm:$0xf] %vm1363_vm14, %v4655_v39  ;;  %v4653_v48 = vpop.permute.xlu0 %4652 }
 0x31d   : > { %v6190_v24 = vld [vmem:[#allocation2 + $0x18] sm:$0xf]  ;;  %4672 = vst.msk [vmem:[#allocation2 + $0x10] sm:$0xf] %vm1363_vm14, %v4653_v48 }
 0x31e   : > { %3988 = vst.msk [vmem:[#allocation2 + $0x18] sm:$0xf] %vm664_vm6, %v6217_v53  ;;  %v8576_v9 = vpop.permute.xlu2 %4245 }
 0x31f   : > { %4757 = vst.msk [vmem:[#allocation2 + $0x14] sm:$0xf] %vm1448_vm15, %v4739_v10  ;;  %v2596_v10 = vsel %vm6884_vm3, %v2591_v26, %v8572_v43  ;;  %v5847_v43 = vld [vmem:[%s6873_s21 + $0xc] sm:$0xf] }
 0x320   : > { %v8570_v41 = vpop.f32.mrf.mxu2  ;;  %2619 = vrot.lane.b32.xlu1 %v2596_v10, %s9171_s1  ;;  %v2603_v10 = vshll.u32 %v6006_v0, 16  ;;  %v1473_v29 = vshll.u32 %v5847_v43, 16 }
 0x322   : > { %v2605_v17 = vrot.slane %v2603_v10, 5 }
 0x323   : > { %v4737_v14 = vpop.permute.xlu1 %4736 }
 0x324   : > { %4756 = vst.msk [vmem:[#allocation2 + $0x10] sm:$0xf] %vm1448_vm15, %v4737_v14  ;;  %v3631_v2 = vpop.permute.xlu0 %3630  ;;  %v2606_v55 = vsel %vm6884_vm3, %v2601_v18, %v2605_v17 }
 0x325   : > { %3647 = vst.msk [vmem:[#allocation2 + $0x1c] sm:$0xf] %vm1448_vm15, %v3631_v2 }
 0x326   : > { %v8596_v30 = vpop.permute.xlu2 %4467 }
 0x328   : > { %v3861_v27 = vpop.f32.mrf.mxu2  ;;  %3770 = vrot.lane.b32.xlu1 %v3755_v31, %s9177_s25  ;;  %v1479_v31 = vshll.u32 %v5848_v21, 16 }
 0x329   : > { %v3886_v46 = vmul.f32 %v8594_v1, %v3861_v27  ;;  %v1470_v27 = vshrl.u32 %v5847_v43, 16  ;;  %v5851_v43 = vld [vmem:[%s6873_s21 + $0x1c] sm:$0xf] }
 0x32a   : > { %v1481_v63 = vrot.slane %v1479_v31, 5 }
 0x32b   : > { %v6426_v40 = vld [vmem:[#allocation2 + $0x10] sm:$0xff]  ;;  %v4113_v37 = vpop.permute.xlu1 %4112  ;;  %v3899_v48 = vadd.f32 %v8609_v52, %v3886_v46 }
 0x32c   : > { %v6421_v16 = vld [vmem:[#allocation2 + $0x18] sm:$0xf0]  ;;  %v4111_v53 = vpop.permute.xlu0 %4110  ;;  %6362 = vmatmul.msk.bf16.gmra.mxu0 %vm1629_vm0, %v6426_v40  ;;  %v1472_v40 = vrot.slane %v1470_v27, 4 }
 0x32d   : > { %3989 = vst.msk [vmem:[#allocation2 + $0x1c] sm:$0xf] %vm664_vm6, %v6218_v35  ;;  %v6191_v39 = vor.u32 %v6421_v16, %v6190_v24  ;;  %v4827_v24 = vor.u32 %v4826_v60, %v4823_v57  ;;  %v3907_v8 = vmax.f32 %v3899_v48, 0.0  ;;  %v6329_v35 = vld [vmem:[%s6873_s21 + $0x10c] sm:$0xf] }
 0x32e   : > { %4128 = vst.msk [vmem:[#allocation2 + $0x18] sm:$0xf] %vm808_vm7, %v4111_v53  ;;  %v8625_v4 = vpop.permute.xlu2 %4518  ;;  %v1485_v53 = vrot.slane %v1483_v62, 4  ;;  %v4854_v57 = vshll.u32 %v6329_v35, 16  ;;  %v6168_v60 = vld [vmem:[%s6873_s21 + $0xc0] sm:$0xf] }
 0x32f   : > { %6203 = vmatmul.msk.bf16.gmra.mxu2 %vm1629_vm0, %v6191_v39  ;;  %4129 = vst.msk [vmem:[#allocation2 + $0x1c] sm:$0xf] %vm808_vm7, %v4113_v37  ;;  %v4828_v13 = vrot.slane %v4827_v24, 4  ;;  %v1475_v37 = vrot.slane %v1473_v29, 5  ;;  %v1489_v39 = vshll.u32 %v5849_v34, 16  ;;  %v3736_v10 = vshll.u32 %v6168_v60, 16 }
 0x330   : > { %v3863_v59 = vpop.f32.mrf.mxu2  ;;  %4212 = vst.msk [vmem:[#allocation2 + $0x18] sm:$0xf] %vm896_vm8, %v8549_v33  ;;  %5206 = vrot.lane.b32.xlu1 %v6535_v50, %s9177_s25  ;;  %v1486_v24 = vor.u32 %v1485_v53, %v1481_v63  ;;  %v4856_v58 = vrot.slane %v4854_v57, 5  ;;  %v4858_v17 = vshrl.u32 %v6329_v35, 16  ;;  %v5852_v29 = vld [vmem:[%s6873_s21 + $0x20] sm:$0x1] }
 0x331   : > { %v3887_v3 = vmul.f32 %v8594_v1, %v3863_v59  ;;  %v4833_v33 = vsel %vm6884_vm3, %v4828_v13, %v8552_v44  ;;  %v1476_v48 = vor.u32 %v1475_v37, %v1472_v40  ;;  %v1507_v40 = vshrl.u32 %v5851_v43, 16 }
 0x332   : > { %4876 = vrot.lane.b32.xlu2 %v4833_v33, %s9172_s23  ;;  %v1487_v0 = vrot.slane %v1486_v24, 4  ;;  %v1513_v37 = vshll.u32 %v5852_v29, 16 }
 0x333   : > { %v3900_v56 = vadd.f32 %v8609_v52, %v3887_v3  ;;  %v4244_v26 = vpop.permute.xlu1 %4243  ;;  %v1491_v3 = vrot.slane %v1489_v39, 5  ;;  %v1509_v53 = vrot.slane %v1507_v40, 4  ;;  %v8726_v40 = vpop.f32.mrf.mxu3 }
 0x334   : > { %v4197_v61 = vpop.permute.xlu0 %4196  ;;  %4261 = vst.msk [vmem:[#allocation2 + $0x18] sm:$0xf] %vm946_vm9, %v4244_v26  ;;  %v1477_v26 = vrot.slane %v1476_v48, 4  ;;  %v1515_v48 = vrot.slane %v1513_v37, 5  ;;  %v5853_v37 = vld [vmem:[%s6873_s21 + $0x24] sm:$0xf] }
 0x335   : > { %v3908_v5 = vmax.f32 %v3900_v56, 0.0  ;;  %4213 = vst.msk [vmem:[#allocation2 + $0x1c] sm:$0xf] %vm896_vm8, %v4197_v61  ;;  %v1492_v18 = vsel %vm6884_vm3, %v1487_v0, %v1491_v3 }
 0x336   : > { %4262 = vst.msk [vmem:[#allocation2 + $0x1c] sm:$0xf] %vm946_vm9, %v8576_v9  ;;  %v8640_v44 = vpop.permute.xlu2 %4740  ;;  %v4845_v9 = vshrl.u32 %v6328_v19, 16  ;;  %v1482_v12 = vsel %vm6884_vm3, %v1477_v26, %v1481_v63  ;;  %v3738_v19 = vrot.slane %v3736_v10, 5 }
 0x337   : > { %v3915_v14 = vpack.c.bf16 %v3908_v5, %v3907_v8  ;;  %1573 = vst.msk [vmem:[#allocation3] sm:$0xf] %vm664_vm6, %v1482_v12 }
 0x338   : > { %v3866_v2 = vpop.f32.mrf.mxu2  ;;  %v4847_v38 = vrot.slane %v4845_v9, 4  ;;  %1574 = vst.msk [vmem:[#allocation3 + $0x4] sm:$0xf] %vm664_vm6, %v1492_v18  ;;  %v4860_v9 = vrot.slane %v4858_v17, 4 }
 0x339   : > { %6207 = vmatmul.msk.bf16.vlgmr.msrb.gmra.mxu3 %vm2772_vm1, %v3915_v14  ;;  %v3888_v22 = vmul.f32 %v8594_v1, %v3866_v2 }
 0x33a   : > { %2621 = vrot.lane.b32.xlu2 %v2606_v55, %s9171_s1  ;;  %v4851_v59 = vor.u32 %v4850_v47, %v4847_v38  ;;  %v4861_v31 = vor.u32 %v4860_v9, %v4856_v58  ;;  %v1503_v38 = vshll.u32 %v5851_v43, 16 }
 0x33b   : > { %v4386_v20 = vpop.permute.xlu1 %4385  ;;  %v3901_v16 = vadd.f32 %v8609_v52, %v3888_v22  ;;  %v5850_v22 = vld [vmem:[%s6873_s21 + $0x18] sm:$0xf] }
 0x33c   : > { %v4384_v28 = vpop.permute.xlu0 %4383  ;;  %4402 = vst.msk [vmem:[#allocation2 + $0x1c] sm:$0xf] %vm1087_vm11, %v4386_v20  ;;  %v4852_v61 = vrot.slane %v4851_v59, 4  ;;  %v1494_v21 = vshrl.u32 %v5850_v22, 16  ;;  %v1497_v27 = vshll.u32 %v5850_v22, 16 }
 0x33d   : > { %4401 = vst.msk [vmem:[#allocation2 + $0x18] sm:$0xf] %vm1087_vm11, %v4384_v28  ;;  %v3909_v33 = vmax.f32 %v3901_v16, 0.0  ;;  %v6330_v16 = vld [vmem:[%s6873_s21 + $0x110] sm:$0x1] }
 0x33e   : > { %4485 = vst.msk [vmem:[#allocation2 + $0x18] sm:$0xf] %vm1172_vm12, %v8596_v30  ;;  %v3733_v30 = vshrl.u32 %v6168_v60, 16  ;;  %v2610_v8 = vpop.permute.xlu2 %2609  ;;  %v4857_v2 = vsel %vm6884_vm3, %v4852_v61, %v4856_v58  ;;  %v1496_v34 = vrot.slane %v1494_v21, 4  ;;  %v1499_v47 = vrot.slane %v1497_v27, 5  ;;  %v6434_v60 = vld [vmem:[%s9092_s4] sm:$0xff] }
 0x33f   : > { %2632 = vst.msk [vmem:[#allocation3 + $0x4] sm:$0xf] %vm808_vm7, %v2610_v8  ;;  %v4864_v57 = vshll.u32 %v6330_v16, 16  ;;  %5141 = vmatpush.bf16.msra.mxu2 %v6434_v60  ;;  %v1521_v16 = vshll.u32 %v5853_v37, 16 }
 0x340   : > { %v3868_v46 = vpop.f32.mrf.mxu2  ;;  %v3735_v11 = vrot.slane %v3733_v30, 4  ;;  %v1500_v39 = vor.u32 %v1499_v47, %v1496_v34  ;;  %v5855_v34 = vld [vmem:[%s6873_s21 + $0x2c] sm:$0x1]  ;;  %v1518_v47 = vshrl.u32 %v5853_v37, 16 }
 0x341   : > { %v3889_v50 = vmul.f32 %v8594_v1, %v3868_v46  ;;  %v1505_v46 = vrot.slane %v1503_v38, 5  ;;  %v4866_v30 = vrot.slane %v4864_v57, 5  ;;  %v1523_v60 = vrot.slane %v1521_v16, 5 }
 0x342   : > { %4880 = vrot.lane.b32.xlu2 %v4857_v2, %s9172_s23  ;;  %v3739_v55 = vor.u32 %v3738_v19, %v3735_v11  ;;  %v1501_v59 = vrot.slane %v1500_v39, 4  ;;  %v1520_v57 = vrot.slane %v1518_v47, 4 }
 0x343   : > { %v3902_v13 = vadd.f32 %v8609_v52, %v3889_v50  ;;  %v4517_v56 = vpop.permute.xlu1 %4516  ;;  %v1510_v50 = vor.u32 %v1509_v53, %v1505_v46 }
 0x344   : > { %v4470_v5 = vpop.permute.xlu0 %4469  ;;  %4534 = vst.msk [vmem:[#allocation2 + $0x18] sm:$0xf] %vm1222_vm13, %v4517_v56  ;;  %v3740_v42 = vrot.slane %v3739_v55, 4 }
 0x345   : > { %v3910_v14 = vmax.f32 %v3902_v13, 0.0  ;;  %4486 = vst.msk [vmem:[#allocation2 + $0x1c] sm:$0xf] %vm1172_vm12, %v4470_v5  ;;  %v1511_v24 = vrot.slane %v1510_v50, 4 }
 0x346   : > { %4535 = vst.msk [vmem:[#allocation2 + $0x1c] sm:$0xf] %vm1222_vm13, %v8625_v4  ;;  %v6536_v4 = vld [vmem:[%s9099_s11] ss:$0 sm:$0xff]  ;;  %v3745_v35 = vsel %vm6884_vm3, %v3740_v42, %v8583_v15  ;;  %v4869_v63 = vpop.permute.xlu2 %4868  ;;  %v4862_v15 = vrot.slane %v4861_v31, 4 }
 0x347   : > { %v3916_v20 = vpack.c.bf16 %v3910_v14, %v3909_v33  ;;  %3768 = vrot.lane.b32.xlu0 %v3745_v35, %s9177_s25  ;;  %v1516_v56 = vsel %vm6884_vm3, %v1511_v24, %v1515_v48 }
 0x348   : > { %v4867_v58 = vsel %vm6884_vm3, %v4862_v15, %v4866_v30  ;;  %1576 = vst.msk [vmem:[#allocation3 + $0xc] sm:$0xf] %vm664_vm6, %v1516_v56  ;;  %v1537_v15 = vshll.u32 %v5855_v34, 16 }
 0x349   : > { %6208 = vmatmul.msk.bf16.gmra.mxu3 %vm2772_vm1, %v3916_v20 }
 0x34a   : > { %5220 = vrot.lane.b32.xlu2 %v6536_v4, %s9177_s25  ;;  %v1539_v24 = vrot.slane %v1537_v15, 5 }
 0x34b   : > { %v4659_v28 = vpop.permute.xlu1 %4658 }
 0x34c   : > { %v4657_v62 = vpop.permute.xlu0 %4656  ;;  %4675 = vst.msk [vmem:[#allocation2 + $0x1c] sm:$0xf] %vm1363_vm14, %v4659_v28 }
 0x34d   : > { %4674 = vst.msk [vmem:[#allocation2 + $0x18] sm:$0xf] %vm1363_vm14, %v4657_v62 }
 0x34e   : > { %4758 = vst.msk [vmem:[#allocation2 + $0x18] sm:$0xf] %vm1448_vm15, %v8640_v44  ;;  %v1506_v44 = vsel %vm6884_vm3, %v1501_v59, %v1505_v46  ;;  %v2614_v26 = vpop.permute.xlu2 %2613  ;;  %v1524_v59 = vor.u32 %v1523_v60, %v1520_v57 }
 0x34f   : > { %4882 = vrot.lane.b32.xlu0 %v4867_v58, %s9172_s23  ;;  %1575 = vst.msk [vmem:[#allocation3 + $0x8] sm:$0xf] %vm664_vm6, %v1506_v44  ;;  %v8732_v58 = vpop.f32.mrf.mxu3  ;;  %s8970_s23 = scalar_lea.vmem [#allocation4], %s9181_s0 }
 0x350   : > { %2634 = vst.msk [vmem:[#allocation3 + $0xc] sm:$0xf] %vm808_vm7, %v2614_v26 }
 0x353   : > { %v2608_v3 = vpop.permute.xlu1 %2607 }
 0x354   : > { %v4743_v13 = vpop.permute.xlu0 %4742  ;;  %2631 = vst.msk [vmem:[#allocation3] sm:$0xf] %vm808_vm7, %v2608_v3  ;;  %v1525_v3 = vrot.slane %v1524_v59, 4 }
 0x355   : > { %4759 = vst.msk [vmem:[#allocation2 + $0x1c] sm:$0xf] %vm1448_vm15, %v4743_v13 }
 0x356   : > { %v4873_v29 = vpop.permute.xlu2 %4872 }
 0x35a   : > { %v3871_v8 = vpop.f32.mrf.mxu2 }
 0x35b   : > { %v3759_v61 = vpop.permute.xlu1 %3758  ;;  %v3890_v11 = vmul.f32 %v8594_v1, %v3871_v8 }
 0x35c   : > { %v3757_v33 = vpop.permute.xlu0 %3756  ;;  %v6427_v5 = vld [vmem:[#allocation2 + $0x18] sm:$0xff]  ;;  %3781 = vst.msk [vmem:[#allocation3 + $0x4] sm:$0xf] %vm896_vm8, %v3759_v61  ;;  %v4978_v0 = vpop.f32.mrf.mxu0 }
 0x35d   : > { %3780 = vst.msk [vmem:[#allocation3] sm:$0xf] %vm896_vm8, %v3757_v33  ;;  %6363 = vmatmul.msk.bf16.gmra.mxu0 %vm1629_vm0, %v6427_v5  ;;  %v5000_v10 = vmul.f32 %v8501_v36, %v4978_v0  ;;  %v3903_v12 = vadd.f32 %v8609_v52, %v3890_v11  ;;  %v8742_v33 = vpop.f32.mrf.mxu3  ;;  %v5856_v11 = vld [vmem:[%s6873_s21 + $0x30] sm:$0xf] }
 0x35e   : > { %4892 = vst.msk [vmem:[#allocation3] sm:$0xf] %vm946_vm9, %v4869_v63  ;;  %v5854_v63 = vld [vmem:[%s6873_s21 + $0x28] sm:$0xf] }
 0x35f   : > { %v5013_v55 = vadd.f32 %v8511_v51, %v5000_v10  ;;  %v3911_v42 = vmax.f32 %v3903_v12, 0.0  ;;  %v1527_v46 = vshll.u32 %v5854_v63, 16  ;;  %v1531_v53 = vshrl.u32 %v5854_v63, 16  ;;  %v5857_v10 = vld [vmem:[%s6873_s21 + $0x34] sm:$0xf] }
 0x360   : > { %v1542_v12 = vshrl.u32 %v5856_v11, 16 }
 0x361   : > { %v5021_v43 = vmax.f32 %v5013_v55, 0.0  ;;  %v1529_v50 = vrot.slane %v1527_v46, 5  ;;  %v1533_v48 = vrot.slane %v1531_v53, 4 }
 0x362   : > { %v3873_v14 = vpop.f32.mrf.mxu2 }
 0x363   : > { %v3891_v2 = vmul.f32 %v8594_v1, %v3873_v14  ;;  %v2612_v17 = vpop.permute.xlu1 %2611  ;;  %v1534_v30 = vor.u32 %v1533_v48, %v1529_v50  ;;  %v1530_v13 = vsel %vm6884_vm3, %v1525_v3, %v1529_v50  ;;  %v5858_v14 = vld [vmem:[%s6873_s21 + $0x38] sm:$0x1]  ;;  %s6696_s21 = smov 120  }
 0x364   : > { %v4871_v18 = vpop.permute.xlu0 %4870  ;;  %2633 = vst.msk [vmem:[#allocation3 + $0x8] sm:$0xf] %vm808_vm7, %v2612_v17  ;;  %v4980_v20 = vpop.f32.mrf.mxu0  ;;  %v1551_v17 = vshll.u32 %v5857_v10, 16 }
 0x365   : > { %v3904_v19 = vadd.f32 %v8609_v52, %v3891_v2  ;;  %4893 = vst.msk [vmem:[#allocation3 + $0x4] sm:$0xf] %vm946_vm9, %v4871_v18  ;;  %v5001_v9 = vmul.f32 %v8501_v36, %v4980_v20  ;;  %v1535_v44 = vrot.slane %v1534_v30, 4  ;;  %v1545_v2 = vshll.u32 %v5856_v11, 16 }
 0x366   : > { %1577 = vst.msk [vmem:[#allocation3 + $0x10] sm:$0xf] %vm664_vm6, %v1530_v13  ;;  %v1555_v18 = vshrl.u32 %v5857_v10, 16  ;;  %v1544_v20 = vrot.slane %v1542_v12, 4 }
 0x367   : > { %v3912_v4 = vmax.f32 %v3904_v19, 0.0  ;;  %v5014_v22 = vadd.f32 %v8511_v51, %v5001_v9  ;;  %v1540_v56 = vsel %vm6884_vm3, %v1535_v44, %v1539_v24  ;;  %v1561_v19 = vshll.u32 %v5858_v14, 16 }
 0x368   : > { %1578 = vst.msk [vmem:[#allocation3 + $0x14] sm:$0xf] %vm664_vm6, %v1540_v56  ;;  %v1547_v55 = vrot.slane %v1545_v2, 5  ;;  %v1553_v9 = vrot.slane %v1551_v17, 5 }
 0x369   : > { %v3917_v28 = vpack.c.bf16 %v3912_v4, %v3911_v42  ;;  %v5022_v21 = vmax.f32 %v5014_v22, 0.0  ;;  %v1557_v42 = vrot.slane %v1555_v18, 4 }
 0x36a   : > { %v1548_v22 = vor.u32 %v1547_v55, %v1544_v20 }
 0x36b   : > { %6209 = vmatmul.msk.bf16.gmra.mxu3 %vm2772_vm1, %v3917_v28  ;;  %v3763_v27 = vpop.permute.xlu1 %3762  ;;  %v5028_v62 = vpack.c.bf16 %v5022_v21, %v5021_v43  ;;  %v1558_v28 = vor.u32 %v1557_v42, %v1553_v9  ;;  %v1563_v43 = vrot.slane %v1561_v19, 5 }
 0x36c   : > { %v3761_v31 = vpop.permute.xlu0 %3760  ;;  %v6430_v35 = vld [vmem:[#allocation3] sm:$0xff]  ;;  %3783 = vst.msk [vmem:[#allocation3 + $0xc] sm:$0xf] %vm896_vm8, %v3763_v27  ;;  %v8751_v27 = vpop.f32.mrf.mxu3 }
 0x36d   : > { %3782 = vst.msk [vmem:[#allocation3 + $0x8] sm:$0xf] %vm896_vm8, %v3761_v31  ;;  %6368 = vmatmul.msk.bf16.gmra.mxu1 %vm2772_vm1, %v5028_v62  ;;  %6391 = vmatmul.msk.bf16.vlgmr.msra.gmra.mxu2 %vm5121_vm2, %v6430_v35  ;;  %v1559_v31 = vrot.slane %v1558_v28, 4 }
 0x36e   : > { %4894 = vst.msk [vmem:[#allocation3 + $0x8] sm:$0xf] %vm946_vm9, %v4873_v29  ;;  %v1549_v29 = vrot.slane %v1548_v22, 4 }
 0x36f   : > { %v1564_v35 = vsel %vm6884_vm3, %v1559_v31, %v1563_v43 }
 0x370   : > { %v1554_v62 = vsel %vm6884_vm3, %v1549_v29, %v1553_v9  ;;  %1580 = vst.msk [vmem:[#allocation3 + $0x1c] sm:$0xf] %vm664_vm6, %v1564_v35  ;;  %v5271_v29 = vld [vmem:[%s9100_s12] sm:$0xf]  ;;  %vm5346_vm3 = vcmask 1043456  }
 0x371   : > { %1579 = vst.msk [vmem:[#allocation3 + $0x18] sm:$0xf] %vm664_vm6, %v1554_v62  ;;  %v5348_v35 = vsel %vm5346_vm3, %v5271_v29, 0 }
 0x372   : > { %5357 = vmatpush.bf16.msra.mxu0 %v5348_v35 }
 0x373   : > { %v2616_v26 = vpop.permute.xlu1 %2615 }
 0x374   : > { %v4875_v38 = vpop.permute.xlu0 %4874  ;;  %2635 = vst.msk [vmem:[#allocation3 + $0x10] sm:$0xf] %vm808_vm7, %v2616_v26  ;;  %v8763_v34 = vpop.f32.mrf.mxu3 }
 0x375   : > { %4895 = vst.msk [vmem:[#allocation3 + $0xc] sm:$0xf] %vm946_vm9, %v4875_v38  ;;  %v2618_v8 = vpop.permute.xlu2 %2617 }
 0x376   : > { %2636 = vst.msk [vmem:[#allocation3 + $0x14] sm:$0xf] %vm808_vm7, %v2618_v8 }
 0x37b   : > { %v3767_v5 = vpop.permute.xlu1 %3766 }
 0x37c   : > { %v6431_v39 = vld [vmem:[#allocation3 + $0x8] sm:$0xff]  ;;  %v3765_v61 = vpop.permute.xlu0 %3764  ;;  %3785 = vst.msk [vmem:[#allocation3 + $0x14] sm:$0xf] %vm896_vm8, %v3767_v5  ;;  %v8765_v47 = vpop.f32.mrf.mxu3 }
 0x37d   : > { %6392 = vmatmul.msk.bf16.gmra.mxu2 %vm5121_vm2, %v6431_v39  ;;  %3784 = vst.msk [vmem:[#allocation3 + $0x10] sm:$0xf] %vm896_vm8, %v3765_v61 }
 0x384   : > { %v8770_v57 = vpop.f32.mrf.mxu3 }
 0x387   : > { %v4879_v4 = vpop.permute.xlu0 %4878 }
 0x388   : > { %4897 = vst.msk [vmem:[#allocation3 + $0x14] sm:$0xf] %vm946_vm9, %v4879_v4 }
 0x38c   : > { %v4877_v0 = vpop.permute.xlu2 %4876 }
 0x38d   : > { %4896 = vst.msk [vmem:[#allocation3 + $0x10] sm:$0xf] %vm946_vm9, %v4877_v0 }
 0x391   : > { %v5057_v3 = vpop.f32.mrf.mxu1 }
 0x392   : > { %v2620_v21 = vpop.permute.xlu1 %2619 }
 0x393   : > { %2637 = vst.msk [vmem:[#allocation3 + $0x18] sm:$0xf] %vm808_vm7, %v2620_v21 }
 0x394   : > { %v2622_v38 = vpop.permute.xlu2 %2621  ;;  %v6432_v37 = vld [vmem:[#allocation3 + $0x10] sm:$0xff] }
 0x395   : > { %2638 = vst.msk [vmem:[#allocation3 + $0x1c] sm:$0xf] %vm808_vm7, %v2622_v38  ;;  %6393 = vmatmul.msk.bf16.gmra.mxu2 %vm5121_vm2, %v6432_v37 }
 0x399   : > { %v5059_v17 = vpop.f32.mrf.mxu1 }
 0x39a   : > { %v3771_v63 = vpop.permute.xlu1 %3770 }
 0x39b   : > { %3787 = vst.msk [vmem:[#allocation3 + $0x1c] sm:$0xf] %vm896_vm8, %v3771_v63 }
 0x39c   : > { %v4881_v56 = vpop.permute.xlu2 %4880 }
 0x3a2   : > { %v8781_v12 = vpop.permute.xlu1 %5206 }
 0x3a4   : > { %v8787_v18 = vpop.permute.xlu2 %5220 }
 0x3a9   : > { %v4983_v23 = vpop.f32.mrf.mxu0 }
 0x3aa   : > { %v5002_v16 = vmul.f32 %v8501_v36, %v4983_v23 }
 0x3ac   : > { %v5015_v46 = vadd.f32 %v8511_v51, %v5002_v16  ;;  %v2847_v16 = vadd.f32 %v8732_v58, %v8470_v6  ;;  %v8814_v6 = vld [vmem:[%s9096_s8] ss:$0 sm:$0xff] }
 0x3ae   : > { %v5023_v60 = vmax.f32 %v5015_v46, 0.0 }
 0x3b1   : > { %v4985_v39 = vpop.f32.mrf.mxu0 }
 0x3b2   : > { %v3876_v53 = vpop.f32.mrf.mxu2  ;;  %v5003_v15 = vmul.f32 %v8501_v36, %v4985_v39 }
 0x3b3   : > { %v3892_v48 = vmul.f32 %v8594_v1, %v3876_v53 }
 0x3b4   : > { %v5016_v50 = vadd.f32 %v8511_v51, %v5003_v15 }
 0x3b5   : > { %v3905_v44 = vadd.f32 %v8609_v52, %v3892_v48 }
 0x3b6   : > { %v5024_v59 = vmax.f32 %v5016_v50, 0.0 }
 0x3b7   : > { %v3913_v5 = vmax.f32 %v3905_v44, 0.0  ;;  %v8823_v44 = vld [vmem:[%s9097_s9] ss:$0 sm:$0xff] }
 0x3b8   : > { %v5029_v30 = vpack.c.bf16 %v5024_v59, %v5023_v60 }
 0x3b9   : > { %v3769_v11 = vpop.permute.xlu0 %3768 }
 0x3ba   : > { %v3878_v24 = vpop.f32.mrf.mxu2  ;;  %6369 = vmatmul.msk.bf16.gmra.mxu1 %vm2772_vm1, %v5029_v30  ;;  %3786 = vst.msk [vmem:[#allocation3 + $0x18] sm:$0xf] %vm896_vm8, %v3769_v11 }
 0x3bb   : > { %v3893_v13 = vmul.f32 %v8594_v1, %v3878_v24  ;;  %4898 = vst.msk [vmem:[#allocation3 + $0x18] sm:$0xf] %vm946_vm9, %v4881_v56  ;;  %v2844_v1 = vadd.f32 %v8726_v40, %v8450_v45 }
 0x3bc   : > { %v3945_v26 = vpop.f32.mrf.mxu3 }
 0x3bd   : > { %v3906_v8 = vadd.f32 %v8609_v52, %v3893_v13  ;;  %v3965_v61 = vadd.f32 %v3945_v26, %v8273_v54 }
 0x3bf   : > { %v3914_v0 = vmax.f32 %v3906_v8, 0.0  ;;  %v5077_v10 = vadd.f32 %v5057_v3, %v3965_v61 }
 0x3c1   : > { %v3918_v14 = vpack.c.bf16 %v3914_v0, %v3913_v5  ;;  %v5209_v54 = vmul.f32 %v8781_v12, %v5077_v10  ;;  %v4883_v20 = vpop.permute.xlu0 %4882 }
 0x3c2   : > { %4899 = vst.msk [vmem:[#allocation3 + $0x1c] sm:$0xf] %vm946_vm9, %v4883_v20 }
 0x3c3   : > { %6210 = vmatmul.msk.bf16.gmra.mxu3 %vm2772_vm1, %v3918_v14  ;;  %v5223_v9 = vadd.f32 %v8787_v18, %v5209_v54 }
 0x3c4   : > { %v3947_v2 = vpop.f32.mrf.mxu3 }
 0x3c5   : > { %v3966_v52 = vadd.f32 %v3947_v2, %v2844_v1  ;;  %v5231_v40 = vmax.f32 %v5223_v9, 0.0 }
 0x3c7   : > { %v5078_v19 = vadd.f32 %v5059_v17, %v3966_v52  ;;  %v6539_v52 = vld [vmem:[%s9093_s5] ss:$0 sm:$0xff] }
 0x3c9   : > { %v5210_v55 = vmul.f32 %v8781_v12, %v5078_v19  ;;  %v6433_v22 = vld [vmem:[#allocation3 + $0x18] sm:$0xff] }
 0x3ca   : > { %6394 = vmatmul.msk.bf16.gmra.mxu2 %vm5121_vm2, %v6433_v22  ;;  %v5276_v22 = vld [vmem:[%s9101_s13] sm:$0x3] }
 0x3cb   : > { %v5224_v42 = vadd.f32 %v8787_v18, %v5210_v55 }
 0x3cc   : > { %v3950_v38 = vpop.f32.mrf.mxu3 }
 0x3cd   : > { %v5232_v45 = vmax.f32 %v5224_v42, 0.0  ;;  %v3967_v39 = vadd.f32 %v3950_v38, %v2847_v16 }
 0x3cf   : > { %v5272_v4 = vpack.c.bf16 %v5232_v45, %v5231_v40 }
 0x3d1   : > { %5281 = vrot.lane.b32.xlu0 %v5272_v4, %s6696_s21 }
 0x3d4   : > { %v3952_v60 = vpop.f32.mrf.mxu3 }
 0x3da   : > { %v4988_v28 = vpop.f32.mrf.mxu0 }
 0x3db   : > { %v5004_v43 = vmul.f32 %v8501_v36, %v4988_v28  ;;  %v5302_v28 = vsel %vm1642_vm10, %v5276_v22, 0 }
 0x3dc   : > { %5311 = vmatpush.bf16.msra.mxu3 %v5302_v28 }
 0x3dd   : > { %v5017_v31 = vadd.f32 %v8511_v51, %v5004_v43 }
 0x3df   : > { %v5025_v63 = vmax.f32 %v5017_v31, 0.0 }
 0x3e2   : > { %v4990_v21 = vpop.f32.mrf.mxu0 }
 0x3e3   : > { %v5005_v62 = vmul.f32 %v8501_v36, %v4990_v21  ;;  %v2849_v36 = vadd.f32 %v8742_v33, %v8490_v25  ;;  %v2852_v21 = vadd.f32 %v8751_v27, %v8504_v49 }
 0x3e5   : > { %v5018_v37 = vadd.f32 %v8511_v51, %v5005_v62  ;;  %v3968_v48 = vadd.f32 %v3952_v60, %v2849_v36 }
 0x3e7   : > { %v5026_v23 = vmax.f32 %v5018_v37, 0.0  ;;  %v2854_v37 = vadd.f32 %v8763_v34, %v8527_v7 }
 0x3e9   : > { %v5030_v46 = vpack.c.bf16 %v5026_v23, %v5025_v63 }
 0x3ea   : > { %v5062_v53 = vpop.f32.mrf.mxu1 }
 0x3eb   : > { %6370 = vmatmul.msk.bf16.gmra.mxu1 %vm2772_vm1, %v5030_v46  ;;  %v5079_v15 = vadd.f32 %v5062_v53, %v3967_v39 }
 0x3ed   : > { %v5211_v51 = vmul.f32 %v8781_v12, %v5079_v15 }
 0x3ee   : > { %v3955_v43 = vpop.f32.mrf.mxu3 }
 0x3ef   : > { %v5225_v58 = vadd.f32 %v8787_v18, %v5211_v51  ;;  %v3969_v31 = vadd.f32 %v3955_v43, %v2852_v21 }
 0x3f0   : > { %v8807_v50 = vpop.f32.mrf.mxu2 }
 0x3f1   : > { %v5163_v24 = vadd.f32 %v8807_v50, %v5077_v10  ;;  %v5233_v56 = vmax.f32 %v5225_v58, 0.0 }
 0x3f2   : > { %v5064_v59 = vpop.f32.mrf.mxu1 }
 0x3f3   : > { %v5080_v30 = vadd.f32 %v5064_v59, %v3968_v48  ;;  %v5175_v33 = vmul.f32 %v8814_v6, %v5163_v24 }
 0x3f5   : > { %v5212_v3 = vmul.f32 %v8781_v12, %v5080_v30  ;;  %v5187_v5 = vadd.f32 %v8823_v44, %v5175_v33  ;;  %v6540_v33 = vld [vmem:[%s9094_s6] ss:$0 sm:$0xff] }
 0x3f6   : > { %v3957_v38 = vpop.f32.mrf.mxu3 }
 0x3f7   : > { %v5226_v25 = vadd.f32 %v8787_v18, %v5212_v3  ;;  %v5195_v10 = vmax.f32 %v5187_v5, 0.0  ;;  %v3970_v23 = vadd.f32 %v3957_v38, %v2854_v37 }
 0x3f8   : > { %v8825_v13 = vpop.f32.mrf.mxu2 }
 0x3f9   : > { %v5234_v26 = vmax.f32 %v5226_v25, 0.0  ;;  %v5164_v8 = vadd.f32 %v8825_v13, %v5078_v19 }
 0x3fb   : > { %v5273_v61 = vpack.c.bf16 %v5234_v26, %v5233_v56  ;;  %v5176_v0 = vmul.f32 %v8814_v6, %v5164_v8  ;;  %v2857_v26 = vadd.f32 %v8765_v47, %v8543_v32 }
 0x3fd   : > { %v5188_v11 = vadd.f32 %v8823_v44, %v5176_v0  ;;  %5283 = vrot.lane.b32.xlu1 %v5273_v61, %s6696_s21 }
 0x3ff   : > { %v5196_v14 = vmax.f32 %v5188_v11, 0.0 }
 0x400   : > { %v8832_v1 = vpop.f32.mrf.mxu2 }
 0x401   : > { %v5267_v2 = vpack.c.bf16 %v5196_v14, %v5195_v10  ;;  %v5165_v54 = vadd.f32 %v8832_v1, %v5079_v15  ;;  %v2859_v10 = vadd.f32 %v8770_v57, %v8570_v41 }
 0x403   : > { %6399 = vmatmul.msk.bf16.vlgmr.msra.gmra.mxu0 %vm5333_vm4, %v5267_v2  ;;  %v5177_v17 = vmul.f32 %v8814_v6, %v5165_v54 }
 0x405   : > { %5242 = vrot.lane.b32.xlu1 %v6539_v52, %s9177_s25  ;;  %v5189_v55 = vadd.f32 %v8823_v44, %v5177_v17 }
 0x407   : > { %v5197_v45 = vmax.f32 %v5189_v55, 0.0 }
 0x408   : > { %v8841_v19 = vpop.f32.mrf.mxu2 }
 0x409   : > { %v5166_v20 = vadd.f32 %v8841_v19, %v5080_v30 }
 0x40b   : > { %v5178_v9 = vmul.f32 %v8814_v6, %v5166_v20 }
 0x40d   : > { %v5190_v42 = vadd.f32 %v8823_v44, %v5178_v9 }
 0x40f   : > { %v5198_v40 = vmax.f32 %v5190_v42, 0.0 }
 0x411   : > { %v5268_v4 = vpack.c.bf16 %v5198_v40, %v5197_v45 }
 0x413   : > { %6400 = vmatmul.msk.bf16.gmra.mxu0 %vm5333_vm4, %v5268_v4 }
 0x418   : > { %v8854_v29 = vpop.f32.mrf.mxu2 }
 0x420   : > { %v8860_v53 = vpop.f32.mrf.mxu2 }
 0x437   : > { %v5067_v62 = vpop.f32.mrf.mxu1 }
 0x438   : > { %v5081_v35 = vadd.f32 %v5067_v62, %v3969_v31 }
 0x43a   : > { %v5167_v63 = vadd.f32 %v8854_v29, %v5081_v35  ;;  %v5213_v16 = vmul.f32 %v8781_v12, %v5081_v35 }
 0x43c   : > { %v5179_v39 = vmul.f32 %v8814_v6, %v5167_v63  ;;  %v5227_v27 = vadd.f32 %v8787_v18, %v5213_v16 }
 0x43e   : > { %v5191_v7 = vadd.f32 %v8823_v44, %v5179_v39  ;;  %v5235_v51 = vmax.f32 %v5227_v27, 0.0  ;;  %v6541_v27 = vld [vmem:[%s9102_s14] ss:$0 sm:$0xff] }
 0x43f   : > { %v5069_v46 = vpop.f32.mrf.mxu1 }
 0x440   : > { %v5082_v49 = vadd.f32 %v5069_v46, %v3970_v23  ;;  %v5199_v58 = vmax.f32 %v5191_v7, 0.0 }
 0x442   : > { %v5214_v15 = vmul.f32 %v8781_v12, %v5082_v49  ;;  %v5168_v36 = vadd.f32 %v8860_v53, %v5082_v49 }
 0x443   : > { %v5282_v60 = vpop.permute.xlu0 %5281 }
 0x444   : > { %6395 = vmatmul.msk.bf16.vlgmr.msra.gmra.mxu3 %vm2772_vm1, %v5282_v60  ;;  %v5228_v34 = vadd.f32 %v8787_v18, %v5214_v15  ;;  %v5180_v48 = vmul.f32 %v8814_v6, %v5168_v36 }
 0x446   : > { %v5236_v59 = vmax.f32 %v5228_v34, 0.0  ;;  %v5192_v30 = vadd.f32 %v8823_v44, %v5180_v48  ;;  %v3960_v56 = vpop.f32.mrf.mxu3 }
 0x447   : > { %v3971_v61 = vadd.f32 %v3960_v56, %v2857_v26 }
 0x448   : > { %v5274_v24 = vpack.c.bf16 %v5236_v59, %v5235_v51  ;;  %v5200_v3 = vmax.f32 %v5192_v30, 0.0 }
 0x44a   : > { %5285 = vrot.lane.b32.xlu2 %v5274_v24, %s6696_s21  ;;  %v5269_v25 = vpack.c.bf16 %v5200_v3, %v5199_v58 }
 0x44c   : > { %6401 = vmatmul.msk.bf16.gmra.mxu0 %vm5333_vm4, %v5269_v25 }
 0x44d   : > { %v5158_v8 = vpop.f32.mrf.mxu2 }
 0x44e   : > { %v3962_v11 = vpop.f32.mrf.mxu3 }
 0x44f   : > { %v3972_v2 = vadd.f32 %v3962_v11, %v2859_v10 }
 0x452   : > { %5256 = vrot.lane.b32.xlu2 %v6540_v33, %s9177_s25  ;;  %s5765_s25 = sshll.u32 %s6670_s30, 3 }
 0x453   : > { %p638_p0 = scmp.lt.s32.totalorder %s5765_s25, 31 }
 0x455   : > { %v5160_v20 = vpop.f32.mrf.mxu2  ;;  %s9204_s25 = smov (!%p638_p0, %s5765_s25), 31 }
 0x456   : > { %s641_s29 = sadd.s32 %s5766_s20, %s9204_s25  ;;  %s8973_s25 = scalar_lea.vmem [#allocation6], %s9181_s0 }
 0x457   : > { %s5767_s2 = sshll.u32 %s641_s29, 3 }
 0x458   : > { %s8915_s28 = scalar_lea.vmem %s9103_s15, %s5767_s2  ;;  %s653_s24 = scalar_lea.vmem %s9104_s16, %s5767_s2 }
 0x468   : > { %v5072_v5 = vpop.f32.mrf.mxu1 }
 0x469   : > { %v5083_v0 = vadd.f32 %v5072_v5, %v3971_v61 }
 0x46b   : > { %v5169_v14 = vadd.f32 %v5158_v8, %v5083_v0  ;;  %v5215_v52 = vmul.f32 %v8781_v12, %v5083_v0 }
 0x46d   : > { %v5181_v55 = vmul.f32 %v8814_v6, %v5169_v14  ;;  %v5229_v47 = vadd.f32 %v8787_v18, %v5215_v52 }
 0x46f   : > { %v5284_v54 = vpop.permute.xlu1 %5283  ;;  %v5193_v45 = vadd.f32 %v8823_v44, %v5181_v55  ;;  %v5237_v40 = vmax.f32 %v5229_v47, 0.0 }
 0x470   : > { %6396 = vmatmul.msk.bf16.gmra.mxu3 %vm2772_vm1, %v5284_v54  ;;  %v5074_v17 = vpop.f32.mrf.mxu1 }
 0x471   : > { %v5084_v32 = vadd.f32 %v5074_v17, %v3972_v2  ;;  %v5201_v21 = vmax.f32 %v5193_v45, 0.0 }
 0x473   : > { %v5216_v9 = vmul.f32 %v8781_v12, %v5084_v32  ;;  %v5170_v42 = vadd.f32 %v5160_v20, %v5084_v32 }
 0x475   : > { %v5230_v41 = vadd.f32 %v8787_v18, %v5216_v9  ;;  %v5182_v57 = vmul.f32 %v8814_v6, %v5170_v42 }
 0x477   : > { %v5238_v4 = vmax.f32 %v5230_v41, 0.0  ;;  %v5194_v22 = vadd.f32 %v8823_v44, %v5182_v57  ;;  %v5243_v62 = vpop.permute.xlu1 %5242 }
 0x478   : > { %v5247_v18 = vmul.f32 %v5243_v62, %v8832_v1  ;;  %v5246_v6 = vmul.f32 %v5243_v62, %v8825_v13  ;;  %v5245_v35 = vmul.f32 %v5243_v62, %v8807_v50  ;;  %v5250_v23 = vmul.f32 %v5243_v62, %v8860_v53 }
 0x479   : > { %v5275_v28 = vpack.c.bf16 %v5238_v4, %v5237_v40  ;;  %v5202_v43 = vmax.f32 %v5194_v22, 0.0  ;;  %v5249_v16 = vmul.f32 %v5243_v62, %v8854_v29  ;;  %v5248_v50 = vmul.f32 %v5243_v62, %v8841_v19 }
 0x47a   : > { %v5252_v39 = vmul.f32 %v5243_v62, %v5160_v20  ;;  %v5251_v49 = vmul.f32 %v5243_v62, %v5158_v8 }
 0x47b   : > { %5287 = vrot.lane.b32.xlu0 %v5275_v28, %s6696_s21  ;;  %v5270_v31 = vpack.c.bf16 %v5202_v43, %v5201_v21 }
 0x47d   : > { %6402 = vmatmul.msk.bf16.gmra.mxu0 %vm5333_vm4, %v5270_v31 }
 0x480   : > { %v5359_v19 = vpop.f32.mrf.mxu0 }
 0x488   : > { %v5361_v7 = vpop.f32.mrf.mxu0 }
 0x490   : > { %v5364_v30 = vpop.f32.mrf.mxu0 }
 0x498   : > { %v5366_v25 = vpop.f32.mrf.mxu0 }
 0x4a4   : > { %v5286_v12 = vpop.permute.xlu2 %5285 }
 0x4a5   : > { %6397 = vmatmul.msk.bf16.gmra.mxu3 %vm2772_vm1, %v5286_v12 }
 0x4ac   : > { %v5257_v44 = vpop.permute.xlu2 %5256 }
 0x4ad   : > { %v5261_v38 = vadd.f32 %v5257_v44, %v5247_v18  ;;  %v5260_v37 = vadd.f32 %v5257_v44, %v5246_v6  ;;  %v5259_v63 = vadd.f32 %v5257_v44, %v5245_v35  ;;  %v5264_v1 = vadd.f32 %v5257_v44, %v5250_v23 }
 0x4ae   : > { %v5263_v13 = vadd.f32 %v5257_v44, %v5249_v16  ;;  %v5262_v46 = vadd.f32 %v5257_v44, %v5248_v50  ;;  %v5266_v53 = vadd.f32 %v5257_v44, %v5252_v39  ;;  %v5265_v29 = vadd.f32 %v5257_v44, %v5251_v49 }
 0x4af   : > { %5411 = vrot.lane.b32.xlu2 %v5261_v38, %s6696_s21  ;;  %5409 = vrot.lane.b32.xlu1 %v5260_v37, %s6696_s21 }
 0x4b0   : > { %5407 = vrot.lane.b32.xlu0 %v5259_v63, %s6696_s21 }
 0x4b7   : > { %5417 = vrot.lane.b32.xlu2 %v5264_v1, %s6696_s21  ;;  %5415 = vrot.lane.b32.xlu1 %v5263_v13, %s6696_s21 }
 0x4b8   : > { %5413 = vrot.lane.b32.xlu0 %v5262_v46, %s6696_s21 }
 0x4bf   : > { %5421 = vrot.lane.b32.xlu1 %v5266_v53, %s6696_s21 }
 0x4c0   : > { %5419 = vrot.lane.b32.xlu0 %v5265_v29, %s6696_s21 }
 0x4c7   : > { %v5313_v15 = vpop.f32.mrf.mxu3 }
 0x4c8   : > { %v5360_v60 = vadd.f32 %v5359_v19, %v5313_v15 }
 0x4c9   : > { %v5369_v11 = vpop.f32.mrf.mxu0 }
 0x4ca   : > { %v8917_v36 = vadd.f32 %v6541_v27, %v5360_v60 }
 0x4cc   : > { %5391 = vst.msk [vmem:[%s8915_s28] sm:$0xff] %vm5121_vm2, %v8917_v36 }
 0x4cf   : > { %v5315_v34 = vpop.f32.mrf.mxu3 }
 0x4d0   : > { %v5362_v48 = vadd.f32 %v5361_v7, %v5315_v34 }
 0x4d1   : > { %v5371_v17 = vpop.f32.mrf.mxu0 }
 0x4d2   : > { %v8922_v51 = vadd.f32 %v6541_v27, %v5362_v48 }
 0x4d4   : > { %5392 = vst.msk [vmem:[%s8915_s28 + $0x8] sm:$0xff] %vm5121_vm2, %v8922_v51 }
 0x4ed   : > { %v5288_v59 = vpop.permute.xlu0 %5287 }
 0x4ee   : > { %6398 = vmatmul.msk.bf16.gmra.mxu3 %vm2772_vm1, %v5288_v59 }
 0x4f3   : > { %v5318_v24 = vpop.f32.mrf.mxu3 }
 0x4f4   : > { %v5365_v58 = vadd.f32 %v5364_v30, %v5318_v24 }
 0x4f6   : > { %v8928_v3 = vadd.f32 %v6541_v27, %v5365_v58 }
 0x4f8   : > { %5393 = vst.msk [vmem:[%s8915_s28 + $0x10] sm:$0xff] %vm5121_vm2, %v8928_v3 }
 0x4fa   : > { %v5374_v42 = vpop.f32.mrf.mxu0 }
 0x4fb   : > { %v5320_v33 = vpop.f32.mrf.mxu3 }
 0x4fc   : > { %v5367_v56 = vadd.f32 %v5366_v25, %v5320_v33 }
 0x4fe   : > { %v8933_v26 = vadd.f32 %v6541_v27, %v5367_v56 }
 0x500   : > { %5394 = vst.msk [vmem:[%s8915_s28 + $0x18] sm:$0xff] %vm5121_vm2, %v8933_v26 }
 0x502   : > { %v5376_v40 = vpop.f32.mrf.mxu0 }
 0x509   : > { %v5412_v8 = vpop.permute.xlu2 %5411 }
 0x50a   : > { %5433 = vst.msk [vmem:[%s653_s24 + $0x10] sm:$0xff] %vm5121_vm2, %v5412_v8 }
 0x511   : > { %v5418_v61 = vpop.permute.xlu2 %5417 }
 0x512   : > { %5436 = vst.msk [vmem:[%s653_s24 + $0x28] sm:$0xff] %vm5121_vm2, %v5418_v61 }
 0x521   : > { %v5410_v5 = vpop.permute.xlu1 %5409 }
 0x522   : > { %5432 = vst.msk [vmem:[%s653_s24 + $0x8] sm:$0xff] %vm5121_vm2, %v5410_v5  ;;  %v5408_v0 = vpop.permute.xlu0 %5407 }
 0x523   : > { %5431 = vst.msk [vmem:[%s653_s24] sm:$0xff] %vm5121_vm2, %v5408_v0 }
 0x528   : > { %v5323_v10 = vpop.f32.mrf.mxu3 }
 0x529   : > { %v5370_v14 = vadd.f32 %v5369_v11, %v5323_v10  ;;  %v5416_v2 = vpop.permute.xlu1 %5415 }
 0x52a   : > { %v5414_v52 = vpop.permute.xlu0 %5413  ;;  %5435 = vst.msk [vmem:[%s653_s24 + $0x20] sm:$0xff] %vm5121_vm2, %v5416_v2 }
 0x52b   : > { %v8946_v54 = vadd.f32 %v6541_v27, %v5370_v14  ;;  %5434 = vst.msk [vmem:[%s653_s24 + $0x18] sm:$0xff] %vm5121_vm2, %v5414_v52 }
 0x52d   : > { %5395 = vst.msk [vmem:[%s8915_s28 + $0x20] sm:$0xff] %vm5121_vm2, %v8946_v54 }
 0x530   : > { %v5325_v20 = vpop.f32.mrf.mxu3 }
 0x531   : > { %v5372_v55 = vadd.f32 %v5371_v17, %v5325_v20  ;;  %v5422_v32 = vpop.permute.xlu1 %5421 }
 0x532   : > { %5438 = vst.msk [vmem:[%s653_s24 + $0x38] sm:$0xff] %vm5121_vm2, %v5422_v32  ;;  %v5420_v47 = vpop.permute.xlu0 %5419 }
 0x533   : > { %v8953_v9 = vadd.f32 %v6541_v27, %v5372_v55  ;;  %5437 = vst.msk [vmem:[%s653_s24 + $0x30] sm:$0xff] %vm5121_vm2, %v5420_v47 }
 0x535   : > { %5396 = vst.msk [vmem:[%s8915_s28 + $0x28] sm:$0xff] %vm5121_vm2, %v8953_v9 }
 0x571   : > { %v5328_v45 = vpop.f32.mrf.mxu3 }
 0x572   : > { %v5375_v41 = vadd.f32 %v5374_v42, %v5328_v45 }
 0x574   : > { %v8959_v57 = vadd.f32 %v6541_v27, %v5375_v41 }
 0x576   : > { %5397 = vst.msk [vmem:[%s8915_s28 + $0x30] sm:$0xff] %vm5121_vm2, %v8959_v57 }
 0x579   : > { %v5330_v4 = vpop.f32.mrf.mxu3 }
 0x57a   : > { %v5377_v22 = vadd.f32 %v5376_v40, %v5330_v4  ;;  %5442 = sbr.rel (%p6403_p1) target bundleno = 1410 (0x582), region = 84 }
 0x57c   : > { %v8964_v28 = vadd.f32 %v6541_v27, %v5377_v22 }
 0x57e   : > { %5398 = vst.msk [vmem:[%s8915_s28 + $0x38] sm:$0xff] %vm5121_vm2, %v8964_v28 }
 0x57f   : > { %vm5443_vm5 = vcmask 122880   ;;  %v6697_v43 = vmov -inf   ;;  %v6698_v21 = vmov 0.0  }
 0x580   : > { %5444 = vst.msk [vmem:[%s8970_s23] sm:$0x1] %vm5443_vm5, %v6697_v43 }
 0x581   : > { %5445 = vst.msk [vmem:[%s8973_s25] sm:$0x1] %vm5443_vm5, %v6698_v21 }
 0x582 PF: > { %v5447_v31 = vsel %vm5121_vm2, %v8917_v36, -inf  ;;  %v5448_v12 = vsel %vm5121_vm2, %v8922_v51, -inf  ;;  %v5449_v62 = vsel %vm5121_vm2, %v8928_v3, -inf  ;;  %v5450_v18 = vsel %vm5121_vm2, %v8933_v26, -inf  ;;  %s9182_s30 = sld [smem:[#allocation13_spill]]  ;;  %s5567_s26 = sshll.u32 %s8970_s23, 4  ;;  %s5568_s26 = int_to_ptr.vmem [resolvable:$true] %s5567_s26 }
 0x583   : > { %v5451_v6 = vsel %vm5121_vm2, %v8946_v54, -inf  ;;  %v5453_v35 = vsel %vm5121_vm2, %v8953_v9, -inf  ;;  %v5455_v44 = vsel %vm5121_vm2, %v8959_v57, -inf  ;;  %v5457_v38 = vsel %vm5121_vm2, %v8964_v28, -inf  ;;  %s9183_s2 = sld [smem:[#allocation27_spill]] }
 0x584   : > { %v5452_v37 = vmax.f32 %v5447_v31, %v5451_v6  ;;  %v5454_v63 = vmax.f32 %v5448_v12, %v5453_v35  ;;  %v5456_v23 = vmax.f32 %v5449_v62, %v5455_v44  ;;  %v5458_v16 = vmax.f32 %v5450_v18, %v5457_v38  ;;  %s9184_s1 = sld [smem:[#allocation22_spill]] }
 0x585   : > { %vm5523_vm6 = vcmask 122880  }
 0x586   : > { %v5459_v1 = vmax.f32 %v5452_v37, %v5454_v63  ;;  %v5460_v13 = vmax.f32 %v5456_v23, %v5458_v16 }
 0x587   : > { %v8995_v19 = vld [vmem:[%s8970_s23] sm:$0x1] }
 0x588   : > { %v5461_v50 = vmax.f32 %v5459_v1, %v5460_v13 }
 0x589   : > { %s5565_s27 = scalar_lea.hbm %s9183_s2, %s9182_s30  ;;  %s6580_s29 = scalar_lea.hbm %s9183_s2, 2 }
 0x58a   : > { %v5462_v46 = vrot.slane %v5461_v50, 4  ;;  %s9013_s19 = sshll.u32 %s5565_s27, 4  ;;  %s5545_s22 = scalar_lea.sflag [#allocation5], %s9184_s1  ;;  %s5570_s19 = int_to_ptr.hbm [resolvable:$true] %s9013_s19 }
 0x58b   : > { %s6574_s21 = sshra.s32 %s5570_s19, 4  ;;  %s6575_s21 = int_to_ptr.hbm [resolvable:$true] %s6574_s21 }
 0x58c   : > { %v5463_v39 = vmax.f32 %v5461_v50, %v5462_v46  ;;  %s6576_s24 = scalar_lea.hbm %s6575_s21, 1  ;;  %p6581_p6 = scmp.lt.s32.totalorder %s6575_s21, %s9183_s2 }
 0x58d   : > { %p6577_p2 = scmp.ne.s32.totalorder %s6575_s21, %s6576_s24  ;;  %p6582_p7 = scmp.lt.s32.totalorder %s6580_s29, %s6576_s24 }
 0x58e   : > { %v5464_v49 = vrot.slane %v5463_v39, 2 }
 0x58f   : > { %p6578_p4 = pnand %p6577_p2, %p6843_p3  ;;  %p6583_p8 = por %p6582_p7, %p6581_p6 }
 0x590   : > { %v5465_v53 = vmax.f32 %v5463_v39, %v5464_v49 }
 0x591   : > { %p6579_p5 = pneg %p6578_p4 }
 0x592   : > { %v5466_v29 = vrot.slane %v5465_v53, 1 }
 0x593   : > { %p6584_p10 = pnand %p6583_p8, %p6579_p5 }
 0x594   : > { %v5467_v27 = vmax.f32 %v5465_v53, %v5466_v29 }
 0x596   : > { %v8998_v15 = vmax.f32 %v8995_v19, %v5467_v27 }
 0x598   : > { %v5475_v60 = vperm.slane %v8998_v15, 0  ;;  %5525 = vst.msk [vmem:[%s8970_s23] sm:$0x1] %vm5523_vm6, %v8998_v15 }
 0x59a   : > { %v5477_v7 = vsub.f32 %v8917_v36, %v5475_v60  ;;  %v5478_v34 = vsub.f32 %v8922_v51, %v5475_v60  ;;  %v5479_v48 = vsub.f32 %v8928_v3, %v5475_v60  ;;  %v5480_v59 = vsub.f32 %v8933_v26, %v5475_v60 }
 0x59b   : > { %v5481_v30 = vsub.f32 %v8946_v54, %v5475_v60  ;;  %v5482_v24 = vsub.f32 %v8953_v9, %v5475_v60  ;;  %v5483_v33 = vsub.f32 %v8959_v57, %v5475_v60  ;;  %v5484_v3 = vsub.f32 %v8964_v28, %v5475_v60 }
 0x59c   : > { %v5485_v58 = vmul.f32 1.442695, %v5477_v7  ;;  %v5487_v25 = vmul.f32 1.442695, %v5478_v34  ;;  %v5489_v56 = vmul.f32 1.442695, %v5479_v48 }
 0x59d   : > { %v5491_v36 = vmul.f32 1.442695, %v5480_v59  ;;  %v5493_v51 = vmul.f32 1.442695, %v5481_v30  ;;  %v5495_v26 = vmul.f32 1.442695, %v5482_v24 }
 0x59e   : > { %6542 = vpow2.f32 %v5485_v58  ;;  %v5497_v8 = vmul.f32 1.442695, %v5483_v33  ;;  %v5499_v61 = vmul.f32 1.442695, %v5484_v3 }
 0x59f   : > { %6544 = vpow2.f32 %v5487_v25 }
 0x5a0   : > { %6546 = vpow2.f32 %v5489_v56 }
 0x5a1   : > { %6548 = vpow2.f32 %v5491_v36 }
 0x5a2   : > { %6550 = vpow2.f32 %v5493_v51 }
 0x5a3   : > { %6552 = vpow2.f32 %v5495_v26 }
 0x5a4   : > { %6587 = shalt.err (!%p6584_p10)
}
 0x5a5   : > { %6440 = dma.vmem_to_hbm [thread:$0]  (%p6843_p3), %s5568_s26, 16, %s5570_s19, %s5545_s22   ;;  %v6543_v5 = vpop.eup %6542  ;;  %6554 = vpow2.f32 %v5497_v8  ;;  %v5470_v45 = vsub.f32 %v8995_v19, %v8998_v15  ;;  %v5469_v35 = vld [vmem:[%s8973_s25] sm:$0x1] }
 0x5a6   : > { %v6545_v0 = vpop.eup %6544  ;;  %v5501_v11 = vsel %vm5121_vm2, %v6543_v5, 0.0  ;;  %6556 = vpow2.f32 %v5499_v61  ;;  %s9186_s26 = sld [smem:[#allocation28_spill]]  ;;  %s5580_s22 = sshll.u32 %s8973_s25, 4  ;;  %s5581_s22 = int_to_ptr.vmem [resolvable:$true] %s5580_s22 }
 0x5a7   : > { %v6547_v10 = vpop.eup %6546  ;;  %v5502_v14 = vsel %vm5121_vm2, %v6545_v0, 0.0  ;;  %v5471_v28 = vmul.f32 1.442695, %v5470_v45  ;;  %s5549_s24 = scalar_lea.sflag [#allocation7], %s9184_s1 }
 0x5a8   : > { %v6549_v2 = vpop.eup %6548  ;;  %v5503_v52 = vadd.f32 %v5502_v14, %v5501_v11  ;;  %v5504_v54 = vsel %vm5121_vm2, %v6547_v10, 0.0 }
 0x5a9   : > { %v6551_v17 = vpop.eup %6550  ;;  %v5506_v20 = vsel %vm5121_vm2, %v6549_v2, 0.0  ;;  %6558 = vpow2.f32 %v5471_v28 }
 0x5aa   : > { %v6553_v55 = vpop.eup %6552  ;;  %v5505_v32 = vadd.f32 %v5504_v54, %v5503_v52  ;;  %v5508_v47 = vsel %vm5121_vm2, %v6551_v17, 0.0 }
 0x5ab   : > { %v6555_v9 = vpop.eup %6554  ;;  %v5510_v41 = vsel %vm5121_vm2, %v6553_v55, 0.0 }
 0x5ac   : > { %v5507_v42 = vadd.f32 %v5506_v20, %v5505_v32  ;;  %v6557_v57 = vpop.eup %6556  ;;  %v5512_v4 = vsel %vm5121_vm2, %v6555_v9, 0.0  ;;  %s5578_s19 = scalar_lea.hbm %s9186_s26, %s9182_s30  ;;  %s6608_s27 = scalar_lea.hbm %s9186_s26, 2 }
 0x5ad   : > { %v5514_v43 = vsel %vm5121_vm2, %v6557_v57, 0.0  ;;  %s5582_s21 = sshll.u32 %s5578_s19, 4  ;;  %s5583_s21 = int_to_ptr.hbm [resolvable:$true] %s5582_s21 }
 0x5ae   : > { %v5509_v40 = vadd.f32 %v5508_v47, %v5507_v42  ;;  %s6602_s0 = sshra.s32 %s5583_s21, 4  ;;  %s6603_s0 = int_to_ptr.hbm [resolvable:$true] %s6602_s0 }
 0x5af   : > { %v6559_v6 = vpop.eup %6558  ;;  %s6604_s20 = scalar_lea.hbm %s6603_s0, 1  ;;  %p6609_p0 = scmp.lt.s32.totalorder %s6603_s0, %s9186_s26 }
 0x5b0   : > { %v5511_v22 = vadd.f32 %v5510_v41, %v5509_v40  ;;  %v5473_v38 = vmul.f32 %v6559_v6, %v5469_v35  ;;  %p6605_p11 = scmp.ne.s32.totalorder %s6603_s0, %s6604_s20  ;;  %p6610_p1 = scmp.lt.s32.totalorder %s6608_s27, %s6604_s20 }
 0x5b2   : > { %v5513_v21 = vadd.f32 %v5512_v4, %v5511_v22  ;;  %p6606_p12 = pnand %p6605_p11, %p6843_p3  ;;  %p6611_p2 = por %p6610_p1, %p6609_p0 }
 0x5b4   : > { %v5515_v31 = vadd.f32 %v5514_v43, %v5513_v21  ;;  %p6607_p13 = pneg %p6606_p12 }
 0x5b6   : > { %v5516_v12 = vrot.slane %v5515_v31, 4  ;;  %p6612_p4 = pnand %p6611_p2, %p6607_p13 }
 0x5b8   : > { %v5517_v62 = vadd.f32 %v5516_v12, %v5515_v31 }
 0x5ba   : > { %v5518_v18 = vrot.slane %v5517_v62, 2 }
 0x5bc   : > { %v5519_v44 = vadd.f32 %v5518_v18, %v5517_v62 }
 0x5be   : > { %v5520_v37 = vrot.slane %v5519_v44, 1 }
 0x5c0   : > { %v5521_v63 = vadd.f32 %v5520_v37, %v5519_v44 }
 0x5c2   : > { %v5522_v23 = vadd.f32 %v5521_v63, %v5473_v38 }
 0x5c4   : > { %5524 = vst.msk [vmem:[%s8973_s25] sm:$0x1] %vm5523_vm6, %v5522_v23 }
 0x5c5   : > { %6615 = shalt.err (!%p6612_p4)
}
 0x5c6   : > { %6441 = dma.vmem_to_hbm [thread:$0]  (%p6843_p3), %s5581_s22, 16, %s5583_s21, %s5549_s24  }
 0x5c7 PF: > { %s9187_s25 = sld [smem:[#allocation16_spill]] }
 0x5c8   : > { %s9188_s1 = sld [smem:[#allocation10_spill]] }
 0x5cd   : > { %p6451_p5 = scmp.ge.s32.totalorder %s9187_s25, 2 }
 0x5ce   : > { %s5618_s2 = sand.u32 1, %s9188_s1  }
 0x5cf   : > { %p6445_p6 = pnand %p6451_p5, %p6853_p9  ;;  %s5619_s29 = scalar_lea.sflag [#allocation5], %s5618_s2 }
 0x5d1   : > { %p6446_p7 = pneg %p6445_p6 }
 0x5d3   : > { %6649 = dma.done.wait (%p6446_p7), %s5619_s29, 16  }
 0x5d4   : > { %6651 = vsyncadd (%p6446_p7), %s5619_s29, 4294967280  ;;  %s5628_s0 = scalar_lea.sflag [#allocation7], %s5618_s2 }
 0x5d5   : > { %6653 = dma.done.wait (%p6446_p7), %s5628_s0, 16  }
 0x5d6   : > { %6655 = vsyncadd (%p6446_p7), %s5628_s0, 4294967280  ;;  %s35_s20 = sadd.s32 1, %s9187_s25   ;;  %s9190_s27 = sld [smem:[#allocation11_spill]] }
 0x5d7   : > { %p32_p8 = scmp.ge.s32.totalorder %s35_s20, 10   ;;  %s9191_s28 = sld [smem:[#allocation12_spill]] }
 0x5d8   : > { %s9192_s29 = sld [smem:[#allocation21_spill]] }
 0x5d9   : > { %s9193_s30 = sld [smem:[#allocation14_spill]]  ;;  %34 = sbr.rel (!%p32_p8) target bundleno = 14 (0xe), region = 183 }
 0x5da   : > { %s9194_s0 = sld [smem:[#allocation15_spill]] }
 0x5db   : > { %s9195_s19 = sld [smem:[#allocation17_spill]] }
 0x5dc   : > { %s9196_s1 = sld [smem:[#allocation19_spill]] }
 0x5de   :  { %5633 = vsyncpa [#allocation5], 1 }
 0x5df   :  { %5635 = vsyncpa [#allocation5 + $0x1], 1 }
 0x5e0   :  { %5636 = vsyncpa [#allocation7], 1 }
 0x5e1   :  { %5638 = vsyncpa [#allocation7 + $0x1], 1 }

</bundles_post_ra>
